<compile_context>
chip_gen: v5e
topology: v5e:2x2
jax: 0.10.0
libtpu: 0.0.40
codegen_flags: <defaults>
</compile_context>

<pallas_src>
import functools

import jax
import jax.numpy as jnp
import numpy as np
from jax.experimental import pallas as pl
from jax.experimental.pallas import tpu as pltpu


def mscn_kernel(x_ref,
                w1_ref, b1_ref, w2_ref, b2_ref,
                wo1s_ref, wo1p_ref, wo1j_ref, bo1_ref,
                wo2t_ref, bo2_ref,
                out_ref, *, hid, s_pad, n_feats):
    tb = out_ref.shape[1]          # batch rows handled by this grid step
    cdt = w1_ref.dtype             # matmul compute dtype (f32 or bf16)

    x = x_ref[...]                                                  # (tb*S, Ftot)

    # Fused (block-diagonal) set MLPs: one (Ftot, 3H) and one (3H, 3H) matmul.
    h = jnp.dot(x, w1_ref[...], preferred_element_type=jnp.float32) + b1_ref[...]
    h = jnp.maximum(h, 0.0)
    h = jnp.dot(h.astype(cdt), w2_ref[...],
                preferred_element_type=jnp.float32) + b2_ref[...]
    h = jnp.maximum(h, 0.0)                                         # (tb*S, 3H) f32

    def pooled(g):
        # Mask column g (already pre-scaled by 1/mask_count in the wrapper),
        # folded into x after the real features.
        m = x[:, n_feats + g:n_feats + g + 1].astype(jnp.float32)    # (tb*S, 1)
        hg = h[:, g * hid:(g + 1) * hid] * m                         # (tb*S, H)
        # s_pad is a multiple of 8 so this reshape-reduce is layout preserving.
        return hg.reshape(tb, s_pad, hid).sum(axis=1)                # (tb, H)

    hs, hp, hj = pooled(0), pooled(1), pooled(2)

    # out_mlp1 on concat(hs, hp, hj) expressed as three matmuls + bias.
    hid_out = (jnp.dot(hs.astype(cdt), wo1s_ref[...], preferred_element_type=jnp.float32)
               + jnp.dot(hp.astype(cdt), wo1p_ref[...], preferred_element_type=jnp.float32)
               + jnp.dot(hj.astype(cdt), wo1j_ref[...], preferred_element_type=jnp.float32)
               + bo1_ref[...])
    hid_out = jnp.maximum(hid_out, 0.0)                              # (tb, H) f32

    # Lane-dense final store: logits as a (1, tb) row (batch on the lane axis),
    # wo2^T (1,H) contracted against hid_out (tb,H) on H.
    logit = jax.lax.dot_general(
        wo2t_ref[...], hid_out.astype(cdt),
        dimension_numbers=(((1,), (1,)), ((), ())),
        preferred_element_type=jnp.float32)                          # (1, tb)
    out_ref[...] = jax.nn.sigmoid(logit + bo2_ref[...])


def init_params(key, sample_feats, predicate_feats, join_feats, hid_units):
    """PyTorch-Linear-style uniform init; weights stored as (in, out)."""
    def linear(key, fan_in, fan_out):
        k = 1.0 / np.sqrt(fan_in)
        kw, kb = jax.random.split(key)
        w = jax.random.uniform(kw, (fan_in, fan_out), jnp.float32, -k, k)
        b = jax.random.uniform(kb, (1, fan_out), jnp.float32, -k, k)
        return w, b

    keys = jax.random.split(key, 8)
    p = {}
    p["ws1"], p["bs1"] = linear(keys[0], sample_feats, hid_units)
    p["ws2"], p["bs2"] = linear(keys[1], hid_units, hid_units)
    p["wp1"], p["bp1"] = linear(keys[2], predicate_feats, hid_units)
    p["wp2"], p["bp2"] = linear(keys[3], hid_units, hid_units)
    p["wj1"], p["bj1"] = linear(keys[4], join_feats, hid_units)
    p["wj2"], p["bj2"] = linear(keys[5], hid_units, hid_units)
    p["wo1"], p["bo1"] = linear(keys[6], hid_units * 3, hid_units)
    p["wo2"], p["bo2"] = linear(keys[7], hid_units, 1)
    return p


def mscn_forward_pallas(params, samples, predicates, joins,
                        sample_mask, predicate_mask, join_mask,
                        *, batch_tile=256, compute_dtype=jnp.float32):
    assert batch_tile % 128 == 0, "batch_tile must be a multiple of 128 (lane axis)"
    B = samples.shape[0]
    H = params["ws1"].shape[1]
    Fs, Fp, Fj = samples.shape[-1], predicates.shape[-1], joins.shape[-1]
    n_feats = Fs + Fp + Fj
    Ftot = n_feats + 3                     # + 3 pre-scaled mask columns
    cdt = compute_dtype

    TB = batch_tile
    B_pad = ((B + TB - 1) // TB) * TB
    n_tiles = B_pad // TB
    S_pad = max(samples.shape[1], predicates.shape[1], joins.shape[1])
    S_pad = ((S_pad + 7) // 8) * 8         # sublane alignment for the reduce

    def pad_x(x):
        S, F = x.shape[1], x.shape[2]
        return jnp.zeros((B_pad, S_pad, F), jnp.float32).at[:B, :S, :].set(
            x.astype(jnp.float32))

    def scaled_mask(mask):
        # mask / mask_count folded into the input: the in-kernel masked sum is
        # then already normalized (pure multiply, no per-step divide).
        # Rows with an all-zero mask give a 0 pooled vector instead of the
        # reference's 0/0 NaN (degenerate input the module implicitly forbids).
        n = mask.astype(jnp.float32).sum(axis=1, keepdims=True)      # (B, 1, 1)
        inv = jnp.where(n > 0.0, 1.0 / n, 0.0)
        sm = mask.astype(jnp.float32) * inv                          # (B, S, 1)
        S = mask.shape[1]
        return jnp.zeros((B_pad, S_pad, 1), jnp.float32).at[:B, :S, :].set(sm)

    x_cat = jnp.concatenate(
        [pad_x(samples), pad_x(predicates), pad_x(joins),
         scaled_mask(sample_mask), scaled_mask(predicate_mask),
         scaled_mask(join_mask)], axis=2)                            # (B_pad, S_pad, Ftot)
    x_cat = x_cat.astype(cdt).reshape(B_pad * S_pad, Ftot)

    # Fused block-diagonal branch weights (mask columns hit zero W1 rows).
    # TODO(synk): for large hid_units (>= ~128) the block-diagonal zeros triple
    # the HxH FLOPs; switch back to a per-branch (unfused) variant there.
    w1 = jnp.zeros((Ftot, 3 * H), jnp.float32)
    w1 = w1.at[:Fs, 0:H].set(params["ws1"])
    w1 = w1.at[Fs:Fs + Fp, H:2 * H].set(params["wp1"])
    w1 = w1.at[Fs + Fp:n_feats, 2 * H:3 * H].set(params["wj1"])
    b1 = jnp.concatenate([params["bs1"], params["bp1"], params["bj1"]], axis=1)

    w2 = jnp.zeros((3 * H, 3 * H), jnp.float32)
    w2 = w2.at[0:H, 0:H].set(params["ws2"])
    w2 = w2.at[H:2 * H, H:2 * H].set(params["wp2"])
    w2 = w2.at[2 * H:3 * H, 2 * H:3 * H].set(params["wj2"])
    b2 = jnp.concatenate([params["bs2"], params["bp2"], params["bj2"]], axis=1)

    weight_inputs = (
        w1.astype(cdt), b1.astype(jnp.float32),
        w2.astype(cdt), b2.astype(jnp.float32),
        params["wo1"][0:H].astype(cdt),           # out_mlp1 split into 3 blocks
        params["wo1"][H:2 * H].astype(cdt),
        params["wo1"][2 * H:3 * H].astype(cdt),
        params["bo1"].astype(jnp.float32),
        params["wo2"].T.astype(cdt),              # (1, H)
        params["bo2"].astype(jnp.float32),        # (1, 1)
    )

    # Explicit scoped-VMEM budget (v5e defaults to only 16 MiB; v7x has 64 MiB
    # physical).  Rough estimate: double-buffered lane-padded x tile +
    # double-buffered weights + f32 intermediates + headroom, clamped.
    def _pad128(n):
        return ((n + 127) // 128) * 128

    item = jnp.dtype(cdt).itemsize
    x_block_bytes = TB * S_pad * _pad128(Ftot) * item
    w_bytes = sum(int(np.prod(w.shape[:-1])) * _pad128(w.shape[-1])
                  * jnp.dtype(w.dtype).itemsize for w in weight_inputs)
    interm_bytes = TB * S_pad * _pad128(3 * H) * 4 * 2
    vmem_limit = int(min(max(2 * x_block_bytes + 2 * w_bytes + interm_bytes
                             + (8 << 20), 32 << 20), 64 << 20))

    kernel = functools.partial(mscn_kernel, hid=H, s_pad=S_pad, n_feats=n_feats)

    in_specs = [pl.BlockSpec((TB * S_pad, Ftot), lambda i: (i, 0))]
    # Weights/biases: constant index map -> stay VMEM-resident across steps.
    in_specs += [pl.BlockSpec(w.shape, lambda i: (0, 0)) for w in weight_inputs]

    out = pl.pallas_call(
        kernel,
        out_shape=jax.ShapeDtypeStruct((1, B_pad), jnp.float32),
        grid=(n_tiles,),
        in_specs=in_specs,
        out_specs=pl.BlockSpec((1, TB), lambda i: (0, i)),
        compiler_params=pltpu.CompilerParams(
            dimension_semantics=("parallel",),
            vmem_limit_bytes=vmem_limit),
    )(x_cat, *weight_inputs)

    # Padded batch lanes carry garbage logits; keep this slice.
    return out[:, :B].T                                              # (B, 1)


def mscn_forward_ref(params, samples, predicates, joins,
                     sample_mask, predicate_mask, join_mask):
    """Pure-JAX reference matching the PyTorch forward semantics."""
    def branch(x, mask, w1, b1, w2, b2):
        h = jax.nn.relu(x @ w1 + b1)
        h = jax.nn.relu(h @ w2 + b2)
        h = h * mask
        return h.sum(axis=1) / mask.sum(axis=1)

    hs = branch(samples, sample_mask, params["ws1"], params["bs1"],
                params["ws2"], params["bs2"])
    hp = branch(predicates, predicate_mask, params["wp1"], params["bp1"],
                params["wp2"], params["bp2"])
    hj = branch(joins, join_mask, params["wj1"], params["bj1"],
                params["wj2"], params["bj2"])
    hid = jnp.concatenate([hs, hp, hj], axis=1)
    hid = jax.nn.relu(hid @ params["wo1"] + params["bo1"])
    return jax.nn.sigmoid(hid @ params["wo2"] + params["bo2"])


if __name__ == "__main__":
    # B > batch_tile so the batch grid (2 steps) and padding paths are
    # exercised; per-set / feature / hidden sizes are kept small.
    B = 200
    S_SAMPLE, S_PRED, S_JOIN = 8, 6, 4
    SAMPLE_FEATS, PRED_FEATS, JOIN_FEATS = 12, 10, 7
    HID = 32

    key = jax.random.PRNGKey(0)
    k_param, k_s, k_p, k_j, k_ms, k_mp, k_mj = jax.random.split(key, 7)

    params = init_params(k_param, SAMPLE_FEATS, PRED_FEATS, JOIN_FEATS, HID)

    samples = jax.random.normal(k_s, (B, S_SAMPLE, SAMPLE_FEATS), jnp.float32)
    predicates = jax.random.normal(k_p, (B, S_PRED, PRED_FEATS), jnp.float32)
    joins = jax.random.normal(k_j, (B, S_JOIN, JOIN_FEATS), jnp.float32)

    def make_mask(k, S):
        m = (jax.random.uniform(k, (B, S, 1)) > 0.4).astype(jnp.float32)
        # guarantee at least one valid element per set (avoid div-by-zero,
        # matching the PyTorch module's implicit assumption)
        return m.at[:, 0, :].set(1.0)

    sample_mask = make_mask(k_ms, S_SAMPLE)
    predicate_mask = make_mask(k_mp, S_PRED)
    join_mask = make_mask(k_mj, S_JOIN)

    ref = mscn_forward_ref(params, samples, predicates, joins,
                           sample_mask, predicate_mask, join_mask)

    # f32 path: exact (tight tolerances).  batch_tile=128 keeps 2 grid steps
    # at this small B; production default is 256.
    out_f32 = mscn_forward_pallas(params, samples, predicates, joins,
                                  sample_mask, predicate_mask, join_mask,
                                  batch_tile=128, compute_dtype=jnp.float32)
    out_f32 = jax.block_until_ready(out_f32)
    np.testing.assert_allclose(np.asarray(out_f32), np.asarray(ref),
                               rtol=5e-4, atol=2e-5)
    assert out_f32.shape == (B, 1)

    # bf16 compute path (v6e/v7x MXU-native; also valid on v5e): inputs and
    # matmul operands quantized to bf16, so tolerances are loose.
    out_bf16 = mscn_forward_pallas(params, samples, predicates, joins,
                                   sample_mask, predicate_mask, join_mask,
                                   batch_tile=128, compute_dtype=jnp.bfloat16)
    out_bf16 = jax.block_until_ready(out_bf16)
    np.testing.assert_allclose(np.asarray(out_bf16), np.asarray(ref),
                               rtol=1e-1, atol=5e-2)

    print("KERNEL_OK")
</pallas_src>

<mosaic_0001>
module attributes {stable_mosaic.version = 11 : i64} {
  func.func @mscn_kernel(%arg0: i32, %arg1: memref<1024x32xf32, #tpu.memory_space<vmem>>, %arg2: memref<32x96xf32, #tpu.memory_space<vmem>>, %arg3: memref<1x96xf32, #tpu.memory_space<vmem>>, %arg4: memref<96x96xf32, #tpu.memory_space<vmem>>, %arg5: memref<1x96xf32, #tpu.memory_space<vmem>>, %arg6: memref<32x32xf32, #tpu.memory_space<vmem>>, %arg7: memref<32x32xf32, #tpu.memory_space<vmem>>, %arg8: memref<32x32xf32, #tpu.memory_space<vmem>>, %arg9: memref<1x32xf32, #tpu.memory_space<vmem>>, %arg10: memref<1x32xf32, #tpu.memory_space<vmem>>, %arg11: memref<1x1xf32, #tpu.memory_space<vmem>>, %arg12: memref<1x128xf32, #tpu.memory_space<vmem>>) attributes {dimension_semantics = [#tpu.dimension_semantics<parallel>], iteration_bounds = array<i64: 2>, scalar_prefetch = 0 : i64, scratch_operands = 0 : i64, tpu.core_type = #tpu.core_type<tc>, window_params = [{transform_indices = @transform_0, window_bounds = array<i64: 1024, 32>}, {pipeline_mode = #tpu.pipeline_mode<synchronous>, transform_indices = @transform_1, window_bounds = array<i64: 32, 96>}, {pipeline_mode = #tpu.pipeline_mode<synchronous>, transform_indices = @transform_2, window_bounds = array<i64: 1, 96>}, {pipeline_mode = #tpu.pipeline_mode<synchronous>, transform_indices = @transform_3, window_bounds = array<i64: 96, 96>}, {pipeline_mode = #tpu.pipeline_mode<synchronous>, transform_indices = @transform_4, window_bounds = array<i64: 1, 96>}, {pipeline_mode = #tpu.pipeline_mode<synchronous>, transform_indices = @transform_5, window_bounds = array<i64: 32, 32>}, {pipeline_mode = #tpu.pipeline_mode<synchronous>, transform_indices = @transform_6, window_bounds = array<i64: 32, 32>}, {pipeline_mode = #tpu.pipeline_mode<synchronous>, transform_indices = @transform_7, window_bounds = array<i64: 32, 32>}, {pipeline_mode = #tpu.pipeline_mode<synchronous>, transform_indices = @transform_8, window_bounds = array<i64: 1, 32>}, {pipeline_mode = #tpu.pipeline_mode<synchronous>, transform_indices = @transform_9, window_bounds = array<i64: 1, 32>}, {pipeline_mode = #tpu.pipeline_mode<synchronous>, transform_indices = @transform_10, window_bounds = array<i64: 1, 1>}, {transform_indices = @transform_11, window_bounds = array<i64: 1, 128>}]} {
    %c0 = arith.constant 0 : index
    %c0_0 = arith.constant 0 : index
    %0 = vector.load %arg1[%c0, %c0_0] : memref<1024x32xf32, #tpu.memory_space<vmem>>, vector<1024x32xf32>
    %c0_1 = arith.constant 0 : index
    %c0_2 = arith.constant 0 : index
    %1 = vector.load %arg2[%c0_1, %c0_2] : memref<32x96xf32, #tpu.memory_space<vmem>>, vector<32x96xf32>
    %cst = arith.constant dense<0.000000e+00> : vector<1024x96xf32>
    %2 = tpu.matmul %0, %1, %cst {dimension_numbers = #tpu.dot_dimension_numbers<[1], [0], [0], [1], [0, 0, 1, 1], [], []>} : vector<1024x32xf32>, vector<32x96xf32>, vector<1024x96xf32> -> vector<1024x96xf32>
    %c0_3 = arith.constant 0 : index
    %c0_4 = arith.constant 0 : index
    %3 = vector.load %arg3[%c0_3, %c0_4] : memref<1x96xf32, #tpu.memory_space<vmem>>, vector<1x96xf32>
    %4 = vector.broadcast %3 : vector<1x96xf32> to vector<1024x96xf32>
    %5 = arith.addf %2, %4 : vector<1024x96xf32>
    %cst_5 = arith.constant 0.000000e+00 : f32
    %6 = vector.broadcast %cst_5 : f32 to vector<1024x96xf32>
    %7 = arith.maximumf %5, %6 : vector<1024x96xf32>
    %c0_6 = arith.constant 0 : index
    %c0_7 = arith.constant 0 : index
    %8 = vector.load %arg4[%c0_6, %c0_7] : memref<96x96xf32, #tpu.memory_space<vmem>>, vector<96x96xf32>
    %cst_8 = arith.constant dense<0.000000e+00> : vector<1024x96xf32>
    %9 = tpu.matmul %7, %8, %cst_8 {dimension_numbers = #tpu.dot_dimension_numbers<[1], [0], [0], [1], [0, 0, 1, 1], [], []>} : vector<1024x96xf32>, vector<96x96xf32>, vector<1024x96xf32> -> vector<1024x96xf32>
    %c0_9 = arith.constant 0 : index
    %c0_10 = arith.constant 0 : index
    %10 = vector.load %arg5[%c0_9, %c0_10] : memref<1x96xf32, #tpu.memory_space<vmem>>, vector<1x96xf32>
    %11 = vector.broadcast %10 : vector<1x96xf32> to vector<1024x96xf32>
    %12 = arith.addf %9, %11 : vector<1024x96xf32>
    %cst_11 = arith.constant 0.000000e+00 : f32
    %13 = vector.broadcast %cst_11 : f32 to vector<1024x96xf32>
    %14 = arith.maximumf %12, %13 : vector<1024x96xf32>
    %15 = vector.extract_strided_slice %0 {offsets = [0, 29], sizes = [1024, 1], strides = [1, 1]} : vector<1024x32xf32> to vector<1024x1xf32>
    %16 = vector.extract_strided_slice %14 {offsets = [0, 0], sizes = [1024, 32], strides = [1, 1]} : vector<1024x96xf32> to vector<1024x32xf32>
    %17 = vector.broadcast %15 : vector<1024x1xf32> to vector<1024x32xf32>
    %18 = arith.mulf %16, %17 : vector<1024x32xf32>
    %19 = vector.shape_cast %18 : vector<1024x32xf32> to vector<128x8x32xf32>
    %cst_12 = arith.constant dense<0.000000e+00> : vector<128x32xf32>
    %20 = vector.multi_reduction <add>, %19, %cst_12 [1] : vector<128x8x32xf32> to vector<128x32xf32>
    %21 = vector.extract_strided_slice %0 {offsets = [0, 30], sizes = [1024, 1], strides = [1, 1]} : vector<1024x32xf32> to vector<1024x1xf32>
    %22 = vector.extract_strided_slice %14 {offsets = [0, 32], sizes = [1024, 32], strides = [1, 1]} : vector<1024x96xf32> to vector<1024x32xf32>
    %23 = vector.broadcast %21 : vector<1024x1xf32> to vector<1024x32xf32>
    %24 = arith.mulf %22, %23 : vector<1024x32xf32>
    %25 = vector.shape_cast %24 : vector<1024x32xf32> to vector<128x8x32xf32>
    %cst_13 = arith.constant dense<0.000000e+00> : vector<128x32xf32>
    %26 = vector.multi_reduction <add>, %25, %cst_13 [1] : vector<128x8x32xf32> to vector<128x32xf32>
    %27 = vector.extract_strided_slice %0 {offsets = [0, 31], sizes = [1024, 1], strides = [1, 1]} : vector<1024x32xf32> to vector<1024x1xf32>
    %28 = vector.extract_strided_slice %14 {offsets = [0, 64], sizes = [1024, 32], strides = [1, 1]} : vector<1024x96xf32> to vector<1024x32xf32>
    %29 = vector.broadcast %27 : vector<1024x1xf32> to vector<1024x32xf32>
    %30 = arith.mulf %28, %29 : vector<1024x32xf32>
    %31 = vector.shape_cast %30 : vector<1024x32xf32> to vector<128x8x32xf32>
    %cst_14 = arith.constant dense<0.000000e+00> : vector<128x32xf32>
    %32 = vector.multi_reduction <add>, %31, %cst_14 [1] : vector<128x8x32xf32> to vector<128x32xf32>
    %c0_15 = arith.constant 0 : index
    %c0_16 = arith.constant 0 : index
    %33 = vector.load %arg6[%c0_15, %c0_16] : memref<32x32xf32, #tpu.memory_space<vmem>>, vector<32x32xf32>
    %cst_17 = arith.constant dense<0.000000e+00> : vector<128x32xf32>
    %34 = tpu.matmul %20, %33, %cst_17 {dimension_numbers = #tpu.dot_dimension_numbers<[1], [0], [0], [1], [0, 0, 1, 1], [], []>} : vector<128x32xf32>, vector<32x32xf32>, vector<128x32xf32> -> vector<128x32xf32>
    %c0_18 = arith.constant 0 : index
    %c0_19 = arith.constant 0 : index
    %35 = vector.load %arg7[%c0_18, %c0_19] : memref<32x32xf32, #tpu.memory_space<vmem>>, vector<32x32xf32>
    %cst_20 = arith.constant dense<0.000000e+00> : vector<128x32xf32>
    %36 = tpu.matmul %26, %35, %cst_20 {dimension_numbers = #tpu.dot_dimension_numbers<[1], [0], [0], [1], [0, 0, 1, 1], [], []>} : vector<128x32xf32>, vector<32x32xf32>, vector<128x32xf32> -> vector<128x32xf32>
    %37 = arith.addf %34, %36 : vector<128x32xf32>
    %c0_21 = arith.constant 0 : index
    %c0_22 = arith.constant 0 : index
    %38 = vector.load %arg8[%c0_21, %c0_22] : memref<32x32xf32, #tpu.memory_space<vmem>>, vector<32x32xf32>
    %cst_23 = arith.constant dense<0.000000e+00> : vector<128x32xf32>
    %39 = tpu.matmul %32, %38, %cst_23 {dimension_numbers = #tpu.dot_dimension_numbers<[1], [0], [0], [1], [0, 0, 1, 1], [], []>} : vector<128x32xf32>, vector<32x32xf32>, vector<128x32xf32> -> vector<128x32xf32>
    %40 = arith.addf %37, %39 : vector<128x32xf32>
    %c0_24 = arith.constant 0 : index
    %c0_25 = arith.constant 0 : index
    %41 = vector.load %arg9[%c0_24, %c0_25] : memref<1x32xf32, #tpu.memory_space<vmem>>, vector<1x32xf32>
    %42 = vector.broadcast %41 : vector<1x32xf32> to vector<128x32xf32>
    %43 = arith.addf %40, %42 : vector<128x32xf32>
    %cst_26 = arith.constant 0.000000e+00 : f32
    %44 = vector.broadcast %cst_26 : f32 to vector<128x32xf32>
    %45 = arith.maximumf %43, %44 : vector<128x32xf32>
    %c0_27 = arith.constant 0 : index
    %c0_28 = arith.constant 0 : index
    %46 = vector.load %arg10[%c0_27, %c0_28] : memref<1x32xf32, #tpu.memory_space<vmem>>, vector<1x32xf32>
    %cst_29 = arith.constant dense<0.000000e+00> : vector<1x128xf32>
    %47 = tpu.matmul %46, %45, %cst_29 {dimension_numbers = #tpu.dot_dimension_numbers<[1], [1], [0], [0], [0, 0, 1, 0], [], []>} : vector<1x32xf32>, vector<128x32xf32>, vector<1x128xf32> -> vector<1x128xf32>
    %c0_30 = arith.constant 0 : index
    %c0_31 = arith.constant 0 : index
    %48 = vector.load %arg11[%c0_30, %c0_31] : memref<1x1xf32, #tpu.memory_space<vmem>>, vector<1x1xf32>
    %49 = vector.broadcast %48 : vector<1x1xf32> to vector<1x128xf32>
    %50 = arith.addf %47, %49 : vector<1x128xf32>
    %51 = arith.negf %50 : vector<1x128xf32>
    %52 = math.exp %51 : vector<1x128xf32>
    %cst_32 = arith.constant 1.000000e+00 : f32
    %53 = vector.broadcast %cst_32 : f32 to vector<1x128xf32>
    %54 = arith.addf %53, %52 : vector<1x128xf32>
    %55 = arith.divf %53, %54 : vector<1x128xf32>
    %c0_33 = arith.constant 0 : index
    %c0_34 = arith.constant 0 : index
    %56 = vector.load %arg12[%c0_33, %c0_34] : memref<1x128xf32, #tpu.memory_space<vmem>>, vector<1x128xf32>
    tpu.vector_store %arg12[%c0_33, %c0_34], %55 {strides = array<i32>} : memref<1x128xf32, #tpu.memory_space<vmem>>, vector<1x128xf32>,
    return
  }
  func.func @transform_0(%arg0: i32) -> (i32, i32) {
    %c0_i32 = arith.constant 0 : i32
    %c0_i32_0 = arith.constant 0 : i32
    return %arg0, %c0_i32 : i32, i32
  }
  func.func @transform_1(%arg0: i32) -> (i32, i32) {
    %c0_i32 = arith.constant 0 : i32
    %c0_i32_0 = arith.constant 0 : i32
    %c0_i32_1 = arith.constant 0 : i32
    return %c0_i32, %c0_i32_0 : i32, i32
  }
  func.func @transform_2(%arg0: i32) -> (i32, i32) {
    %c0_i32 = arith.constant 0 : i32
    %c0_i32_0 = arith.constant 0 : i32
    %c0_i32_1 = arith.constant 0 : i32
    return %c0_i32, %c0_i32_0 : i32, i32
  }
  func.func @transform_3(%arg0: i32) -> (i32, i32) {
    %c0_i32 = arith.constant 0 : i32
    %c0_i32_0 = arith.constant 0 : i32
    %c0_i32_1 = arith.constant 0 : i32
    return %c0_i32, %c0_i32_0 : i32, i32
  }
  func.func @transform_4(%arg0: i32) -> (i32, i32) {
    %c0_i32 = arith.constant 0 : i32
    %c0_i32_0 = arith.constant 0 : i32
    %c0_i32_1 = arith.constant 0 : i32
    return %c0_i32, %c0_i32_0 : i32, i32
  }
  func.func @transform_5(%arg0: i32) -> (i32, i32) {
    %c0_i32 = arith.constant 0 : i32
    %c0_i32_0 = arith.constant 0 : i32
    %c0_i32_1 = arith.constant 0 : i32
    return %c0_i32, %c0_i32_0 : i32, i32
  }
  func.func @transform_6(%arg0: i32) -> (i32, i32) {
    %c0_i32 = arith.constant 0 : i32
    %c0_i32_0 = arith.constant 0 : i32
    %c0_i32_1 = arith.constant 0 : i32
    return %c0_i32, %c0_i32_0 : i32, i32
  }
  func.func @transform_7(%arg0: i32) -> (i32, i32) {
    %c0_i32 = arith.constant 0 : i32
    %c0_i32_0 = arith.constant 0 : i32
    %c0_i32_1 = arith.constant 0 : i32
    return %c0_i32, %c0_i32_0 : i32, i32
  }
  func.func @transform_8(%arg0: i32) -> (i32, i32) {
    %c0_i32 = arith.constant 0 : i32
    %c0_i32_0 = arith.constant 0 : i32
    %c0_i32_1 = arith.constant 0 : i32
    return %c0_i32, %c0_i32_0 : i32, i32
  }
  func.func @transform_9(%arg0: i32) -> (i32, i32) {
    %c0_i32 = arith.constant 0 : i32
    %c0_i32_0 = arith.constant 0 : i32
    %c0_i32_1 = arith.constant 0 : i32
    return %c0_i32, %c0_i32_0 : i32, i32
  }
  func.func @transform_10(%arg0: i32) -> (i32, i32) {
    %c0_i32 = arith.constant 0 : i32
    %c0_i32_0 = arith.constant 0 : i32
    %c0_i32_1 = arith.constant 0 : i32
    return %c0_i32, %c0_i32_0 : i32, i32
  }
  func.func @transform_11(%arg0: i32) -> (i32, i32) {
    %c0_i32 = arith.constant 0 : i32
    %c0_i32_0 = arith.constant 0 : i32
    return %c0_i32, %arg0 : i32, i32
  }
}

</mosaic_0001>

<bundles_post_ra>
// kernel: tpu_custom_call.1
= control target key start
LH: loop header
LB: loop body
LE: loop exit
PB: predicated region body
PF: predicated region fallthrough
CT: control target
= control target key end

     0   :  { %s14801_s0 = inlined_call_operand.vmem [shape: f32[2048,32], index: 0, kind: input, shape index: {}]   ;;  %s14802_s1 = inlined_call_operand.vmem [shape: f32[32,96], index: 1, kind: input, shape index: {}]   ;;  %s14803_s2 = inlined_call_operand.vmem [shape: f32[1,96], index: 2, kind: input, shape index: {}]   ;;  %s14804_s3 = inlined_call_operand.vmem [shape: f32[96,96], index: 3, kind: input, shape index: {}]   ;;  %s14805_s4 = inlined_call_operand.vmem [shape: f32[1,96], index: 4, kind: input, shape index: {}]   ;;  %s14806_s5 = inlined_call_operand.vmem [shape: f32[32,32], index: 5, kind: input, shape index: {}]   ;;  %s14807_s6 = inlined_call_operand.vmem [shape: f32[32,32], index: 6, kind: input, shape index: {}]   ;;  %s14808_s7 = inlined_call_operand.vmem [shape: f32[32,32], index: 7, kind: input, shape index: {}]   ;;  %s14809_s8 = inlined_call_operand.vmem [shape: f32[1,32], index: 8, kind: input, shape index: {}]   ;;  %s14810_s9 = inlined_call_operand.vmem [shape: f32[1,32], index: 9, kind: input, shape index: {}]   ;;  %s14811_s10 = inlined_call_operand.<no memory space> [shape: f32[1,1], index: 10, kind: input, shape index: {}]   ;;  %s14812_s11 = inlined_call_operand.hbm [shape: f32[1,256], index: 11, kind: output, shape index: {}]  }
   0x1   :  { %v16_v0 = vstv %s14811_s10 }
   0x2   :  { %17 = vst [vmem:[#allocation2] sm:$0x1] %v16_v0 }
   0x3   :  { %18 = vsyncpa [#allocation4], 0 }
   0x4   :  { %20 = vsyncpa [#allocation4 + $0x1], 0  ;;  %s9117_s19 = smov 0   ;;  %s9119_s20 = smov 0  }
   0x5   :  { %s9121_s21 = smov 0   ;;  %s9123_s22 = smov 0  }
   0x6 LB: > { %s9138_s10 = sadd.s32 4294967295, %s9046_s22   ;;  %s8291_s23 = sadd.s32 4294967294, %s9046_s22   ;;  %s9046_s22 = sphi %s9123_s22, %s16207_s22   ;;  %s9042_s21 = sphi %s9121_s21, %s16206_s21   ;;  %s9038_s20 = sphi %s9119_s20, %s16205_s20   ;;  %s9034_s19 = sphi %s9117_s19, %s16204_s19  }
   0x7   : > { %s9142_s24 = sadd.s32 1, %s9046_s22   ;;  %s269_s25 = sadd.s32 1, %s9042_s21 }
   0x8   : > { %s266_s26 = ssub.s32 %s9046_s22, %s9142_s24  ;;  %p279_p0 = scmp.ne.s32.totalorder %s9042_s21, %s9038_s20 }
   0x9   : > { %p267_p1 = scmp.eq.s32.totalorder %s266_s26, 0  ;;  %p280_p2 = scmp.eq.s32.totalorder %s9138_s10, 1 }
   0xa   : > { %p285_p3 = scmp.ne.s32.totalorder %s9038_s20, %s9034_s19  ;;  %p286_p4 = scmp.eq.s32.totalorder %s8291_s23, 1 }
   0xb   : > { %s9153_s27 = scalar_select %p267_p1, %s9042_s21, %s269_s25  }
   0xc   : > { %p9155_p5 = por %p280_p2, %p279_p0  ;;  %p9159_p6 = por %p286_p4, %p285_p3 }
   0xd   : > { %p8294_p7 = scmp.ge.s32.totalorder %s9046_s22, 1  ;;  %p343_p8 = scmp.lt.s32.totalorder %s9046_s22, 3 }
   0xf   : > { %p344_p9 = pnand %p8294_p7, %p343_p8 }
  0x11   : > { %347 = sbr.rel (%p344_p9) target bundleno = 2099 (0x833), region = 64 }
  0x16   : > { %v519_v1 = vld [vmem:[%s14802_s1 + $0x18] sm:$0xff]  ;;  %v518_v2 = vld [vmem:[%s14802_s1 + $0x10] sm:$0xff]  ;;  %s8295_s15 = sshll.u32 %s9138_s10, 7  ;;  %v9048_v3 = vmov 29   ;;  %v517_v4 = vld [vmem:[%s14802_s1 + $0x8] sm:$0xff]  ;;  %vm524_vm0 = vcmask 261120   ;;  %s8232_s17 = scalar_lea.hbm %s14812_s11, %s9138_s10 }
  0x17   : > { %921 = vmatpush.msra.mxu0 %v519_v1  ;;  %8688 = vset.pattern.permute.xlu2 %v9048_v3  ;;  %p383_p10 = scmp.lt.s32.totalorder %s8295_s15, 255  ;;  %v516_v5 = vld [vmem:[%s14802_s1] sm:$0xff]  ;;  %v1449_v36 = vld [vmem:[%s14804_s3 + $0x58] sm:$0xff]  ;;  %v1448_v37 = vld [vmem:[%s14804_s3 + $0x50] sm:$0xff]  ;;  %vm1454_vm1 = vcmask 785408   ;;  %vm7114_vm2 = vcmask 1041409  }
  0x18   : > { %8687 = vset.pattern.permute.xlu1 %v9048_v3  ;;  %8686 = vset.pattern.permute.xlu0 %v9048_v3  ;;  %v1447_v38 = vld [vmem:[%s14804_s3 + $0x48] sm:$0xff]  ;;  %v1446_v42 = vld [vmem:[%s14804_s3 + $0x40] sm:$0xff]  ;;  %v1445_v43 = vld [vmem:[%s14804_s3 + $0x38] sm:$0xff]  ;;  %vm7116_vm3 = vcmask 1042434   ;;  %vm7118_vm4 = vcmask 1043459   ;;  %vm7120_vm5 = vcmask 1044484  }
  0x19   : > { %922 = vmatpush.msra.mxu0 %v518_v2  ;;  %s16209_s15 = smov (!%p383_p10, %s8295_s15), 255  ;;  %8621 = vmatpush.msra.mxu2 %v519_v1  ;;  %v1444_v44 = vld [vmem:[%s14804_s3 + $0x30] sm:$0xff]  ;;  %v1443_v48 = vld [vmem:[%s14804_s3 + $0x28] sm:$0xff]  ;;  %v1442_v49 = vld [vmem:[%s14804_s3 + $0x20] sm:$0xff]  ;;  %vm4544_vm6 = vcmask 523520   ;;  %vm7122_vm7 = vcmask 1045509  }
  0x1a   : > { %8622 = vmatpush.msra.mxu3 %v519_v1  ;;  %s8296_s25 = sshll.u32 %s16209_s15, 3  ;;  %1843 = vmatpush.msra.mxu1 %v1449_v36  ;;  %v1441_v51 = vld [vmem:[%s14804_s3 + $0x18] sm:$0xff]  ;;  %v1440_v55 = vld [vmem:[%s14804_s3 + $0x10] sm:$0xff]  ;;  %v1439_v56 = vld [vmem:[%s14804_s3 + $0x8] sm:$0xff]  ;;  %vm7124_vm8 = vcmask 1046534   ;;  %vm7126_vm9 = vcmask 1047559  }
  0x1b   : > { %923 = vmatpush.msra.mxu0 %v517_v4  ;;  %8623 = vmatpush.msra.mxu2 %v518_v2  ;;  %s9181_s12 = scalar_lea.vmem %s14801_s0, %s8296_s25  ;;  %v1438_v58 = vld [vmem:[%s14804_s3] sm:$0xff]  ;;  %s9051_s26 = smov 96   ;;  %vm6081_vm10 = vcmask 785920  }
  0x1c   : > { %8624 = vmatpush.msra.mxu3 %v518_v2  ;;  %v392_v6 = vld [vmem:[%s9181_s12 + $0x20] sm:$0xff]  ;;  %v390_v7 = vld [vmem:[%s9181_s12 + $0x10] sm:$0xff]  ;;  %v393_v9 = vld [vmem:[%s9181_s12 + $0x28] sm:$0xff]  ;;  %1844 = vmatpush.msra.mxu1 %v1448_v37  ;;  %s9052_s13 = smov 64   ;;  %s380_s14 = sand.u32 1, %s9038_s20  }
  0x1d   : > { %924 = vmatpush.msra.mxu0 %v516_v5  ;;  %v388_v8 = vld [vmem:[%s9181_s12] sm:$0xff]  ;;  %8625 = vmatpush.msra.mxu2 %v517_v4  ;;  %v391_v10 = vld [vmem:[%s9181_s12 + $0x18] sm:$0xff]  ;;  %v389_v11 = vld [vmem:[%s9181_s12 + $0x8] sm:$0xff]  ;;  %s381_s18 = scalar_lea.vmem [#allocation3], %s380_s14  ;;  %s8236_s23 = sshll.u32 %s8232_s17, 4  ;;  %s8237_s23 = int_to_ptr.hbm [resolvable:$true] %s8236_s23 }
  0x1e   : > { %2385 = vperm.xlu2 %8688, %v392_v6   ;;  %2377 = vperm.xlu1 %8687, %v390_v7   ;;  %v396_v12 = vld [vmem:[%s9181_s12 + $0x40] sm:$0xff]  ;;  %v395_v13 = vld [vmem:[%s9181_s12 + $0x38] sm:$0xff]  ;;  %v394_v14 = vld [vmem:[%s9181_s12 + $0x30] sm:$0xff]  ;;  %s8998_s10 = sshra.s32 %s8237_s23, 4  ;;  %s9004_s15 = scalar_lea.hbm %s14812_s11, 2  ;;  %s8999_s10 = int_to_ptr.hbm [resolvable:$true] %s8998_s10 }
  0x1f   : > { %2369 = vperm.xlu0 %8686, %v388_v8   ;;  %8297 = vmatmul.msk.f32.vlgmr.msra.gmra.mxu0 %vm524_vm0, %v388_v8  ;;  %v9196_v15 = vld [vmem:[%s9181_s12 + $0x58] sm:$0xff]  ;;  %v9199_v16 = vld [vmem:[%s9181_s12 + $0x50] sm:$0xff]  ;;  %v397_v17 = vld [vmem:[%s9181_s12 + $0x48] sm:$0xff]  ;;  %s9000_s25 = scalar_lea.hbm %s8999_s10, 1  ;;  %p9005_p0 = scmp.lt.s32.totalorder %s8999_s10, %s14812_s11 }
  0x20   : > { %8627 = vmatpush.msra.mxu2 %v516_v5  ;;  %8626 = vmatpush.msra.mxu3 %v517_v4  ;;  %v9206_v18 = vld [vmem:[%s9181_s12 + $0x70] sm:$0xff]  ;;  %v9209_v19 = vld [vmem:[%s9181_s12 + $0x68] sm:$0xff]  ;;  %v9212_v20 = vld [vmem:[%s9181_s12 + $0x60] sm:$0xff]  ;;  %p9001_p11 = scmp.ne.s32.totalorder %s8999_s10, %s9000_s25  ;;  %p9006_p1 = scmp.lt.s32.totalorder %s9004_s15, %s9000_s25 }
  0x21   : > { %v9219_v21 = vld [vmem:[%s9181_s12 + $0x88] sm:$0xff]  ;;  %v9222_v22 = vld [vmem:[%s9181_s12 + $0x80] sm:$0xff]  ;;  %v9225_v23 = vld [vmem:[%s9181_s12 + $0x78] sm:$0xff]  ;;  %1845 = vmatpush.msra.mxu1 %v1447_v38 }
  0x22   : > { %8628 = vmatpush.msra.mxu3 %v516_v5  ;;  %v9232_v24 = vld [vmem:[%s9181_s12 + $0xa0] sm:$0xff]  ;;  %v9235_v25 = vld [vmem:[%s9181_s12 + $0x98] sm:$0xff]  ;;  %v9238_v26 = vld [vmem:[%s9181_s12 + $0x90] sm:$0xff]  ;;  %p9002_p12 = pnand %p9001_p11, %p9155_p5  ;;  %p9007_p2 = por %p9006_p1, %p9005_p0 }
  0x23   : > { %v9245_v27 = vld [vmem:[%s9181_s12 + $0xb8] sm:$0xff]  ;;  %v9248_v28 = vld [vmem:[%s9181_s12 + $0xb0] sm:$0xff]  ;;  %v9251_v29 = vld [vmem:[%s9181_s12 + $0xa8] sm:$0xff]  ;;  %1846 = vmatpush.msra.mxu1 %v1446_v42 }
  0x24   : > { %v9258_v30 = vld [vmem:[%s9181_s12 + $0xd0] sm:$0xff]  ;;  %v9261_v31 = vld [vmem:[%s9181_s12 + $0xc8] sm:$0xff]  ;;  %v9264_v32 = vld [vmem:[%s9181_s12 + $0xc0] sm:$0xff]  ;;  %8629 = vmatpush.msrb.mxu3 %v1449_v36  ;;  %p9003_p13 = pneg %p9002_p12 }
  0x25   : > { %v9271_v33 = vld [vmem:[%s9181_s12 + $0xe8] sm:$0xff]  ;;  %v9274_v34 = vld [vmem:[%s9181_s12 + $0xe0] sm:$0xff]  ;;  %v9277_v35 = vld [vmem:[%s9181_s12 + $0xd8] sm:$0xff]  ;;  %1847 = vmatpush.msra.mxu1 %v1445_v43 }
  0x26   : > { %2389 = vperm.xlu2 %8688, %v393_v9   ;;  %2381 = vperm.xlu1 %8687, %v391_v10   ;;  %v9293_v39 = vld [vmem:[%s9181_s12 + $0x100] sm:$0xff]  ;;  %v9296_v40 = vld [vmem:[%s9181_s12 + $0xf8] sm:$0xff]  ;;  %v9299_v41 = vld [vmem:[%s9181_s12 + $0xf0] sm:$0xff]  ;;  %p9008_p3 = pnand %p9007_p2, %p9003_p13 }
  0x27   : > { %2373 = vperm.xlu0 %8686, %v389_v11   ;;  %8298 = vmatmul.msk.f32.gmra.mxu0 %vm524_vm0, %v389_v11  ;;  %v9316_v45 = vld [vmem:[%s9181_s12 + $0x118] sm:$0xff]  ;;  %v9319_v46 = vld [vmem:[%s9181_s12 + $0x110] sm:$0xff]  ;;  %v9322_v47 = vld [vmem:[%s9181_s12 + $0x108] sm:$0xff] }
  0x28   : > { %8630 = vmatpush.msrb.mxu3 %v1448_v37  ;;  %1848 = vmatpush.msra.mxu1 %v1444_v44  ;;  %v9341_v52 = vld [vmem:[%s9181_s12 + $0x130] sm:$0xff]  ;;  %v9344_v53 = vld [vmem:[%s9181_s12 + $0x128] sm:$0xff]  ;;  %v9347_v54 = vld [vmem:[%s9181_s12 + $0x120] sm:$0xff] }
  0x29   : > { %v9366_v59 = vld [vmem:[%s9181_s12 + $0x148] sm:$0xff]  ;;  %v9369_v60 = vld [vmem:[%s9181_s12 + $0x140] sm:$0xff]  ;;  %v9372_v61 = vld [vmem:[%s9181_s12 + $0x138] sm:$0xff] }
  0x2a   : > { %8631 = vmatpush.msrb.mxu3 %v1447_v38  ;;  %1849 = vmatpush.msra.mxu1 %v1443_v48  ;;  %v9382_v63 = vld [vmem:[%s9181_s12 + $0x160] sm:$0xff]  ;;  %v9385_v0 = vld [vmem:[%s9181_s12 + $0x158] sm:$0xff]  ;;  %v9388_v1 = vld [vmem:[%s9181_s12 + $0x150] sm:$0xff] }
  0x2b   : > { %v9402_v5 = vld [vmem:[%s9181_s12 + $0x178] sm:$0xff]  ;;  %v9424_v11 = vld [vmem:[%s14803_s2] ss:$0 sm:$0xff] }
  0x2c   : > { %8632 = vmatpush.msrb.mxu3 %v1446_v42  ;;  %1850 = vmatpush.msra.mxu1 %v1442_v49  ;;  %v440_v36 = vld [vmem:[%s9181_s12 + $0x1a0] sm:$0xff]  ;;  %v9451_v38 = vld [vmem:[%s9181_s12 + $0x198] sm:$0xff] }
  0x2e   : > { %2401 = vperm.xlu2 %8688, %v396_v12   ;;  %2397 = vperm.xlu1 %8687, %v395_v13  }
  0x2f   : > { %2393 = vperm.xlu0 %8686, %v394_v14   ;;  %8299 = vmatmul.msk.f32.gmra.mxu0 %vm524_vm0, %v390_v7  ;;  %v9408_v7 = vld [vmem:[%s9181_s12 + $0x168] sm:$0xff] }
  0x30   : > { %8633 = vmatpush.msrb.mxu3 %v1445_v43  ;;  %1851 = vmatpush.msra.mxu1 %v1441_v51 }
  0x32   : > { %8634 = vmatpush.msrb.mxu3 %v1444_v44  ;;  %1852 = vmatpush.msra.mxu1 %v1440_v55 }
  0x34   : > { %8635 = vmatpush.msrb.mxu3 %v1443_v48  ;;  %1853 = vmatpush.msra.mxu1 %v1439_v56 }
  0x36   : > { %2413 = vperm.xlu2 %8688, %v9196_v15   ;;  %2409 = vperm.xlu1 %8687, %v9199_v16  }
  0x37   : > { %2405 = vperm.xlu0 %8686, %v397_v17   ;;  %8300 = vmatmul.msk.f32.gmra.mxu0 %vm524_vm0, %v391_v10 }
  0x38   : > { %8636 = vmatpush.msrb.mxu3 %v1442_v49  ;;  %1854 = vmatpush.msra.mxu1 %v1438_v58  ;;  %v444_v49 = vld [vmem:[%s9181_s12 + $0x1c0] sm:$0xff] }
  0x3a   : > { %8637 = vmatpush.msrb.mxu3 %v1441_v51  ;;  %v443_v51 = vld [vmem:[%s9181_s12 + $0x1b8] sm:$0xff] }
  0x3c   : > { %8638 = vmatpush.msrb.mxu3 %v1440_v55 }
  0x3e   : > { %2425 = vperm.xlu2 %8688, %v9206_v18   ;;  %2421 = vperm.xlu1 %8687, %v9209_v19  }
  0x3f   : > { %2417 = vperm.xlu0 %8686, %v9212_v20   ;;  %8301 = vmatmul.msk.f32.gmra.mxu0 %vm524_vm0, %v392_v6  ;;  %v9405_v6 = vld [vmem:[%s9181_s12 + $0x170] sm:$0xff] }
  0x40   : > { %8639 = vmatpush.msrb.mxu3 %v1439_v56  ;;  %v442_v56 = vld [vmem:[%s9181_s12 + $0x1b0] sm:$0xff] }
  0x42   : > { %8640 = vmatpush.msrb.mxu3 %v1438_v58 }
  0x46   : > { %2437 = vperm.xlu2 %8688, %v9219_v21   ;;  %2433 = vperm.xlu1 %8687, %v9222_v22  }
  0x47   : > { %2429 = vperm.xlu0 %8686, %v9225_v23   ;;  %8302 = vmatmul.msk.f32.gmra.mxu0 %vm524_vm0, %v393_v9 }
  0x4e   : > { %2449 = vperm.xlu2 %8688, %v9232_v24   ;;  %2445 = vperm.xlu1 %8687, %v9235_v25  }
  0x4f   : > { %2441 = vperm.xlu0 %8686, %v9238_v26   ;;  %8303 = vmatmul.msk.f32.gmra.mxu0 %vm524_vm0, %v394_v14 }
  0x56   : > { %2461 = vperm.xlu2 %8688, %v9245_v27   ;;  %2457 = vperm.xlu1 %8687, %v9248_v28  }
  0x57   : > { %2453 = vperm.xlu0 %8686, %v9251_v29   ;;  %8304 = vmatmul.msk.f32.gmra.mxu0 %vm524_vm0, %v395_v13  ;;  %v9430_v13 = vld [vmem:[%s9181_s12 + $0x188] sm:$0xff] }
  0x5e   : > { %2473 = vperm.xlu2 %8688, %v9258_v30   ;;  %2469 = vperm.xlu1 %8687, %v9261_v31  }
  0x5f   : > { %2465 = vperm.xlu0 %8686, %v9264_v32   ;;  %8305 = vmatmul.msk.f32.gmra.mxu0 %vm524_vm0, %v396_v12  ;;  %v9427_v12 = vld [vmem:[%s9181_s12 + $0x190] sm:$0xff] }
  0x66   : > { %2485 = vperm.xlu2 %8688, %v9271_v33   ;;  %2481 = vperm.xlu1 %8687, %v9274_v34  }
  0x67   : > { %2477 = vperm.xlu0 %8686, %v9277_v35   ;;  %8306 = vmatmul.msk.f32.gmra.mxu0 %vm524_vm0, %v397_v17 }
  0x6e   : > { %2497 = vperm.xlu2 %8688, %v9293_v39   ;;  %2493 = vperm.xlu1 %8687, %v9296_v40  }
  0x6f   : > { %2489 = vperm.xlu0 %8686, %v9299_v41   ;;  %8307 = vmatmul.msk.f32.gmra.mxu0 %vm524_vm0, %v9199_v16 }
  0x76   : > { %2509 = vperm.xlu2 %8688, %v9316_v45   ;;  %2505 = vperm.xlu1 %8687, %v9319_v46  }
  0x77   : > { %2501 = vperm.xlu0 %8686, %v9322_v47   ;;  %8308 = vmatmul.msk.f32.gmra.mxu0 %vm524_vm0, %v9196_v15  ;;  %v9433_v15 = vld [vmem:[%s9181_s12 + $0x180] sm:$0xff] }
  0x78   : > { %v9335_v50 = vpop.permute.xlu2 %2385 }
  0x7e   : > { %2521 = vperm.xlu2 %8688, %v9341_v52   ;;  %2517 = vperm.xlu1 %8687, %v9344_v53  }
  0x7f   : > { %2513 = vperm.xlu0 %8686, %v9347_v54   ;;  %8309 = vmatmul.msk.f32.gmra.mxu0 %vm524_vm0, %v9212_v20 }
  0x80   : > { %v9360_v57 = vpop.permute.xlu2 %2389 }
  0x86   : > { %2533 = vperm.xlu2 %8688, %v9366_v59   ;;  %2529 = vperm.xlu1 %8687, %v9369_v60  }
  0x87   : > { %2525 = vperm.xlu0 %8686, %v9372_v61   ;;  %8310 = vmatmul.msk.f32.gmra.mxu0 %vm524_vm0, %v9209_v19 }
  0x88   : > { %v9379_v62 = vpop.permute.xlu2 %2401 }
  0x8e   : > { %2545 = vperm.xlu2 %8688, %v9382_v63   ;;  %2541 = vperm.xlu1 %8687, %v9385_v0  }
  0x8f   : > { %2537 = vperm.xlu0 %8686, %v9388_v1   ;;  %8311 = vmatmul.msk.f32.gmra.mxu0 %vm524_vm0, %v9206_v18 }
  0x90   : > { %v9395_v2 = vpop.permute.xlu2 %2413  ;;  %v9397_v3 = vpop.permute.xlu1 %2377 }
  0x91   : > { %v9399_v4 = vpop.permute.xlu0 %2369 }
  0x96   : > { %2557 = vperm.xlu2 %8688, %v9402_v5   ;;  %2553 = vperm.xlu1 %8687, %v9405_v6  }
  0x97   : > { %2549 = vperm.xlu0 %8686, %v9408_v7   ;;  %8312 = vmatmul.msk.f32.gmra.mxu0 %vm524_vm0, %v9225_v23  ;;  %v441_v23 = vld [vmem:[%s9181_s12 + $0x1a8] sm:$0xff] }
  0x98   : > { %v9415_v8 = vpop.permute.xlu2 %2425  ;;  %v9417_v9 = vpop.permute.xlu1 %2381 }
  0x99   : > { %v9419_v10 = vpop.permute.xlu0 %2373 }
  0x9c   : > { %v926_v14 = vpop.f32.mrf.mxu0 }
  0x9d   : > { %v927_v16 = vadd.f32 %v9424_v11, %v926_v14 }
  0x9e   : > { %2569 = vperm.xlu2 %8688, %v9427_v12   ;;  %2565 = vperm.xlu1 %8687, %v9430_v13  }
  0x9f   : > { %v1310_v17 = vmax.f32 %v927_v16, 0.0  ;;  %2561 = vperm.xlu0 %8686, %v9433_v15   ;;  %8313 = vmatmul.msk.f32.gmra.mxu0 %vm524_vm0, %v9222_v22 }
  0xa0   : > { %v9441_v18 = vpop.permute.xlu2 %2437  ;;  %v9443_v19 = vpop.permute.xlu1 %2397 }
  0xa1   : > { %v9445_v20 = vpop.permute.xlu0 %2393  ;;  %8425 = vmatmul.msk.f32.vlgmr.msra.gmra.mxu1 %vm1454_vm1, %v1310_v17 }
  0xa4   : > { %v929_v37 = vpop.f32.mrf.mxu0 }
  0xa5   : > { %v930_v42 = vadd.f32 %v9424_v11, %v929_v37 }
  0xa6   : > { %2581 = vperm.xlu2 %8688, %v441_v23   ;;  %2577 = vperm.xlu1 %8687, %v440_v36   ;;  %v447_v23 = vld [vmem:[%s9181_s12 + $0x1d8] sm:$0xff]  ;;  %v446_v36 = vld [vmem:[%s9181_s12 + $0x1d0] sm:$0xff] }
  0xa7   : > { %v1311_v22 = vmax.f32 %v930_v42, 0.0  ;;  %2573 = vperm.xlu0 %8686, %v9451_v38   ;;  %8314 = vmatmul.msk.f32.gmra.mxu0 %vm524_vm0, %v9219_v21  ;;  %v445_v42 = vld [vmem:[%s9181_s12 + $0x1c8] sm:$0xff] }
  0xa8   : > { %v9457_v43 = vpop.permute.xlu2 %2449  ;;  %v9459_v44 = vpop.permute.xlu1 %2409 }
  0xa9   : > { %15005 = vst [vmem:[#allocation6_spill] sm:$0xff] %v9457_v43  ;;  %v9461_v48 = vpop.permute.xlu0 %2405  ;;  %8426 = vmatmul.msk.f32.gmra.mxu1 %vm1454_vm1, %v1311_v22 }
  0xac   : > { %v932_v55 = vpop.f32.mrf.mxu0 }
  0xad   : > { %v933_v58 = vadd.f32 %v9424_v11, %v932_v55 }
  0xae   : > { %2593 = vperm.xlu2 %8688, %v444_v49   ;;  %2589 = vperm.xlu1 %8687, %v443_v51  }
  0xaf   : > { %v1312_v21 = vmax.f32 %v933_v58, 0.0  ;;  %2585 = vperm.xlu0 %8686, %v442_v56   ;;  %8315 = vmatmul.msk.f32.gmra.mxu0 %vm524_vm0, %v9238_v26  ;;  %v450_v56 = vld [vmem:[%s9181_s12 + $0x1f0] sm:$0xff]  ;;  %v449_v58 = vld [vmem:[%s9181_s12 + $0x1e8] sm:$0xff] }
  0xb0   : > { %v9470_v14 = vpop.permute.xlu2 %2461  ;;  %v9472_v16 = vpop.permute.xlu1 %2421 }
  0xb1   : > { %15006 = vst [vmem:[#allocation7_spill] sm:$0xff] %v9470_v14  ;;  %v9474_v17 = vpop.permute.xlu0 %2417  ;;  %8427 = vmatmul.msk.f32.gmra.mxu1 %vm1454_vm1, %v1312_v21  ;;  %v455_v14 = vld [vmem:[%s9181_s12 + $0x218] sm:$0xff] }
  0xb4   : > { %v935_v37 = vpop.f32.mrf.mxu0 }
  0xb5   : > { %v936_v22 = vadd.f32 %v9424_v11, %v935_v37 }
  0xb6   : > { %2605 = vperm.xlu2 %8688, %v447_v23   ;;  %2601 = vperm.xlu1 %8687, %v446_v36   ;;  %v448_v23 = vld [vmem:[%s9181_s12 + $0x1e0] sm:$0xff] }
  0xb7   : > { %v1313_v26 = vmax.f32 %v936_v22, 0.0  ;;  %2597 = vperm.xlu0 %8686, %v445_v42   ;;  %8316 = vmatmul.msk.f32.gmra.mxu0 %vm524_vm0, %v9235_v25 }
  0xb8   : > { %v9483_v49 = vpop.permute.xlu2 %2473  ;;  %v9485_v51 = vpop.permute.xlu1 %2433 }
  0xb9   : > { %15007 = vst [vmem:[#allocation8_spill] sm:$0xff] %v9483_v49  ;;  %v9487_v55 = vpop.permute.xlu0 %2429  ;;  %8428 = vmatmul.msk.f32.gmra.mxu1 %vm1454_vm1, %v1313_v26  ;;  %v453_v26 = vld [vmem:[%s9181_s12 + $0x208] sm:$0xff]  ;;  %v452_v49 = vld [vmem:[%s9181_s12 + $0x200] sm:$0xff] }
  0xbc   : > { %v938_v21 = vpop.f32.mrf.mxu0 }
  0xbd   : > { %v939_v36 = vadd.f32 %v9424_v11, %v938_v21 }
  0xbe   : > { %2617 = vperm.xlu2 %8688, %v450_v56   ;;  %2613 = vperm.xlu1 %8687, %v449_v58   ;;  %v451_v58 = vld [vmem:[%s9181_s12 + $0x1f8] sm:$0xff] }
  0xbf   : > { %v1314_v25 = vmax.f32 %v939_v36, 0.0  ;;  %2609 = vperm.xlu0 %8686, %v448_v23   ;;  %8317 = vmatmul.msk.f32.gmra.mxu0 %vm524_vm0, %v9232_v24 }
  0xc0   : > { %v9496_v37 = vpop.permute.xlu2 %2485  ;;  %v9498_v42 = vpop.permute.xlu1 %2445 }
  0xc1   : > { %15008 = vst [vmem:[#allocation9_spill] sm:$0xff] %v9496_v37  ;;  %v9500_v22 = vpop.permute.xlu0 %2441  ;;  %8429 = vmatmul.msk.f32.gmra.mxu1 %vm1454_vm1, %v1314_v25  ;;  %v456_v37 = vld [vmem:[%s9181_s12 + $0x220] sm:$0xff] }
  0xc4   : > { %v941_v56 = vpop.f32.mrf.mxu0 }
  0xc5   : > { %v942_v21 = vadd.f32 %v9424_v11, %v941_v56 }
  0xc6   : > { %2629 = vperm.xlu2 %8688, %v453_v26   ;;  %2625 = vperm.xlu1 %8687, %v452_v49   ;;  %v454_v49 = vld [vmem:[%s9181_s12 + $0x210] sm:$0xff] }
  0xc7   : > { %v1315_v24 = vmax.f32 %v942_v21, 0.0  ;;  %2621 = vperm.xlu0 %8686, %v451_v58   ;;  %8318 = vmatmul.msk.f32.gmra.mxu0 %vm524_vm0, %v9251_v29  ;;  %v466_v58 = vld [vmem:[%s9181_s12 + $0x270] sm:$0xff] }
  0xc8   : > { %v9509_v23 = vpop.permute.xlu2 %2497  ;;  %v9511_v36 = vpop.permute.xlu1 %2457  ;;  %8375 = vmatmul.msk.f32.vlgmr.msra.gmra.mxu2 %vm524_vm0, %v466_v58 }
  0xc9   : > { %15009 = vst [vmem:[#allocation10_spill] sm:$0xff] %v9509_v23  ;;  %v9513_v25 = vpop.permute.xlu0 %2453  ;;  %8430 = vmatmul.msk.f32.gmra.mxu1 %vm1454_vm1, %v1315_v24 }
  0xca   : > { %15010 = vst [vmem:[#allocation11_spill] sm:$0xff] %v9511_v36 }
  0xcb   : > { %15011 = vst [vmem:[#allocation12_spill] sm:$0xff] %v9513_v25  ;;  %v490_v25 = vld [vmem:[%s9181_s12 + $0x330] sm:$0xff] }
  0xcc   : > { %v944_v26 = vpop.f32.mrf.mxu0 }
  0xcd   : > { %v945_v56 = vadd.f32 %v9424_v11, %v944_v26  ;;  %v459_v26 = vld [vmem:[%s9181_s12 + $0x238] sm:$0xff] }
  0xce   : > { %2641 = vperm.xlu2 %8688, %v456_v37   ;;  %2637 = vperm.xlu1 %8687, %v455_v14   ;;  %v458_v14 = vld [vmem:[%s9181_s12 + $0x230] sm:$0xff] }
  0xcf   : > { %v1316_v29 = vmax.f32 %v945_v56, 0.0  ;;  %2633 = vperm.xlu0 %8686, %v454_v49   ;;  %8319 = vmatmul.msk.f32.gmra.mxu0 %vm524_vm0, %v9248_v28  ;;  %v457_v49 = vld [vmem:[%s9181_s12 + $0x228] sm:$0xff] }
  0xd0   : > { %v9523_v21 = vpop.permute.xlu2 %2509  ;;  %v9525_v24 = vpop.permute.xlu1 %2469 }
  0xd1   : > { %15012 = vst [vmem:[#allocation13_spill] sm:$0xff] %v9523_v21  ;;  %v9528_v23 = vpop.permute.xlu0 %2465  ;;  %8431 = vmatmul.msk.f32.gmra.mxu1 %vm1454_vm1, %v1316_v29  ;;  %v467_v21 = vld [vmem:[%s9181_s12 + $0x278] sm:$0xff] }
  0xd2   : > { %15013 = vst [vmem:[#allocation14_spill] sm:$0xff] %v9525_v24  ;;  %8376 = vmatmul.msk.f32.gmra.mxu2 %vm524_vm0, %v467_v21 }
  0xd3   : > { %15014 = vst [vmem:[#allocation15_spill] sm:$0xff] %v9528_v23  ;;  %v491_v23 = vld [vmem:[%s9181_s12 + $0x338] sm:$0xff] }
  0xd4   : > { %v947_v37 = vpop.f32.mrf.mxu0 }
  0xd5   : > { %v948_v28 = vadd.f32 %v9424_v11, %v947_v37  ;;  %v462_v37 = vld [vmem:[%s9181_s12 + $0x250] sm:$0xff] }
  0xd6   : > { %2653 = vperm.xlu2 %8688, %v459_v26   ;;  %2649 = vperm.xlu1 %8687, %v458_v14   ;;  %v461_v26 = vld [vmem:[%s9181_s12 + $0x248] sm:$0xff] }
  0xd7   : > { %v1317_v56 = vmax.f32 %v948_v28, 0.0  ;;  %2645 = vperm.xlu0 %8686, %v457_v49   ;;  %8320 = vmatmul.msk.f32.gmra.mxu0 %vm524_vm0, %v9245_v27  ;;  %v460_v49 = vld [vmem:[%s9181_s12 + $0x240] sm:$0xff] }
  0xd8   : > { %v9538_v24 = vpop.permute.xlu2 %2521  ;;  %v9540_v29 = vpop.permute.xlu1 %2481 }
  0xd9   : > { %15015 = vst [vmem:[#allocation16_spill] sm:$0xff] %v9538_v24  ;;  %v9543_v36 = vpop.permute.xlu0 %2477  ;;  %8432 = vmatmul.msk.f32.gmra.mxu1 %vm1454_vm1, %v1317_v56  ;;  %v468_v24 = vld [vmem:[%s9181_s12 + $0x280] sm:$0xff] }
  0xda   : > { %15016 = vst [vmem:[#allocation17_spill] sm:$0xff] %v9540_v29  ;;  %8377 = vmatmul.msk.f32.gmra.mxu2 %vm524_vm0, %v468_v24 }
  0xdb   : > { %15017 = vst [vmem:[#allocation18_spill] sm:$0xff] %v9543_v36 }
  0xdc   : > { %v950_v14 = vpop.f32.mrf.mxu0 }
  0xdd   : > { %v951_v27 = vadd.f32 %v9424_v11, %v950_v14  ;;  %v465_v14 = vld [vmem:[%s9181_s12 + $0x268] sm:$0xff] }
  0xde   : > { %2665 = vperm.xlu2 %8688, %v462_v37   ;;  %2661 = vperm.xlu1 %8687, %v461_v26   ;;  %v464_v37 = vld [vmem:[%s9181_s12 + $0x260] sm:$0xff] }
  0xdf   : > { %v1318_v28 = vmax.f32 %v951_v27, 0.0  ;;  %2657 = vperm.xlu0 %8686, %v460_v49   ;;  %8321 = vmatmul.msk.f32.gmra.mxu0 %vm524_vm0, %v9264_v32  ;;  %v463_v27 = vld [vmem:[%s9181_s12 + $0x258] sm:$0xff] }
  0xe0   : > { %v9553_v29 = vpop.permute.xlu2 %2533  ;;  %v9555_v56 = vpop.permute.xlu1 %2493 }
  0xe1   : > { %15018 = vst [vmem:[#allocation19_spill] sm:$0xff] %v9553_v29  ;;  %v9558_v36 = vpop.permute.xlu0 %2489  ;;  %8433 = vmatmul.msk.f32.gmra.mxu1 %vm1454_vm1, %v1318_v28  ;;  %v469_v29 = vld [vmem:[%s9181_s12 + $0x288] sm:$0xff] }
  0xe2   : > { %15019 = vst [vmem:[#allocation20_spill] sm:$0xff] %v9555_v56  ;;  %8378 = vmatmul.msk.f32.gmra.mxu2 %vm524_vm0, %v469_v29 }
  0xe3   : > { %15020 = vst [vmem:[#allocation21_spill] sm:$0xff] %v9558_v36 }
  0xe4   : > { %v953_v26 = vpop.f32.mrf.mxu0 }
  0xe5   : > { %v954_v49 = vadd.f32 %v9424_v11, %v953_v26 }
  0xe6   : > { %2677 = vperm.xlu2 %8688, %v465_v14   ;;  %2673 = vperm.xlu1 %8687, %v464_v37  }
  0xe7   : > { %v1319_v32 = vmax.f32 %v954_v49, 0.0  ;;  %2669 = vperm.xlu0 %8686, %v463_v27   ;;  %8322 = vmatmul.msk.f32.gmra.mxu0 %vm524_vm0, %v9261_v31  ;;  %v470_v31 = vld [vmem:[%s9181_s12 + $0x290] sm:$0xff] }
  0xe8   : > { %v9568_v56 = vpop.permute.xlu2 %2545  ;;  %v9570_v36 = vpop.permute.xlu1 %2505 }
  0xe9   : > { %15021 = vst [vmem:[#allocation22_spill] sm:$0xff] %v9568_v56  ;;  %v9573_v28 = vpop.permute.xlu0 %2501  ;;  %8434 = vmatmul.msk.f32.gmra.mxu1 %vm1454_vm1, %v1319_v32 }
  0xea   : > { %15022 = vst [vmem:[#allocation23_spill] sm:$0xff] %v9570_v36  ;;  %8379 = vmatmul.msk.f32.gmra.mxu2 %vm524_vm0, %v470_v31  ;;  %v9706_v36 = vld [vmem:[%s9181_s12 + $0x320] sm:$0xff] }
  0xeb   : > { %15023 = vst [vmem:[#allocation24_spill] sm:$0xff] %v9573_v28  ;;  %v9709_v28 = vld [vmem:[%s9181_s12 + $0x318] sm:$0xff] }
  0xec   : > { %v956_v14 = vpop.f32.mrf.mxu0 }
  0xed   : > { %v957_v37 = vadd.f32 %v9424_v11, %v956_v14 }
  0xee   : > { %2689 = vperm.xlu2 %8688, %v468_v24   ;;  %2685 = vperm.xlu1 %8687, %v467_v21   ;;  %v471_v24 = vld [vmem:[%s9181_s12 + $0x298] sm:$0xff] }
  0xef   : > { %v1320_v26 = vmax.f32 %v957_v37, 0.0  ;;  %2681 = vperm.xlu0 %8686, %v466_v58   ;;  %8323 = vmatmul.msk.f32.gmra.mxu0 %vm524_vm0, %v9258_v30 }
  0xf0   : > { %v9580_v27 = vpop.permute.xlu2 %2557  ;;  %v9582_v49 = vpop.permute.xlu1 %2517 }
  0xf1   : > { %15024 = vst [vmem:[#allocation25_spill] sm:$0xff] %v9580_v27  ;;  %v9585_v56 = vpop.permute.xlu0 %2513  ;;  %8435 = vmatmul.msk.f32.gmra.mxu1 %vm1454_vm1, %v1320_v26  ;;  %v474_v26 = vld [vmem:[%s9181_s12 + $0x2b0] sm:$0xff]  ;;  %v9615_v27 = vld [vmem:[%s9181_s12 + $0x2c8] sm:$0xff] }
  0xf2   : > { %15025 = vst [vmem:[#allocation26_spill] sm:$0xff] %v9582_v49  ;;  %8380 = vmatmul.msk.f32.gmra.mxu2 %vm524_vm0, %v471_v24  ;;  %v9661_v49 = vld [vmem:[%s9181_s12 + $0x2e8] sm:$0xff] }
  0xf3   : > { %15026 = vst [vmem:[#allocation27_spill] sm:$0xff] %v9585_v56  ;;  %v9684_v56 = vld [vmem:[%s9181_s12 + $0x300] sm:$0xff] }
  0xf4   : > { %v959_v21 = vpop.f32.mrf.mxu0 }
  0xf5   : > { %v960_v58 = vadd.f32 %v9424_v11, %v959_v21  ;;  %v473_v21 = vld [vmem:[%s9181_s12 + $0x2a8] sm:$0xff] }
  0xf6   : > { %2701 = vperm.xlu2 %8688, %v471_v24   ;;  %2697 = vperm.xlu1 %8687, %v470_v31  }
  0xf7   : > { %v1321_v30 = vmax.f32 %v960_v58, 0.0  ;;  %2693 = vperm.xlu0 %8686, %v469_v29   ;;  %8324 = vmatmul.msk.f32.gmra.mxu0 %vm524_vm0, %v9277_v35  ;;  %v472_v29 = vld [vmem:[%s9181_s12 + $0x2a0] sm:$0xff] }
  0xf8   : > { %v9592_v32 = vpop.permute.xlu2 %2569  ;;  %v9594_v14 = vpop.permute.xlu1 %2529 }
  0xf9   : > { %15027 = vst [vmem:[#allocation28_spill] sm:$0xff] %v9592_v32  ;;  %v9597_v37 = vpop.permute.xlu0 %2525  ;;  %8436 = vmatmul.msk.f32.gmra.mxu1 %vm1454_vm1, %v1321_v30 }
  0xfa   : > { %15028 = vst [vmem:[#allocation29_spill] sm:$0xff] %v9594_v14  ;;  %8381 = vmatmul.msk.f32.gmra.mxu2 %vm524_vm0, %v472_v29  ;;  %v475_v14 = vld [vmem:[%s9181_s12 + $0x2b8] sm:$0xff] }
  0xfb   : > { %15029 = vst [vmem:[#allocation30_spill] sm:$0xff] %v9597_v37  ;;  %v9638_v37 = vld [vmem:[%s9181_s12 + $0x2d0] sm:$0xff] }
  0xfc   : > { %v962_v31 = vpop.f32.mrf.mxu0 }
  0xfd   : > { %v963_v58 = vadd.f32 %v9424_v11, %v962_v31  ;;  %v476_v31 = vld [vmem:[%s9181_s12 + $0x2c0] sm:$0xff] }
  0xfe   : > { %2713 = vperm.xlu2 %8688, %v474_v26   ;;  %2709 = vperm.xlu1 %8687, %v473_v21  }
  0xff   : > { %v1322_v35 = vmax.f32 %v963_v58, 0.0  ;;  %2705 = vperm.xlu0 %8686, %v472_v29   ;;  %8325 = vmatmul.msk.f32.gmra.mxu0 %vm524_vm0, %v9274_v34 }
 0x100   : > { %v9606_v24 = vpop.permute.xlu2 %2581  ;;  %v9608_v32 = vpop.permute.xlu1 %2541 }
 0x101   : > { %15030 = vst [vmem:[#allocation31_spill] sm:$0xff] %v9606_v24  ;;  %v9611_v30 = vpop.permute.xlu0 %2537  ;;  %8437 = vmatmul.msk.f32.gmra.mxu1 %vm1454_vm1, %v1322_v35 }
 0x102   : > { %15031 = vst [vmem:[#allocation32_spill] sm:$0xff] %v9608_v32  ;;  %8382 = vmatmul.msk.f32.gmra.mxu2 %vm524_vm0, %v473_v21 }
 0x103   : > { %15032 = vst [vmem:[#allocation33_spill] sm:$0xff] %v9611_v30  ;;  %v9635_v30 = vld [vmem:[%s9181_s12 + $0x2d8] sm:$0xff] }
 0x104   : > { %v965_v58 = vpop.f32.mrf.mxu0 }
 0x105   : > { %v966_v34 = vadd.f32 %v9424_v11, %v965_v58  ;;  %v9632_v58 = vld [vmem:[%s9181_s12 + $0x2e0] sm:$0xff] }
 0x106   : > { %2725 = vperm.xlu2 %8688, %v9615_v27   ;;  %2721 = vperm.xlu1 %8687, %v476_v31  }
 0x107   : > { %v1323_v24 = vmax.f32 %v966_v34, 0.0  ;;  %2717 = vperm.xlu0 %8686, %v475_v14   ;;  %8326 = vmatmul.msk.f32.gmra.mxu0 %vm524_vm0, %v9271_v33 }
 0x108   : > { %v9623_v29 = vpop.permute.xlu2 %2593  ;;  %v9625_v35 = vpop.permute.xlu1 %2553 }
 0x109   : > { %15033 = vst [vmem:[#allocation34_spill] sm:$0xff] %v9623_v29  ;;  %v9628_v32 = vpop.permute.xlu0 %2549  ;;  %8438 = vmatmul.msk.f32.gmra.mxu1 %vm1454_vm1, %v1323_v24 }
 0x10a   : > { %15034 = vst [vmem:[#allocation35_spill] sm:$0xff] %v9625_v35  ;;  %8383 = vmatmul.msk.f32.gmra.mxu2 %vm524_vm0, %v474_v26 }
 0x10b   : > { %15035 = vst [vmem:[#allocation36_spill] sm:$0xff] %v9628_v32 }
 0x10c   : > { %v968_v34 = vpop.f32.mrf.mxu0 }
 0x10d   : > { %v969_v33 = vadd.f32 %v9424_v11, %v968_v34  ;;  %v9655_v34 = vld [vmem:[%s9181_s12 + $0x2f8] sm:$0xff] }
 0x10e   : > { %2737 = vperm.xlu2 %8688, %v9632_v58   ;;  %2733 = vperm.xlu1 %8687, %v9635_v30  }
 0x10f   : > { %v1324_v21 = vmax.f32 %v969_v33, 0.0  ;;  %2729 = vperm.xlu0 %8686, %v9638_v37   ;;  %8327 = vmatmul.msk.f32.gmra.mxu0 %vm524_vm0, %v9299_v41  ;;  %v9658_v33 = vld [vmem:[%s9181_s12 + $0x2f0] sm:$0xff] }
 0x110   : > { %v9646_v24 = vpop.permute.xlu2 %2605  ;;  %v9648_v29 = vpop.permute.xlu1 %2565 }
 0x111   : > { %15036 = vst [vmem:[#allocation37_spill] sm:$0xff] %v9646_v24  ;;  %v9651_v35 = vpop.permute.xlu0 %2561  ;;  %8439 = vmatmul.msk.f32.gmra.mxu1 %vm1454_vm1, %v1324_v21 }
 0x112   : > { %15037 = vst [vmem:[#allocation38_spill] sm:$0xff] %v9648_v29  ;;  %8384 = vmatmul.msk.f32.gmra.mxu2 %vm524_vm0, %v475_v14 }
 0x113   : > { %15038 = vst [vmem:[#allocation39_spill] sm:$0xff] %v9651_v35  ;;  %v9681_v35 = vld [vmem:[%s9181_s12 + $0x308] sm:$0xff] }
 0x114   : > { %v971_v32 = vpop.f32.mrf.mxu0 }
 0x115   : > { %v972_v41 = vadd.f32 %v9424_v11, %v971_v32  ;;  %v9678_v32 = vld [vmem:[%s9181_s12 + $0x310] sm:$0xff] }
 0x116   : > { %2749 = vperm.xlu2 %8688, %v9655_v34   ;;  %2745 = vperm.xlu1 %8687, %v9658_v33  }
 0x117   : > { %v1325_v26 = vmax.f32 %v972_v41, 0.0  ;;  %2741 = vperm.xlu0 %8686, %v9661_v49   ;;  %8328 = vmatmul.msk.f32.gmra.mxu0 %vm524_vm0, %v9296_v40 }
 0x118   : > { %v9669_v21 = vpop.permute.xlu2 %2617  ;;  %v9671_v24 = vpop.permute.xlu1 %2577 }
 0x119   : > { %15039 = vst [vmem:[#allocation40_spill] sm:$0xff] %v9669_v21  ;;  %v9674_v29 = vpop.permute.xlu0 %2573  ;;  %8440 = vmatmul.msk.f32.gmra.mxu1 %vm1454_vm1, %v1325_v26 }
 0x11a   : > { %15040 = vst [vmem:[#allocation41_spill] sm:$0xff] %v9671_v24  ;;  %8385 = vmatmul.msk.f32.gmra.mxu2 %vm524_vm0, %v476_v31 }
 0x11b   : > { %15041 = vst [vmem:[#allocation42_spill] sm:$0xff] %v9674_v29 }
 0x11c   : > { %v974_v41 = vpop.f32.mrf.mxu0 }
 0x11d   : > { %v975_v40 = vadd.f32 %v9424_v11, %v974_v41  ;;  %v9703_v41 = vld [vmem:[%s9181_s12 + $0x328] sm:$0xff] }
 0x11e   : > { %v9687_v21 = vpop.f32.mrf.mxu1  ;;  %2761 = vperm.xlu2 %8688, %v9678_v32   ;;  %2757 = vperm.xlu1 %8687, %v9681_v35  }
 0x11f   : > { %v1326_v14 = vmax.f32 %v975_v40, 0.0  ;;  %2753 = vperm.xlu0 %8686, %v9684_v56   ;;  %8329 = vmatmul.msk.f32.gmra.mxu0 %vm524_vm0, %v9293_v39 }
 0x120   : > { %v9694_v26 = vpop.permute.xlu2 %2629  ;;  %v9696_v24 = vpop.permute.xlu1 %2589 }
 0x121   : > { %15042 = vst [vmem:[#allocation43_spill] sm:$0xff] %v9694_v26  ;;  %v9699_v29 = vpop.permute.xlu0 %2585  ;;  %8441 = vmatmul.msk.f32.gmra.mxu1 %vm1454_vm1, %v1326_v14 }
 0x122   : > { %15043 = vst [vmem:[#allocation44_spill] sm:$0xff] %v9696_v24  ;;  %8386 = vmatmul.msk.f32.gmra.mxu2 %vm524_vm0, %v9615_v27 }
 0x123   : > { %15044 = vst [vmem:[#allocation45_spill] sm:$0xff] %v9699_v29  ;;  %v492_v29 = vld [vmem:[%s9181_s12 + $0x340] sm:$0xff] }
 0x124   : > { %v977_v40 = vpop.f32.mrf.mxu0 }
 0x125   : > { %v978_v39 = vadd.f32 %v9424_v11, %v977_v40 }
 0x126   : > { %v9712_v26 = vpop.f32.mrf.mxu1  ;;  %2773 = vperm.xlu2 %8688, %v9703_v41   ;;  %2769 = vperm.xlu1 %8687, %v9706_v36  }
 0x127   : > { %v1327_v31 = vmax.f32 %v978_v39, 0.0  ;;  %2765 = vperm.xlu0 %8686, %v9709_v28   ;;  %8330 = vmatmul.msk.f32.gmra.mxu0 %vm524_vm0, %v9322_v47 }
 0x128   : > { %v9719_v14 = vpop.permute.xlu2 %2641  ;;  %v9721_v24 = vpop.permute.xlu1 %2601 }
 0x129   : > { %15045 = vst [vmem:[#allocation46_spill] sm:$0xff] %v9719_v14  ;;  %v9725_v40 = vpop.permute.xlu0 %2597  ;;  %8442 = vmatmul.msk.f32.gmra.mxu1 %vm1454_vm1, %v1327_v31 }
 0x12a   : > { %15046 = vst [vmem:[#allocation47_spill] sm:$0xff] %v9721_v24  ;;  %8387 = vmatmul.msk.f32.gmra.mxu2 %vm524_vm0, %v9638_v37 }
 0x12b   : > { %15047 = vst [vmem:[#allocation48_spill] sm:$0xff] %v9725_v40 }
 0x12c   : > { %v980_v39 = vpop.f32.mrf.mxu0 }
 0x12d   : > { %v981_v47 = vadd.f32 %v9424_v11, %v980_v39  ;;  %v495_v39 = vld [vmem:[%s9181_s12 + $0x358] sm:$0xff] }
 0x12e   : > { %v9732_v43 = vpop.f32.mrf.mxu1  ;;  %2785 = vperm.xlu2 %8688, %v492_v29   ;;  %2781 = vperm.xlu1 %8687, %v491_v23   ;;  %v494_v29 = vld [vmem:[%s9181_s12 + $0x350] sm:$0xff] }
 0x12f   : > { %v1328_v14 = vmax.f32 %v981_v47, 0.0  ;;  %2777 = vperm.xlu0 %8686, %v490_v25   ;;  %8331 = vmatmul.msk.f32.gmra.mxu0 %vm524_vm0, %v9319_v46  ;;  %v493_v25 = vld [vmem:[%s9181_s12 + $0x348] sm:$0xff] }
 0x130   : > { %v9736_v27 = vpop.permute.xlu2 %2653  ;;  %v9738_v31 = vpop.permute.xlu1 %2613 }
 0x131   : > { %15048 = vst [vmem:[#allocation49_spill] sm:$0xff] %v9736_v27  ;;  %v9742_v24 = vpop.permute.xlu0 %2609  ;;  %8443 = vmatmul.msk.f32.gmra.mxu1 %vm1454_vm1, %v1328_v14 }
 0x132   : > { %15049 = vst [vmem:[#allocation50_spill] sm:$0xff] %v9738_v31  ;;  %8388 = vmatmul.msk.f32.gmra.mxu2 %vm524_vm0, %v9635_v30 }
 0x133   : > { %15050 = vst [vmem:[#allocation51_spill] sm:$0xff] %v9742_v24 }
 0x134   : > { %v983_v23 = vpop.f32.mrf.mxu0 }
 0x135   : > { %v984_v46 = vadd.f32 %v9424_v11, %v983_v23  ;;  %v498_v23 = vld [vmem:[%s9181_s12 + $0x370] sm:$0xff] }
 0x136   : > { %v9749_v47 = vpop.f32.mrf.mxu1  ;;  %2797 = vperm.xlu2 %8688, %v495_v39   ;;  %2793 = vperm.xlu1 %8687, %v494_v29   ;;  %v497_v39 = vld [vmem:[%s9181_s12 + $0x368] sm:$0xff] }
 0x137   : > { %v1329_v27 = vmax.f32 %v984_v46, 0.0  ;;  %2789 = vperm.xlu0 %8686, %v493_v25   ;;  %8332 = vmatmul.msk.f32.gmra.mxu0 %vm524_vm0, %v9316_v45  ;;  %v496_v25 = vld [vmem:[%s9181_s12 + $0x360] sm:$0xff] }
 0x138   : > { %v9753_v37 = vpop.permute.xlu2 %2665  ;;  %v9755_v14 = vpop.permute.xlu1 %2625 }
 0x139   : > { %15051 = vst [vmem:[#allocation52_spill] sm:$0xff] %v9753_v37  ;;  %v9759_v31 = vpop.permute.xlu0 %2621  ;;  %8444 = vmatmul.msk.f32.gmra.mxu1 %vm1454_vm1, %v1329_v27 }
 0x13a   : > { %15052 = vst [vmem:[#allocation53_spill] sm:$0xff] %v9755_v14  ;;  %8389 = vmatmul.msk.f32.gmra.mxu2 %vm524_vm0, %v9632_v58  ;;  %v9788_v58 = vld [vmem:[%s9181_s12 + $0x3d8] sm:$0xff]  ;;  %v10112_v14 = vld [vmem:[%s9181_s12 + $0x1c0] sm:$0xff] }
 0x13b   : > { %15053 = vst [vmem:[#allocation54_spill] sm:$0xff] %v9759_v31  ;;  %8420 = vmatmul.msk.f32.vlgmr.msra.gmra.mxu3 %vm524_vm0, %v9788_v58 }
 0x13c   : > { %v986_v29 = vpop.f32.mrf.mxu0 }
 0x13d   : > { %v987_v45 = vadd.f32 %v9424_v11, %v986_v29  ;;  %v501_v29 = vld [vmem:[%s9181_s12 + $0x388] sm:$0xff] }
 0x13e   : > { %v9766_v46 = vpop.f32.mrf.mxu1  ;;  %2809 = vperm.xlu2 %8688, %v498_v23   ;;  %2805 = vperm.xlu1 %8687, %v497_v39   ;;  %v500_v23 = vld [vmem:[%s9181_s12 + $0x380] sm:$0xff] }
 0x13f   : > { %v1330_v37 = vmax.f32 %v987_v45, 0.0  ;;  %2801 = vperm.xlu0 %8686, %v496_v25   ;;  %8333 = vmatmul.msk.f32.gmra.mxu0 %vm524_vm0, %v9347_v54  ;;  %v499_v25 = vld [vmem:[%s9181_s12 + $0x378] sm:$0xff] }
 0x140   : > { %v9770_v30 = vpop.permute.xlu2 %2677  ;;  %v9772_v27 = vpop.permute.xlu1 %2637 }
 0x141   : > { %15054 = vst [vmem:[#allocation55_spill] sm:$0xff] %v9770_v30  ;;  %v9776_v31 = vpop.permute.xlu0 %2633  ;;  %8445 = vmatmul.msk.f32.gmra.mxu1 %vm1454_vm1, %v1330_v37 }
 0x142   : > { %15055 = vst [vmem:[#allocation56_spill] sm:$0xff] %v9772_v27  ;;  %8390 = vmatmul.msk.f32.gmra.mxu2 %vm524_vm0, %v9661_v49 }
 0x143   : > { %15056 = vst [vmem:[#allocation57_spill] sm:$0xff] %v9776_v31 }
 0x144   : > { %v989_v39 = vpop.f32.mrf.mxu0 }
 0x145   : > { %v990_v54 = vadd.f32 %v9424_v11, %v989_v39  ;;  %v503_v39 = vld [vmem:[%s9181_s12 + $0x398] sm:$0xff] }
 0x146   : > { %v9783_v45 = vpop.f32.mrf.mxu1  ;;  %2821 = vperm.xlu2 %8688, %v501_v29   ;;  %2817 = vperm.xlu1 %8687, %v500_v23   ;;  %v504_v23 = vld [vmem:[%s9181_s12 + $0x3a0] sm:$0xff] }
 0x147   : > { %v1331_v30 = vmax.f32 %v990_v54, 0.0  ;;  %2813 = vperm.xlu0 %8686, %v499_v25   ;;  %8334 = vmatmul.msk.f32.gmra.mxu0 %vm524_vm0, %v9344_v53  ;;  %v502_v25 = vld [vmem:[%s9181_s12 + $0x390] sm:$0xff] }
 0x148   : > { %v9790_v37 = vpop.permute.xlu2 %2689  ;;  %v9792_v27 = vpop.permute.xlu1 %2649 }
 0x149   : > { %15057 = vst [vmem:[#allocation58_spill] sm:$0xff] %v9790_v37  ;;  %v9798_v29 = vpop.permute.xlu0 %2645  ;;  %8446 = vmatmul.msk.f32.gmra.mxu1 %vm1454_vm1, %v1331_v30 }
 0x14a   : > { %15058 = vst [vmem:[#allocation59_spill] sm:$0xff] %v9792_v27  ;;  %v512_v27 = vld [vmem:[%s9181_s12 + $0x3e0] sm:$0xff]  ;;  %8391 = vmatmul.msk.f32.gmra.mxu2 %vm524_vm0, %v9658_v33 }
 0x14b   : > { %15059 = vst [vmem:[#allocation60_spill] sm:$0xff] %v9798_v29  ;;  %8421 = vmatmul.msk.f32.gmra.mxu3 %vm524_vm0, %v512_v27 }
 0x14c   : > { %v992_v53 = vpop.f32.mrf.mxu0 }
 0x14d   : > { %v993_v54 = vadd.f32 %v9424_v11, %v992_v53 }
 0x14e   : > { %v9805_v37 = vpop.f32.mrf.mxu1  ;;  %2833 = vperm.xlu2 %8688, %v504_v23   ;;  %2829 = vperm.xlu1 %8687, %v503_v39   ;;  %v507_v23 = vld [vmem:[%s9181_s12 + $0x3b8] sm:$0xff]  ;;  %v506_v39 = vld [vmem:[%s9181_s12 + $0x3b0] sm:$0xff] }
 0x14f   : > { %v1332_v49 = vmax.f32 %v993_v54, 0.0  ;;  %2825 = vperm.xlu0 %8686, %v502_v25   ;;  %8335 = vmatmul.msk.f32.gmra.mxu0 %vm524_vm0, %v9341_v52  ;;  %v505_v52 = vld [vmem:[%s9181_s12 + $0x3a8] sm:$0xff] }
 0x150   : > { %v9810_v30 = vpop.permute.xlu2 %2701  ;;  %v9812_v29 = vpop.permute.xlu1 %2661 }
 0x151   : > { %15060 = vst [vmem:[#allocation61_spill] sm:$0xff] %v9810_v30  ;;  %v9817_v53 = vpop.permute.xlu0 %2657  ;;  %8447 = vmatmul.msk.f32.gmra.mxu1 %vm1454_vm1, %v1332_v49 }
 0x152   : > { %15061 = vst [vmem:[#allocation62_spill] sm:$0xff] %v9812_v29  ;;  %v513_v29 = vld [vmem:[%s9181_s12 + $0x3e8] sm:$0xff]  ;;  %8392 = vmatmul.msk.f32.gmra.mxu2 %vm524_vm0, %v9655_v34  ;;  %v514_v34 = vld [vmem:[%s9181_s12 + $0x3f0] sm:$0xff] }
 0x153   : > { %15062 = vst [vmem:[#allocation63_spill] sm:$0xff] %v9817_v53  ;;  %8422 = vmatmul.msk.f32.gmra.mxu3 %vm524_vm0, %v513_v29 }
 0x154   : > { %v995_v25 = vpop.f32.mrf.mxu0 }
 0x155   : > { %v996_v54 = vadd.f32 %v9424_v11, %v995_v25 }
 0x156   : > { %v9824_v30 = vpop.f32.mrf.mxu1  ;;  %2845 = vperm.xlu2 %8688, %v507_v23   ;;  %2841 = vperm.xlu1 %8687, %v506_v39   ;;  %v510_v23 = vld [vmem:[%s9181_s12 + $0x3d0] sm:$0xff]  ;;  %v509_v39 = vld [vmem:[%s9181_s12 + $0x3c8] sm:$0xff] }
 0x157   : > { %v1333_v33 = vmax.f32 %v996_v54, 0.0  ;;  %2837 = vperm.xlu0 %8686, %v505_v52   ;;  %8336 = vmatmul.msk.f32.gmra.mxu0 %vm524_vm0, %v9372_v61  ;;  %v508_v54 = vld [vmem:[%s9181_s12 + $0x3c0] sm:$0xff] }
 0x158   : > { %v9829_v49 = vpop.permute.xlu2 %2713  ;;  %v9831_v53 = vpop.permute.xlu1 %2673 }
 0x159   : > { %15063 = vst [vmem:[#allocation64_spill] sm:$0xff] %v9829_v49  ;;  %v9836_v25 = vpop.permute.xlu0 %2669  ;;  %8448 = vmatmul.msk.f32.gmra.mxu1 %vm1454_vm1, %v1333_v33 }
 0x15a   : > { %15064 = vst [vmem:[#allocation65_spill] sm:$0xff] %v9831_v53  ;;  %8393 = vmatmul.msk.f32.gmra.mxu2 %vm524_vm0, %v9684_v56  ;;  %v515_v56 = vld [vmem:[%s9181_s12 + $0x3f8] sm:$0xff] }
 0x15b   : > { %15065 = vst [vmem:[#allocation66_spill] sm:$0xff] %v9836_v25  ;;  %8423 = vmatmul.msk.f32.gmra.mxu3 %vm524_vm0, %v514_v34 }
 0x15c   : > { %v998_v52 = vpop.f32.mrf.mxu0 }
 0x15d   : > { %v999_v61 = vadd.f32 %v9424_v11, %v998_v52 }
 0x15e   : > { %v9843_v31 = vpop.f32.mrf.mxu1  ;;  %2857 = vperm.xlu2 %8688, %v510_v23   ;;  %2853 = vperm.xlu1 %8687, %v509_v39  }
 0x15f   : > { %v1334_v49 = vmax.f32 %v999_v61, 0.0  ;;  %2849 = vperm.xlu0 %8686, %v508_v54   ;;  %8337 = vmatmul.msk.f32.gmra.mxu0 %vm524_vm0, %v9369_v60 }
 0x160   : > { %v9848_v53 = vpop.permute.xlu2 %2725  ;;  %v9850_v33 = vpop.permute.xlu1 %2685 }
 0x161   : > { %15066 = vst [vmem:[#allocation67_spill] sm:$0xff] %v9848_v53  ;;  %v9855_v52 = vpop.permute.xlu0 %2681  ;;  %8449 = vmatmul.msk.f32.gmra.mxu1 %vm1454_vm1, %v1334_v49 }
 0x162   : > { %15067 = vst [vmem:[#allocation68_spill] sm:$0xff] %v9850_v33  ;;  %8394 = vmatmul.msk.f32.gmra.mxu2 %vm524_vm0, %v9681_v35  ;;  %v8704_v35 = vld [vmem:[%s9181_s12] sm:$0xff]  ;;  %v10094_v33 = vld [vmem:[%s9181_s12 + $0x1b8] sm:$0xff] }
 0x163   : > { %15068 = vst [vmem:[#allocation69_spill] sm:$0xff] %v9855_v52  ;;  %8424 = vmatmul.msk.f32.gmra.mxu3 %vm524_vm0, %v515_v56 }
 0x164   : > { %v1001_v23 = vpop.f32.mrf.mxu0 }
 0x165   : > { %v1002_v39 = vadd.f32 %v9424_v11, %v1001_v23 }
 0x166   : > { %v9859_v54 = vpop.f32.mrf.mxu1  ;;  %2869 = vperm.xlu2 %8688, %v513_v29   ;;  %2865 = vperm.xlu1 %8687, %v512_v27  }
 0x167   : > { %v1335_v60 = vmax.f32 %v1002_v39, 0.0  ;;  %2861 = vperm.xlu0 %8686, %v9788_v58   ;;  %8338 = vmatmul.msk.f32.gmra.mxu0 %vm524_vm0, %v9366_v59  ;;  %v9049_v59 = vmov 30  }
 0x168   : > { %v9865_v61 = vpop.permute.xlu2 %2737  ;;  %v9867_v53 = vpop.permute.xlu1 %2697 }
 0x169   : > { %15069 = vst [vmem:[#allocation70_spill] sm:$0xff] %v9865_v61  ;;  %v9872_v49 = vpop.permute.xlu0 %2693  ;;  %8450 = vmatmul.msk.f32.gmra.mxu1 %vm1454_vm1, %v1335_v60  ;;  %v8707_v61 = vld [vmem:[%s9181_s12 + $0x8] sm:$0xff] }
 0x16a   : > { %15070 = vst [vmem:[#allocation71_spill] sm:$0xff] %v9867_v53  ;;  %8395 = vmatmul.msk.f32.gmra.mxu2 %vm524_vm0, %v9678_v32  ;;  %v8706_v32 = vld [vmem:[%s9181_s12 + $0x18] sm:$0xff] }
 0x16b   : > { %15071 = vst [vmem:[#allocation72_spill] sm:$0xff] %v9872_v49 }
 0x16c   : > { %v1004_v27 = vpop.f32.mrf.mxu0 }
 0x16d   : > { %v1005_v58 = vadd.f32 %v9424_v11, %v1004_v27 }
 0x16e   : > { %v9876_v29 = vpop.f32.mrf.mxu1  ;;  %8689 = vset.pattern.permute.xlu2 %v9049_v59  ;;  %2877 = vperm.xlu1 %8687, %v515_v56  }
 0x16f   : > { %v1336_v23 = vmax.f32 %v1005_v58, 0.0  ;;  %2873 = vperm.xlu0 %8686, %v514_v34   ;;  %8339 = vmatmul.msk.f32.gmra.mxu0 %vm524_vm0, %v9388_v1 }
 0x170   : > { %3905 = vperm.xlu2 %8689, %v8704_v35   ;;  %v9881_v39 = vpop.permute.xlu2 %2749  ;;  %v9883_v60 = vpop.permute.xlu1 %2709  ;;  %v8705_v35 = vld [vmem:[%s9181_s12 + $0x10] sm:$0xff] }
 0x171   : > { %15072 = vst [vmem:[#allocation73_spill] sm:$0xff] %v9881_v39  ;;  %v9887_v27 = vpop.permute.xlu0 %2705  ;;  %8451 = vmatmul.msk.f32.gmra.mxu1 %vm1454_vm1, %v1336_v23 }
 0x172   : > { %15073 = vst [vmem:[#allocation74_spill] sm:$0xff] %v9883_v60  ;;  %8396 = vmatmul.msk.f32.gmra.mxu2 %vm524_vm0, %v9709_v28  ;;  %v8710_v28 = vld [vmem:[%s9181_s12 + $0x30] sm:$0xff] }
 0x173   : > { %15074 = vst [vmem:[#allocation75_spill] sm:$0xff] %v9887_v27  ;;  %v10076_v27 = vld [vmem:[%s9181_s12 + $0x1b0] sm:$0xff] }
 0x174   : > { %v1007_v34 = vpop.f32.mrf.mxu0 }
 0x175   : > { %v1008_v56 = vadd.f32 %v9424_v11, %v1007_v34 }
 0x176   : > { %v9891_v58 = vpop.f32.mrf.mxu1  ;;  %8691 = vset.pattern.permute.xlu1 %v9049_v59 }
 0x177   : > { %v1337_v1 = vmax.f32 %v1008_v56, 0.0  ;;  %8690 = vset.pattern.permute.xlu0 %v9049_v59  ;;  %8340 = vmatmul.msk.f32.gmra.mxu0 %vm524_vm0, %v9385_v0 }
 0x178   : > { %3913 = vperm.xlu1 %8691, %v8705_v35   ;;  %3917 = vperm.xlu2 %8689, %v8706_v32   ;;  %v9897_v39 = vpop.permute.xlu2 %2761  ;;  %v9899_v23 = vpop.permute.xlu1 %2721  ;;  %v8708_v32 = vld [vmem:[%s9181_s12 + $0x20] sm:$0xff] }
 0x179   : > { %15075 = vst [vmem:[#allocation76_spill] sm:$0xff] %v9897_v39  ;;  %3909 = vperm.xlu0 %8690, %v8707_v61   ;;  %v9902_v34 = vpop.permute.xlu0 %2717  ;;  %8452 = vmatmul.msk.f32.gmra.mxu1 %vm1454_vm1, %v1337_v1  ;;  %v8709_v61 = vld [vmem:[%s9181_s12 + $0x28] sm:$0xff] }
 0x17a   : > { %15076 = vst [vmem:[#allocation77_spill] sm:$0xff] %v9899_v23  ;;  %8397 = vmatmul.msk.f32.gmra.mxu2 %vm524_vm0, %v9706_v36  ;;  %v8713_v36 = vld [vmem:[%s9181_s12 + $0x48] sm:$0xff] }
 0x17b   : > { %15077 = vst [vmem:[#allocation78_spill] sm:$0xff] %v9902_v34  ;;  %v10058_v23 = vld [vmem:[%s9181_s12 + $0x1a8] sm:$0xff] }
 0x17c   : > { %v1010_v0 = vpop.f32.mrf.mxu0 }
 0x17d   : > { %v1011_v59 = vadd.f32 %v9424_v11, %v1010_v0 }
 0x17e   : > { %v9908_v56 = vpop.f32.mrf.mxu1 }
 0x17f   : > { %v1338_v35 = vmax.f32 %v1011_v59, 0.0  ;;  %8341 = vmatmul.msk.f32.gmra.mxu0 %vm524_vm0, %v9382_v63 }
 0x180   : > { %3921 = vperm.xlu1 %8691, %v8708_v32   ;;  %3925 = vperm.xlu2 %8689, %v8709_v61   ;;  %v9914_v39 = vpop.permute.xlu2 %2773  ;;  %v9916_v1 = vpop.permute.xlu1 %2733 }
 0x181   : > { %15078 = vst [vmem:[#allocation79_spill] sm:$0xff] %v9914_v39  ;;  %3929 = vperm.xlu0 %8690, %v8710_v28   ;;  %v9919_v0 = vpop.permute.xlu0 %2729  ;;  %8453 = vmatmul.msk.f32.gmra.mxu1 %vm1454_vm1, %v1338_v35  ;;  %v8711_v39 = vld [vmem:[%s9181_s12 + $0x38] sm:$0xff]  ;;  %v8712_v28 = vld [vmem:[%s9181_s12 + $0x40] sm:$0xff] }
 0x182   : > { %15079 = vst [vmem:[#allocation80_spill] sm:$0xff] %v9916_v1  ;;  %8398 = vmatmul.msk.f32.gmra.mxu2 %vm524_vm0, %v9703_v41  ;;  %v8716_v41 = vld [vmem:[%s9181_s12 + $0x60] sm:$0xff] }
 0x183   : > { %15080 = vst [vmem:[#allocation81_spill] sm:$0xff] %v9919_v0  ;;  %v10040_v0 = vld [vmem:[%s9181_s12 + $0x1a0] sm:$0xff] }
 0x184   : > { %v1013_v63 = vpop.f32.mrf.mxu0 }
 0x185   : > { %v1014_v59 = vadd.f32 %v9424_v11, %v1013_v63 }
 0x186   : > { %v9925_v32 = vpop.f32.mrf.mxu1 }
 0x187   : > { %v1339_v61 = vmax.f32 %v1014_v59, 0.0  ;;  %8342 = vmatmul.msk.f32.gmra.mxu0 %vm524_vm0, %v9408_v7 }
 0x188   : > { %3933 = vperm.xlu1 %8691, %v8711_v39   ;;  %3937 = vperm.xlu2 %8689, %v8712_v28   ;;  %v9931_v1 = vpop.permute.xlu2 %2785  ;;  %v9933_v35 = vpop.permute.xlu1 %2745 }
 0x189   : > { %15081 = vst [vmem:[#allocation82_spill] sm:$0xff] %v9931_v1  ;;  %3941 = vperm.xlu0 %8690, %v8713_v36   ;;  %v9936_v63 = vpop.permute.xlu0 %2741  ;;  %8454 = vmatmul.msk.f32.gmra.mxu1 %vm1454_vm1, %v1339_v61  ;;  %v8714_v1 = vld [vmem:[%s9181_s12 + $0x50] sm:$0xff]  ;;  %v8715_v36 = vld [vmem:[%s9181_s12 + $0x58] sm:$0xff] }
 0x18a   : > { %15082 = vst [vmem:[#allocation83_spill] sm:$0xff] %v9933_v35 }
 0x18b   : > { %15083 = vst [vmem:[#allocation84_spill] sm:$0xff] %v9936_v63 }
 0x18c   : > { %v1016_v7 = vpop.f32.mrf.mxu0 }
 0x18d   : > { %v1017_v39 = vadd.f32 %v9424_v11, %v1016_v7 }
 0x18e   : > { %v9942_v59 = vpop.f32.mrf.mxu1 }
 0x18f   : > { %v1340_v28 = vmax.f32 %v1017_v39, 0.0  ;;  %8343 = vmatmul.msk.f32.gmra.mxu0 %vm524_vm0, %v9405_v6 }
 0x190   : > { %3945 = vperm.xlu1 %8691, %v8714_v1   ;;  %3949 = vperm.xlu2 %8689, %v8715_v36   ;;  %v9948_v35 = vpop.permute.xlu2 %2797  ;;  %v9950_v61 = vpop.permute.xlu1 %2757  ;;  %v8717_v36 = vld [vmem:[%s9181_s12 + $0x68] sm:$0xff] }
 0x191   : > { %15084 = vst [vmem:[#allocation85_spill] sm:$0xff] %v9948_v35  ;;  %3953 = vperm.xlu0 %8690, %v8716_v41   ;;  %v9953_v7 = vpop.permute.xlu0 %2753  ;;  %8455 = vmatmul.msk.f32.gmra.mxu1 %vm1454_vm1, %v1340_v28  ;;  %v8718_v35 = vld [vmem:[%s9181_s12 + $0x70] sm:$0xff]  ;;  %v8719_v28 = vld [vmem:[%s9181_s12 + $0x78] sm:$0xff] }
 0x192   : > { %15085 = vst [vmem:[#allocation86_spill] sm:$0xff] %v9950_v61 }
 0x193   : > { %15086 = vst [vmem:[#allocation87_spill] sm:$0xff] %v9953_v7 }
 0x194   : > { %v1019_v39 = vpop.f32.mrf.mxu0 }
 0x195   : > { %v1020_v6 = vadd.f32 %v9424_v11, %v1019_v39 }
 0x196   : > { %v9957_v63 = vpop.f32.mrf.mxu1 }
 0x197   : > { %v1341_v1 = vmax.f32 %v1020_v6, 0.0  ;;  %8344 = vmatmul.msk.f32.gmra.mxu0 %vm524_vm0, %v9402_v5 }
 0x198   : > { %3957 = vperm.xlu1 %8691, %v8717_v36   ;;  %3961 = vperm.xlu2 %8689, %v8718_v35   ;;  %v9963_v41 = vpop.permute.xlu2 %2809  ;;  %v9965_v61 = vpop.permute.xlu1 %2769  ;;  %v8720_v35 = vld [vmem:[%s9181_s12 + $0x80] sm:$0xff] }
 0x199   : > { %15087 = vst [vmem:[#allocation88_spill] sm:$0xff] %v9963_v41  ;;  %3965 = vperm.xlu0 %8690, %v8719_v28   ;;  %v9968_v39 = vpop.permute.xlu0 %2765  ;;  %8456 = vmatmul.msk.f32.gmra.mxu1 %vm1454_vm1, %v1341_v1  ;;  %v8721_v41 = vld [vmem:[%s9181_s12 + $0x88] sm:$0xff]  ;;  %v8722_v1 = vld [vmem:[%s9181_s12 + $0x90] sm:$0xff] }
 0x19a   : > { %15088 = vst [vmem:[#allocation89_spill] sm:$0xff] %v9965_v61 }
 0x19b   : > { %15089 = vst [vmem:[#allocation90_spill] sm:$0xff] %v9968_v39 }
 0x19c   : > { %v1022_v6 = vpop.f32.mrf.mxu0 }
 0x19d   : > { %v1023_v5 = vadd.f32 %v9424_v11, %v1022_v6 }
 0x19e   : > { %v9972_v7 = vpop.f32.mrf.mxu1 }
 0x19f   : > { %v1342_v36 = vmax.f32 %v1023_v5, 0.0  ;;  %8345 = vmatmul.msk.f32.gmra.mxu0 %vm524_vm0, %v9433_v15 }
 0x1a0   : > { %3969 = vperm.xlu1 %8691, %v8720_v35   ;;  %3973 = vperm.xlu2 %8689, %v8721_v41   ;;  %v9978_v28 = vpop.permute.xlu2 %2821  ;;  %v9980_v61 = vpop.permute.xlu1 %2781  ;;  %v8723_v41 = vld [vmem:[%s9181_s12 + $0x98] sm:$0xff] }
 0x1a1   : > { %15090 = vst [vmem:[#allocation91_spill] sm:$0xff] %v9978_v28  ;;  %3977 = vperm.xlu0 %8690, %v8722_v1   ;;  %v9983_v6 = vpop.permute.xlu0 %2777  ;;  %8457 = vmatmul.msk.f32.gmra.mxu1 %vm1454_vm1, %v1342_v36  ;;  %v8724_v28 = vld [vmem:[%s9181_s12 + $0xa0] sm:$0xff]  ;;  %v8725_v36 = vld [vmem:[%s9181_s12 + $0xa8] sm:$0xff] }
 0x1a2   : > { %15091 = vst [vmem:[#allocation92_spill] sm:$0xff] %v9980_v61 }
 0x1a3   : > { %15092 = vst [vmem:[#allocation93_spill] sm:$0xff] %v9983_v6 }
 0x1a4   : > { %v1025_v5 = vpop.f32.mrf.mxu0 }
 0x1a5   : > { %v1026_v15 = vadd.f32 %v9424_v11, %v1025_v5 }
 0x1a6   : > { %v9987_v39 = vpop.f32.mrf.mxu1 }
 0x1a7   : > { %v1343_v35 = vmax.f32 %v1026_v15, 0.0  ;;  %8346 = vmatmul.msk.f32.gmra.mxu0 %vm524_vm0, %v9430_v13 }
 0x1a8   : > { %3981 = vperm.xlu1 %8691, %v8723_v41   ;;  %3985 = vperm.xlu2 %8689, %v8724_v28   ;;  %v9993_v1 = vpop.permute.xlu2 %2833  ;;  %v9995_v61 = vpop.permute.xlu1 %2793  ;;  %v8726_v28 = vld [vmem:[%s9181_s12 + $0xb0] sm:$0xff] }
 0x1a9   : > { %15093 = vst [vmem:[#allocation94_spill] sm:$0xff] %v9993_v1  ;;  %3989 = vperm.xlu0 %8690, %v8725_v36   ;;  %v9998_v5 = vpop.permute.xlu0 %2789  ;;  %8458 = vmatmul.msk.f32.gmra.mxu1 %vm1454_vm1, %v1343_v35  ;;  %v8727_v1 = vld [vmem:[%s9181_s12 + $0xb8] sm:$0xff]  ;;  %v8728_v35 = vld [vmem:[%s9181_s12 + $0xc0] sm:$0xff] }
 0x1aa   : > { %15094 = vst [vmem:[#allocation95_spill] sm:$0xff] %v9995_v61 }
 0x1ab   : > { %15095 = vst [vmem:[#allocation96_spill] sm:$0xff] %v9998_v5 }
 0x1ac   : > { %v1028_v15 = vpop.f32.mrf.mxu0 }
 0x1ad   : > { %v1029_v13 = vadd.f32 %v9424_v11, %v1028_v15 }
 0x1ae   : > { %v10002_v6 = vpop.f32.mrf.mxu1 }
 0x1af   : > { %v1344_v41 = vmax.f32 %v1029_v13, 0.0  ;;  %8347 = vmatmul.msk.f32.gmra.mxu0 %vm524_vm0, %v9427_v12  ;;  %v10019_v12 = vld [vmem:[%s14803_s2] ss:$0 sm:$0xff] }
 0x1b0   : > { %3993 = vperm.xlu1 %8691, %v8726_v28   ;;  %3997 = vperm.xlu2 %8689, %v8727_v1   ;;  %v10008_v36 = vpop.permute.xlu2 %2845  ;;  %v10010_v61 = vpop.permute.xlu1 %2805 }
 0x1b1   : > { %15096 = vst [vmem:[#allocation97_spill] sm:$0xff] %v10008_v36  ;;  %4001 = vperm.xlu0 %8690, %v8728_v35   ;;  %v10013_v11 = vpop.permute.xlu0 %2801  ;;  %8459 = vmatmul.msk.f32.gmra.mxu1 %vm1454_vm1, %v1344_v41  ;;  %v8730_v35 = vld [vmem:[%s9181_s12 + $0xc8] sm:$0xff]  ;;  %v8731_v36 = vld [vmem:[%s9181_s12 + $0xd0] sm:$0xff] }
 0x1b2   : > { %15097 = vst [vmem:[#allocation98_spill] sm:$0xff] %v10010_v61 }
 0x1b3   : > { %15098 = vst [vmem:[#allocation99_spill] sm:$0xff] %v10013_v11  ;;  %v8732_v11 = vld [vmem:[%s9181_s12 + $0xd8] sm:$0xff] }
 0x1b4   : > { %v1031_v15 = vpop.f32.mrf.mxu0 }
 0x1b5   : > { %v1032_v13 = vadd.f32 %v10019_v12, %v1031_v15 }
 0x1b6   : > { %v10022_v1 = vpop.f32.mrf.mxu1 }
 0x1b7   : > { %v1345_v28 = vmax.f32 %v1032_v13, 0.0  ;;  %8348 = vmatmul.msk.f32.gmra.mxu0 %vm524_vm0, %v9451_v38 }
 0x1b8   : > { %4005 = vperm.xlu1 %8691, %v8730_v35   ;;  %4009 = vperm.xlu2 %8689, %v8731_v36   ;;  %v10028_v41 = vpop.permute.xlu2 %2857  ;;  %v10030_v61 = vpop.permute.xlu1 %2817  ;;  %v8734_v36 = vld [vmem:[%s9181_s12 + $0xe0] sm:$0xff] }
 0x1b9   : > { %15099 = vst [vmem:[#allocation100_spill] sm:$0xff] %v10028_v41  ;;  %4013 = vperm.xlu0 %8690, %v8732_v11   ;;  %v10033_v15 = vpop.permute.xlu0 %2813  ;;  %8460 = vmatmul.msk.f32.gmra.mxu1 %vm1454_vm1, %v1345_v28  ;;  %v8735_v11 = vld [vmem:[%s9181_s12 + $0xe8] sm:$0xff] }
 0x1ba   : > { %15100 = vst [vmem:[#allocation101_spill] sm:$0xff] %v10030_v61 }
 0x1bb   : > { %15101 = vst [vmem:[#allocation102_spill] sm:$0xff] %v10033_v15 }
 0x1bc   : > { %v1034_v13 = vpop.f32.mrf.mxu0 }
 0x1bd   : > { %v1035_v38 = vadd.f32 %v10019_v12, %v1034_v13  ;;  %v8736_v13 = vld [vmem:[%s9181_s12 + $0xf0] sm:$0xff] }
 0x1be   : > { %v10037_v5 = vpop.f32.mrf.mxu1 }
 0x1bf   : > { %v1346_v35 = vmax.f32 %v1035_v38, 0.0  ;;  %8349 = vmatmul.msk.f32.gmra.mxu0 %vm524_vm0, %v10040_v0 }
 0x1c0   : > { %4017 = vperm.xlu1 %8691, %v8734_v36   ;;  %4021 = vperm.xlu2 %8689, %v8735_v11   ;;  %v10046_v41 = vpop.permute.xlu2 %2869  ;;  %v10048_v28 = vpop.permute.xlu1 %2829  ;;  %v8738_v11 = vld [vmem:[%s9181_s12 + $0xf8] sm:$0xff] }
 0x1c1   : > { %15102 = vst [vmem:[#allocation103_spill] sm:$0xff] %v10046_v41  ;;  %4025 = vperm.xlu0 %8690, %v8736_v13   ;;  %v10051_v38 = vpop.permute.xlu0 %2825  ;;  %8461 = vmatmul.msk.f32.gmra.mxu1 %vm1454_vm1, %v1346_v35  ;;  %v8739_v13 = vld [vmem:[%s9181_s12 + $0x100] sm:$0xff]  ;;  %v8740_v35 = vld [vmem:[%s9181_s12 + $0x108] sm:$0xff] }
 0x1c2   : > { %15103 = vst [vmem:[#allocation104_spill] sm:$0xff] %v10048_v28 }
 0x1c3   : > { %15104 = vst [vmem:[#allocation105_spill] sm:$0xff] %v10051_v38 }
 0x1c4   : > { %v1037_v15 = vpop.f32.mrf.mxu0 }
 0x1c5   : > { %v1038_v61 = vadd.f32 %v10019_v12, %v1037_v15 }
 0x1c6   : > { %v10055_v34 = vpop.f32.mrf.mxu1 }
 0x1c7   : > { %v1347_v36 = vmax.f32 %v1038_v61, 0.0  ;;  %8350 = vmatmul.msk.f32.gmra.mxu0 %vm524_vm0, %v10058_v23 }
 0x1c8   : > { %4029 = vperm.xlu1 %8691, %v8738_v11   ;;  %4033 = vperm.xlu2 %8689, %v8739_v13   ;;  %v10064_v41 = vpop.permute.xlu1 %2841  ;;  %v8742_v13 = vld [vmem:[%s9181_s12 + $0x110] sm:$0xff] }
 0x1c9   : > { %15105 = vst [vmem:[#allocation106_spill] sm:$0xff] %v10064_v41  ;;  %4037 = vperm.xlu0 %8690, %v8740_v35   ;;  %v10067_v15 = vpop.permute.xlu0 %2837  ;;  %8462 = vmatmul.msk.f32.gmra.mxu1 %vm1454_vm1, %v1347_v36  ;;  %v8743_v35 = vld [vmem:[%s9181_s12 + $0x118] sm:$0xff]  ;;  %v8744_v41 = vld [vmem:[%s9181_s12 + $0x120] sm:$0xff] }
 0x1ca   : > { %15106 = vst [vmem:[#allocation107_spill] sm:$0xff] %v10067_v15  ;;  %v10070_v61 = vpop.permute.xlu2 %3905 }
 0x1cc   : > { %v1040_v28 = vpop.f32.mrf.mxu0 }
 0x1cd   : > { %v1041_v38 = vadd.f32 %v10019_v12, %v1040_v28 }
 0x1ce   : > { %v10073_v60 = vpop.f32.mrf.mxu1 }
 0x1cf   : > { %15107 = vst [vmem:[#allocation108_spill] sm:$0xff] %v10073_v60  ;;  %v1348_v11 = vmax.f32 %v1041_v38, 0.0  ;;  %8351 = vmatmul.msk.f32.gmra.mxu0 %vm524_vm0, %v10076_v27 }
 0x1d0   : > { %4041 = vperm.xlu1 %8691, %v8742_v13   ;;  %4045 = vperm.xlu2 %8689, %v8743_v35   ;;  %v10082_v36 = vpop.permute.xlu1 %2853  ;;  %v8746_v35 = vld [vmem:[%s9181_s12 + $0x128] sm:$0xff] }
 0x1d1   : > { %15108 = vst [vmem:[#allocation109_spill] sm:$0xff] %v10082_v36  ;;  %4049 = vperm.xlu0 %8690, %v8744_v41   ;;  %v10085_v28 = vpop.permute.xlu0 %2849  ;;  %8463 = vmatmul.msk.f32.gmra.mxu1 %vm1454_vm1, %v1348_v11  ;;  %v8747_v41 = vld [vmem:[%s9181_s12 + $0x130] sm:$0xff]  ;;  %v8748_v36 = vld [vmem:[%s9181_s12 + $0x138] sm:$0xff] }
 0x1d2   : > { %15109 = vst [vmem:[#allocation110_spill] sm:$0xff] %v10085_v28  ;;  %v10088_v38 = vpop.permute.xlu2 %3917 }
 0x1d3   : > { %15110 = vst [vmem:[#allocation111_spill] sm:$0xff] %v10088_v38 }
 0x1d4   : > { %v1043_v15 = vpop.f32.mrf.mxu0 }
 0x1d5   : > { %v1044_v53 = vadd.f32 %v10019_v12, %v1043_v15 }
 0x1d6   : > { %v10091_v49 = vpop.f32.mrf.mxu1 }
 0x1d7   : > { %15111 = vst [vmem:[#allocation112_spill] sm:$0xff] %v10091_v49  ;;  %v1349_v13 = vmax.f32 %v1044_v53, 0.0  ;;  %8352 = vmatmul.msk.f32.gmra.mxu0 %vm524_vm0, %v10094_v33  ;;  %v10130_v49 = vld [vmem:[%s9181_s12 + $0x1c8] sm:$0xff] }
 0x1d8   : > { %4053 = vperm.xlu1 %8691, %v8746_v35   ;;  %4057 = vperm.xlu2 %8689, %v8747_v41   ;;  %v10100_v11 = vpop.permute.xlu1 %2865  ;;  %v8750_v41 = vld [vmem:[%s9181_s12 + $0x140] sm:$0xff] }
 0x1d9   : > { %15112 = vst [vmem:[#allocation113_spill] sm:$0xff] %v10100_v11  ;;  %4061 = vperm.xlu0 %8690, %v8748_v36   ;;  %v10103_v15 = vpop.permute.xlu0 %2861  ;;  %8464 = vmatmul.msk.f32.gmra.mxu1 %vm1454_vm1, %v1349_v13  ;;  %v8751_v36 = vld [vmem:[%s9181_s12 + $0x148] sm:$0xff]  ;;  %v8752_v11 = vld [vmem:[%s9181_s12 + $0x150] sm:$0xff] }
 0x1da   : > { %15113 = vst [vmem:[#allocation114_spill] sm:$0xff] %v10103_v15  ;;  %v10106_v53 = vpop.permute.xlu2 %3925 }
 0x1db   : > { %15114 = vst [vmem:[#allocation115_spill] sm:$0xff] %v10106_v53 }
 0x1dc   : > { %v1046_v28 = vpop.f32.mrf.mxu0 }
 0x1dd   : > { %v1047_v52 = vadd.f32 %v10019_v12, %v1046_v28 }
 0x1de   : > { %v10109_v25 = vpop.f32.mrf.mxu1 }
 0x1df   : > { %v1350_v35 = vmax.f32 %v1047_v52, 0.0  ;;  %8353 = vmatmul.msk.f32.gmra.mxu0 %vm524_vm0, %v10112_v14 }
 0x1e0   : > { %4065 = vperm.xlu1 %8691, %v8750_v41   ;;  %4069 = vperm.xlu2 %8689, %v8751_v36   ;;  %v10118_v13 = vpop.permute.xlu1 %2877  ;;  %v8754_v36 = vld [vmem:[%s9181_s12 + $0x158] sm:$0xff] }
 0x1e1   : > { %15115 = vst [vmem:[#allocation116_spill] sm:$0xff] %v10118_v13  ;;  %4073 = vperm.xlu0 %8690, %v8752_v11   ;;  %v10121_v28 = vpop.permute.xlu0 %2873  ;;  %8465 = vmatmul.msk.f32.gmra.mxu1 %vm1454_vm1, %v1350_v35  ;;  %v8755_v11 = vld [vmem:[%s9181_s12 + $0x160] sm:$0xff]  ;;  %v8756_v35 = vld [vmem:[%s9181_s12 + $0x168] sm:$0xff] }
 0x1e2   : > { %15116 = vst [vmem:[#allocation117_spill] sm:$0xff] %v10121_v28  ;;  %v10124_v52 = vpop.permute.xlu2 %3937 }
 0x1e3   : > { %15117 = vst [vmem:[#allocation118_spill] sm:$0xff] %v10124_v52 }
 0x1e4   : > { %v1049_v15 = vpop.f32.mrf.mxu0 }
 0x1e5   : > { %v1050_v24 = vadd.f32 %v10019_v12, %v1049_v15 }
 0x1e6   : > { %v10127_v40 = vpop.f32.mrf.mxu1 }
 0x1e7   : > { %15118 = vst [vmem:[#allocation119_spill] sm:$0xff] %v10127_v40  ;;  %v1351_v41 = vmax.f32 %v1050_v24, 0.0  ;;  %8354 = vmatmul.msk.f32.gmra.mxu0 %vm524_vm0, %v10130_v49  ;;  %v8757_v40 = vld [vmem:[%s9181_s12 + $0x1d0] sm:$0xff] }
 0x1e8   : > { %4077 = vperm.xlu1 %8691, %v8754_v36   ;;  %4081 = vperm.xlu2 %8689, %v8755_v11   ;;  %v8758_v11 = vld [vmem:[%s9181_s12 + $0x170] sm:$0xff] }
 0x1e9   : > { %4085 = vperm.xlu0 %8690, %v8756_v35   ;;  %8466 = vmatmul.msk.f32.gmra.mxu1 %vm1454_vm1, %v1351_v41  ;;  %v8759_v41 = vld [vmem:[%s9181_s12 + $0x178] sm:$0xff]  ;;  %v8760_v35 = vld [vmem:[%s9181_s12 + $0x180] sm:$0xff] }
 0x1ea   : > { %v10138_v15 = vpop.permute.xlu1 %3913  ;;  %v10140_v24 = vpop.permute.xlu2 %3949 }
 0x1eb   : > { %15119 = vst [vmem:[#allocation120_spill] sm:$0xff] %v10138_v15  ;;  %v10142_v13 = vpop.permute.xlu0 %3909  ;;  %v8761_v15 = vld [vmem:[%s9181_s12 + $0x1d8] sm:$0xff] }
 0x1ec   : > { %15120 = vst [vmem:[#allocation121_spill] sm:$0xff] %v10140_v24  ;;  %v1052_v28 = vpop.f32.mrf.mxu0 }
 0x1ed   : > { %15121 = vst [vmem:[#allocation122_spill] sm:$0xff] %v10142_v13  ;;  %v1053_v52 = vadd.f32 %v10019_v12, %v1052_v28 }
 0x1ee   : > { %v10145_v53 = vpop.f32.mrf.mxu1 }
 0x1ef   : > { %15122 = vst [vmem:[#allocation123_spill] sm:$0xff] %v10145_v53  ;;  %v1352_v36 = vmax.f32 %v1053_v52, 0.0  ;;  %8355 = vmatmul.msk.f32.gmra.mxu0 %vm524_vm0, %v8757_v40 }
 0x1f0   : > { %4089 = vperm.xlu1 %8691, %v8758_v11   ;;  %4093 = vperm.xlu2 %8689, %v8759_v41   ;;  %v8762_v11 = vld [vmem:[%s9181_s12 + $0x188] sm:$0xff]  ;;  %v8763_v41 = vld [vmem:[%s9181_s12 + $0x190] sm:$0xff] }
 0x1f1   : > { %4097 = vperm.xlu0 %8690, %v8760_v35   ;;  %8467 = vmatmul.msk.f32.gmra.mxu1 %vm1454_vm1, %v1352_v36  ;;  %v8764_v35 = vld [vmem:[%s9181_s12 + $0x198] sm:$0xff] }
 0x1f2   : > { %v10153_v13 = vpop.permute.xlu1 %3921  ;;  %v10155_v28 = vpop.permute.xlu2 %3961 }
 0x1f3   : > { %15123 = vst [vmem:[#allocation124_spill] sm:$0xff] %v10153_v13  ;;  %v10157_v53 = vpop.permute.xlu0 %3929 }
 0x1f4   : > { %15124 = vst [vmem:[#allocation125_spill] sm:$0xff] %v10155_v28  ;;  %v1055_v52 = vpop.f32.mrf.mxu0 }
 0x1f5   : > { %15125 = vst [vmem:[#allocation126_spill] sm:$0xff] %v10157_v53  ;;  %v1056_v36 = vadd.f32 %v10019_v12, %v1055_v52 }
 0x1f6   : > { %v10159_v24 = vpop.f32.mrf.mxu1 }
 0x1f7   : > { %15126 = vst [vmem:[#allocation127_spill] sm:$0xff] %v10159_v24  ;;  %8356 = vmatmul.msk.f32.gmra.mxu0 %vm524_vm0, %v8761_v15  ;;  %v1353_v38 = vmax.f32 %v1056_v36, 0.0 }
 0x1f8   : > { %4101 = vperm.xlu1 %8691, %v8762_v11   ;;  %4105 = vperm.xlu2 %8689, %v8763_v41   ;;  %v8765_v11 = vld [vmem:[%s9181_s12 + $0x1e0] sm:$0xff] }
 0x1f9   : > { %4109 = vperm.xlu0 %8690, %v8764_v35   ;;  %8468 = vmatmul.msk.f32.gmra.mxu1 %vm1454_vm1, %v1353_v38 }
 0x1fa   : > { %v10167_v13 = vpop.permute.xlu1 %3933  ;;  %v10169_v28 = vpop.permute.xlu2 %3973 }
 0x1fb   : > { %15127 = vst [vmem:[#allocation128_spill] sm:$0xff] %v10167_v13  ;;  %v10171_v53 = vpop.permute.xlu0 %3941 }
 0x1fc   : > { %15128 = vst [vmem:[#allocation129_spill] sm:$0xff] %v10169_v28  ;;  %v1058_v24 = vpop.f32.mrf.mxu0 }
 0x1fd   : > { %15129 = vst [vmem:[#allocation130_spill] sm:$0xff] %v10171_v53  ;;  %v1059_v52 = vadd.f32 %v10019_v12, %v1058_v24 }
 0x1fe   : > { %v10174_v60 = vpop.f32.mrf.mxu1 }
 0x1ff   : > { %15130 = vst [vmem:[#allocation131_spill] sm:$0xff] %v10174_v60  ;;  %8357 = vmatmul.msk.f32.gmra.mxu0 %vm524_vm0, %v8765_v11  ;;  %v1354_v38 = vmax.f32 %v1059_v52, 0.0 }
 0x200   : > { %4113 = vperm.xlu1 %8691, %v10040_v0   ;;  %4117 = vperm.xlu2 %8689, %v10058_v23   ;;  %v8766_v0 = vld [vmem:[%s9181_s12 + $0x1e8] sm:$0xff] }
 0x201   : > { %4121 = vperm.xlu0 %8690, %v10076_v27   ;;  %8469 = vmatmul.msk.f32.gmra.mxu1 %vm1454_vm1, %v1354_v38 }
 0x202   : > { %v10182_v41 = vpop.permute.xlu1 %3945  ;;  %v10184_v35 = vpop.permute.xlu2 %3985 }
 0x203   : > { %15131 = vst [vmem:[#allocation132_spill] sm:$0xff] %v10182_v41  ;;  %v10186_v36 = vpop.permute.xlu0 %3953 }
 0x204   : > { %15132 = vst [vmem:[#allocation133_spill] sm:$0xff] %v10184_v35  ;;  %v1061_v28 = vpop.f32.mrf.mxu0 }
 0x205   : > { %15133 = vst [vmem:[#allocation134_spill] sm:$0xff] %v10186_v36  ;;  %v1062_v27 = vadd.f32 %v10019_v12, %v1061_v28 }
 0x206   : > { %v10189_v13 = vpop.f32.mrf.mxu1 }
 0x207   : > { %15134 = vst [vmem:[#allocation135_spill] sm:$0xff] %v10189_v13  ;;  %8358 = vmatmul.msk.f32.gmra.mxu0 %vm524_vm0, %v8766_v0  ;;  %v1355_v38 = vmax.f32 %v1062_v27, 0.0  ;;  %v10206_v13 = vld [vmem:[%s14805_s4] ss:$0 sm:$0xff] }
 0x208   : > { %4125 = vperm.xlu1 %8691, %v10094_v33   ;;  %4129 = vperm.xlu2 %8689, %v10112_v14   ;;  %v8767_v14 = vld [vmem:[%s9181_s12 + $0x1f0] sm:$0xff]  ;;  %v1863_v28 = vadd.f32 %v10206_v13, %v9732_v43  ;;  %v8768_v43 = vld [vmem:[%s9181_s12 + $0x1f8] sm:$0xff] }
 0x209   : > { %4133 = vperm.xlu0 %8690, %v10130_v49   ;;  %8470 = vmatmul.msk.f32.gmra.mxu1 %vm1454_vm1, %v1355_v38  ;;  %v1860_v49 = vadd.f32 %v10206_v13, %v9712_v26  ;;  %v1857_v38 = vadd.f32 %v10206_v13, %v9687_v21 }
 0x20a   : > { %v10197_v23 = vpop.permute.xlu1 %3957  ;;  %v10199_v24 = vpop.permute.xlu2 %3997  ;;  %v10227_v35 = vmax.f32 %v1863_v28, 0.0 }
 0x20b   : > { %15135 = vst [vmem:[#allocation136_spill] sm:$0xff] %v10197_v23  ;;  %v10201_v52 = vpop.permute.xlu0 %3965 }
 0x20c   : > { %15136 = vst [vmem:[#allocation137_spill] sm:$0xff] %v10199_v24  ;;  %v1064_v36 = vpop.f32.mrf.mxu0  ;;  %v10225_v24 = vmax.f32 %v1860_v49, 0.0  ;;  %v2882_v49 = vmul.f32 %v9397_v3, %v10227_v35  ;;  %v1869_v3 = vadd.f32 %v10206_v13, %v9766_v46 }
 0x20d   : > { %15137 = vst [vmem:[#allocation138_spill] sm:$0xff] %v10201_v52  ;;  %v1065_v26 = vadd.f32 %v10019_v12, %v1064_v36 }
 0x20e   : > { %v10209_v33 = vpop.f32.mrf.mxu1  ;;  %15142 = vst [vmem:[#allocation143_spill] sm:$0xff] %v10225_v24 }
 0x20f   : > { %15138 = vst [vmem:[#allocation139_spill] sm:$0xff] %v10209_v33  ;;  %8359 = vmatmul.msk.f32.gmra.mxu0 %vm524_vm0, %v8767_v14  ;;  %v1356_v21 = vmax.f32 %v1065_v26, 0.0 }
 0x210   : > { %4137 = vperm.xlu1 %8691, %v8757_v40   ;;  %4141 = vperm.xlu2 %8689, %v8761_v15   ;;  %15143 = vst [vmem:[#allocation144_spill] sm:$0xff] %v10227_v35  ;;  %v10232_v15 = vmax.f32 %v1857_v38, 0.0 }
 0x211   : > { %4145 = vperm.xlu0 %8690, %v8765_v11   ;;  %v2881_v11 = vmul.f32 %v9419_v10, %v10225_v24  ;;  %8471 = vmatmul.msk.f32.gmra.mxu1 %vm1454_vm1, %v1356_v21 }
 0x212   : > { %v10217_v27 = vpop.permute.xlu1 %3969  ;;  %v10219_v52 = vpop.permute.xlu2 %4009  ;;  %15145 = vst [vmem:[#allocation146_spill] sm:$0xff] %v10232_v15  ;;  %v2880_v38 = vmul.f32 %v9399_v4, %v10232_v15  ;;  %v3022_v4 = vsel %vm524_vm0, %v2882_v49, 0.0  ;;  %v8771_v49 = vld [vmem:[%s9181_s12 + $0x210] sm:$0xff] }
 0x213   : > { %15139 = vst [vmem:[#allocation140_spill] sm:$0xff] %v10217_v27  ;;  %v10223_v33 = vpop.permute.xlu0 %3977  ;;  %v3015_v10 = vsel %vm524_vm0, %v2881_v11, 0.0 }
 0x214   : > { %15140 = vst [vmem:[#allocation141_spill] sm:$0xff] %v10219_v52  ;;  %v1067_v23 = vpop.f32.mrf.mxu0  ;;  %v3008_v11 = vsel %vm524_vm0, %v2880_v38, 0.0 }
 0x215   : > { %15141 = vst [vmem:[#allocation142_spill] sm:$0xff] %v10223_v33 }
 0x216   : > { %v10230_v40 = vpop.f32.mrf.mxu1 }
 0x217   : > { %15144 = vst [vmem:[#allocation145_spill] sm:$0xff] %v10230_v40  ;;  %8360 = vmatmul.msk.f32.gmra.mxu0 %vm524_vm0, %v8768_v43 }
 0x218   : > { %4149 = vperm.xlu1 %8691, %v8766_v0   ;;  %4153 = vperm.xlu2 %8689, %v8767_v14   ;;  %v1866_v0 = vadd.f32 %v10206_v13, %v9749_v47  ;;  %v1068_v14 = vadd.f32 %v10019_v12, %v1067_v23  ;;  %v8769_v47 = vld [vmem:[%s9181_s12 + $0x200] sm:$0xff]  ;;  %v3023_v23 = vrot.slane %v3022_v4, 4 }
 0x219   : > { %4157 = vperm.xlu0 %8690, %v8768_v43   ;;  %v1872_v43 = vadd.f32 %v10206_v13, %v9783_v45  ;;  %v8770_v45 = vld [vmem:[%s9181_s12 + $0x208] sm:$0xff] }
 0x21a   : > { %v10241_v36 = vpop.permute.xlu1 %3981  ;;  %v10243_v28 = vpop.permute.xlu2 %4021  ;;  %v1357_v21 = vmax.f32 %v1068_v14, 0.0  ;;  %v10263_v46 = vmax.f32 %v1866_v0, 0.0  ;;  %v3009_v14 = vrot.slane %v3008_v11, 4 }
 0x21b   : > { %15146 = vst [vmem:[#allocation147_spill] sm:$0xff] %v10241_v36  ;;  %v10247_v40 = vpop.permute.xlu0 %3989  ;;  %v10265_v36 = vmax.f32 %v1869_v3, 0.0  ;;  %v10267_v33 = vmax.f32 %v1872_v43, 0.0 }
 0x21c   : > { %15147 = vst [vmem:[#allocation148_spill] sm:$0xff] %v10243_v28  ;;  %v1070_v26 = vpop.f32.mrf.mxu0  ;;  %v3016_v28 = vrot.slane %v3015_v10, 4  ;;  %8472 = vmatmul.msk.f32.gmra.mxu1 %vm1454_vm1, %v1357_v21  ;;  %v2883_v3 = vmul.f32 %v9417_v9, %v10263_v46  ;;  %v3024_v21 = vadd.f32 %v3023_v23, %v3022_v4  ;;  %v10295_v4 = vld [vmem:[%s9181_s12 + $0x218] sm:$0xff]  ;;  %v10304_v23 = vld [vmem:[%s9181_s12 + $0x228] sm:$0xff] }
 0x21d   : > { %15148 = vst [vmem:[#allocation149_spill] sm:$0xff] %v10247_v40  ;;  %v2884_v43 = vmul.f32 %v9335_v50, %v10265_v36 }
 0x21e   : > { %v10258_v40 = vpop.f32.mrf.mxu1  ;;  %15150 = vst [vmem:[#allocation151_spill] sm:$0xff] %v10263_v46  ;;  %v3017_v52 = vadd.f32 %v3016_v28, %v3015_v10  ;;  %v3010_v28 = vadd.f32 %v3009_v14, %v3008_v11  ;;  %v1071_v10 = vadd.f32 %v10019_v12, %v1070_v26  ;;  %v3029_v50 = vsel %vm524_vm0, %v2883_v3, 0.0  ;;  %v10300_v26 = vld [vmem:[%s9181_s12 + $0x220] sm:$0xff] }
 0x21f   : > { %15149 = vst [vmem:[#allocation150_spill] sm:$0xff] %v10258_v40  ;;  %8361 = vmatmul.msk.f32.gmra.mxu0 %vm524_vm0, %v8769_v47  ;;  %v3036_v9 = vsel %vm524_vm0, %v2884_v43, 0.0 }
 0x220   : > { %15151 = vst [vmem:[#allocation152_spill] sm:$0xff] %v10265_v36  ;;  %4161 = vperm.xlu1 %8691, %v8769_v47   ;;  %4165 = vperm.xlu2 %8689, %v8770_v45   ;;  %v1875_v47 = vadd.f32 %v10206_v13, %v9805_v37  ;;  %v1358_v41 = vmax.f32 %v1071_v10, 0.0  ;;  %v3037_v10 = vrot.slane %v3036_v9, 4 }
 0x221   : > { %15152 = vst [vmem:[#allocation153_spill] sm:$0xff] %v10267_v33  ;;  %4169 = vperm.xlu0 %8690, %v8771_v49  }
 0x222   : > { %v10272_v38 = vpop.permute.xlu1 %3993  ;;  %v10274_v40 = vpop.permute.xlu2 %4033  ;;  %v10292_v37 = vmax.f32 %v1875_v47, 0.0  ;;  %v3030_v47 = vrot.slane %v3029_v50, 4 }
 0x223   : > { %15153 = vst [vmem:[#allocation154_spill] sm:$0xff] %v10272_v38  ;;  %v10276_v0 = vpop.permute.xlu0 %4001  ;;  %v2885_v38 = vmul.f32 %v9360_v57, %v10267_v33  ;;  %v3025_v57 = vrot.slane %v3024_v21, 2 }
 0x224   : > { %15154 = vst [vmem:[#allocation155_spill] sm:$0xff] %v10274_v40  ;;  %v1073_v27 = vpop.f32.mrf.mxu0  ;;  %8473 = vmatmul.msk.f32.gmra.mxu1 %vm1454_vm1, %v1358_v41  ;;  %v2886_v60 = vmul.f32 %v9445_v20, %v10292_v37  ;;  %v1878_v41 = vadd.f32 %v10206_v13, %v9824_v30 }
 0x225   : > { %15155 = vst [vmem:[#allocation156_spill] sm:$0xff] %v10276_v0  ;;  %v3018_v0 = vrot.slane %v3017_v52, 2  ;;  %v3043_v11 = vsel %vm524_vm0, %v2885_v38, 0.0  ;;  %v1074_v53 = vadd.f32 %v10019_v12, %v1073_v27  ;;  %v3026_v24 = vadd.f32 %v3025_v57, %v3024_v21  ;;  %v10332_v57 = vld [vmem:[%s9181_s12 + $0x230] sm:$0xff] }
 0x226   : > { %v10287_v40 = vpop.f32.mrf.mxu1  ;;  %15157 = vst [vmem:[#allocation158_spill] sm:$0xff] %v10292_v37  ;;  %v3044_v38 = vrot.slane %v3043_v11, 4  ;;  %v3031_v27 = vadd.f32 %v3030_v47, %v3029_v50  ;;  %v3038_v37 = vadd.f32 %v3037_v10, %v3036_v9  ;;  %v3050_v30 = vsel %vm524_vm0, %v2886_v60, 0.0  ;;  %v10338_v50 = vld [vmem:[%s9181_s12 + $0x238] sm:$0xff] }
 0x227   : > { %15156 = vst [vmem:[#allocation157_spill] sm:$0xff] %v10287_v40  ;;  %8362 = vmatmul.msk.f32.gmra.mxu0 %vm524_vm0, %v8770_v45  ;;  %v3011_v45 = vrot.slane %v3010_v28, 2  ;;  %v3019_v43 = vadd.f32 %v3018_v0, %v3017_v52  ;;  %v1881_v52 = vadd.f32 %v10206_v13, %v9843_v31  ;;  %v1884_v0 = vadd.f32 %v10206_v13, %v9859_v54 }
 0x228   : > { %4173 = vperm.xlu1 %8691, %v10295_v4   ;;  %4177 = vperm.xlu2 %8689, %v10300_v26   ;;  %v3045_v21 = vadd.f32 %v3044_v38, %v3043_v11  ;;  %v1890_v31 = vadd.f32 %v10206_v13, %v9891_v58  ;;  %v3027_v54 = vrot.slane %v3026_v24, 1  ;;  %v3032_v47 = vrot.slane %v3031_v27, 2 }
 0x229   : > { %4181 = vperm.xlu0 %8690, %v10304_v23   ;;  %v3020_v20 = vrot.slane %v3019_v43, 1  ;;  %v10347_v9 = vmax.f32 %v1884_v0, 0.0  ;;  %v3039_v10 = vrot.slane %v3038_v37, 2  ;;  %v3051_v38 = vrot.slane %v3050_v30, 4 }
 0x22a   : > { %v10308_v14 = vpop.permute.xlu1 %4005  ;;  %v10310_v3 = vpop.permute.xlu2 %4045  ;;  %v3046_v35 = vrot.slane %v3045_v21, 2  ;;  %v10359_v0 = vmax.f32 %v1890_v31, 0.0 }
 0x22b   : > { %15158 = vst [vmem:[#allocation159_spill] sm:$0xff] %v10308_v14  ;;  %v10312_v40 = vpop.permute.xlu0 %4013  ;;  %v3012_v14 = vadd.f32 %v3011_v45, %v3010_v28  ;;  %v1887_v28 = vadd.f32 %v10206_v13, %v9876_v29  ;;  %v10345_v29 = vmax.f32 %v1881_v52, 0.0  ;;  %v3040_v31 = vadd.f32 %v3039_v10, %v3038_v37 }
 0x22c   : > { %15159 = vst [vmem:[#allocation160_spill] sm:$0xff] %v10310_v3  ;;  %v1076_v36 = vpop.f32.mrf.mxu0  ;;  %v1359_v3 = vmax.f32 %v1074_v53, 0.0  ;;  %v10335_v53 = vmax.f32 %v1878_v41, 0.0 }
 0x22d   : > { %15160 = vst [vmem:[#allocation161_spill] sm:$0xff] %v10312_v40  ;;  %v3013_v60 = vrot.slane %v3012_v14, 1  ;;  %v1077_v58 = vadd.f32 %v10019_v12, %v1076_v36  ;;  %v10357_v52 = vmax.f32 %v1887_v28, 0.0 }
 0x22e   : > { %v10323_v40 = vpop.f32.mrf.mxu1  ;;  %15162 = vst [vmem:[#allocation163_spill] sm:$0xff] %v10335_v53  ;;  %8474 = vmatmul.msk.f32.gmra.mxu1 %vm1454_vm1, %v1359_v3  ;;  %v3028_v3 = vadd.f32 %v3027_v54, %v3026_v24  ;;  %v2887_v36 = vmul.f32 %v9443_v19, %v10335_v53  ;;  %v3033_v24 = vadd.f32 %v3032_v47, %v3031_v27 }
 0x22f   : > { %15161 = vst [vmem:[#allocation162_spill] sm:$0xff] %v10323_v40  ;;  %8363 = vmatmul.msk.f32.gmra.mxu0 %vm524_vm0, %v8771_v49  ;;  %v10342_v49 = vld [vmem:[%s9181_s12 + $0x240] sm:$0xff]  ;;  %v3021_v40 = vadd.f32 %v3020_v20, %v3019_v43  ;;  %v2889_v43 = vmul.f32 %v9461_v48, %v10347_v9  ;;  %v1360_v20 = vmax.f32 %v1077_v58, 0.0  ;;  %v3052_v54 = vadd.f32 %v3051_v38, %v3050_v30 }
 0x230   : > { %4185 = vperm.xlu1 %8691, %v10332_v57   ;;  %4189 = vperm.xlu2 %8689, %v10338_v50   ;;  %15163 = vst [vmem:[#allocation164_spill] sm:$0xff] %v10342_v49  ;;  %v2891_v48 = vmul.f32 %v9395_v2, %v10359_v0  ;;  %v3057_v37 = vsel %vm524_vm0, %v2887_v36, 0.0  ;;  %v1899_v53 = vadd.f32 %v10206_v13, %v9942_v59 }
 0x231   : > { %4193 = vperm.xlu0 %8690, %v10342_v49   ;;  %15164 = vst [vmem:[#allocation165_spill] sm:$0xff] %v10345_v29  ;;  %v3053_v47 = vrot.slane %v3052_v54, 2 }
 0x232   : > { %15165 = vst [vmem:[#allocation166_spill] sm:$0xff] %v10347_v9  ;;  %v10351_v11 = vpop.permute.xlu1 %4017  ;;  %v10353_v45 = vpop.permute.xlu2 %4057 }
 0x233   : > { %15166 = vst [vmem:[#allocation167_spill] sm:$0xff] %v10351_v11  ;;  %v10355_v41 = vpop.permute.xlu0 %4025  ;;  %v3014_v11 = vadd.f32 %v3013_v60, %v3012_v14  ;;  %v10379_v14 = vld [vmem:[%s9181_s12 + $0x248] sm:$0xff] }
 0x234   : > { %15167 = vst [vmem:[#allocation168_spill] sm:$0xff] %v10353_v45  ;;  %v1079_v49 = vpop.f32.mrf.mxu0  ;;  %v1893_v45 = vadd.f32 %v10206_v13, %v9908_v56  ;;  %v3047_v56 = vadd.f32 %v3046_v35, %v3045_v21  ;;  %v10393_v35 = vld [vmem:[%s9181_s12 + $0x258] sm:$0xff]  ;;  %v1905_v21 = vadd.f32 %v10206_v13, %v9972_v7  ;;  %v1908_v7 = vadd.f32 %v10206_v13, %v9987_v39 }
 0x235   : > { %15168 = vst [vmem:[#allocation169_spill] sm:$0xff] %v10355_v41  ;;  %v2888_v41 = vmul.f32 %v9379_v62, %v10345_v29  ;;  %v7490_v19 = vsel %vm7114_vm2, %v3021_v40, %v3014_v11  ;;  %v2890_v62 = vmul.f32 %v9459_v44, %v10357_v52  ;;  %v3071_v44 = vsel %vm524_vm0, %v2889_v43, 0.0 }
 0x236   : > { %15169 = vst [vmem:[#allocation170_spill] sm:$0xff] %v10357_v52  ;;  %v10369_v28 = vpop.f32.mrf.mxu1  ;;  %v10383_v27 = vsel %vm7116_vm3, %v3028_v3, %v7490_v19  ;;  %v10386_v30 = vmax.f32 %v1893_v45, 0.0  ;;  %v1896_v40 = vadd.f32 %v10206_v13, %v9925_v32  ;;  %8475 = vmatmul.msk.f32.gmra.mxu1 %vm1454_vm1, %v1360_v20  ;;  %v3034_v11 = vrot.slane %v3033_v24, 1 }
 0x237   : > { %15170 = vst [vmem:[#allocation171_spill] sm:$0xff] %v10359_v0  ;;  %8364 = vmatmul.msk.f32.gmra.mxu0 %vm524_vm0, %v10295_v4  ;;  %v10389_v4 = vld [vmem:[%s9181_s12 + $0x250] sm:$0xff]  ;;  %v3064_v2 = vsel %vm524_vm0, %v2888_v41, 0.0  ;;  %v3041_v45 = vrot.slane %v3040_v31, 1  ;;  %v1080_v10 = vadd.f32 %v10019_v12, %v1079_v49  ;;  %v3048_v41 = vrot.slane %v3047_v56, 1 }
 0x238   : > { %15171 = vst [vmem:[#allocation172_spill] sm:$0xff] %v10369_v28  ;;  %4197 = vperm.xlu1 %8691, %v10379_v14   ;;  %4201 = vperm.xlu2 %8689, %v10389_v4   ;;  %v3078_v3 = vsel %vm524_vm0, %v2890_v62, 0.0  ;;  %v3085_v32 = vsel %vm524_vm0, %v2891_v48, 0.0  ;;  %v3058_v43 = vrot.slane %v3057_v37, 4  ;;  %v3065_v20 = vrot.slane %v3064_v2, 4 }
 0x239   : > { %15172 = vst [vmem:[#allocation173_spill] sm:$0xff] %v10386_v30  ;;  %4205 = vperm.xlu0 %8690, %v10393_v35   ;;  %v3072_v19 = vrot.slane %v3071_v44, 4  ;;  %v10418_v49 = vmax.f32 %v1905_v21, 0.0  ;;  %v1911_v62 = vadd.f32 %v10206_v13, %v10002_v6  ;;  %v3054_v39 = vadd.f32 %v3053_v47, %v3052_v54 }
 0x23a   : > { %v10403_v60 = vpop.permute.xlu1 %4029  ;;  %v10405_v58 = vpop.permute.xlu2 %4069  ;;  %v3079_v28 = vrot.slane %v3078_v3, 4  ;;  %v3086_v52 = vrot.slane %v3085_v32, 4  ;;  %v10432_v21 = vmax.f32 %v1908_v7, 0.0  ;;  %v1914_v6 = vadd.f32 %v10206_v13, %v10022_v1 }
 0x23b   : > { %15173 = vst [vmem:[#allocation174_spill] sm:$0xff] %v10403_v60  ;;  %v10408_v38 = vpop.permute.xlu0 %4037  ;;  %v10416_v60 = vmax.f32 %v1896_v40, 0.0  ;;  %v10430_v40 = vadd.f32 %v3041_v45, %v3040_v31  ;;  %v10440_v54 = vadd.f32 %v3048_v41, %v3047_v56  ;;  %v3059_v47 = vadd.f32 %v3058_v43, %v3057_v37 }
 0x23c   : > { %15174 = vst [vmem:[#allocation175_spill] sm:$0xff] %v10405_v58  ;;  %v1082_v36 = vpop.f32.mrf.mxu0  ;;  %v2892_v58 = vmul.f32 %v9474_v17, %v10386_v30  ;;  %v10428_v17 = vadd.f32 %v3034_v11, %v3033_v24  ;;  %v3066_v59 = vadd.f32 %v3065_v20, %v3064_v2  ;;  %v8783_v24 = vld [vmem:[%s9181_s12 + $0x270] sm:$0xff]  ;;  %v3073_v31 = vadd.f32 %v3072_v19, %v3071_v44 }
 0x23d   : > { %15175 = vst [vmem:[#allocation176_spill] sm:$0xff] %v10408_v38  ;;  %v1361_v38 = vmax.f32 %v1080_v10, 0.0  ;;  %v10437_v10 = vld [vmem:[%s9181_s12 + $0x260] sm:$0xff]  ;;  %v2893_v1 = vmul.f32 %v9472_v16, %v10416_v60  ;;  %v2896_v11 = vmul.f32 %v9485_v51, %v10418_v49  ;;  %v10452_v45 = vmax.f32 %v1911_v62, 0.0 }
 0x23e   : > { %15176 = vst [vmem:[#allocation177_spill] sm:$0xff] %v10416_v60  ;;  %v10422_v48 = vpop.f32.mrf.mxu1  ;;  %v3055_v2 = vrot.slane %v3054_v39, 1  ;;  %v3087_v41 = vadd.f32 %v3086_v52, %v3085_v32  ;;  %v10459_v7 = vmax.f32 %v1899_v53, 0.0  ;;  %v1902_v16 = vadd.f32 %v10206_v13, %v9957_v63 }
 0x23f   : > { %15177 = vst [vmem:[#allocation178_spill] sm:$0xff] %v10418_v49  ;;  %8365 = vmatmul.msk.f32.gmra.mxu0 %vm524_vm0, %v10300_v26  ;;  %v10444_v26 = vld [vmem:[%s9181_s12 + $0x268] sm:$0xff]  ;;  %8476 = vmatmul.msk.f32.gmra.mxu1 %vm1454_vm1, %v1361_v38  ;;  %v2897_v51 = vmul.f32 %v9441_v18, %v10432_v21  ;;  %v10467_v20 = vmax.f32 %v1914_v6, 0.0  ;;  %v3060_v19 = vrot.slane %v3059_v47, 2  ;;  %v3067_v62 = vrot.slane %v3066_v59, 2 }
 0x240   : > { %15178 = vst [vmem:[#allocation179_spill] sm:$0xff] %v10422_v48  ;;  %4209 = vperm.xlu1 %8691, %v10437_v10   ;;  %v3092_v48 = vsel %vm524_vm0, %v2892_v58, 0.0  ;;  %4213 = vperm.xlu2 %8689, %v10444_v26   ;;  %v3080_v58 = vadd.f32 %v3079_v28, %v3078_v3  ;;  %v1917_v28 = vadd.f32 %v10206_v13, %v10037_v5  ;;  %v3074_v52 = vrot.slane %v3073_v31, 2 }
 0x241   : > { %15179 = vst [vmem:[#allocation180_spill] sm:$0xff] %v10432_v21  ;;  %4217 = vperm.xlu0 %8690, %v8783_v24   ;;  %v3093_v43 = vrot.slane %v3092_v48, 4  ;;  %v1083_v53 = vadd.f32 %v10019_v12, %v1082_v36  ;;  %v3099_v3 = vsel %vm524_vm0, %v2893_v1, 0.0  ;;  %v3120_v32 = vsel %vm524_vm0, %v2896_v11, 0.0  ;;  %v8784_v11 = vld [vmem:[%s9181_s12 + $0x278] sm:$0xff] }
 0x242   : > { %15180 = vst [vmem:[#allocation181_spill] sm:$0xff] %v10452_v45  ;;  %v10455_v56 = vpop.permute.xlu1 %4041  ;;  %v10457_v37 = vpop.permute.xlu2 %4081  ;;  %v2898_v63 = vmul.f32 %v9500_v22, %v10452_v45  ;;  %v3081_v6 = vrot.slane %v3080_v58, 2  ;;  %v3088_v24 = vrot.slane %v3087_v41, 2  ;;  %v3127_v1 = vsel %vm524_vm0, %v2897_v51, 0.0 }
 0x243   : > { %15181 = vst [vmem:[#allocation182_spill] sm:$0xff] %v10455_v56  ;;  %v10461_v44 = vpop.permute.xlu0 %4049  ;;  %v1362_v5 = vmax.f32 %v1083_v53, 0.0  ;;  %v3094_v36 = vadd.f32 %v3093_v43, %v3092_v48  ;;  %v2899_v22 = vmul.f32 %v9498_v42, %v10467_v20  ;;  %v3100_v56 = vrot.slane %v3099_v3, 4  ;;  %v8785_v53 = vld [vmem:[%s9181_s12 + $0x280] sm:$0xff] }
 0x244   : > { %15182 = vst [vmem:[#allocation183_spill] sm:$0xff] %v10457_v37  ;;  %v1085_v38 = vpop.f32.mrf.mxu0  ;;  %v2894_v37 = vmul.f32 %v9415_v8, %v10459_v7  ;;  %v3121_v45 = vrot.slane %v3120_v32, 4  ;;  %v10490_v8 = vmax.f32 %v1917_v28, 0.0  ;;  %v3068_v48 = vadd.f32 %v3067_v62, %v3066_v59  ;;  %v8786_v28 = vld [vmem:[%s9181_s12 + $0x288] sm:$0xff] }
 0x245   : > { %15183 = vst [vmem:[#allocation184_spill] sm:$0xff] %v10459_v7  ;;  %v3134_v43 = vsel %vm524_vm0, %v2898_v63, 0.0  ;;  %v1086_v42 = vadd.f32 %v10019_v12, %v1085_v38  ;;  %v3089_v59 = vadd.f32 %v3088_v24, %v3087_v41  ;;  %v3141_v38 = vsel %vm524_vm0, %v2899_v22, 0.0 }
 0x246   : > { %15184 = vst [vmem:[#allocation185_spill] sm:$0xff] %v10461_v44  ;;  %v10476_v18 = vpop.f32.mrf.mxu1  ;;  %v10482_v44 = vmax.f32 %v1902_v16, 0.0  ;;  %v3106_v51 = vsel %vm524_vm0, %v2894_v37, 0.0  ;;  %v15192_v37 = vld [vmem:[#allocation6_spill] sm:$0xff] }
 0x247   : > { %15185 = vst [vmem:[#allocation186_spill] sm:$0xff] %v10467_v20  ;;  %8366 = vmatmul.msk.f32.gmra.mxu0 %vm524_vm0, %v10304_v23  ;;  %v10493_v23 = vadd.f32 %v3060_v19, %v3059_v47  ;;  %8477 = vmatmul.msk.f32.gmra.mxu1 %vm1454_vm1, %v1362_v5  ;;  %v3095_v19 = vrot.slane %v3094_v36, 2  ;;  %v3101_v5 = vadd.f32 %v3100_v56, %v3099_v3  ;;  %v1363_v41 = vmax.f32 %v1086_v42, 0.0 }
 0x248   : > { %15186 = vst [vmem:[#allocation187_spill] sm:$0xff] %v10476_v18  ;;  %4221 = vperm.xlu1 %8691, %v8784_v11   ;;  %v10488_v18 = vadd.f32 %v3055_v2, %v3054_v39  ;;  %4225 = vperm.xlu2 %8689, %v8785_v53   ;;  %v3075_v39 = vadd.f32 %v3074_v52, %v3073_v31  ;;  %v3128_v11 = vrot.slane %v3127_v1, 4  ;;  %v3107_v53 = vrot.slane %v3106_v51, 4 }
 0x249   : > { %15187 = vst [vmem:[#allocation188_spill] sm:$0xff] %v10482_v44  ;;  %v3082_v2 = vadd.f32 %v3081_v6, %v3080_v58  ;;  %4229 = vperm.xlu0 %8690, %v8786_v28   ;;  %v2895_v62 = vmul.f32 %v9487_v55, %v10482_v44  ;;  %v3122_v31 = vadd.f32 %v3121_v45, %v3120_v32  ;;  %v3135_v58 = vrot.slane %v3134_v43, 4  ;;  %v8788_v55 = vld [vmem:[%s9181_s12 + $0x298] sm:$0xff] }
 0x24a   : > { %15188 = vst [vmem:[#allocation189_spill] sm:$0xff] %v10490_v8  ;;  %v10498_v16 = vpop.permute.xlu1 %4053  ;;  %v10502_v20 = vpop.permute.xlu2 %4093  ;;  %v2900_v52 = vmul.f32 %v15192_v37, %v10490_v8  ;;  %v3069_v6 = vrot.slane %v3068_v48, 1  ;;  %v1920_v28 = vadd.f32 %v10206_v13, %v10055_v34  ;;  %v3076_v22 = vrot.slane %v3075_v39, 1 }
 0x24b   : > { %15189 = vst [vmem:[#allocation190_spill] sm:$0xff] %v10498_v16  ;;  %v10504_v47 = vpop.permute.xlu0 %4061  ;;  %v3142_v56 = vrot.slane %v3141_v38, 4  ;;  %v3083_v45 = vrot.slane %v3082_v2, 1  ;;  %v3090_v3 = vrot.slane %v3089_v59, 1  ;;  %v3096_v32 = vadd.f32 %v3095_v19, %v3094_v36 }
 0x24c   : > { %15190 = vst [vmem:[#allocation191_spill] sm:$0xff] %v10502_v20  ;;  %v1088_v63 = vpop.f32.mrf.mxu0  ;;  %v3129_v20 = vadd.f32 %v3128_v11, %v3127_v1  ;;  %v3113_v37 = vsel %vm524_vm0, %v2895_v62, 0.0  ;;  %v3102_v34 = vrot.slane %v3101_v5, 2  ;;  %v3123_v42 = vrot.slane %v3122_v31, 2 }
 0x24d   : > { %15191 = vst [vmem:[#allocation192_spill] sm:$0xff] %v10504_v47  ;;  %v8787_v47 = vld [vmem:[%s9181_s12 + $0x290] sm:$0xff]  ;;  %v3148_v16 = vsel %vm524_vm0, %v2900_v52, 0.0  ;;  %v10522_v1 = vadd.f32 %v3069_v6, %v3068_v48  ;;  %v3108_v11 = vadd.f32 %v3107_v53, %v3106_v51  ;;  %v10524_v49 = vmax.f32 %v1920_v28, 0.0 }
 0x24e   : > { %v10513_v24 = vpop.f32.mrf.mxu1  ;;  %v3114_v19 = vrot.slane %v3113_v37, 4  ;;  %v3130_v62 = vrot.slane %v3129_v20, 2  ;;  %v10537_v51 = vadd.f32 %v3083_v45, %v3082_v2  ;;  %v10539_v6 = vadd.f32 %v3090_v3, %v3089_v59 }
 0x24f   : > { %15193 = vst [vmem:[#allocation6_spill] sm:$0xff] %v10513_v24  ;;  %8367 = vmatmul.msk.f32.gmra.mxu0 %vm524_vm0, %v10332_v57  ;;  %v3136_v24 = vadd.f32 %v3135_v58, %v3134_v43  ;;  %8478 = vmatmul.msk.f32.gmra.mxu1 %vm1454_vm1, %v1363_v41  ;;  %v1089_v57 = vadd.f32 %v10019_v12, %v1088_v63  ;;  %v8789_v58 = vld [vmem:[%s9181_s12 + $0x2a0] sm:$0xff]  ;;  %v3097_v53 = vrot.slane %v3096_v32, 1  ;;  %v3149_v63 = vrot.slane %v3148_v16, 4 }
 0x250   : > { %4233 = vperm.xlu1 %8691, %v8787_v47   ;;  %4237 = vperm.xlu2 %8689, %v8788_v55   ;;  %15194 = vst [vmem:[#allocation193_spill] sm:$0xff] %v10522_v1  ;;  %v10530_v47 = vadd.f32 %v3076_v22, %v3075_v39  ;;  %v3143_v43 = vadd.f32 %v3142_v56, %v3141_v38  ;;  %v3109_v22 = vrot.slane %v3108_v11, 2  ;;  %v15202_v56 = vld [vmem:[#allocation12_spill] sm:$0xff] }
 0x251   : > { %15195 = vst [vmem:[#allocation194_spill] sm:$0xff] %v10524_v49  ;;  %4241 = vperm.xlu0 %8690, %v8789_v58   ;;  %v10541_v41 = vadd.f32 %v3102_v34, %v3101_v5  ;;  %v3124_v39 = vadd.f32 %v3123_v42, %v3122_v31  ;;  %v3137_v55 = vrot.slane %v3136_v24, 2  ;;  %v1929_v38 = vadd.f32 %v10206_v13, %v10109_v25  ;;  %v15205_v42 = vld [vmem:[#allocation108_spill] sm:$0xff] }
 0x252   : > { %v10528_v36 = vpop.permute.xlu1 %4065  ;;  %15196 = vst [vmem:[#allocation195_spill] sm:$0xff] %v10530_v47  ;;  %v10533_v52 = vpop.permute.xlu2 %4105  ;;  %v2901_v58 = vmul.f32 %v15202_v56, %v10524_v49  ;;  %v4416_v2 = vmul.f32 %v10070_v61, %v10232_v15  ;;  %v1364_v59 = vmax.f32 %v1089_v57, 0.0  ;;  %v10551_v3 = vadd.f32 %v3114_v19, %v3113_v37  ;;  %v15206_v57 = vld [vmem:[#allocation111_spill] sm:$0xff] }
 0x253   : > { %15197 = vst [vmem:[#allocation196_spill] sm:$0xff] %v10533_v52  ;;  %v10535_v48 = vpop.permute.xlu0 %4073  ;;  %v3131_v5 = vadd.f32 %v3130_v62, %v3129_v20  ;;  %v3144_v31 = vrot.slane %v3143_v43, 2  ;;  %v10555_v25 = vadd.f32 %v3097_v53, %v3096_v32  ;;  %v3150_v34 = vadd.f32 %v3149_v63, %v3148_v16  ;;  %v8790_v15 = vld [vmem:[%s9181_s12 + $0x2a8] sm:$0xff] }
 0x254   : > { %15198 = vst [vmem:[#allocation197_spill] sm:$0xff] %v10535_v48  ;;  %v1091_v28 = vpop.f32.mrf.mxu0  ;;  %v1923_v61 = vadd.f32 %v10206_v13, %v15205_v42  ;;  %v4419_v56 = vmul.f32 %v15206_v57, %v10263_v46  ;;  %v3125_v20 = vrot.slane %v3124_v39, 1  ;;  %v3138_v19 = vadd.f32 %v3137_v55, %v3136_v24  ;;  %v15208_v53 = vld [vmem:[#allocation119_spill] sm:$0xff] }
 0x255   : > { %15199 = vst [vmem:[#allocation198_spill] sm:$0xff] %v10537_v51  ;;  %v10563_v62 = vmax.f32 %v1929_v38, 0.0  ;;  %v3155_v32 = vsel %vm524_vm0, %v2901_v58, 0.0  ;;  %v4545_v16 = vsel %vm4544_vm6, %v4416_v2, 0.0  ;;  %v1932_v63 = vadd.f32 %v10206_v13, %v15208_v53 }
 0x256   : > { %15200 = vst [vmem:[#allocation199_spill] sm:$0xff] %v10539_v6  ;;  %v10549_v45 = vpop.f32.mrf.mxu1  ;;  %v10574_v57 = vadd.f32 %v3109_v22, %v3108_v11  ;;  %v3132_v55 = vrot.slane %v3131_v5, 1  ;;  %v3145_v38 = vadd.f32 %v3144_v31, %v3143_v43  ;;  %v3151_v53 = vrot.slane %v3150_v34, 2  ;;  %v15216_v43 = vld [vmem:[#allocation15_spill] sm:$0xff] }
 0x257   : > { %15201 = vst [vmem:[#allocation200_spill] sm:$0xff] %v10541_v41  ;;  %8368 = vmatmul.msk.f32.gmra.mxu0 %vm524_vm0, %v10338_v50  ;;  %v8791_v50 = vld [vmem:[%s9181_s12 + $0x2b0] sm:$0xff]  ;;  %8479 = vmatmul.msk.f32.gmra.mxu1 %vm1454_vm1, %v1364_v59  ;;  %v10582_v37 = vmax.f32 %v1923_v61, 0.0  ;;  %v10587_v22 = vadd.f32 %v3125_v20, %v3124_v39  ;;  %v3156_v24 = vrot.slane %v3155_v32, 4  ;;  %v4546_v52 = vrot.slane %v4545_v16, 4 }
 0x258   : > { %15203 = vst [vmem:[#allocation12_spill] sm:$0xff] %v10551_v3  ;;  %4245 = vperm.xlu1 %8691, %v8790_v15   ;;  %4249 = vperm.xlu2 %8689, %v8791_v50   ;;  %v1092_v15 = vadd.f32 %v10019_v12, %v1091_v28  ;;  %v8792_v50 = vld [vmem:[%s9181_s12 + $0x2b8] sm:$0xff]  ;;  %v4566_v28 = vsel %vm4544_vm6, %v4419_v56, 0.0  ;;  %v15214_v59 = vld [vmem:[#allocation115_spill] sm:$0xff]  ;;  %v2904_v31 = vmul.f32 %v15216_v43, %v10563_v62 }
 0x259   : > { %15204 = vst [vmem:[#allocation201_spill] sm:$0xff] %v10555_v25  ;;  %4253 = vperm.xlu0 %8690, %v8792_v50   ;;  %v4421_v46 = vmul.f32 %v15214_v59, %v10267_v33  ;;  %v3139_v50 = vrot.slane %v3138_v19, 1  ;;  %v7492_v56 = vsel %vm7118_vm4, %v10428_v17, %v10383_v27  ;;  %v10598_v59 = vadd.f32 %v3132_v55, %v3131_v5  ;;  %v15219_v20 = vld [vmem:[#allocation112_spill] sm:$0xff]  ;;  %v15222_v6 = vld [vmem:[#allocation11_spill] sm:$0xff]  ;;  %v8793_v27 = vld [vmem:[%s9181_s12 + $0x2c0] sm:$0xff] }
 0x25a   : > { %15207 = vst [vmem:[#allocation108_spill] sm:$0xff] %v10563_v62  ;;  %v10572_v42 = vpop.permute.xlu1 %4077  ;;  %v10578_v58 = vpop.permute.xlu2 %4117  ;;  %v4567_v39 = vrot.slane %v4566_v28, 4  ;;  %v1926_v33 = vadd.f32 %v10206_v13, %v15219_v20  ;;  %v15221_v25 = vld [vmem:[#allocation164_spill] sm:$0xff]  ;;  %v2902_v51 = vmul.f32 %v15222_v6, %v10582_v37  ;;  %v3157_v17 = vadd.f32 %v3156_v24, %v3155_v32  ;;  %v8794_v20 = vld [vmem:[%s9181_s12 + $0x2c8] sm:$0xff] }
 0x25b   : > { %15209 = vst [vmem:[#allocation111_spill] sm:$0xff] %v10572_v42  ;;  %v10580_v2 = vpop.permute.xlu0 %4085  ;;  %v4580_v42 = vsel %vm4544_vm6, %v4421_v46, 0.0  ;;  %v4547_v5 = vadd.f32 %v4546_v52, %v4545_v16  ;;  %v3176_v55 = vsel %vm524_vm0, %v2904_v31, 0.0 }
 0x25c   : > { %15210 = vst [vmem:[#allocation119_spill] sm:$0xff] %v10574_v57  ;;  %v1094_v11 = vpop.f32.mrf.mxu0  ;;  %v4568_v32 = vadd.f32 %v4567_v39, %v4566_v28  ;;  %v10624_v16 = vmax.f32 %v1926_v33, 0.0  ;;  %v4581_v24 = vrot.slane %v4580_v42, 4  ;;  %v15230_v33 = vld [vmem:[#allocation144_spill] sm:$0xff] }
 0x25d   : > { %15211 = vst [vmem:[#allocation202_spill] sm:$0xff] %v10578_v58  ;;  %v10591_v58 = vmax.f32 %v1932_v63, 0.0  ;;  %v3146_v63 = vrot.slane %v3145_v38, 1  ;;  %v1095_v46 = vadd.f32 %v10019_v12, %v1094_v11  ;;  %v3162_v11 = vsel %vm524_vm0, %v2902_v51, 0.0  ;;  %v15231_v39 = vld [vmem:[#allocation120_spill] sm:$0xff] }
 0x25e   : > { %15212 = vst [vmem:[#allocation203_spill] sm:$0xff] %v10580_v2  ;;  %v1365_v2 = vmax.f32 %v1092_v15, 0.0  ;;  %v10593_v61 = vpop.f32.mrf.mxu1  ;;  %v3152_v15 = vadd.f32 %v3151_v53, %v3150_v34  ;;  %v15224_v34 = vld [vmem:[#allocation14_spill] sm:$0xff]  ;;  %v4548_v28 = vrot.slane %v4547_v5, 2  ;;  %v3163_v51 = vrot.slane %v3162_v11, 4 }
 0x25f   : > { %15213 = vst [vmem:[#allocation204_spill] sm:$0xff] %v10582_v37  ;;  %8369 = vmatmul.msk.f32.gmra.mxu0 %vm524_vm0, %v15221_v25  ;;  %v10614_v25 = vadd.f32 %v3139_v50, %v3138_v19  ;;  %v2905_v53 = vmul.f32 %v15224_v34, %v10591_v58  ;;  %v8795_v19 = vld [vmem:[%s9181_s12 + $0x2d0] sm:$0xff] }
 0x260   : > { %15215 = vst [vmem:[#allocation115_spill] sm:$0xff] %v10587_v22  ;;  %v15220_v22 = vld [vmem:[#allocation118_spill] sm:$0xff]  ;;  %4257 = vperm.xlu1 %8691, %v8793_v27   ;;  %4261 = vperm.xlu2 %8689, %v8794_v20   ;;  %v3153_v12 = vrot.slane %v3152_v15, 1  ;;  %v4418_v20 = vmul.f32 %v15231_v39, %v15230_v33 }
 0x261   : > { %15217 = vst [vmem:[#allocation15_spill] sm:$0xff] %v10591_v58  ;;  %v4424_v43 = vmul.f32 %v15220_v22, %v10345_v29  ;;  %v7493_v22 = vsel %vm7120_vm5, %v10430_v40, %v7492_v56  ;;  %8480 = vmatmul.msk.f32.gmra.mxu1 %vm1454_vm1, %v1365_v2  ;;  %4265 = vperm.xlu0 %8690, %v8795_v19   ;;  %v3177_v56 = vrot.slane %v3176_v55, 4  ;;  %v3183_v34 = vsel %vm524_vm0, %v2905_v53, 0.0  ;;  %v15235_v53 = vld [vmem:[#allocation143_spill] sm:$0xff]  ;;  %v15236_v39 = vld [vmem:[#allocation122_spill] sm:$0xff] }
 0x262   : > { %15218 = vst [vmem:[#allocation205_spill] sm:$0xff] %v10598_v59  ;;  %v10620_v6 = vpop.permute.xlu1 %4089  ;;  %v7494_v52 = vsel %vm7122_vm7, %v10440_v54, %v7493_v22  ;;  %v10628_v31 = vpop.permute.xlu2 %4129  ;;  %v10632_v2 = vadd.f32 %v3146_v63, %v3145_v38  ;;  %v3158_v54 = vrot.slane %v3157_v17, 2  ;;  %v15232_v38 = vld [vmem:[#allocation121_spill] sm:$0xff]  ;;  %v1366_v19 = vmax.f32 %v1095_v46, 0.0 }
 0x263   : > { %15223 = vst [vmem:[#allocation112_spill] sm:$0xff] %v10614_v25  ;;  %v4601_v40 = vsel %vm4544_vm6, %v4424_v43, 0.0  ;;  %v10630_v50 = vpop.permute.xlu0 %4097  ;;  %v7495_v43 = vsel %vm7124_vm8, %v10488_v18, %v7494_v52  ;;  %v4427_v63 = vmul.f32 %v15232_v38, %v10359_v0  ;;  %v4569_v29 = vrot.slane %v4568_v32, 2  ;;  %v15237_v38 = vld [vmem:[#allocation123_spill] sm:$0xff]  ;;  %v8796_v0 = vld [vmem:[%s9181_s12 + $0x2d8] sm:$0xff] }
 0x264   : > { %15225 = vst [vmem:[#allocation118_spill] sm:$0xff] %v10620_v6  ;;  %v1097_v27 = vpop.f32.mrf.mxu0  ;;  %v4602_v22 = vrot.slane %v4601_v40, 4  ;;  %v10648_v18 = vadd.f32 %v3153_v12, %v3152_v15  ;;  %v3178_v52 = vadd.f32 %v3177_v56, %v3176_v55  ;;  %v4417_v33 = vmul.f32 %v15236_v39, %v15235_v53 }
 0x265   : > { %15226 = vst [vmem:[#allocation164_spill] sm:$0xff] %v10624_v16  ;;  %v1935_v46 = vadd.f32 %v10206_v13, %v15237_v38  ;;  %v4549_v59 = vadd.f32 %v4548_v28, %v4547_v5  ;;  %v3184_v6 = vrot.slane %v3183_v34, 4  ;;  %v10660_v55 = vadd.f32 %v3158_v54, %v3157_v17  ;;  %v8799_v54 = vld [vmem:[%s9181_s12 + $0x2e8] sm:$0xff] }
 0x266   : > { %15227 = vst [vmem:[#allocation11_spill] sm:$0xff] %v10628_v31  ;;  %v15233_v31 = vld [vmem:[#allocation7_spill] sm:$0xff]  ;;  %v10644_v25 = vpop.f32.mrf.mxu1  ;;  %v4622_v12 = vsel %vm4544_vm6, %v4427_v63, 0.0  ;;  %v3164_v28 = vadd.f32 %v3163_v51, %v3162_v11  ;;  %v3179_v63 = vrot.slane %v3178_v52, 2  ;;  %v4552_v39 = vsel %vm4544_vm6, %v4417_v33, 0.0 }
 0x267   : > { %15228 = vst [vmem:[#allocation14_spill] sm:$0xff] %v10630_v50  ;;  %v2903_v50 = vmul.f32 %v15233_v31, %v10624_v16  ;;  %8370 = vmatmul.msk.f32.gmra.mxu0 %vm524_vm0, %v10379_v14  ;;  %v15238_v14 = vrot.slane %v10493_v23, 1  ;;  %v4603_v31 = vadd.f32 %v4602_v22, %v4601_v40  ;;  %v10679_v38 = vmax.f32 %v1935_v46, 0.0 }
 0x268   : > { %15229 = vst [vmem:[#allocation206_spill] sm:$0xff] %v10632_v2  ;;  %v4582_v2 = vadd.f32 %v4581_v24, %v4580_v42  ;;  %4269 = vperm.xlu1 %8691, %v8796_v0   ;;  %v4559_v42 = vsel %vm4544_vm6, %v4418_v20, 0.0  ;;  %v8797_v24 = vld [vmem:[%s9181_s12 + $0x2e0] sm:$0xff]  ;;  %v4570_v20 = vadd.f32 %v4569_v29, %v4568_v32  ;;  %v4623_v29 = vrot.slane %v4622_v12, 4 }
 0x269   : > { %15234 = vst [vmem:[#allocation120_spill] sm:$0xff] %v10648_v18  ;;  %4273 = vperm.xlu2 %8689, %v8797_v24   ;;  %v3063_v15 = vadd.f32 %v15238_v14, %v10493_v23  ;;  %8481 = vmatmul.msk.f32.gmra.mxu1 %vm1454_vm1, %v1366_v19  ;;  %v10667_v0 = vld [vmem:[%s14803_s2] ss:$0 sm:$0xff]  ;;  %v3169_v23 = vsel %vm524_vm0, %v2903_v50, 0.0  ;;  %v4560_v19 = vrot.slane %v4559_v42, 4  ;;  %v4550_v24 = vrot.slane %v4549_v59, 1 }
 0x26a   : > { %15239 = vst [vmem:[#allocation121_spill] sm:$0xff] %v10660_v55  ;;  %v1098_v5 = vadd.f32 %v10667_v0, %v1097_v27  ;;  %v10670_v56 = vpop.permute.xlu1 %4101  ;;  %v4583_v17 = vrot.slane %v4582_v2, 2  ;;  %4277 = vperm.xlu0 %8690, %v8799_v54   ;;  %v10674_v40 = vpop.permute.xlu2 %4141  ;;  %v3185_v14 = vadd.f32 %v3184_v6, %v3183_v34  ;;  %v3170_v11 = vrot.slane %v3169_v23, 4  ;;  %v15245_v34 = vld [vmem:[#allocation8_spill] sm:$0xff] }
 0x26b   : > { %15240 = vst [vmem:[#allocation7_spill] sm:$0xff] %v10670_v56  ;;  %v10676_v22 = vpop.permute.xlu0 %4109  ;;  %v10682_v32 = vsel %vm7126_vm9, %v3063_v15, %v7495_v43  ;;  %v4604_v51 = vrot.slane %v4603_v31, 2  ;;  %v3165_v53 = vrot.slane %v3164_v28, 2  ;;  %v4553_v33 = vrot.slane %v4552_v39, 4  ;;  %v15246_v43 = vld [vmem:[#allocation152_spill] sm:$0xff] }
 0x26c   : > { %15241 = vst [vmem:[#allocation122_spill] sm:$0xff] %v10674_v40  ;;  %v1100_v27 = vpop.f32.mrf.mxu0  ;;  %v1367_v54 = vmax.f32 %v1098_v5, 0.0  ;;  %v4571_v40 = vrot.slane %v4570_v20, 1  ;;  %v3180_v46 = vadd.f32 %v3179_v63, %v3178_v52  ;;  %v4561_v6 = vadd.f32 %v4560_v19, %v4559_v42  ;;  %v15247_v15 = vld [vmem:[#allocation124_spill] sm:$0xff]  ;;  %v15250_v63 = vld [vmem:[#allocation127_spill] sm:$0xff] }
 0x26d   : > { %15242 = vst [vmem:[#allocation123_spill] sm:$0xff] %v10676_v22  ;;  %v4584_v22 = vadd.f32 %v4583_v17, %v4582_v2  ;;  %v2906_v56 = vmul.f32 %v15245_v34, %v10679_v38  ;;  %v8800_v50 = vld [vmem:[%s9181_s12 + $0x2f0] sm:$0xff]  ;;  %v10692_v55 = vadd.f32 %v4550_v24, %v4549_v59  ;;  %v3186_v5 = vrot.slane %v3185_v14, 2  ;;  %v15248_v2 = vld [vmem:[#allocation125_spill] sm:$0xff] }
 0x26e   : > { %15243 = vst [vmem:[#allocation207_spill] sm:$0xff] %v10679_v38  ;;  %v4624_v18 = vadd.f32 %v4623_v29, %v4622_v12  ;;  %v4430_v17 = vmul.f32 %v15248_v2, %v10459_v7  ;;  %v10696_v47 = vpop.f32.mrf.mxu1  ;;  %v10699_v52 = vadd.f32 %v3170_v11, %v3169_v23  ;;  %v4605_v42 = vadd.f32 %v4604_v51, %v4603_v31 }
 0x26f   : > { %15244 = vst [vmem:[#allocation208_spill] sm:$0xff] %v10682_v32  ;;  %8371 = vmatmul.msk.f32.gmra.mxu0 %vm524_vm0, %v10389_v4  ;;  %v4420_v32 = vmul.f32 %v15247_v15, %v15246_v43  ;;  %v8801_v4 = vld [vmem:[%s9181_s12 + $0x2f8] sm:$0xff]  ;;  %v1938_v19 = vadd.f32 %v10206_v13, %v15250_v63  ;;  %v1101_v59 = vadd.f32 %v10667_v0, %v1100_v27  ;;  %v8802_v15 = vld [vmem:[%s9181_s12 + $0x300] sm:$0xff]  ;;  %v3181_v11 = vrot.slane %v3180_v46, 1 }
 0x270   : > { %4281 = vperm.xlu1 %8691, %v8800_v50   ;;  %15249 = vst [vmem:[#allocation8_spill] sm:$0xff] %v10699_v52  ;;  %v10707_v12 = vadd.f32 %v3165_v53, %v3164_v28  ;;  %v10709_v29 = vadd.f32 %v4571_v40, %v4570_v20  ;;  %v4585_v50 = vrot.slane %v4584_v22, 1  ;;  %v4554_v34 = vadd.f32 %v4553_v33, %v4552_v39  ;;  %v15256_v20 = vld [vmem:[#allocation158_spill] sm:$0xff] }
 0x271   : > { %4285 = vperm.xlu2 %8689, %v8801_v4   ;;  %8482 = vmatmul.msk.f32.gmra.mxu1 %vm1454_vm1, %v1367_v54  ;;  %v4562_v51 = vrot.slane %v4561_v6, 2  ;;  %v3190_v54 = vsel %vm524_vm0, %v2906_v56, 0.0  ;;  %v4573_v27 = vsel %vm4544_vm6, %v4420_v32, 0.0  ;;  %v3187_v4 = vadd.f32 %v3186_v5, %v3185_v14  ;;  %v15257_v40 = vld [vmem:[#allocation126_spill] sm:$0xff] }
 0x272   : > { %v10705_v24 = vpop.permute.xlu1 %4113  ;;  %15252 = vst [vmem:[#allocation125_spill] sm:$0xff] %v10707_v12  ;;  %4289 = vperm.xlu0 %8690, %v8802_v15   ;;  %v10712_v23 = vpop.permute.xlu2 %4153  ;;  %v4625_v53 = vrot.slane %v4624_v18, 2  ;;  %v4643_v28 = vsel %vm4544_vm6, %v4430_v17, 0.0  ;;  %v4422_v39 = vmul.f32 %v15257_v40, %v15256_v20  ;;  %v4606_v63 = vrot.slane %v4605_v42, 1  ;;  %v15261_v40 = vld [vmem:[#allocation130_spill] sm:$0xff] }
 0x273   : > { %15251 = vst [vmem:[#allocation124_spill] sm:$0xff] %v10705_v24  ;;  %v10714_v31 = vpop.permute.xlu0 %4121  ;;  %v10722_v15 = vmax.f32 %v1938_v19, 0.0  ;;  %v1368_v7 = vmax.f32 %v1101_v59, 0.0  ;;  %v10724_v43 = vadd.f32 %v4585_v50, %v4584_v22  ;;  %v4555_v56 = vrot.slane %v4554_v34, 2  ;;  %v8803_v20 = vld [vmem:[%s9181_s12 + $0x308] sm:$0xff]  ;;  %v8804_v24 = vld [vmem:[%s9181_s12 + $0x310] sm:$0xff] }
 0x274   : > { %15253 = vst [vmem:[#allocation127_spill] sm:$0xff] %v10709_v29  ;;  %v1103_v2 = vpop.f32.mrf.mxu0  ;;  %v3191_v32 = vrot.slane %v3190_v54, 4  ;;  %v10728_v14 = vadd.f32 %v3181_v11, %v3180_v46  ;;  %v4563_v5 = vadd.f32 %v4562_v51, %v4561_v6  ;;  %v4644_v17 = vrot.slane %v4643_v28, 4  ;;  %v15262_v50 = vld [vmem:[#allocation131_spill] sm:$0xff]  ;;  %v15263_v46 = vld [vmem:[#allocation18_spill] sm:$0xff]  ;;  %v15265_v51 = vld [vmem:[#allocation128_spill] sm:$0xff] }
 0x275   : > { %15254 = vst [vmem:[#allocation209_spill] sm:$0xff] %v10712_v23  ;;  %v4574_v23 = vrot.slane %v4573_v27, 4  ;;  %v4425_v33 = vmul.f32 %v15261_v40, %v10347_v9  ;;  %v3188_v19 = vrot.slane %v3187_v4, 1  ;;  %v10733_v59 = vadd.f32 %v4625_v53, %v4624_v18  ;;  %v15264_v11 = vld [vmem:[#allocation163_spill] sm:$0xff]  ;;  %v15277_v52 = vld [vmem:[#allocation134_spill] sm:$0xff] }
 0x276   : > { %15255 = vst [vmem:[#allocation210_spill] sm:$0xff] %v10714_v31  ;;  %v4587_v22 = vsel %vm4544_vm6, %v4422_v39, 0.0  ;;  %v1941_v31 = vadd.f32 %v10206_v13, %v15262_v50  ;;  %v2907_v6 = vmul.f32 %v15263_v46, %v10722_v15  ;;  %v4423_v40 = vmul.f32 %v15265_v51, %v15264_v11  ;;  %v15267_v13 = vld [vmem:[#allocation129_spill] sm:$0xff]  ;;  %v15270_v11 = vld [vmem:[#allocation170_spill] sm:$0xff] }
 0x277   : > { %15258 = vst [vmem:[#allocation126_spill] sm:$0xff] %v10722_v15  ;;  %8372 = vmatmul.msk.f32.gmra.mxu0 %vm524_vm0, %v10393_v35  ;;  %v10739_v35 = vadd.f32 %v4606_v63, %v4605_v42  ;;  %v1104_v18 = vadd.f32 %v10667_v0, %v1103_v2  ;;  %v3192_v39 = vadd.f32 %v3191_v32, %v3190_v54  ;;  %v10751_v42 = vpop.f32.mrf.mxu1  ;;  %v8805_v63 = vld [vmem:[%s9181_s12 + $0x318] sm:$0xff]  ;;  %v4588_v51 = vrot.slane %v4587_v22, 4 }
 0x278   : > { %15259 = vst [vmem:[#allocation211_spill] sm:$0xff] %v10724_v43  ;;  %4293 = vperm.xlu1 %8691, %v8803_v20   ;;  %v4556_v20 = vadd.f32 %v4555_v56, %v4554_v34  ;;  %v4575_v9 = vadd.f32 %v4574_v23, %v4573_v27  ;;  %v4645_v46 = vadd.f32 %v4644_v17, %v4643_v28  ;;  %v15271_v2 = vld [vmem:[#allocation132_spill] sm:$0xff]  ;;  %v4564_v54 = vrot.slane %v4563_v5, 1 }
 0x279   : > { %15260 = vst [vmem:[#allocation212_spill] sm:$0xff] %v10728_v14  ;;  %4297 = vperm.xlu2 %8689, %v8804_v24   ;;  %8483 = vmatmul.msk.f32.gmra.mxu1 %vm1454_vm1, %v1368_v7  ;;  %v4433_v24 = vmul.f32 %v15267_v13, %v10432_v21  ;;  %v4608_v7 = vsel %vm4544_vm6, %v4425_v33, 0.0  ;;  %v4426_v14 = vmul.f32 %v15271_v2, %v15270_v11  ;;  %v4627_v27 = vrot.slane %v10733_v59, 1  ;;  %v15275_v33 = vld [vmem:[#allocation133_spill] sm:$0xff] }
 0x27a   : > { %v10747_v53 = vpop.permute.xlu1 %4125  ;;  %15268 = vst [vmem:[#allocation131_spill] sm:$0xff] %v10751_v42  ;;  %4301 = vperm.xlu0 %8690, %v8805_v63   ;;  %v10754_v50 = vpop.permute.xlu2 %4165  ;;  %v10761_v23 = vadd.f32 %v3188_v19, %v3187_v4  ;;  %v10764_v56 = vmax.f32 %v1941_v31, 0.0  ;;  %v3197_v32 = vsel %vm524_vm0, %v2907_v6, 0.0  ;;  %v4594_v28 = vsel %vm4544_vm6, %v4423_v40, 0.0 }
 0x27b   : > { %15266 = vst [vmem:[#allocation130_spill] sm:$0xff] %v10747_v53  ;;  %v10759_v53 = vpop.permute.xlu0 %4133  ;;  %v4436_v17 = vmul.f32 %v15275_v33, %v10490_v8  ;;  %v1369_v13 = vmax.f32 %v1104_v18, 0.0  ;;  %v4557_v63 = vrot.slane %v4556_v20, 1  ;;  %v3193_v2 = vrot.slane %v3192_v39, 2  ;;  %v15276_v8 = vld [vmem:[#allocation17_spill] sm:$0xff] }
 0x27c   : > { %15269 = vst [vmem:[#allocation18_spill] sm:$0xff] %v10754_v50  ;;  %v1106_v34 = vpop.f32.mrf.mxu0  ;;  %v4664_v4 = vsel %vm4544_vm6, %v4433_v24, 0.0  ;;  %v4609_v19 = vrot.slane %v4608_v7, 4  ;;  %v4576_v11 = vrot.slane %v4575_v9, 2  ;;  %v4646_v31 = vrot.slane %v4645_v46, 2  ;;  %v8806_v50 = vld [vmem:[%s9181_s12 + $0x320] sm:$0xff] }
 0x27d   : > { %15272 = vst [vmem:[#allocation128_spill] sm:$0xff] %v10759_v53  ;;  %v4589_v21 = vadd.f32 %v4588_v51, %v4587_v22  ;;  %v4615_v6 = vsel %vm4544_vm6, %v4426_v14, 0.0  ;;  %v10775_v40 = vadd.f32 %v4564_v54, %v4563_v5  ;;  %v3198_v33 = vrot.slane %v3197_v32, 4  ;;  %v8807_v24 = vld [vmem:[%s9181_s12 + $0x328] sm:$0xff] }
 0x27e   : > { %15273 = vst [vmem:[#allocation129_spill] sm:$0xff] %v10761_v23  ;;  %v4595_v18 = vrot.slane %v4594_v28, 4  ;;  %v2908_v53 = vmul.f32 %v15276_v8, %v10764_v56  ;;  %v4665_v23 = vrot.slane %v4664_v4, 4  ;;  %v4428_v22 = vmul.f32 %v15277_v52, %v10386_v30  ;;  %v10790_v8 = vld [vmem:[%s9181_s12 + $0x330] sm:$0xff] }
 0x27f   : > { %15274 = vst [vmem:[#allocation132_spill] sm:$0xff] %v10764_v56  ;;  %8373 = vmatmul.msk.f32.gmra.mxu0 %vm524_vm0, %v10437_v10  ;;  %v4685_v10 = vsel %vm4544_vm6, %v4436_v17, 0.0  ;;  %v1107_v14 = vadd.f32 %v10667_v0, %v1106_v34  ;;  %v3194_v51 = vadd.f32 %v3193_v2, %v3192_v39  ;;  %v4610_v54 = vadd.f32 %v4609_v19, %v4608_v7  ;;  %v10787_v1 = vpop.f32.mrf.mxu1  ;;  %v10804_v2 = vld [vmem:[%s14805_s4] ss:$0 sm:$0xff]  ;;  %v15282_v19 = vld [vmem:[#allocation135_spill] sm:$0xff] }
 0x280   : > { %4305 = vperm.xlu1 %8691, %v8806_v50   ;;  %v4558_v50 = vadd.f32 %v4557_v63, %v4556_v20  ;;  %v4616_v12 = vrot.slane %v4615_v6, 4  ;;  %15279 = vst [vmem:[#allocation17_spill] sm:$0xff] %v10787_v1  ;;  %v10796_v52 = vadd.f32 %v4627_v27, %v10733_v59  ;;  %v4590_v34 = vrot.slane %v4589_v21, 2 }
 0x281   : > { %4309 = vperm.xlu2 %8689, %v8807_v24   ;;  %8484 = vmatmul.msk.f32.gmra.mxu1 %vm1454_vm1, %v1369_v13  ;;  %v4577_v13 = vadd.f32 %v4576_v11, %v4575_v9  ;;  %v4647_v24 = vadd.f32 %v4646_v31, %v4645_v46  ;;  %v3199_v39 = vadd.f32 %v3198_v33, %v3197_v32  ;;  %v3204_v7 = vsel %vm524_vm0, %v2908_v53, 0.0 }
 0x282   : > { %v10785_v5 = vpop.permute.xlu1 %4137  ;;  %4313 = vperm.xlu0 %8690, %v10790_v8   ;;  %v10793_v17 = vpop.permute.xlu2 %4177  ;;  %v4686_v63 = vrot.slane %v4685_v10, 4  ;;  %v1944_v59 = vadd.f32 %v10804_v2, %v15282_v19  ;;  %v4596_v27 = vadd.f32 %v4595_v18, %v4594_v28  ;;  %v4666_v9 = vadd.f32 %v4665_v23, %v4664_v4  ;;  %v15283_v28 = vld [vmem:[#allocation136_spill] sm:$0xff] }
 0x283   : > { %15278 = vst [vmem:[#allocation133_spill] sm:$0xff] %v10785_v5  ;;  %v10798_v30 = vpop.permute.xlu0 %4145  ;;  %v4629_v11 = vsel %vm4544_vm6, %v4428_v22, 0.0  ;;  %v1370_v46 = vmax.f32 %v1107_v14, 0.0  ;;  %v10811_v32 = vsel %vm7114_vm2, %v4558_v50, %v10692_v55  ;;  %v3195_v53 = vrot.slane %v3194_v51, 1  ;;  %v10818_v4 = vld [vmem:[%s9181_s12 + $0x338] sm:$0xff] }
 0x284   : > { %15280 = vst [vmem:[#allocation134_spill] sm:$0xff] %v10793_v17  ;;  %v1109_v20 = vpop.f32.mrf.mxu0  ;;  %v4611_v31 = vrot.slane %v4610_v54, 2  ;;  %v4617_v33 = vadd.f32 %v4616_v12, %v4615_v6  ;;  %v4578_v17 = vrot.slane %v4577_v13, 1  ;;  %v3205_v5 = vrot.slane %v3204_v7, 4  ;;  %v10824_v12 = vld [vmem:[%s9181_s12 + $0x340] sm:$0xff] }
 0x285   : > { %15281 = vst [vmem:[#allocation213_spill] sm:$0xff] %v10798_v30  ;;  %v4591_v30 = vadd.f32 %v4590_v34, %v4589_v21  ;;  %v4429_v23 = vmul.f32 %v15283_v28, %v10416_v60  ;;  %v3200_v18 = vrot.slane %v3199_v39, 2  ;;  %v4687_v55 = vadd.f32 %v4686_v63, %v4685_v10  ;;  %v15287_v63 = vld [vmem:[#allocation137_spill] sm:$0xff]  ;;  %v10836_v60 = vld [vmem:[%s9181_s12 + $0x348] sm:$0xff] }
 0x286   : > { %v4630_v22 = vrot.slane %v4629_v11, 4  ;;  %v10821_v14 = vmax.f32 %v1944_v59, 0.0  ;;  %v4597_v21 = vrot.slane %v4596_v27, 2  ;;  %v4667_v6 = vrot.slane %v4666_v9, 2 }
 0x287   : > { %8374 = vmatmul.msk.f32.gmra.mxu0 %vm524_vm0, %v10444_v26  ;;  %v4648_v26 = vrot.slane %v4647_v24, 1  ;;  %v1110_v50 = vadd.f32 %v10667_v0, %v1109_v20  ;;  %v10831_v19 = vadd.f32 %v3195_v53, %v3194_v51  ;;  %v4612_v28 = vadd.f32 %v4611_v31, %v4610_v54 }
 0x288   : > { %4317 = vperm.xlu1 %8691, %v10818_v4   ;;  %15284 = vst [vmem:[#allocation135_spill] sm:$0xff] %v10821_v14  ;;  %v4618_v10 = vrot.slane %v4617_v33, 2  ;;  %v4439_v59 = vmul.f32 %v15287_v63, %v10624_v16  ;;  %v10841_v43 = vadd.f32 %v4578_v17, %v4577_v13  ;;  %v3206_v41 = vadd.f32 %v3205_v5, %v3204_v7  ;;  %v15291_v63 = vld [vmem:[#allocation9_spill] sm:$0xff] }
 0x289   : > { %4321 = vperm.xlu2 %8689, %v10824_v12   ;;  %8485 = vmatmul.msk.f32.gmra.mxu1 %vm1454_vm1, %v1370_v46  ;;  %15286 = vst [vmem:[#allocation214_spill] sm:$0xff] %v10831_v19  ;;  %v4592_v46 = vrot.slane %v4591_v30, 1  ;;  %v4636_v20 = vsel %vm4544_vm6, %v4429_v23, 0.0  ;;  %v3201_v54 = vadd.f32 %v3200_v18, %v3199_v39  ;;  %v4688_v53 = vrot.slane %v4687_v55, 2  ;;  %v10848_v19 = vpop.f32.mrf.mxu1 }
 0x28a   : > { %v10829_v34 = vpop.permute.xlu1 %4149  ;;  %4325 = vperm.xlu0 %8690, %v10836_v60   ;;  %v10839_v48 = vpop.permute.xlu2 %4189  ;;  %15289 = vst [vmem:[#allocation215_spill] sm:$0xff] %v10841_v43  ;;  %v4631_v31 = vadd.f32 %v4630_v22, %v4629_v11  ;;  %v2909_v16 = vmul.f32 %v15291_v63, %v10821_v14  ;;  %v10850_v1 = vadd.f32 %v4648_v26, %v4647_v24  ;;  %v1371_v5 = vmax.f32 %v1110_v50, 0.0  ;;  %v15294_v22 = vld [vmem:[#allocation138_spill] sm:$0xff]  ;;  %v10862_v26 = vld [vmem:[%s9181_s12 + $0x350] sm:$0xff] }
 0x28b   : > { %15285 = vst [vmem:[#allocation136_spill] sm:$0xff] %v10829_v34  ;;  %v10844_v34 = vpop.permute.xlu0 %4157  ;;  %v10852_v17 = vadd.f32 %v4597_v21, %v4596_v27  ;;  %v4668_v13 = vadd.f32 %v4667_v6, %v4666_v9  ;;  %v4613_v7 = vrot.slane %v4612_v28, 1  ;;  %v4619_v23 = vadd.f32 %v4618_v10, %v4617_v33  ;;  %v10867_v6 = vld [vmem:[%s9181_s12 + $0x358] sm:$0xff]  ;;  %v15296_v10 = vld [vmem:[#allocation178_spill] sm:$0xff] }
 0x28c   : > { %15288 = vst [vmem:[#allocation137_spill] sm:$0xff] %v10839_v48  ;;  %v1112_v51 = vpop.f32.mrf.mxu0  ;;  %v4637_v48 = vrot.slane %v4636_v20, 4  ;;  %v4706_v39 = vsel %vm4544_vm6, %v4439_v59, 0.0  ;;  %v10855_v18 = vadd.f32 %v4592_v46, %v4591_v30  ;;  %v3207_v11 = vrot.slane %v3206_v41, 2  ;;  %v15297_v59 = vld [vmem:[#allocation140_spill] sm:$0xff] }
 0x28d   : > { %15290 = vst [vmem:[#allocation216_spill] sm:$0xff] %v10844_v34  ;;  %v4431_v63 = vmul.f32 %v15294_v22, %v10482_v44  ;;  %v15295_v34 = vld [vmem:[#allocation139_spill] sm:$0xff]  ;;  %v3202_v27 = vrot.slane %v3201_v54, 1  ;;  %v4689_v9 = vadd.f32 %v4688_v53, %v4687_v55  ;;  %v4632_v33 = vrot.slane %v4631_v31, 2 }
 0x28e   : > { %15292 = vst [vmem:[#allocation9_spill] sm:$0xff] %v10848_v19  ;;  %v1947_v24 = vadd.f32 %v10804_v2, %v15295_v34  ;;  %v3211_v21 = vsel %vm524_vm0, %v2909_v16, 0.0  ;;  %v4707_v50 = vrot.slane %v4706_v39, 4  ;;  %v4432_v34 = vmul.f32 %v15297_v59, %v15296_v10  ;;  %v10878_v19 = vld [vmem:[%s9181_s12 + $0x360] sm:$0xff] }
 0x28f   : > { %15293 = vst [vmem:[#allocation217_spill] sm:$0xff] %v10855_v18  ;;  %v1113_v46 = vadd.f32 %v10667_v0, %v1112_v51  ;;  %v4669_v55 = vrot.slane %v4668_v13, 1  ;;  %v4614_v53 = vadd.f32 %v4613_v7, %v4612_v28  ;;  %v4620_v44 = vrot.slane %v4619_v23, 1 }
 0x290   : > { %4329 = vperm.xlu1 %8691, %v10862_v26   ;;  %v4638_v16 = vadd.f32 %v4637_v48, %v4636_v20  ;;  %v3208_v30 = vadd.f32 %v3207_v11, %v3206_v41  ;;  %v3212_v3 = vrot.slane %v3211_v21, 4  ;;  %v4650_v59 = vsel %vm4544_vm6, %v4431_v63, 0.0  ;;  %v15303_v20 = vld [vmem:[#allocation141_spill] sm:$0xff]  ;;  %v15305_v11 = vld [vmem:[#allocation142_spill] sm:$0xff] }
 0x291   : > { %4333 = vperm.xlu2 %8689, %v10867_v6   ;;  %8486 = vmatmul.msk.f32.gmra.mxu1 %vm1454_vm1, %v1371_v5  ;;  %v10884_v10 = vmax.f32 %v1947_v24, 0.0  ;;  %v4690_v28 = vrot.slane %v4689_v9, 1  ;;  %v4633_v48 = vadd.f32 %v4632_v33, %v4631_v31  ;;  %v4442_v7 = vmul.f32 %v15303_v20, %v10679_v38  ;;  %v15304_v41 = vld [vmem:[#allocation181_spill] sm:$0xff]  ;;  %v15313_v38 = vld [vmem:[#allocation147_spill] sm:$0xff] }
 0x292   : > { %v10875_v22 = vpop.permute.xlu1 %4161  ;;  %4337 = vperm.xlu0 %8690, %v10878_v19   ;;  %v10881_v18 = vpop.permute.xlu2 %4201  ;;  %v4708_v43 = vadd.f32 %v4707_v50, %v4706_v39  ;;  %v4434_v42 = vmul.f32 %v15305_v11, %v15304_v41  ;;  %v1372_v63 = vmax.f32 %v1113_v46, 0.0  ;;  %v10895_v24 = vadd.f32 %v4669_v55, %v4668_v13  ;;  %v15307_v39 = vld [vmem:[#allocation21_spill] sm:$0xff]  ;;  %v10913_v11 = vld [vmem:[%s9181_s12 + $0x370] sm:$0xff] }
 0x293   : > { %15298 = vst [vmem:[#allocation138_spill] sm:$0xff] %v10875_v22  ;;  %v10886_v5 = vpop.permute.xlu0 %4169  ;;  %v10888_v22 = vadd.f32 %v3202_v27, %v3201_v54  ;;  %v4639_v57 = vrot.slane %v4638_v16, 2  ;;  %v4651_v54 = vrot.slane %v4650_v59, 4  ;;  %v10897_v27 = vpop.f32.mrf.mxu1  ;;  %v7128_v31 = vsel %vm7114_vm2, %v4614_v53, %v10739_v35 }
 0x294   : > { %15299 = vst [vmem:[#allocation139_spill] sm:$0xff] %v10881_v18  ;;  %v1115_v51 = vpop.f32.mrf.mxu0  ;;  %v4657_v18 = vsel %vm4544_vm6, %v4432_v34, 0.0  ;;  %v3209_v33 = vrot.slane %v3208_v30, 1  ;;  %v3213_v20 = vadd.f32 %v3212_v3, %v3211_v21  ;;  %v2910_v50 = vmul.f32 %v15307_v39, %v10884_v10  ;;  %v10904_v34 = vld [vmem:[%s9181_s12 + $0x368] sm:$0xff] }
 0x295   : > { %15300 = vst [vmem:[#allocation140_spill] sm:$0xff] %v10884_v10  ;;  %v10907_v46 = vadd.f32 %v4690_v28, %v4689_v9  ;;  %v4727_v13 = vsel %vm4544_vm6, %v4442_v7, 0.0  ;;  %v4634_v3 = vrot.slane %v4633_v48, 1  ;;  %v4709_v35 = vrot.slane %v4708_v43, 2 }
 0x296   : > { %15301 = vst [vmem:[#allocation218_spill] sm:$0xff] %v10886_v5  ;;  %v4621_v5 = vadd.f32 %v4620_v44, %v4619_v23  ;;  %v4658_v44 = vrot.slane %v4657_v18, 4  ;;  %v15309_v23 = vld [vmem:[#allocation150_spill] sm:$0xff]  ;;  %v4671_v21 = vsel %vm4544_vm6, %v4434_v42, 0.0  ;;  %v1116_v9 = vadd.f32 %v10667_v0, %v1115_v51 }
 0x297   : > { %15302 = vst [vmem:[#allocation219_spill] sm:$0xff] %v10888_v22  ;;  %v1953_v55 = vadd.f32 %v10804_v2, %v15309_v23  ;;  %v4640_v7 = vadd.f32 %v4639_v57, %v4638_v16  ;;  %v4652_v39 = vadd.f32 %v4651_v54, %v4650_v59  ;;  %v15312_v23 = vld [vmem:[#allocation186_spill] sm:$0xff]  ;;  %v10927_v22 = vld [vmem:[%s9181_s12 + $0x378] sm:$0xff]  ;;  %v10932_v42 = vadd.f32 %v3209_v33, %v3208_v30 }
 0x298   : > { %15306 = vst [vmem:[#allocation141_spill] sm:$0xff] %v10897_v27  ;;  %4341 = vperm.xlu1 %8691, %v10904_v34   ;;  %v10922_v28 = vsel %vm7116_vm3, %v4621_v5, %v7128_v31  ;;  %v4435_v41 = vmul.f32 %v15313_v38, %v15312_v23  ;;  %v3218_v51 = vsel %vm524_vm0, %v2910_v50, 0.0  ;;  %v4659_v57 = vadd.f32 %v4658_v44, %v4657_v18  ;;  %v15318_v59 = vld [vmem:[#allocation145_spill] sm:$0xff]  ;;  %v15321_v30 = vld [vmem:[#allocation148_spill] sm:$0xff] }
 0x299   : > { %15308 = vst [vmem:[#allocation142_spill] sm:$0xff] %v10907_v46  ;;  %4345 = vperm.xlu2 %8689, %v10913_v11   ;;  %8487 = vmatmul.msk.f32.gmra.mxu1 %vm1454_vm1, %v1372_v63  ;;  %v3214_v63 = vrot.slane %v3213_v20, 2  ;;  %v4672_v16 = vrot.slane %v4671_v21, 4  ;;  %v1950_v38 = vadd.f32 %v10804_v2, %v15318_v59  ;;  %v10939_v54 = vmax.f32 %v1953_v55, 0.0  ;;  %v10957_v59 = vld [vmem:[%s9181_s12 + $0x380] sm:$0xff] }
 0x29a   : > { %15310 = vst [vmem:[#allocation21_spill] sm:$0xff] %v10913_v11  ;;  %v10919_v53 = vpop.permute.xlu1 %4173  ;;  %4349 = vperm.xlu0 %8690, %v10927_v22   ;;  %v10930_v46 = vpop.permute.xlu2 %4213  ;;  %v10941_v31 = vadd.f32 %v4634_v3, %v4633_v48  ;;  %v4445_v33 = vmul.f32 %v15321_v30, %v10821_v14  ;;  %v1373_v50 = vmax.f32 %v1116_v9, 0.0  ;;  %v4641_v23 = vrot.slane %v4640_v7, 1  ;;  %v15324_v48 = vld [vmem:[#allocation149_spill] sm:$0xff] }
 0x29b   : > { %15311 = vst [vmem:[#allocation150_spill] sm:$0xff] %v10919_v53  ;;  %v4728_v53 = vrot.slane %v4727_v13, 4  ;;  %v10935_v27 = vpop.permute.xlu0 %4181  ;;  %v4678_v18 = vsel %vm4544_vm6, %v4435_v41, 0.0  ;;  %v10948_v44 = vpop.f32.mrf.mxu1  ;;  %v4437_v3 = vmul.f32 %v15324_v48, %v10524_v49  ;;  %v4660_v9 = vrot.slane %v4659_v57, 2  ;;  %v15328_v41 = vld [vmem:[#allocation10_spill] sm:$0xff]  ;;  %v15329_v48 = vld [vmem:[#allocation156_spill] sm:$0xff] }
 0x29c   : > { %15314 = vst [vmem:[#allocation147_spill] sm:$0xff] %v10927_v22  ;;  %v1118_v5 = vpop.f32.mrf.mxu0  ;;  %v10950_v22 = vadd.f32 %v3214_v63, %v3213_v20  ;;  %v4673_v30 = vadd.f32 %v4672_v16, %v4671_v21  ;;  %v10960_v14 = vmax.f32 %v1950_v38, 0.0  ;;  %v2912_v20 = vmul.f32 %v15328_v41, %v10939_v54  ;;  %v8820_v63 = vld [vmem:[%s9181_s12 + $0x388] sm:$0xff] }
 0x29d   : > { %15315 = vst [vmem:[#allocation220_spill] sm:$0xff] %v10930_v46  ;;  %v10943_v46 = vadd.f32 %v4709_v35, %v4708_v43  ;;  %v4729_v55 = vadd.f32 %v4728_v53, %v4727_v13  ;;  %v15325_v43 = vld [vmem:[#allocation154_spill] sm:$0xff]  ;;  %v4679_v13 = vrot.slane %v4678_v18, 4  ;;  %v4748_v53 = vsel %vm4544_vm6, %v4445_v33, 0.0 }
 0x29e   : > { %15316 = vst [vmem:[#allocation221_spill] sm:$0xff] %v10932_v42  ;;  %v3219_v42 = vrot.slane %v3218_v51, 4  ;;  %v4438_v35 = vmul.f32 %v15325_v43, %v10582_v37  ;;  %v4440_v43 = vmul.f32 %v15329_v48, %v10563_v62  ;;  %v1119_v37 = vadd.f32 %v10667_v0, %v1118_v5  ;;  %v15332_v5 = vld [vmem:[#allocation155_spill] sm:$0xff] }
 0x29f   : > { %15317 = vst [vmem:[#allocation222_spill] sm:$0xff] %v10935_v27  ;;  %v4653_v27 = vrot.slane %v4652_v39, 2  ;;  %v10972_v21 = vadd.f32 %v4641_v23, %v4640_v7  ;;  %v4730_v33 = vrot.slane %v4729_v55, 2  ;;  %v4692_v48 = vsel %vm4544_vm6, %v4437_v3, 0.0 }
 0x2a0   : > { %15319 = vst [vmem:[#allocation145_spill] sm:$0xff] %v10939_v54  ;;  %4353 = vperm.xlu1 %8691, %v10957_v59   ;;  %v3220_v41 = vadd.f32 %v3219_v42, %v3218_v51  ;;  %v4448_v62 = vmul.f32 %v15332_v5, %v10939_v54  ;;  %v4661_v23 = vadd.f32 %v4660_v9, %v4659_v57  ;;  %v4674_v16 = vrot.slane %v4673_v30, 2  ;;  %v15334_v42 = vld [vmem:[#allocation20_spill] sm:$0xff] }
 0x2a1   : > { %15320 = vst [vmem:[#allocation223_spill] sm:$0xff] %v10943_v46  ;;  %4357 = vperm.xlu2 %8689, %v8820_v63   ;;  %8488 = vmatmul.msk.f32.gmra.mxu1 %vm1454_vm1, %v1373_v50  ;;  %v10975_v38 = vadd.f32 %v4653_v27, %v4652_v39  ;;  %v8821_v63 = vld [vmem:[%s9181_s12 + $0x390] sm:$0xff]  ;;  %v4699_v50 = vsel %vm4544_vm6, %v4438_v35, 0.0  ;;  %v4749_v27 = vrot.slane %v4748_v53, 4  ;;  %v3232_v39 = vsel %vm524_vm0, %v2912_v20, 0.0  ;;  %v15336_v20 = vld [vmem:[#allocation157_spill] sm:$0xff] }
 0x2a2   : > { %15322 = vst [vmem:[#allocation148_spill] sm:$0xff] %v10948_v44  ;;  %v10970_v49 = vpop.permute.xlu1 %4185  ;;  %4361 = vperm.xlu0 %8690, %v8821_v63   ;;  %v10978_v44 = vpop.permute.xlu2 %4225  ;;  %v2911_v51 = vmul.f32 %v15334_v42, %v10960_v14  ;;  %v4680_v63 = vadd.f32 %v4679_v13, %v4678_v18  ;;  %v4713_v3 = vsel %vm4544_vm6, %v4440_v43, 0.0  ;;  %v4693_v5 = vrot.slane %v4692_v48, 4  ;;  %v8822_v42 = vld [vmem:[%s9181_s12 + $0x398] sm:$0xff] }
 0x2a3   : > { %15323 = vst [vmem:[#allocation224_spill] sm:$0xff] %v10950_v22  ;;  %v10991_v54 = vpop.f32.mrf.mxu1  ;;  %v4731_v57 = vadd.f32 %v4730_v33, %v4729_v55  ;;  %v3233_v9 = vrot.slane %v3232_v39, 4  ;;  %v4769_v11 = vsel %vm4544_vm6, %v4448_v62, 0.0  ;;  %v1956_v46 = vadd.f32 %v10804_v2, %v15336_v20  ;;  %v10997_v18 = vpop.f32.mrf.mxu2  ;;  %8399 = vmatmul.msk.f32.gmra.mxu2 %vm524_vm0, %v10790_v8  ;;  %v8823_v55 = vld [vmem:[%s9181_s12 + $0x3a0] sm:$0xff] }
 0x2a4   : > { %15326 = vst [vmem:[#allocation149_spill] sm:$0xff] %v10957_v59  ;;  %v1121_v7 = vpop.f32.mrf.mxu0  ;;  %v3221_v59 = vrot.slane %v3220_v41, 2  ;;  %v4662_v13 = vrot.slane %v4661_v23, 1  ;;  %v4750_v43 = vadd.f32 %v4749_v27, %v4748_v53  ;;  %v4714_v35 = vrot.slane %v4713_v3, 4  ;;  %v8824_v53 = vld [vmem:[%s9181_s12 + $0x3a8] sm:$0xff] }
 0x2a5   : > { %15327 = vst [vmem:[#allocation154_spill] sm:$0xff] %v10960_v14  ;;  %v4675_v33 = vadd.f32 %v4674_v16, %v4673_v30  ;;  %v3225_v62 = vsel %vm524_vm0, %v2911_v51, 0.0  ;;  %v4681_v22 = vrot.slane %v4680_v63, 2  ;;  %v1122_v20 = vadd.f32 %v10667_v0, %v1121_v7 }
 0x2a6   : > { %15330 = vst [vmem:[#allocation10_spill] sm:$0xff] %v10970_v49  ;;  %v10984_v49 = vpop.permute.xlu0 %4193  ;;  %v11013_v30 = vadd.f32 %v3221_v59, %v3220_v41  ;;  %v4732_v16 = vrot.slane %v4731_v57, 1  ;;  %v3234_v51 = vadd.f32 %v3233_v9, %v3232_v39 }
 0x2a7   : > { %15331 = vst [vmem:[#allocation156_spill] sm:$0xff] %v10978_v44  ;;  %v1374_v44 = vmax.f32 %v1119_v37, 0.0  ;;  %v15339_v37 = vld [vmem:[#allocation159_spill] sm:$0xff] }
 0x2a8   : > { %15333 = vst [vmem:[#allocation155_spill] sm:$0xff] %v10984_v49  ;;  %v4700_v49 = vrot.slane %v4699_v50, 4  ;;  %4365 = vperm.xlu1 %8691, %v8822_v42   ;;  %v4441_v29 = vmul.f32 %v15339_v37, %v10591_v58  ;;  %v4682_v37 = vadd.f32 %v4681_v22, %v4680_v63  ;;  %v8825_v63 = vld [vmem:[%s9181_s12 + $0x3b0] sm:$0xff] }
 0x2a9   : > { %15335 = vst [vmem:[#allocation20_spill] sm:$0xff] %v10991_v54  ;;  %4369 = vperm.xlu2 %8689, %v8823_v55   ;;  %8489 = vmatmul.msk.f32.gmra.mxu1 %vm1454_vm1, %v1374_v44  ;;  %v4770_v54 = vrot.slane %v4769_v11, 4  ;;  %v11015_v55 = vmax.f32 %v1956_v46, 0.0 }
 0x2aa   : > { %15337 = vst [vmem:[#allocation157_spill] sm:$0xff] %v10997_v18  ;;  %v11006_v42 = vpop.permute.xlu1 %4197  ;;  %v4694_v18 = vadd.f32 %v4693_v5, %v4692_v48  ;;  %v4701_v8 = vadd.f32 %v4700_v49, %v4699_v50  ;;  %4373 = vperm.xlu0 %8690, %v8824_v53   ;;  %v11011_v27 = vpop.permute.xlu2 %4237  ;;  %v3226_v48 = vrot.slane %v3225_v62, 4  ;;  %v4751_v49 = vrot.slane %v4750_v43, 2  ;;  %v15344_v53 = vld [vmem:[#allocation161_spill] sm:$0xff] }
 0x2ab   : > { %15338 = vst [vmem:[#allocation225_spill] sm:$0xff] %v11006_v42  ;;  %v4663_v42 = vadd.f32 %v4662_v13, %v4661_v23  ;;  %v4715_v50 = vadd.f32 %v4714_v35, %v4713_v3  ;;  %v4676_v5 = vrot.slane %v4675_v33, 1  ;;  %v4443_v58 = vmul.f32 %v15344_v53, %v10722_v15  ;;  %v11022_v9 = vpop.f32.mrf.mxu1  ;;  %v15346_v13 = vld [vmem:[#allocation24_spill] sm:$0xff]  ;;  %v15347_v35 = vld [vmem:[#allocation162_spill] sm:$0xff] }
 0x2ac   : > { %15340 = vst [vmem:[#allocation159_spill] sm:$0xff] %v11011_v27  ;;  %v1124_v7 = vpop.f32.mrf.mxu0  ;;  %v1375_v27 = vmax.f32 %v1122_v20, 0.0  ;;  %v4695_v59 = vrot.slane %v4694_v18, 2  ;;  %v4702_v41 = vrot.slane %v4701_v8, 2  ;;  %v4771_v39 = vadd.f32 %v4770_v54, %v4769_v11  ;;  %v11031_v20 = vpop.f32.mrf.mxu2  ;;  %8400 = vmatmul.msk.f32.gmra.mxu2 %vm524_vm0, %v10818_v4 }
 0x2ad   : > { %15341 = vst [vmem:[#allocation226_spill] sm:$0xff] %v11013_v30  ;;  %v4720_v46 = vsel %vm4544_vm6, %v4441_v29, 0.0  ;;  %v3235_v23 = vrot.slane %v3234_v51, 2  ;;  %v2913_v3 = vmul.f32 %v15346_v13, %v11015_v55  ;;  %v1959_v22 = vadd.f32 %v10804_v2, %v15347_v35 }
 0x2ae   : > { %15342 = vst [vmem:[#allocation227_spill] sm:$0xff] %v11015_v55  ;;  %v11017_v44 = vpop.permute.xlu0 %4205  ;;  %v7135_v29 = vsel %vm7114_vm2, %v10895_v24, %v4663_v42  ;;  %v11037_v11 = vadd.f32 %v3226_v48, %v3225_v62  ;;  %v4752_v54 = vadd.f32 %v4751_v49, %v4750_v43  ;;  %v4677_v53 = vadd.f32 %v4676_v5, %v4675_v33  ;;  %v8827_v62 = vld [vmem:[%s9181_s12 + $0x3c0] sm:$0xff] }
 0x2af   : > { %15343 = vst [vmem:[#allocation228_spill] sm:$0xff] %v11017_v44  ;;  %v11024_v44 = vadd.f32 %v4732_v16, %v4731_v57  ;;  %v4716_v57 = vrot.slane %v4715_v50, 2  ;;  %v8826_v16 = vld [vmem:[%s9181_s12 + $0x3b8] sm:$0xff]  ;;  %v4721_v13 = vrot.slane %v4720_v46, 4  ;;  %v4734_v35 = vsel %vm4544_vm6, %v4443_v58, 0.0  ;;  %v15353_v58 = vld [vmem:[#allocation167_spill] sm:$0xff] }
 0x2b0   : > { %15345 = vst [vmem:[#allocation161_spill] sm:$0xff] %v11022_v9  ;;  %4377 = vperm.xlu1 %8691, %v8825_v63   ;;  %v1125_v63 = vadd.f32 %v10667_v0, %v1124_v7  ;;  %v4683_v4 = vrot.slane %v4682_v37, 1  ;;  %v4696_v30 = vadd.f32 %v4695_v59, %v4694_v18  ;;  %v4703_v24 = vadd.f32 %v4702_v41, %v4701_v8  ;;  %v15355_v8 = vld [vmem:[#allocation172_spill] sm:$0xff] }
 0x2b1   : > { %15348 = vst [vmem:[#allocation24_spill] sm:$0xff] %v11031_v20  ;;  %4381 = vperm.xlu2 %8689, %v8826_v16   ;;  %8490 = vmatmul.msk.f32.gmra.mxu1 %vm1454_vm1, %v1375_v27  ;;  %v4772_v42 = vrot.slane %v4771_v39, 2  ;;  %v3236_v48 = vadd.f32 %v3235_v23, %v3234_v51  ;;  %v3239_v33 = vsel %vm524_vm0, %v2913_v3, 0.0  ;;  %v11049_v49 = vmax.f32 %v1959_v22, 0.0  ;;  %v15356_v23 = vld [vmem:[#allocation169_spill] sm:$0xff] }
 0x2b2   : > { %15349 = vst [vmem:[#allocation162_spill] sm:$0xff] %v11037_v11  ;;  %v11043_v15 = vpop.permute.xlu1 %4209  ;;  %4385 = vperm.xlu0 %8690, %v8827_v62   ;;  %v11046_v43 = vpop.permute.xlu2 %4249  ;;  %v4444_v27 = vmul.f32 %v15353_v58, %v10764_v56  ;;  %v4753_v16 = vrot.slane %v4752_v54, 1  ;;  %v4735_v18 = vrot.slane %v4734_v35, 4  ;;  %v1962_v59 = vadd.f32 %v10804_v2, %v15355_v8  ;;  %v15358_v8 = vld [vmem:[#allocation23_spill] sm:$0xff] }
 0x2b3   : > { %15350 = vst [vmem:[#allocation229_spill] sm:$0xff] %v11043_v15  ;;  %v4717_v15 = vadd.f32 %v4716_v57, %v4715_v50  ;;  %v11058_v41 = vsel %vm7116_vm3, %v4677_v53, %v7135_v29  ;;  %v4722_v51 = vadd.f32 %v4721_v13, %v4720_v46  ;;  %v4446_v3 = vmul.f32 %v15356_v23, %v10884_v10  ;;  %v11064_v50 = vpop.f32.mrf.mxu1  ;;  %v8828_v46 = vld [vmem:[%s9181_s12 + $0x3c8] sm:$0xff] }
 0x2b4   : > { %15351 = vst [vmem:[#allocation230_spill] sm:$0xff] %v11046_v43  ;;  %v1127_v7 = vpop.f32.mrf.mxu0  ;;  %v1376_v22 = vmax.f32 %v1125_v63, 0.0  ;;  %v11062_v62 = vadd.f32 %v4683_v4, %v4682_v37  ;;  %v4697_v58 = vrot.slane %v4696_v30, 1  ;;  %v4704_v43 = vrot.slane %v4703_v24, 1  ;;  %v11070_v53 = vpop.f32.mrf.mxu2  ;;  %8401 = vmatmul.msk.f32.gmra.mxu2 %vm524_vm0, %v10824_v12 }
 0x2b5   : > { %15352 = vst [vmem:[#allocation231_spill] sm:$0xff] %v11049_v49  ;;  %v3240_v56 = vrot.slane %v3239_v33, 4  ;;  %v3237_v57 = vrot.slane %v3236_v48, 1  ;;  %v2914_v20 = vmul.f32 %v15358_v8, %v11049_v49  ;;  %v4741_v29 = vsel %vm4544_vm6, %v4444_v27, 0.0  ;;  %v15361_v27 = vld [vmem:[#allocation179_spill] sm:$0xff] }
 0x2b6   : > { %v11053_v5 = vpop.permute.xlu0 %4217  ;;  %15357 = vst [vmem:[#allocation172_spill] sm:$0xff] %v11064_v50  ;;  %v11074_v37 = vadd.f32 %v4753_v16, %v4752_v54  ;;  %v4718_v13 = vrot.slane %v4717_v15, 1  ;;  %v4736_v63 = vadd.f32 %v4735_v18, %v4734_v35  ;;  %v11076_v4 = vmax.f32 %v1962_v59, 0.0  ;;  %v15364_v18 = vld [vmem:[#allocation176_spill] sm:$0xff] }
 0x2b7   : > { %15354 = vst [vmem:[#allocation167_spill] sm:$0xff] %v11053_v5  ;;  %v4773_v5 = vadd.f32 %v4772_v42, %v4771_v39  ;;  %v8829_v39 = vld [vmem:[%s9181_s12 + $0x3d0] sm:$0xff]  ;;  %v4723_v42 = vrot.slane %v4722_v51, 2  ;;  %v4755_v23 = vsel %vm4544_vm6, %v4446_v3, 0.0  ;;  %v1965_v8 = vadd.f32 %v10804_v2, %v15361_v27 }
 0x2b8   : > { %4389 = vperm.xlu1 %8691, %v8828_v46   ;;  %15359 = vst [vmem:[#allocation169_spill] sm:$0xff] %v11070_v53  ;;  %v1128_v46 = vadd.f32 %v10667_v0, %v1127_v7  ;;  %v11086_v54 = vadd.f32 %v4697_v58, %v4696_v30  ;;  %v3241_v16 = vadd.f32 %v3240_v56, %v3239_v33  ;;  %v4742_v35 = vrot.slane %v4741_v29, 4  ;;  %v15368_v33 = vld [vmem:[#allocation13_spill] sm:$0xff] }
 0x2b9   : > { %15360 = vst [vmem:[#allocation23_spill] sm:$0xff] %v11076_v4  ;;  %4393 = vperm.xlu2 %8689, %v8829_v39   ;;  %8491 = vmatmul.msk.f32.gmra.mxu1 %vm1454_vm1, %v1376_v22  ;;  %v4449_v59 = vmul.f32 %v15364_v18, %v11015_v55  ;;  %v8830_v39 = vld [vmem:[%s9181_s12 + $0x3d8] sm:$0xff]  ;;  %v11093_v3 = vadd.f32 %v3237_v57, %v3236_v48  ;;  %v4774_v22 = vrot.slane %v4773_v5, 1  ;;  %v3246_v7 = vsel %vm524_vm0, %v2914_v20, 0.0  ;;  %v8832_v55 = vld [vmem:[%s9181_s12 + $0x3e8] sm:$0xff] }
 0x2ba   : > { %v11084_v12 = vpop.permute.xlu1 %4221  ;;  %15363 = vst [vmem:[#allocation232_spill] sm:$0xff] %v11086_v54  ;;  %4397 = vperm.xlu0 %8690, %v8830_v39   ;;  %v11091_v10 = vpop.permute.xlu2 %4261  ;;  %v11095_v27 = vadd.f32 %v4704_v43, %v4703_v24  ;;  %v4737_v30 = vrot.slane %v4736_v63, 2  ;;  %v4756_v56 = vrot.slane %v4755_v23, 4  ;;  %v2915_v58 = vmul.f32 %v15368_v33, %v11076_v4  ;;  %v15370_v48 = vld [vmem:[#allocation160_spill] sm:$0xff] }
 0x2bb   : > { %15362 = vst [vmem:[#allocation179_spill] sm:$0xff] %v11084_v12  ;;  %v11098_v12 = vadd.f32 %v4718_v13, %v4717_v15  ;;  %v4724_v39 = vadd.f32 %v4723_v42, %v4722_v51  ;;  %v4451_v57 = vmul.f32 %v15370_v48, %v11076_v4  ;;  %v11106_v24 = vmax.f32 %v1965_v8, 0.0  ;;  %v15373_v51 = vld [vmem:[#allocation182_spill] sm:$0xff] }
 0x2bc   : > { %15365 = vst [vmem:[#allocation176_spill] sm:$0xff] %v11091_v10  ;;  %v1130_v53 = vpop.f32.mrf.mxu0  ;;  %v1377_v43 = vmax.f32 %v1128_v46, 0.0  ;;  %v3247_v20 = vrot.slane %v3246_v7, 4  ;;  %v4743_v15 = vadd.f32 %v4742_v35, %v4741_v29  ;;  %v4776_v13 = vsel %vm4544_vm6, %v4449_v59, 0.0  ;;  %v11109_v10 = vpop.f32.mrf.mxu1  ;;  %v8831_v48 = vld [vmem:[%s9181_s12 + $0x3e0] sm:$0xff] }
 0x2bd   : > { %15366 = vst [vmem:[#allocation233_spill] sm:$0xff] %v11093_v3  ;;  %v3242_v3 = vrot.slane %v3241_v16, 2  ;;  %v11112_v33 = vadd.f32 %v4774_v22, %v4773_v5  ;;  %v4450_v42 = vmul.f32 %v15373_v51, %v11049_v49  ;;  %v11119_v46 = vpop.f32.mrf.mxu2  ;;  %8402 = vmatmul.msk.f32.gmra.mxu2 %vm524_vm0, %v10836_v60  ;;  %v4738_v29 = vadd.f32 %v4737_v30, %v4736_v63  ;;  %v15376_v5 = vld [vmem:[#allocation174_spill] sm:$0xff] }
 0x2be   : > { %15367 = vst [vmem:[#allocation234_spill] sm:$0xff] %v11095_v27  ;;  %v11102_v18 = vpop.permute.xlu0 %4229  ;;  %v4757_v35 = vadd.f32 %v4756_v56, %v4755_v23  ;;  %v3253_v59 = vsel %vm524_vm0, %v2915_v58, 0.0  ;;  %v4447_v22 = vmul.f32 %v15376_v5, %v10960_v14  ;;  %v4790_v51 = vsel %vm4544_vm6, %v4451_v57, 0.0  ;;  %v8833_v5 = vld [vmem:[%s9181_s12 + $0x3f0] sm:$0xff]  ;;  %v15383_v27 = vld [vmem:[#allocation190_spill] sm:$0xff] }
 0x2bf   : > { %15369 = vst [vmem:[#allocation13_spill] sm:$0xff] %v11102_v18  ;;  %v15374_v18 = vld [vmem:[#allocation187_spill] sm:$0xff]  ;;  %v1131_v60 = vadd.f32 %v10667_v0, %v1130_v53  ;;  %v11134_v23 = vadd.f32 %v3242_v3, %v3241_v16  ;;  %v4725_v30 = vrot.slane %v4724_v39, 1  ;;  %v3248_v56 = vadd.f32 %v3247_v20, %v3246_v7 }
 0x2c0   : > { %15371 = vst [vmem:[#allocation160_spill] sm:$0xff] %v11106_v24  ;;  %v1968_v8 = vadd.f32 %v10804_v2, %v15374_v18  ;;  %4401 = vperm.xlu1 %8691, %v8831_v48   ;;  %v4777_v18 = vrot.slane %v4776_v13, 4  ;;  %v15377_v48 = vld [vmem:[#allocation27_spill] sm:$0xff]  ;;  %v4744_v58 = vrot.slane %v4743_v15, 2  ;;  %v3254_v57 = vrot.slane %v3253_v59, 4 }
 0x2c1   : > { %15372 = vst [vmem:[#allocation235_spill] sm:$0xff] %v11109_v10  ;;  %4405 = vperm.xlu2 %8689, %v8832_v55   ;;  %v2916_v4 = vmul.f32 %v15377_v48, %v11106_v24  ;;  %8492 = vmatmul.msk.f32.gmra.mxu1 %vm1454_vm1, %v1377_v43  ;;  %v4783_v14 = vsel %vm4544_vm6, %v4450_v42, 0.0  ;;  %v15380_v48 = vld [vmem:[#allocation185_spill] sm:$0xff]  ;;  %v4739_v11 = vrot.slane %v4738_v29, 1  ;;  %v4791_v16 = vrot.slane %v4790_v51, 4 }
 0x2c2   : > { %15375 = vst [vmem:[#allocation182_spill] sm:$0xff] %v11119_v46  ;;  %v11132_v63 = vpop.permute.xlu1 %4233  ;;  %4409 = vperm.xlu0 %8690, %v8833_v5   ;;  %v4452_v49 = vmul.f32 %v15380_v48, %v11106_v24  ;;  %v11142_v43 = vmax.f32 %v1968_v8, 0.0  ;;  %v4762_v3 = vsel %vm4544_vm6, %v4447_v22, 0.0  ;;  %v4778_v20 = vadd.f32 %v4777_v18, %v4776_v13  ;;  %v8834_v22 = vld [vmem:[%s9181_s12 + $0x3f8] sm:$0xff] }
 0x2c3   : > { %15378 = vst [vmem:[#allocation187_spill] sm:$0xff] %v11132_v63  ;;  %v11137_v55 = vpop.permute.xlu2 %4273  ;;  %v4758_v63 = vrot.slane %v4757_v35, 2  ;;  %v3260_v5 = vsel %vm524_vm0, %v2916_v4, 0.0  ;;  %v4726_v46 = vadd.f32 %v4725_v30, %v4724_v39  ;;  %v3249_v42 = vrot.slane %v3248_v56, 2 }
 0x2c4   : > { %15379 = vst [vmem:[#allocation174_spill] sm:$0xff] %v11137_v55  ;;  %v1133_v53 = vpop.f32.mrf.mxu0  ;;  %v1378_v55 = vmax.f32 %v1131_v60, 0.0  ;;  %v4745_v10 = vadd.f32 %v4744_v58, %v4743_v15  ;;  %v4784_v50 = vrot.slane %v4783_v14, 4  ;;  %v11148_v48 = vpop.f32.mrf.mxu1  ;;  %v3255_v8 = vadd.f32 %v3254_v57, %v3253_v59  ;;  %v15385_v15 = vld [vmem:[#allocation26_spill] sm:$0xff] }
 0x2c5   : > { %15381 = vst [vmem:[#allocation27_spill] sm:$0xff] %v11142_v43  ;;  %v4763_v24 = vrot.slane %v4762_v3, 4  ;;  %v4797_v9 = vsel %vm4544_vm6, %v4452_v49, 0.0  ;;  %v4453_v54 = vmul.f32 %v15383_v27, %v11142_v43  ;;  %v11154_v13 = vpop.f32.mrf.mxu2  ;;  %8403 = vmatmul.msk.f32.gmra.mxu2 %vm524_vm0, %v10862_v26  ;;  %v4792_v4 = vadd.f32 %v4791_v16, %v4790_v51  ;;  %v15386_v59 = vld [vmem:[#allocation6_spill] sm:$0xff] }
 0x2c6   : > { %v11145_v7 = vpop.permute.xlu0 %4241  ;;  %15384 = vst [vmem:[#allocation190_spill] sm:$0xff] %v11154_v13  ;;  %v3261_v39 = vrot.slane %v3260_v5, 4  ;;  %v2917_v18 = vmul.f32 %v15385_v15, %v11142_v43  ;;  %v1971_v60 = vadd.f32 %v10804_v2, %v15386_v59  ;;  %v9050_v49 = vmov 31   ;;  %v8835_v26 = vld [vmem:[%s9181_s12] sm:$0xff] }
 0x2c7   : > { %15382 = vst [vmem:[#allocation185_spill] sm:$0xff] %v11145_v7  ;;  %v3244_v27 = vrot.slane %v11134_v23, 1  ;;  %v4759_v30 = vadd.f32 %v4758_v63, %v4757_v35  ;;  %v4779_v58 = vrot.slane %v4778_v20, 2  ;;  %v1134_v57 = vadd.f32 %v10667_v0, %v1133_v53 }
 0x2c8   : > { %4413 = vperm.xlu1 %8691, %v8834_v22   ;;  %v11168_v16 = vadd.f32 %v4739_v11, %v4738_v29  ;;  %v4746_v22 = vrot.slane %v4745_v10, 1  ;;  %v4785_v15 = vadd.f32 %v4784_v50, %v4783_v14  ;;  %v4798_v59 = vrot.slane %v4797_v9, 4 }
 0x2c9   : > { %8692 = vset.pattern.permute.xlu2 %v9050_v49  ;;  %8493 = vmatmul.msk.f32.gmra.mxu1 %vm1454_vm1, %v1378_v55  ;;  %v3250_v43 = vadd.f32 %v3249_v42, %v3248_v56  ;;  %v3256_v35 = vrot.slane %v3255_v8, 2  ;;  %v4764_v63 = vadd.f32 %v4763_v24, %v4762_v3  ;;  %v4804_v13 = vsel %vm4544_vm6, %v4453_v54, 0.0  ;;  %v8836_v55 = vld [vmem:[%s9181_s12 + $0x8] sm:$0xff] }
 0x2ca   : > { %5442 = vperm.xlu2 %8692, %v8835_v26   ;;  %v11166_v51 = vpop.permute.xlu1 %4245  ;;  %8693 = vset.pattern.permute.xlu0 %v9050_v49  ;;  %v4793_v53 = vrot.slane %v4792_v4, 2  ;;  %v3262_v26 = vadd.f32 %v3261_v39, %v3260_v5  ;;  %v11175_v11 = vmax.f32 %v1971_v60, 0.0  ;;  %v11181_v14 = vsel %vm7114_vm2, %v4726_v46, %v11098_v12 }
 0x2cb   : > { %15387 = vst [vmem:[#allocation26_spill] sm:$0xff] %v11166_v51  ;;  %v11170_v7 = vpop.permute.xlu2 %4285  ;;  %5446 = vperm.xlu0 %8693, %v8836_v55   ;;  %v3267_v51 = vsel %vm524_vm0, %v2917_v18, 0.0  ;;  %v4760_v50 = vrot.slane %v4759_v30, 1  ;;  %v4780_v56 = vadd.f32 %v4779_v58, %v4778_v20  ;;  %v1379_v24 = vmax.f32 %v1134_v57, 0.0  ;;  %v8837_v58 = vld [vmem:[%s9181_s12 + $0x10] sm:$0xff] }
 0x2cc   : > { %15388 = vst [vmem:[#allocation6_spill] sm:$0xff] %v11170_v7  ;;  %v1136_v0 = vpop.f32.mrf.mxu0  ;;  %v11184_v54 = vadd.f32 %v3244_v27, %v11134_v23  ;;  %v4786_v3 = vrot.slane %v4785_v15, 2  ;;  %v4799_v42 = vadd.f32 %v4798_v59, %v4797_v9  ;;  %v4805_v5 = vrot.slane %v4804_v13, 4  ;;  %v11186_v39 = vpop.f32.mrf.mxu1  ;;  %v15393_v9 = vld [vmem:[#allocation16_spill] sm:$0xff] }
 0x2cd   : > { %15389 = vst [vmem:[#allocation236_spill] sm:$0xff] %v11175_v11  ;;  %v3251_v18 = vrot.slane %v3250_v43, 1  ;;  %v3257_v60 = vadd.f32 %v3256_v35, %v3255_v8  ;;  %v4765_v55 = vrot.slane %v4764_v63, 2  ;;  %v3268_v7 = vrot.slane %v3267_v51, 4  ;;  %v11188_v12 = vpop.f32.mrf.mxu2  ;;  %8404 = vmatmul.msk.f32.gmra.mxu2 %vm524_vm0, %v10867_v6  ;;  %v11205_v6 = vld [vmem:[%s14803_s2] ss:$0 sm:$0xff] }
 0x2ce   : > { %v11177_v29 = vpop.permute.xlu0 %4253  ;;  %15391 = vst [vmem:[#allocation238_spill] sm:$0xff] %v11184_v54  ;;  %v11192_v46 = vadd.f32 %v4746_v22, %v4745_v10  ;;  %v4794_v23 = vadd.f32 %v4793_v53, %v4792_v4  ;;  %v3263_v20 = vrot.slane %v3262_v26, 2  ;;  %v2918_v27 = vmul.f32 %v15393_v9, %v11175_v11  ;;  %v8839_v4 = vld [vmem:[%s9181_s12 + $0x18] sm:$0xff] }
 0x2cf   : > { %15390 = vst [vmem:[#allocation237_spill] sm:$0xff] %v11177_v29  ;;  %v11197_v57 = vadd.f32 %v4760_v50, %v4759_v30  ;;  %v4781_v8 = vrot.slane %v4780_v56, 1  ;;  %v1137_v10 = vadd.f32 %v11205_v6, %v1136_v0  ;;  %v4787_v30 = vadd.f32 %v4786_v3, %v4785_v15  ;;  %v15395_v53 = vld [vmem:[#allocation168_spill] sm:$0xff] }
 0x2d0   : > { %8694 = vset.pattern.permute.xlu1 %v9050_v49  ;;  %15392 = vst [vmem:[#allocation239_spill] sm:$0xff] %v11188_v12  ;;  %v1974_v49 = vadd.f32 %v10804_v2, %v10549_v45  ;;  %v4800_v59 = vrot.slane %v4799_v42, 2  ;;  %v4806_v35 = vadd.f32 %v4805_v5, %v4804_v13  ;;  %v4454_v45 = vmul.f32 %v15395_v53, %v11175_v11  ;;  %v8840_v29 = vld [vmem:[%s9181_s12 + $0x30] sm:$0xff]  ;;  %v15401_v53 = vld [vmem:[#allocation30_spill] sm:$0xff] }
 0x2d1   : > { %5450 = vperm.xlu1 %8694, %v8837_v58   ;;  %8494 = vmatmul.msk.f32.gmra.mxu1 %vm1454_vm1, %v1379_v24  ;;  %v11215_v24 = vadd.f32 %v3251_v18, %v3250_v43  ;;  %v3258_v9 = vrot.slane %v3257_v60, 1  ;;  %v11217_v58 = vadd.f32 %v4765_v55, %v4764_v63  ;;  %v3269_v54 = vadd.f32 %v3268_v7, %v3267_v51 }
 0x2d2   : > { %5454 = vperm.xlu2 %8692, %v8839_v4   ;;  %v11209_v22 = vpop.permute.xlu1 %4257  ;;  %v4795_v4 = vrot.slane %v4794_v23, 1  ;;  %v3264_v12 = vadd.f32 %v3263_v20, %v3262_v26  ;;  %v3274_v15 = vsel %vm524_vm0, %v2918_v27, 0.0  ;;  %v7130_v13 = vsel %vm7118_vm4, %v10796_v52, %v10922_v28 }
 0x2d3   : > { %15394 = vst [vmem:[#allocation16_spill] sm:$0xff] %v11209_v22  ;;  %v11213_v50 = vpop.permute.xlu2 %4297  ;;  %5466 = vperm.xlu0 %8693, %v8840_v29   ;;  %v4782_v5 = vadd.f32 %v4781_v8, %v4780_v56  ;;  %v11226_v43 = vmax.f32 %v1974_v49, 0.0  ;;  %v1977_v63 = vadd.f32 %v10804_v2, %v10593_v61  ;;  %v1380_v7 = vmax.f32 %v1137_v10, 0.0  ;;  %v8841_v49 = vld [vmem:[%s9181_s12 + $0x20] sm:$0xff] }
 0x2d4   : > { %15396 = vst [vmem:[#allocation168_spill] sm:$0xff] %v11213_v50  ;;  %v1139_v0 = vpop.f32.mrf.mxu0  ;;  %v4788_v51 = vrot.slane %v4787_v30, 1  ;;  %v4801_v29 = vadd.f32 %v4800_v59, %v4799_v42  ;;  %v4807_v18 = vrot.slane %v4806_v35, 2  ;;  %v4811_v26 = vsel %vm4544_vm6, %v4454_v45, 0.0  ;;  %v11231_v55 = vpop.f32.mrf.mxu1  ;;  %v15444_v50 = vld [vmem:[#allocation195_spill] sm:$0xff] }
 0x2d5   : > { %15397 = vst [vmem:[#allocation240_spill] sm:$0xff] %v11215_v24  ;;  %v3270_v27 = vrot.slane %v3269_v54, 2  ;;  %v3275_v52 = vrot.slane %v3274_v15, 4  ;;  %v11234_v28 = vpop.f32.mrf.mxu2  ;;  %v7131_v56 = vsel %vm7120_vm5, %v10941_v31, %v7130_v13  ;;  %8405 = vmatmul.msk.f32.gmra.mxu2 %vm524_vm0, %v10878_v19  ;;  %v11240_v61 = vadd.f32 %v3258_v9, %v3257_v60  ;;  %v8842_v31 = vld [vmem:[%s9181_s12 + $0x28] sm:$0xff] }
 0x2d6   : > { %v11221_v3 = vpop.permute.xlu0 %4265  ;;  %15399 = vst [vmem:[#allocation242_spill] sm:$0xff] %v11226_v43  ;;  %v11242_v42 = vadd.f32 %v4795_v4, %v4794_v23  ;;  %v3265_v8 = vrot.slane %v3264_v12, 1  ;;  %v7132_v10 = vsel %vm7122_vm7, %v10972_v21, %v7131_v56  ;;  %v4812_v59 = vrot.slane %v4811_v26, 4 }
 0x2d7   : > { %15398 = vst [vmem:[#allocation241_spill] sm:$0xff] %v11221_v3  ;;  %v2919_v45 = vmul.f32 %v15401_v53, %v11226_v43  ;;  %v11249_v20 = vmax.f32 %v1977_v63, 0.0  ;;  %v1140_v19 = vadd.f32 %v11205_v6, %v1139_v0  ;;  %v7149_v23 = vsel %vm7114_vm2, %v4782_v5, %v11112_v33  ;;  %v8843_v53 = vld [vmem:[%s9181_s12 + $0x48] sm:$0xff] }
 0x2d8   : > { %15400 = vst [vmem:[#allocation243_spill] sm:$0xff] %v11240_v61  ;;  %v4789_v9 = vadd.f32 %v4788_v51, %v4787_v30  ;;  %v4802_v21 = vrot.slane %v4801_v29, 1  ;;  %v4808_v4 = vadd.f32 %v4807_v18, %v4806_v35  ;;  %v11260_v56 = vadd.f32 %v3270_v27, %v3269_v54 }
 0x2d9   : > { %5458 = vperm.xlu1 %8694, %v8841_v49   ;;  %15402 = vst [vmem:[#allocation30_spill] sm:$0xff] %v11249_v20  ;;  %8495 = vmatmul.msk.f32.gmra.mxu1 %vm1454_vm1, %v1380_v7  ;;  %v3276_v63 = vadd.f32 %v3275_v52, %v3274_v15  ;;  %v15406_v49 = vld [vmem:[#allocation192_spill] sm:$0xff]  ;;  %v11267_v61 = vadd.f32 %v3265_v8, %v3264_v12  ;;  %v15409_v54 = vrot.slane %v10975_v38, 1  ;;  %v3281_v51 = vsel %vm524_vm0, %v2919_v45, 0.0 }
 0x2da   : > { %5462 = vperm.xlu2 %8692, %v8842_v31   ;;  %v11254_v60 = vpop.permute.xlu1 %4269  ;;  %15405 = vst [vmem:[#allocation246_spill] sm:$0xff] %v11260_v56  ;;  %v4455_v7 = vmul.f32 %v15406_v49, %v11226_v43  ;;  %v7133_v31 = vsel %vm7124_vm8, %v10850_v1, %v7132_v10  ;;  %v1980_v33 = vadd.f32 %v10804_v2, %v10644_v25  ;;  %v15410_v1 = vld [vmem:[#allocation29_spill] sm:$0xff]  ;;  %v1381_v18 = vmax.f32 %v1140_v19, 0.0  ;;  %v15460_v43 = vld [vmem:[#allocation36_spill] sm:$0xff] }
 0x2db   : > { %15403 = vst [vmem:[#allocation244_spill] sm:$0xff] %v11254_v60  ;;  %v11258_v13 = vpop.permute.xlu2 %4309  ;;  %5478 = vperm.xlu0 %8693, %v8843_v53   ;;  %v4656_v35 = vadd.f32 %v15409_v54, %v10975_v38  ;;  %v7143_v15 = vsel %vm7116_vm3, %v11024_v44, %v11181_v14  ;;  %v4813_v5 = vadd.f32 %v4812_v59, %v4811_v26  ;;  %v4809_v52 = vrot.slane %v4808_v4, 1  ;;  %v15427_v44 = vld [vmem:[#allocation12_spill] sm:$0xff]  ;;  %v15448_v60 = vld [vmem:[#allocation9_spill] sm:$0xff] }
 0x2dc   : > { %15404 = vst [vmem:[#allocation245_spill] sm:$0xff] %v11258_v13  ;;  %v1142_v0 = vpop.f32.mrf.mxu0  ;;  %v2920_v12 = vmul.f32 %v15410_v1, %v11249_v20  ;;  %v11283_v25 = vsel %vm7116_vm3, %v4789_v9, %v7149_v23  ;;  %v11285_v27 = vadd.f32 %v4802_v21, %v4801_v29  ;;  %v3277_v14 = vrot.slane %v3276_v63, 2  ;;  %v8844_v23 = vld [vmem:[%s9181_s12 + $0x38] sm:$0xff]  ;;  %v15416_v1 = vld [vmem:[#allocation127_spill] sm:$0xff] }
 0x2dd   : > { %15407 = vst [vmem:[#allocation192_spill] sm:$0xff] %v11267_v61  ;;  %v11290_v38 = vsel %vm7126_vm9, %v4656_v35, %v7133_v31  ;;  %v4818_v26 = vsel %vm4544_vm6, %v4455_v7, 0.0  ;;  %v11294_v10 = vpop.f32.mrf.mxu2  ;;  %v7144_v59 = vsel %vm7118_vm4, %v11168_v16, %v7143_v15  ;;  %8406 = vmatmul.msk.f32.gmra.mxu2 %vm524_vm0, %v10904_v34  ;;  %v3282_v29 = vrot.slane %v3281_v51, 4  ;;  %v8845_v16 = vld [vmem:[%s9181_s12 + $0x40] sm:$0xff] }
 0x2de   : > { %v11271_v30 = vpop.permute.xlu0 %4277  ;;  %v11287_v8 = vpop.f32.mrf.mxu1  ;;  %v4456_v45 = vmul.f32 %v10528_v36, %v11249_v20  ;;  %v11302_v19 = vmax.f32 %v1980_v33, 0.0  ;;  %v7117_v9 = vsel %vm7116_vm3, %v10775_v40, %v10811_v32  ;;  %v4814_v21 = vrot.slane %v4813_v5, 2  ;;  %v8846_v35 = vld [vmem:[%s9181_s12 + $0x60] sm:$0xff] }
 0x2df   : > { %15408 = vst [vmem:[#allocation247_spill] sm:$0xff] %v11271_v30  ;;  %v3288_v49 = vsel %vm524_vm0, %v2920_v12, 0.0  ;;  %v1143_v34 = vadd.f32 %v11205_v6, %v1142_v0  ;;  %v15413_v36 = vrot.slane %v10852_v17, 1  ;;  %v11319_v31 = vadd.f32 %v4809_v52, %v4808_v4  ;;  %v15417_v12 = vld [vmem:[#allocation223_spill] sm:$0xff] }
 0x2e0   : > { %15411 = vst [vmem:[#allocation29_spill] sm:$0xff] %v11302_v19  ;;  %v4819_v33 = vrot.slane %v4818_v26, 4  ;;  %v1983_v40 = vadd.f32 %v10804_v2, %v10696_v47  ;;  %v7145_v0 = vsel %vm7120_vm5, %v11192_v46, %v7144_v59  ;;  %v11327_v54 = vadd.f32 %v3277_v14, %v3276_v63  ;;  %v15419_v52 = vld [vmem:[#allocation119_spill] sm:$0xff] }
 0x2e1   : > { %5470 = vperm.xlu1 %8694, %v8844_v23   ;;  %8496 = vmatmul.msk.f32.gmra.mxu1 %vm1454_vm1, %v1381_v18  ;;  %v11317_v53 = vadd.f32 %v15413_v36, %v10852_v17  ;;  %v7119_v17 = vsel %vm7118_vm4, %v15416_v1, %v7117_v9  ;;  %v15418_v4 = vrot.slane %v15417_v12, 1  ;;  %v3111_v47 = vrot.slane %v15419_v52, 1  ;;  %v15421_v63 = vld [vmem:[#allocation19_spill] sm:$0xff]  ;;  %v11350_v36 = vld [vmem:[%s14805_s4] ss:$0 sm:$0xff] }
 0x2e2   : > { %5474 = vperm.xlu2 %8692, %v8845_v16   ;;  %v11312_v7 = vpop.permute.xlu1 %4281  ;;  %15415 = vst [vmem:[#allocation250_spill] sm:$0xff] %v11327_v54  ;;  %v11338_v2 = vadd.f32 %v3282_v29, %v3281_v51  ;;  %v3289_v23 = vrot.slane %v3288_v49, 4  ;;  %v4825_v46 = vsel %vm4544_vm6, %v4456_v45, 0.0  ;;  %v2921_v14 = vmul.f32 %v15421_v63, %v11302_v19  ;;  %v15423_v16 = vld [vmem:[#allocation175_spill] sm:$0xff] }
 0x2e3   : > { %15412 = vst [vmem:[#allocation248_spill] sm:$0xff] %v11312_v7  ;;  %v11323_v32 = vpop.permute.xlu2 %4321  ;;  %5490 = vperm.xlu0 %8693, %v8846_v35   ;;  %v11335_v18 = vadd.f32 %v15418_v4, %v15417_v12  ;;  %v4457_v9 = vmul.f32 %v15423_v16, %v11302_v19  ;;  %v15424_v35 = vld [vmem:[#allocation131_spill] sm:$0xff]  ;;  %v1382_v29 = vmax.f32 %v1143_v34, 0.0  ;;  %v7146_v45 = vsel %vm7122_vm7, %v11074_v37, %v7145_v0 }
 0x2e4   : > { %15414 = vst [vmem:[#allocation249_spill] sm:$0xff] %v11323_v32  ;;  %v1145_v15 = vpop.f32.mrf.mxu0  ;;  %v1986_v51 = vadd.f32 %v11350_v36, %v15424_v35  ;;  %v11356_v1 = vadd.f32 %v4819_v33, %v4818_v26  ;;  %v11358_v12 = vmax.f32 %v1983_v40, 0.0  ;;  %v15426_v63 = vld [vmem:[#allocation215_spill] sm:$0xff]  ;;  %v15428_v61 = vrot.slane %v15427_v44, 2  ;;  %v15429_v32 = vld [vmem:[#allocation17_spill] sm:$0xff]  ;;  %v15432_v40 = vld [vmem:[#allocation200_spill] sm:$0xff] }
 0x2e5   : > { %15420 = vst [vmem:[#allocation127_spill] sm:$0xff] %v11338_v2  ;;  %v7121_v16 = vsel %vm7120_vm5, %v15426_v63, %v7119_v17  ;;  %v11369_v35 = vadd.f32 %v4814_v21, %v4813_v5  ;;  %v4826_v34 = vrot.slane %v4825_v46, 4  ;;  %v1989_v37 = vadd.f32 %v11350_v36, %v15429_v32  ;;  %v11373_v26 = vpop.f32.mrf.mxu2  ;;  %v15431_v33 = vld [vmem:[#allocation21_spill] sm:$0xff]  ;;  %v8848_v5 = vld [vmem:[%s9181_s12 + $0x50] sm:$0xff] }
 0x2e6   : > { %v11343_v59 = vpop.permute.xlu0 %4289  ;;  %15425 = vst [vmem:[#allocation119_spill] sm:$0xff] %v11358_v12  ;;  %v11360_v4 = vpop.f32.mrf.mxu1  ;;  %v11367_v24 = vadd.f32 %v15428_v61, %v15427_v44  ;;  %8407 = vmatmul.msk.f32.gmra.mxu2 %vm524_vm0, %v15431_v33  ;;  %v15433_v0 = vrot.slane %v15432_v40, 1  ;;  %v3290_v63 = vadd.f32 %v3289_v23, %v3288_v49  ;;  %v3295_v61 = vsel %vm524_vm0, %v2921_v14, 0.0  ;;  %v8849_v23 = vld [vmem:[%s9181_s12 + $0x58] sm:$0xff] }
 0x2e7   : > { %15422 = vst [vmem:[#allocation223_spill] sm:$0xff] %v11343_v59  ;;  %v11386_v44 = vsel %vm7124_vm8, %v11197_v57, %v7146_v45  ;;  %v11389_v21 = vadd.f32 %v3111_v47, %v15419_v52  ;;  %v4832_v32 = vsel %vm4544_vm6, %v4457_v9, 0.0  ;;  %v11392_v33 = vmax.f32 %v1986_v51, 0.0  ;;  %v15437_v47 = vld [vmem:[#allocation33_spill] sm:$0xff] }
 0x2e8   : > { %15430 = vst [vmem:[#allocation19_spill] sm:$0xff] %v11373_v26  ;;  %v11380_v17 = vadd.f32 %v15433_v0, %v15432_v40  ;;  %v1146_v49 = vadd.f32 %v11205_v6, %v1145_v15  ;;  %v15436_v40 = vld [vmem:[#allocation211_spill] sm:$0xff]  ;;  %v2922_v9 = vmul.f32 %v15437_v47, %v11358_v12  ;;  %v4827_v0 = vadd.f32 %v4826_v34, %v4825_v46  ;;  %v8850_v59 = vld [vmem:[%s9181_s12 + $0x78] sm:$0xff] }
 0x2e9   : > { %5482 = vperm.xlu1 %8694, %v8848_v5   ;;  %15434 = vst [vmem:[#allocation175_spill] sm:$0xff] %v11392_v33  ;;  %8497 = vmatmul.msk.f32.gmra.mxu1 %vm1454_vm1, %v1382_v29  ;;  %v7123_v57 = vsel %vm7122_vm7, %v15436_v40, %v7121_v16  ;;  %v3118_v29 = vrot.slane %v11367_v24, 1  ;;  %v3296_v15 = vrot.slane %v3295_v61, 4  ;;  %v15439_v5 = vld [vmem:[#allocation197_spill] sm:$0xff]  ;;  %v11410_v13 = vmax.f32 %v1989_v37, 0.0  ;;  %v15445_v34 = vld [vmem:[#allocation32_spill] sm:$0xff] }
 0x2ea   : > { %5486 = vperm.xlu2 %8692, %v8849_v23   ;;  %v11397_v14 = vpop.permute.xlu1 %4293  ;;  %v4458_v23 = vmul.f32 %v15439_v5, %v11358_v12  ;;  %v3291_v40 = vrot.slane %v3290_v63, 2  ;;  %v4833_v45 = vrot.slane %v4832_v32, 4  ;;  %v15442_v2 = vld [vmem:[#allocation217_spill] sm:$0xff]  ;;  %v15446_v37 = vld [vmem:[#allocation111_spill] sm:$0xff]  ;;  %v1383_v7 = vmax.f32 %v1146_v49, 0.0 }
 0x2eb   : > { %15435 = vst [vmem:[#allocation131_spill] sm:$0xff] %v11397_v14  ;;  %v11405_v51 = vpop.permute.xlu2 %4333  ;;  %5502 = vperm.xlu0 %8693, %v8850_v59   ;;  %v7125_v47 = vsel %vm7124_vm8, %v15442_v2, %v7123_v57  ;;  %v2923_v14 = vmul.f32 %v15445_v34, %v11392_v33  ;;  %v4459_v5 = vmul.f32 %v15446_v37, %v11392_v33  ;;  %v15447_v59 = vld [vmem:[#allocation198_spill] sm:$0xff]  ;;  %v4828_v49 = vrot.slane %v4827_v0, 2 }
 0x2ec   : > { %15438 = vst [vmem:[#allocation215_spill] sm:$0xff] %v11405_v51  ;;  %v1148_v16 = vpop.f32.mrf.mxu0  ;;  %v15443_v51 = vld [vmem:[#allocation193_spill] sm:$0xff]  ;;  %v1992_v2 = vadd.f32 %v11350_v36, %v15448_v60  ;;  %v11436_v34 = vsel %vm7126_vm9, %v11317_v53, %v7125_v47  ;;  %v3297_v37 = vadd.f32 %v3296_v15, %v3295_v61  ;;  %v15452_v60 = vld [vmem:[#allocation147_spill] sm:$0xff]  ;;  %v3292_v22 = vadd.f32 %v3291_v40, %v3290_v63 }
 0x2ed   : > { %15440 = vst [vmem:[#allocation12_spill] sm:$0xff] %v11410_v13  ;;  %v7497_v46 = vsel %vm7114_vm2, %v15444_v50, %v15443_v51  ;;  %v15449_v50 = vrot.slane %v11217_v58, 1  ;;  %v11441_v3 = vpop.f32.mrf.mxu2  ;;  %v4834_v33 = vadd.f32 %v4833_v45, %v4832_v32  ;;  %v8851_v53 = vld [vmem:[%s9181_s12 + $0x68] sm:$0xff]  ;;  %v8852_v63 = vld [vmem:[%s9181_s12 + $0x70] sm:$0xff] }
 0x2ee   : > { %v11413_v52 = vpop.permute.xlu0 %4301  ;;  %v7498_v30 = vsel %vm7116_vm3, %v15447_v59, %v7497_v46  ;;  %v11429_v57 = vpop.f32.mrf.mxu1  ;;  %v4839_v46 = vsel %vm4544_vm6, %v4458_v23, 0.0  ;;  %15451 = vst [vmem:[#allocation21_spill] sm:$0xff] %v11441_v3  ;;  %8408 = vmatmul.msk.f32.gmra.mxu2 %vm524_vm0, %v15452_v60  ;;  %v15454_v47 = vld [vmem:[#allocation199_spill] sm:$0xff]  ;;  %v3309_v23 = vsel %vm524_vm0, %v2923_v14, 0.0  ;;  %v1149_v60 = vadd.f32 %v11205_v6, %v1148_v16  ;;  %v15538_v3 = vld [vmem:[#allocation202_spill] sm:$0xff] }
 0x2ef   : > { %15441 = vst [vmem:[#allocation17_spill] sm:$0xff] %v11413_v52  ;;  %v3302_v52 = vsel %vm524_vm0, %v2922_v9, 0.0  ;;  %v4768_v51 = vadd.f32 %v15449_v50, %v11217_v58  ;;  %v15450_v9 = vld [vmem:[#allocation22_spill] sm:$0xff]  ;;  %v15453_v58 = vld [vmem:[#allocation183_spill] sm:$0xff]  ;;  %v7499_v61 = vsel %vm7118_vm4, %v15454_v47, %v7498_v30  ;;  %v4840_v45 = vrot.slane %v4839_v46, 4 }
 0x2f0   : > { %v2924_v59 = vmul.f32 %v15450_v9, %v11410_v13  ;;  %v4460_v50 = vmul.f32 %v15453_v58, %v11410_v13  ;;  %v3303_v15 = vrot.slane %v3302_v52, 4  ;;  %v4846_v9 = vsel %vm4544_vm6, %v4459_v5, 0.0  ;;  %v8853_v16 = vld [vmem:[%s9181_s12 + $0x90] sm:$0xff] }
 0x2f1   : > { %5494 = vperm.xlu1 %8694, %v8851_v53   ;;  %8498 = vmatmul.msk.f32.gmra.mxu1 %vm1454_vm1, %v1383_v7  ;;  %v11457_v40 = vmax.f32 %v1992_v2, 0.0  ;;  %v11462_v30 = vadd.f32 %v3118_v29, %v11367_v24  ;;  %v15458_v53 = vld [vmem:[#allocation201_spill] sm:$0xff]  ;;  %v4829_v5 = vadd.f32 %v4828_v49, %v4827_v0  ;;  %v3298_v47 = vrot.slane %v3297_v37, 2 }
 0x2f2   : > { %5498 = vperm.xlu2 %8692, %v8852_v63   ;;  %v11455_v32 = vpop.permute.xlu1 %4305  ;;  %v7500_v14 = vsel %vm7120_vm5, %v15458_v53, %v7499_v61  ;;  %v3316_v7 = vsel %vm524_vm0, %v2924_v59, 0.0  ;;  %v3310_v2 = vrot.slane %v3309_v23, 4  ;;  %v4847_v13 = vrot.slane %v4846_v9, 4 }
 0x2f3   : > { %15455 = vst [vmem:[#allocation200_spill] sm:$0xff] %v11455_v32  ;;  %v11459_v58 = vpop.permute.xlu2 %4345  ;;  %5514 = vperm.xlu0 %8693, %v8853_v16   ;;  %v11470_v32 = vsel %vm7126_vm9, %v4768_v51, %v11386_v44  ;;  %v7501_v29 = vsel %vm7122_vm7, %v11380_v17, %v7500_v14  ;;  %v3293_v0 = vrot.slane %v3292_v22, 1  ;;  %v4835_v49 = vrot.slane %v4834_v33, 2  ;;  %v15461_v51 = vld [vmem:[#allocation141_spill] sm:$0xff] }
 0x2f4   : > { %15456 = vst [vmem:[#allocation211_spill] sm:$0xff] %v11457_v40  ;;  %v1151_v63 = vpop.f32.mrf.mxu0  ;;  %v3304_v61 = vadd.f32 %v3303_v15, %v3302_v52  ;;  %v1384_v59 = vmax.f32 %v1149_v60, 0.0  ;;  %v4841_v53 = vadd.f32 %v4840_v45, %v4839_v46  ;;  %v3317_v16 = vrot.slane %v3316_v7, 4  ;;  %v15463_v14 = vld [vmem:[#allocation149_spill] sm:$0xff] }
 0x2f5   : > { %15457 = vst [vmem:[#allocation33_spill] sm:$0xff] %v11459_v58  ;;  %v4853_v58 = vsel %vm4544_vm6, %v4460_v50, 0.0  ;;  %v2925_v44 = vmul.f32 %v15460_v43, %v11457_v40  ;;  %v1995_v11 = vadd.f32 %v11350_v36, %v15461_v51  ;;  %v4830_v50 = vrot.slane %v4829_v5, 1  ;;  %v11483_v17 = vpop.f32.mrf.mxu2  ;;  %v15464_v43 = vld [vmem:[#allocation203_spill] sm:$0xff]  ;;  %v8854_v45 = vld [vmem:[%s9181_s12 + $0x80] sm:$0xff] }
 0x2f6   : > { %v11473_v24 = vpop.permute.xlu0 %4313  ;;  %v11481_v12 = vpop.f32.mrf.mxu1  ;;  %v4854_v54 = vrot.slane %v4853_v58, 4  ;;  %15462 = vst [vmem:[#allocation217_spill] sm:$0xff] %v11483_v17  ;;  %8409 = vmatmul.msk.f32.gmra.mxu2 %vm524_vm0, %v15463_v14  ;;  %v7502_v52 = vsel %vm7124_vm8, %v11389_v21, %v7501_v29  ;;  %v3311_v46 = vadd.f32 %v3310_v2, %v3309_v23  ;;  %v4848_v15 = vadd.f32 %v4847_v13, %v4846_v9  ;;  %v8855_v23 = vld [vmem:[%s9181_s12 + $0x88] sm:$0xff] }
 0x2f7   : > { %15459 = vst [vmem:[#allocation197_spill] sm:$0xff] %v11473_v24  ;;  %v3299_v24 = vadd.f32 %v3298_v47, %v3297_v37  ;;  %v4461_v60 = vmul.f32 %v15464_v43, %v11457_v40  ;;  %v7137_v37 = vsel %vm7118_vm4, %v11062_v62, %v11058_v41  ;;  %v11495_v47 = vadd.f32 %v3293_v0, %v3292_v22  ;;  %v8856_v0 = vld [vmem:[%s9181_s12 + $0xa8] sm:$0xff]  ;;  %v15475_v40 = vld [vmem:[#allocation232_spill] sm:$0xff] }
 0x2f8   : > { %v4836_v51 = vadd.f32 %v4835_v49, %v4834_v33  ;;  %v3305_v20 = vrot.slane %v3304_v61, 2  ;;  %v1152_v21 = vadd.f32 %v11205_v6, %v1151_v63  ;;  %v4842_v9 = vrot.slane %v4841_v53, 2  ;;  %v15469_v63 = vld [vmem:[#allocation142_spill] sm:$0xff] }
 0x2f9   : > { %5506 = vperm.xlu1 %8694, %v8854_v45   ;;  %15465 = vst [vmem:[#allocation193_spill] sm:$0xff] %v11495_v47  ;;  %8499 = vmatmul.msk.f32.gmra.mxu1 %vm1454_vm1, %v1384_v59  ;;  %v3318_v2 = vadd.f32 %v3317_v16, %v3316_v7  ;;  %v3323_v29 = vsel %vm524_vm0, %v2925_v44, 0.0  ;;  %v11503_v14 = vmax.f32 %v1995_v11, 0.0  ;;  %v11507_v62 = vadd.f32 %v4830_v50, %v4829_v5 }
 0x2fa   : > { %5510 = vperm.xlu2 %8692, %v8855_v23   ;;  %v11500_v13 = vpop.permute.xlu1 %4317  ;;  %v3300_v22 = vrot.slane %v3299_v24, 1  ;;  %v4855_v33 = vadd.f32 %v4854_v54, %v4853_v58  ;;  %v7138_v59 = vsel %vm7120_vm5, %v15469_v63, %v7137_v37  ;;  %v3312_v43 = vrot.slane %v3311_v46, 2  ;;  %v15472_v37 = vld [vmem:[#allocation148_spill] sm:$0xff] }
 0x2fb   : > { %15466 = vst [vmem:[#allocation195_spill] sm:$0xff] %v11500_v13  ;;  %v11505_v41 = vpop.permute.xlu2 %4357  ;;  %5526 = vperm.xlu0 %8693, %v8856_v0   ;;  %v4849_v45 = vrot.slane %v4848_v15, 2  ;;  %v4860_v7 = vsel %vm4544_vm6, %v4461_v60, 0.0  ;;  %v4837_v44 = vrot.slane %v4836_v51, 1  ;;  %v3306_v5 = vadd.f32 %v3305_v20, %v3304_v61  ;;  %v15471_v0 = vld [vmem:[#allocation35_spill] sm:$0xff]  ;;  %v15473_v13 = vld [vmem:[#allocation118_spill] sm:$0xff] }
 0x2fc   : > { %15467 = vst [vmem:[#allocation32_spill] sm:$0xff] %v11503_v14  ;;  %v1154_v49 = vpop.f32.mrf.mxu0  ;;  %v3324_v50 = vrot.slane %v3323_v29, 4  ;;  %v1385_v54 = vmax.f32 %v1152_v21, 0.0  ;;  %v4843_v58 = vadd.f32 %v4842_v9, %v4841_v53  ;;  %v3319_v23 = vrot.slane %v3318_v2, 2  ;;  %v8857_v21 = vld [vmem:[%s9181_s12 + $0x388] sm:$0xff] }
 0x2fd   : > { %15468 = vst [vmem:[#allocation111_spill] sm:$0xff] %v11505_v41  ;;  %v1155_v11 = vadd.f32 %v11205_v6, %v1154_v49  ;;  %v2926_v41 = vmul.f32 %v15471_v0, %v11503_v14  ;;  %v1998_v63 = vadd.f32 %v11350_v36, %v15472_v37  ;;  %v4856_v60 = vrot.slane %v4855_v33, 2  ;;  %v11524_v61 = vpop.f32.mrf.mxu2  ;;  %v8858_v0 = vld [vmem:[%s9181_s12 + $0x98] sm:$0xff] }
 0x2fe   : > { %v11513_v16 = vpop.permute.xlu0 %4325  ;;  %v11520_v47 = vpop.f32.mrf.mxu1  ;;  %v4462_v49 = vmul.f32 %v15473_v13, %v11503_v14  ;;  %15474 = vst [vmem:[#allocation9_spill] sm:$0xff] %v11524_v61  ;;  %8410 = vmatmul.msk.f32.gmra.mxu2 %vm524_vm0, %v8857_v21  ;;  %v3313_v53 = vadd.f32 %v3312_v43, %v3311_v46  ;;  %v4850_v9 = vadd.f32 %v4849_v45, %v4848_v15  ;;  %v3307_v13 = vrot.slane %v3306_v5, 1  ;;  %v8859_v14 = vld [vmem:[%s9181_s12 + $0xa0] sm:$0xff] }
 0x2ff   : > { %15470 = vst [vmem:[#allocation198_spill] sm:$0xff] %v11513_v16  ;;  %v4861_v16 = vrot.slane %v4860_v7, 4  ;;  %v1386_v20 = vmax.f32 %v1155_v11, 0.0  ;;  %v7139_v37 = vsel %vm7122_vm7, %v15475_v40, %v7138_v59  ;;  %v11533_v19 = vsel %vm7126_vm9, %v11462_v30, %v7502_v52  ;;  %v15479_v15 = vld [vmem:[#allocation234_spill] sm:$0xff] }
 0x300   : > { %15476 = vst [vmem:[#allocation22_spill] sm:$0xff] %v11533_v19  ;;  %v11535_v56 = vadd.f32 %v3300_v22, %v3299_v24  ;;  %v3325_v11 = vadd.f32 %v3324_v50, %v3323_v29  ;;  %v7140_v43 = vsel %vm7124_vm8, %v15479_v15, %v7139_v37  ;;  %v11543_v45 = vadd.f32 %v4837_v44, %v4836_v51  ;;  %v8860_v50 = vld [vmem:[%s9181_s12 + $0xc0] sm:$0xff]  ;;  %v15482_v44 = vld [vmem:[#allocation20_spill] sm:$0xff]  ;;  %v15486_v15 = vld [vmem:[#allocation115_spill] sm:$0xff] }
 0x301   : > { %5518 = vperm.xlu1 %8694, %v8858_v0   ;;  %8500 = vmatmul.msk.f32.gmra.mxu1 %vm1454_vm1, %v1385_v54  ;;  %v4844_v40 = vrot.slane %v4843_v58, 1  ;;  %v3330_v30 = vsel %vm524_vm0, %v2926_v41, 0.0  ;;  %v11546_v52 = vmax.f32 %v1998_v63, 0.0  ;;  %v3320_v29 = vadd.f32 %v3319_v23, %v3318_v2  ;;  %v8863_v19 = vld [vmem:[%s9181_s12 + $0xb8] sm:$0xff] }
 0x302   : > { %15477 = vst [vmem:[#allocation147_spill] sm:$0xff] %v11535_v56  ;;  %5522 = vperm.xlu2 %8692, %v8859_v14   ;;  %v11539_v46 = vpop.permute.xlu1 %4329  ;;  %8501 = vmatmul.msk.f32.vlgmr.msrb.gmra.mxu3 %vm1454_vm1, %v1386_v20  ;;  %v4857_v22 = vadd.f32 %v4856_v60, %v4855_v33  ;;  %v4862_v59 = vadd.f32 %v4861_v16, %v4860_v7  ;;  %v4867_v14 = vsel %vm4544_vm6, %v4462_v49, 0.0  ;;  %v3314_v21 = vrot.slane %v3313_v53, 1  ;;  %v15485_v60 = vld [vmem:[#allocation25_spill] sm:$0xff] }
 0x303   : > { %15478 = vst [vmem:[#allocation183_spill] sm:$0xff] %v11539_v46  ;;  %v11549_v24 = vpop.permute.xlu2 %4369  ;;  %5538 = vperm.xlu0 %8693, %v8860_v50   ;;  %v4851_v51 = vrot.slane %v4850_v9, 1  ;;  %v2001_v0 = vadd.f32 %v11350_v36, %v15482_v44  ;;  %v11558_v20 = vadd.f32 %v3307_v13, %v3306_v5  ;;  %v3326_v2 = vrot.slane %v3325_v11, 2  ;;  %v15487_v50 = vld [vmem:[#allocation205_spill] sm:$0xff] }
 0x304   : > { %15480 = vst [vmem:[#allocation199_spill] sm:$0xff] %v11546_v52  ;;  %v1157_v54 = vpop.f32.mrf.mxu0  ;;  %v3331_v33 = vrot.slane %v3330_v30, 4  ;;  %v11562_v7 = vsel %vm7126_vm9, %v11335_v18, %v7140_v43  ;;  %v11564_v16 = vadd.f32 %v4844_v40, %v4843_v58  ;;  %v4868_v23 = vrot.slane %v4867_v14, 4  ;;  %v8861_v58 = vld [vmem:[%s9181_s12 + $0x390] sm:$0xff] }
 0x305   : > { %15481 = vst [vmem:[#allocation201_spill] sm:$0xff] %v11549_v24  ;;  %v1158_v63 = vadd.f32 %v11205_v6, %v1157_v54  ;;  %v2927_v49 = vmul.f32 %v15485_v60, %v11546_v52  ;;  %v7504_v5 = vsel %vm7114_vm2, %v15487_v50, %v15486_v15  ;;  %v3321_v13 = vrot.slane %v3320_v29, 1  ;;  %v11573_v18 = vpop.f32.mrf.mxu2  ;;  %v15490_v60 = vld [vmem:[#allocation191_spill] sm:$0xff] }
 0x306   : > { %v11555_v41 = vpop.permute.xlu0 %4337  ;;  %15484 = vst [vmem:[#allocation141_spill] sm:$0xff] %v11558_v20  ;;  %v11568_v37 = vpop.f32.mrf.mxu1  ;;  %v4858_v54 = vrot.slane %v4857_v22, 1  ;;  %v4863_v44 = vrot.slane %v4862_v59, 2  ;;  %8411 = vmatmul.msk.f32.gmra.mxu2 %vm524_vm0, %v8861_v58  ;;  %v11577_v43 = vadd.f32 %v3314_v21, %v3313_v53  ;;  %v11579_v40 = vadd.f32 %v4851_v51, %v4850_v9  ;;  %v8862_v15 = vld [vmem:[%s9181_s12 + $0xb0] sm:$0xff]  ;;  %v15495_v58 = vld [vmem:[#allocation161_spill] sm:$0xff] }
 0x307   : > { %15483 = vst [vmem:[#allocation36_spill] sm:$0xff] %v11555_v41  ;;  %v1387_v24 = vmax.f32 %v1158_v63, 0.0  ;;  %v4463_v20 = vmul.f32 %v15490_v60, %v11546_v52  ;;  %v11583_v56 = vmax.f32 %v2001_v0, 0.0  ;;  %v11586_v50 = vadd.f32 %v3326_v2, %v3325_v11  ;;  %v15494_v9 = vld [vmem:[#allocation112_spill] sm:$0xff]  ;;  %v15496_v2 = vld [vmem:[#allocation157_spill] sm:$0xff]  ;;  %v15527_v52 = vld [vmem:[#allocation123_spill] sm:$0xff] }
 0x308   : > { %15488 = vst [vmem:[#allocation149_spill] sm:$0xff] %v11573_v18  ;;  %v3332_v63 = vadd.f32 %v3331_v33, %v3330_v30  ;;  %v7151_v53 = vsel %vm7118_vm4, %v11242_v42, %v11283_v25  ;;  %v7505_v21 = vsel %vm7116_vm3, %v15494_v9, %v7504_v5  ;;  %v4869_v51 = vadd.f32 %v4868_v23, %v4867_v14  ;;  %v8864_v25 = vld [vmem:[%s9181_s12 + $0xd8] sm:$0xff]  ;;  %v15499_v14 = vld [vmem:[#allocation206_spill] sm:$0xff]  ;;  %v15500_v5 = vld [vmem:[#allocation39_spill] sm:$0xff] }
 0x309   : > { %15489 = vst [vmem:[#allocation203_spill] sm:$0xff] %v11577_v43  ;;  %5530 = vperm.xlu1 %8694, %v8862_v15   ;;  %v3337_v0 = vsel %vm524_vm0, %v2927_v49, 0.0  ;;  %v2004_v11 = vadd.f32 %v11350_v36, %v15495_v58  ;;  %v1161_v30 = vadd.f32 %v11205_v6, %v15496_v2  ;;  %v11604_v33 = vadd.f32 %v3321_v13, %v3320_v29  ;;  %v15504_v58 = vld [vmem:[#allocation172_spill] sm:$0xff] }
 0x30a   : > { %15491 = vst [vmem:[#allocation142_spill] sm:$0xff] %v11583_v56  ;;  %5534 = vperm.xlu2 %8692, %v8863_v19   ;;  %v11589_v41 = vpop.permute.xlu1 %4341  ;;  %8502 = vmatmul.msk.f32.gmra.mxu3 %vm1454_vm1, %v1387_v24  ;;  %v11606_v60 = vadd.f32 %v4858_v54, %v4857_v22  ;;  %v11608_v42 = vadd.f32 %v4863_v44, %v4862_v59  ;;  %v4874_v49 = vsel %vm4544_vm6, %v4463_v20, 0.0  ;;  %v15501_v24 = vld [vmem:[#allocation14_spill] sm:$0xff]  ;;  %v3333_v13 = vrot.slane %v3332_v63, 2 }
 0x30b   : > { %15492 = vst [vmem:[#allocation35_spill] sm:$0xff] %v11586_v50  ;;  %v11602_v19 = vpop.permute.xlu2 %4381  ;;  %5550 = vperm.xlu0 %8693, %v8864_v25   ;;  %v7506_v23 = vsel %vm7118_vm4, %v15499_v14, %v7505_v21  ;;  %v2928_v15 = vmul.f32 %v15500_v5, %v11583_v56  ;;  %v4464_v9 = vmul.f32 %v15501_v24, %v11583_v56  ;;  %v3338_v54 = vrot.slane %v3337_v0, 4  ;;  %v15505_v24 = vld [vmem:[#allocation235_spill] sm:$0xff]  ;;  %v15509_v50 = vld [vmem:[#allocation121_spill] sm:$0xff] }
 0x30c   : > { %15493 = vst [vmem:[#allocation148_spill] sm:$0xff] %v11589_v41  ;;  %v7152_v22 = vsel %vm7120_vm5, %v11285_v27, %v7151_v53  ;;  %v4816_v44 = vrot.slane %v11369_v35, 1  ;;  %v4870_v20 = vrot.slane %v4869_v51, 2  ;;  %v11624_v21 = vmax.f32 %v2004_v11, 0.0  ;;  %v15507_v11 = vld [vmem:[#allocation120_spill] sm:$0xff]  ;;  %v8866_v14 = vld [vmem:[%s9181_s12 + $0xc8] sm:$0xff] }
 0x30d   : > { %15497 = vst [vmem:[#allocation118_spill] sm:$0xff] %v11602_v19  ;;  %v2007_v2 = vadd.f32 %v11350_v36, %v15504_v58  ;;  %v1388_v25 = vmax.f32 %v1161_v30, 0.0  ;;  %v4875_v5 = vrot.slane %v4874_v49, 4  ;;  %v2010_v27 = vadd.f32 %v11350_v36, %v15505_v24  ;;  %v11633_v59 = vpop.f32.mrf.mxu2  ;;  %v8865_v19 = vld [vmem:[%s9181_s12 + $0x398] sm:$0xff] }
 0x30e   : > { %15498 = vst [vmem:[#allocation232_spill] sm:$0xff] %v11604_v33  ;;  %v11618_v29 = vpop.permute.xlu0 %4349  ;;  %v11631_v53 = vpop.f32.mrf.mxu1  ;;  %8412 = vmatmul.msk.f32.gmra.mxu2 %vm524_vm0, %v8865_v19  ;;  %v7507_v33 = vsel %vm7120_vm5, %v15507_v11, %v7506_v23  ;;  %v3344_v58 = vsel %vm524_vm0, %v2928_v15, 0.0  ;;  %v4881_v30 = vsel %vm4544_vm6, %v4464_v9, 0.0  ;;  %v15508_v43 = vrot.slane %v11356_v1, 2  ;;  %v8867_v23 = vld [vmem:[%s9181_s12 + $0xd0] sm:$0xff] }
 0x30f   : > { %15502 = vst [vmem:[#allocation234_spill] sm:$0xff] %v11618_v29  ;;  %v15510_v29 = vrot.slane %v15509_v50, 1  ;;  %v11648_v46 = vadd.f32 %v3333_v13, %v3332_v63  ;;  %v11650_v19 = vadd.f32 %v3338_v54, %v3337_v0  ;;  %v4817_v9 = vadd.f32 %v4816_v44, %v11369_v35  ;;  %v15516_v63 = vld [vmem:[#allocation24_spill] sm:$0xff] }
 0x310   : > { %15503 = vst [vmem:[#allocation20_spill] sm:$0xff] %v11624_v21  ;;  %v4822_v24 = vadd.f32 %v15508_v43, %v11356_v1  ;;  %v11658_v11 = vadd.f32 %v4870_v20, %v4869_v51  ;;  %v15514_v1 = vld [vmem:[#allocation38_spill] sm:$0xff]  ;;  %v1164_v0 = vadd.f32 %v11205_v6, %v15516_v63  ;;  %v11669_v13 = vadd.f32 %v4875_v5, %v4874_v49  ;;  %v15521_v5 = vld [vmem:[#allocation7_spill] sm:$0xff]  ;;  %v15522_v63 = vld [vmem:[#allocation8_spill] sm:$0xff] }
 0x311   : > { %15506 = vst [vmem:[#allocation25_spill] sm:$0xff] %v11633_v59  ;;  %5542 = vperm.xlu1 %8694, %v8866_v14   ;;  %v3161_v41 = vadd.f32 %v15510_v29, %v15509_v50  ;;  %v7153_v14 = vsel %vm7122_vm7, %v11319_v31, %v7152_v22  ;;  %v2929_v43 = vmul.f32 %v15514_v1, %v11624_v21  ;;  %v11662_v50 = vmax.f32 %v2007_v2, 0.0  ;;  %v8868_v31 = vld [vmem:[%s9181_s12 + $0xf0] sm:$0xff]  ;;  %v15520_v2 = vld [vmem:[#allocation125_spill] sm:$0xff] }
 0x312   : > { %15511 = vst [vmem:[#allocation115_spill] sm:$0xff] %v11648_v46  ;;  %5546 = vperm.xlu2 %8692, %v8867_v23   ;;  %v11653_v15 = vpop.permute.xlu1 %4353  ;;  %8503 = vmatmul.msk.f32.gmra.mxu3 %vm1454_vm1, %v1388_v25  ;;  %v3345_v35 = vrot.slane %v3344_v58, 4  ;;  %v4882_v54 = vrot.slane %v4881_v30, 4  ;;  %v11671_v44 = vmax.f32 %v2010_v27, 0.0  ;;  %v2013_v51 = vadd.f32 %v11350_v36, %v11148_v48  ;;  %v15525_v46 = vld [vmem:[#allocation196_spill] sm:$0xff] }
 0x313   : > { %15512 = vst [vmem:[#allocation205_spill] sm:$0xff] %v11650_v19  ;;  %v11667_v29 = vpop.permute.xlu2 %4393  ;;  %5562 = vperm.xlu0 %8693, %v8868_v31   ;;  %v4823_v20 = vrot.slane %v4822_v24, 1  ;;  %v3167_v23 = vrot.slane %v15520_v2, 1  ;;  %v7508_v25 = vsel %vm7122_vm7, %v3161_v41, %v7507_v33  ;;  %v4465_v1 = vmul.f32 %v15521_v5, %v11624_v21 }
 0x314   : > { %15513 = vst [vmem:[#allocation191_spill] sm:$0xff] %v11653_v15  ;;  %v11684_v27 = vsel %vm7124_vm8, %v4817_v9, %v7153_v14  ;;  %v15523_v31 = vrot.slane %v15522_v63, 2  ;;  %v4466_v41 = vmul.f32 %v15525_v46, %v11662_v50  ;;  %v1389_v33 = vmax.f32 %v1164_v0, 0.0  ;;  %v15526_v9 = vld [vmem:[#allocation42_spill] sm:$0xff] }
 0x315   : > { %15515 = vst [vmem:[#allocation112_spill] sm:$0xff] %v11662_v50  ;;  %v3346_v5 = vadd.f32 %v3345_v35, %v3344_v58  ;;  %v4883_v19 = vadd.f32 %v4882_v54, %v4881_v30  ;;  %v2931_v14 = vmul.f32 %v15526_v9, %v11671_v44  ;;  %v3168_v21 = vadd.f32 %v3167_v23, %v15520_v2  ;;  %v8870_v35 = vld [vmem:[%s9181_s12 + $0xe8] sm:$0xff]  ;;  %v15530_v2 = vld [vmem:[#allocation169_spill] sm:$0xff]  ;;  %v11777_v26 = vpop.f32.mrf.mxu2 }
 0x316   : > { %15517 = vst [vmem:[#allocation161_spill] sm:$0xff] %v11667_v29  ;;  %v11676_v22 = vpop.permute.xlu0 %4361  ;;  %v3173_v48 = vadd.f32 %v15523_v31, %v15522_v63  ;;  %v3351_v29 = vsel %vm524_vm0, %v2929_v43, 0.0  ;;  %v4467_v63 = vmul.f32 %v15527_v52, %v11671_v44  ;;  %v11699_v31 = vmax.f32 %v2013_v51, 0.0  ;;  %v8869_v43 = vld [vmem:[%s9181_s12 + $0xe0] sm:$0xff]  ;;  %v11706_v30 = vpop.f32.mrf.mxu1 }
 0x317   : > { %15518 = vst [vmem:[#allocation157_spill] sm:$0xff] %v11671_v44  ;;  %v3352_v46 = vrot.slane %v3351_v29, 4  ;;  %v4888_v0 = vsel %vm4544_vm6, %v4465_v1, 0.0  ;;  %v2016_v58 = vadd.f32 %v11350_v36, %v11186_v39  ;;  %v1167_v23 = vadd.f32 %v11205_v6, %v15530_v2  ;;  %v15533_v2 = vld [vmem:[#allocation124_spill] sm:$0xff] }
 0x318   : > { %15519 = vst [vmem:[#allocation206_spill] sm:$0xff] %v11676_v22  ;;  %v15524_v22 = vld [vmem:[#allocation28_spill] sm:$0xff]  ;;  %v3174_v52 = vrot.slane %v3173_v48, 1  ;;  %v3347_v1 = vrot.slane %v3346_v5, 2  ;;  %v4884_v9 = vrot.slane %v4883_v19, 2  ;;  %v4902_v49 = vsel %vm4544_vm6, %v4467_v63, 0.0 }
 0x319   : > { %v2930_v15 = vmul.f32 %v15524_v22, %v11662_v50  ;;  %15528 = vst [vmem:[#allocation39_spill] sm:$0xff] %v11699_v31  ;;  %5554 = vperm.xlu1 %8694, %v8869_v43   ;;  %v4824_v22 = vadd.f32 %v4823_v20, %v4822_v24  ;;  %v4895_v24 = vsel %vm4544_vm6, %v4466_v41, 0.0  ;;  %v2019_v20 = vadd.f32 %v11350_v36, %v11231_v55  ;;  %v15532_v55 = vld [vmem:[#allocation41_spill] sm:$0xff] }
 0x31a   : > { %5558 = vperm.xlu2 %8692, %v8870_v35   ;;  %v11709_v54 = vpop.permute.xlu1 %4365  ;;  %8504 = vmatmul.msk.f32.gmra.mxu3 %vm1454_vm1, %v1389_v33  ;;  %v3365_v43 = vsel %vm524_vm0, %v2931_v14, 0.0  ;;  %v2022_v35 = vadd.f32 %v11350_v36, %v11287_v8  ;;  %v4889_v41 = vrot.slane %v4888_v0, 4  ;;  %v4468_v33 = vmul.f32 %v15533_v2, %v11699_v31 }
 0x31b   : > { %15529 = vst [vmem:[#allocation14_spill] sm:$0xff] %v11709_v54  ;;  %v3358_v51 = vsel %vm524_vm0, %v2930_v15, 0.0  ;;  %v11718_v39 = vpop.permute.xlu2 %4405  ;;  %v8871_v15 = vld [vmem:[%s9181_s12 + $0x108] sm:$0xff]  ;;  %v2932_v54 = vmul.f32 %v15532_v55, %v11699_v31  ;;  %v4896_v14 = vrot.slane %v4895_v24, 4  ;;  %v11731_v56 = vmax.f32 %v2016_v58, 0.0  ;;  %v8872_v58 = vld [vmem:[%s9181_s12 + $0xf8] sm:$0xff] }
 0x31c   : > { %15531 = vst [vmem:[#allocation172_spill] sm:$0xff] %v11718_v39  ;;  %5574 = vperm.xlu0 %8693, %v8871_v15   ;;  %v3353_v39 = vadd.f32 %v3352_v46, %v3351_v29  ;;  %v3359_v50 = vrot.slane %v3358_v51, 4  ;;  %v3366_v8 = vrot.slane %v3365_v43, 4  ;;  %v11733_v59 = vmax.f32 %v2019_v20, 0.0 }
 0x31d   : > { %15535 = vst [vmem:[#allocation120_spill] sm:$0xff] %v11731_v56  ;;  %v1390_v15 = vmax.f32 %v1167_v23, 0.0  ;;  %v7509_v63 = vsel %vm7124_vm8, %v3168_v21, %v7508_v25  ;;  %v3348_v18 = vadd.f32 %v3347_v1, %v3346_v5  ;;  %v4903_v55 = vrot.slane %v4902_v49, 4  ;;  %v8873_v25 = vld [vmem:[%s9181_s12 + $0x100] sm:$0xff] }
 0x31e   : > { %v11729_v44 = vpop.permute.xlu0 %4373  ;;  %15536 = vst [vmem:[#allocation121_spill] sm:$0xff] %v11733_v59  ;;  %v11736_v61 = vmax.f32 %v2022_v35, 0.0  ;;  %v3175_v2 = vadd.f32 %v3174_v52, %v3173_v48  ;;  %v4885_v31 = vadd.f32 %v4884_v9, %v4883_v19  ;;  %v3372_v29 = vsel %vm524_vm0, %v2932_v54, 0.0  ;;  %v15540_v19 = vld [vmem:[#allocation210_spill] sm:$0xff]  ;;  %v11757_v35 = vpop.f32.mrf.mxu1 }
 0x31f   : > { %15534 = vst [vmem:[#allocation235_spill] sm:$0xff] %v11729_v44  ;;  %v4890_v44 = vadd.f32 %v4889_v41, %v4888_v0  ;;  %v4909_v46 = vsel %vm4544_vm6, %v4468_v33, 0.0  ;;  %v3354_v17 = vrot.slane %v3353_v39, 2  ;;  %v3360_v20 = vadd.f32 %v3359_v50, %v3358_v51  ;;  %v15541_v54 = vld [vmem:[#allocation182_spill] sm:$0xff] }
 0x320   : > { %15537 = vst [vmem:[#allocation38_spill] sm:$0xff] %v11736_v61  ;;  %v4897_v23 = vadd.f32 %v4896_v14, %v4895_v24  ;;  %v4469_v21 = vmul.f32 %v15538_v3, %v11731_v56  ;;  %v3367_v48 = vadd.f32 %v3366_v8, %v3365_v43  ;;  %v4470_v0 = vmul.f32 %v15540_v19, %v11733_v59  ;;  %v15542_v1 = vld [vmem:[#allocation130_spill] sm:$0xff]  ;;  %v15546_v19 = vld [vmem:[#allocation31_spill] sm:$0xff] }
 0x321   : > { %5566 = vperm.xlu1 %8694, %v8872_v58   ;;  %v1170_v52 = vadd.f32 %v11205_v6, %v15541_v54  ;;  %v11753_v50 = vsel %vm7126_vm9, %v4824_v22, %v11684_v27  ;;  %v4904_v51 = vadd.f32 %v4903_v55, %v4902_v49  ;;  %v3373_v24 = vrot.slane %v3372_v29, 4  ;;  %v8874_v43 = vld [vmem:[%s9181_s12 + $0x120] sm:$0xff] }
 0x322   : > { %5570 = vperm.xlu2 %8692, %v8873_v25   ;;  %v11744_v5 = vpop.permute.xlu1 %4377  ;;  %8505 = vmatmul.msk.f32.gmra.mxu3 %vm1454_vm1, %v1390_v15  ;;  %v4910_v3 = vrot.slane %v4909_v46, 4  ;;  %v4471_v9 = vmul.f32 %v15542_v1, %v11736_v61  ;;  %v3349_v33 = vrot.slane %v3348_v18, 1  ;;  %v4886_v14 = vrot.slane %v4885_v31, 1 }
 0x323   : > { %15539 = vst [vmem:[#allocation24_spill] sm:$0xff] %v11744_v5  ;;  %v4891_v8 = vrot.slane %v4890_v44, 2  ;;  %v11765_v27 = vsel %vm7126_vm9, %v3175_v2, %v7509_v63  ;;  %v3355_v49 = vadd.f32 %v3354_v17, %v3353_v39  ;;  %v3361_v22 = vrot.slane %v3360_v20, 2 }
 0x324   : > { %5586 = vperm.xlu0 %8693, %v8874_v43   ;;  %v11760_v41 = vpop.permute.xlu2 %5442  ;;  %15545 = vst [vmem:[#allocation8_spill] sm:$0xff] %v11765_v27  ;;  %v4898_v55 = vrot.slane %v4897_v23, 2  ;;  %v4916_v58 = vsel %vm4544_vm6, %v4469_v21, 0.0  ;;  %v3368_v25 = vrot.slane %v3367_v48, 2  ;;  %v2933_v54 = vmul.f32 %v15546_v19, %v11731_v56  ;;  %v8875_v27 = vld [vmem:[%s9181_s12 + $0x110] sm:$0xff]  ;;  %v8876_v19 = vld [vmem:[%s9181_s12 + $0x3a0] sm:$0xff] }
 0x325   : > { %15543 = vst [vmem:[#allocation125_spill] sm:$0xff] %v11760_v41  ;;  %v4923_v1 = vsel %vm4544_vm6, %v4470_v0, 0.0  ;;  %v1391_v43 = vmax.f32 %v1170_v52, 0.0  ;;  %v4905_v5 = vrot.slane %v4904_v51, 2  ;;  %v3374_v41 = vadd.f32 %v3373_v24, %v3372_v29  ;;  %8413 = vmatmul.msk.f32.gmra.mxu2 %vm524_vm0, %v8876_v19 }
 0x326   : > { %v11762_v15 = vpop.permute.xlu0 %4385  ;;  %v4930_v63 = vsel %vm4544_vm6, %v4471_v9, 0.0  ;;  %v11772_v17 = vadd.f32 %v3349_v33, %v3348_v18  ;;  %v11774_v39 = vadd.f32 %v4886_v14, %v4885_v31  ;;  %v4892_v2 = vadd.f32 %v4891_v8, %v4890_v44  ;;  %v15549_v9 = vld [vmem:[#allocation190_spill] sm:$0xff]  ;;  %v11799_v19 = vpop.f32.mrf.mxu1 }
 0x327   : > { %15544 = vst [vmem:[#allocation7_spill] sm:$0xff] %v11762_v15  ;;  %v4911_v15 = vadd.f32 %v4910_v3, %v4909_v46  ;;  %v4917_v21 = vrot.slane %v4916_v58, 4  ;;  %v3356_v0 = vrot.slane %v3355_v49, 1  ;;  %v3362_v52 = vadd.f32 %v3361_v22, %v3360_v20  ;;  %v8877_v46 = vld [vmem:[%s9181_s12 + $0x118] sm:$0xff] }
 0x328   : > { %15547 = vst [vmem:[#allocation28_spill] sm:$0xff] %v11772_v17  ;;  %v4899_v29 = vadd.f32 %v4898_v55, %v4897_v23  ;;  %v4924_v24 = vrot.slane %v4923_v1, 4  ;;  %v3369_v18 = vadd.f32 %v3368_v25, %v3367_v48  ;;  %v3379_v31 = vsel %vm524_vm0, %v2933_v54, 0.0  ;;  %v15550_v20 = vld [vmem:[#allocation45_spill] sm:$0xff] }
 0x329   : > { %5578 = vperm.xlu1 %8694, %v8875_v27   ;;  %v4931_v44 = vrot.slane %v4930_v63, 4  ;;  %v1173_v33 = vadd.f32 %v11205_v6, %v15549_v9  ;;  %v4906_v14 = vadd.f32 %v4905_v5, %v4904_v51  ;;  %v3375_v8 = vrot.slane %v3374_v41, 2 }
 0x32a   : > { %5582 = vperm.xlu2 %8692, %v8877_v46   ;;  %v11782_v3 = vpop.permute.xlu1 %4389  ;;  %8506 = vmatmul.msk.f32.gmra.mxu3 %vm1454_vm1, %v1391_v43  ;;  %v4912_v27 = vrot.slane %v4911_v15, 2  ;;  %v2934_v23 = vmul.f32 %v15550_v20, %v11733_v59  ;;  %v4893_v48 = vrot.slane %v4892_v2, 1  ;;  %v4918_v55 = vadd.f32 %v4917_v21, %v4916_v58 }
 0x32b   : > { %15548 = vst [vmem:[#allocation196_spill] sm:$0xff] %v11782_v3  ;;  %v2025_v25 = vadd.f32 %v11350_v36, %v11360_v4  ;;  %v7156_v6 = vsel %vm7114_vm2, %v11543_v45, %v11507_v62  ;;  %v3363_v5 = vrot.slane %v3362_v52, 1  ;;  %v4900_v51 = vrot.slane %v4899_v29, 1 }
 0x32c   : > { %7235 = vrot.lane.b32.xlu0 %v11290_v38, %s9051_s26  ;;  %v11792_v22 = vpop.permute.xlu2 %5454  ;;  %v3380_v54 = vrot.slane %v3379_v31, 4  ;;  %v4925_v43 = vadd.f32 %v4924_v24, %v4923_v1  ;;  %v11801_v46 = vadd.f32 %v3356_v0, %v3355_v49  ;;  %v3370_v38 = vrot.slane %v3369_v18, 1  ;;  %v11812_v49 = vpop.f32.mrf.mxu2  ;;  %v8878_v0 = vld [vmem:[%s9181_s12 + $0x3a8] sm:$0xff] }
 0x32d   : > { %v4932_v9 = vadd.f32 %v4931_v44, %v4930_v63  ;;  %v1392_v20 = vmax.f32 %v1173_v33, 0.0  ;;  %v4907_v21 = vrot.slane %v4906_v14, 1  ;;  %v3376_v4 = vadd.f32 %v3375_v8, %v3374_v41  ;;  %8414 = vmatmul.msk.f32.gmra.mxu2 %vm524_vm0, %v8878_v0  ;;  %v8879_v44 = vld [vmem:[%s9181_s12 + $0x128] sm:$0xff] }
 0x32e   : > { %15551 = vst [vmem:[#allocation42_spill] sm:$0xff] %v11801_v46  ;;  %v11803_v58 = vpop.permute.xlu0 %4397  ;;  %v4913_v3 = vadd.f32 %v4912_v27, %v4911_v15  ;;  %v3386_v62 = vsel %vm524_vm0, %v2934_v23, 0.0  ;;  %v11806_v45 = vadd.f32 %v4893_v48, %v4892_v2  ;;  %v4919_v17 = vrot.slane %v4918_v55, 2  ;;  %v11828_v27 = vld [vmem:[%s14803_s2] ss:$0 sm:$0xff] }
 0x32f   : > { %15552 = vst [vmem:[#allocation123_spill] sm:$0xff] %v11803_v58  ;;  %v11808_v1 = vmax.f32 %v2025_v25, 0.0  ;;  %v7157_v63 = vsel %vm7116_vm3, %v11564_v16, %v7156_v6  ;;  %v11818_v41 = vadd.f32 %v3363_v5, %v3362_v52  ;;  %v11820_v15 = vadd.f32 %v4900_v51, %v4899_v29  ;;  %v15556_v16 = vld [vmem:[#allocation239_spill] sm:$0xff]  ;;  %v15558_v5 = vld [vmem:[#allocation34_spill] sm:$0xff] }
 0x330   : > { %v3381_v2 = vadd.f32 %v3380_v54, %v3379_v31  ;;  %v4926_v24 = vrot.slane %v4925_v43, 2  ;;  %v3387_v8 = vrot.slane %v3386_v62, 4  ;;  %v1176_v23 = vadd.f32 %v11828_v27, %v15556_v16 }
 0x331   : > { %15553 = vst [vmem:[#allocation169_spill] sm:$0xff] %v11808_v1  ;;  %7233 = vrot.lane.b32.xlu1 %v11436_v34, %s9051_s26  ;;  %v4933_v34 = vrot.slane %v4932_v9, 2  ;;  %v7158_v52 = vsel %vm7118_vm4, %v11579_v40, %v7157_v63  ;;  %v11835_v29 = vadd.f32 %v3370_v38, %v3369_v18  ;;  %v4908_v31 = vadd.f32 %v4907_v21, %v4906_v14  ;;  %v15559_v18 = vld [vmem:[#allocation11_spill] sm:$0xff] }
 0x332   : > { %15554 = vst [vmem:[#allocation41_spill] sm:$0xff] %v11818_v41  ;;  %5590 = vperm.xlu2 %8692, %v8879_v44   ;;  %v11823_v33 = vpop.permute.xlu1 %4401  ;;  %8507 = vmatmul.msk.f32.gmra.mxu3 %vm1454_vm1, %v1392_v20  ;;  %v3377_v48 = vrot.slane %v3376_v4, 1  ;;  %v4914_v25 = vrot.slane %v4913_v3, 1  ;;  %v4920_v6 = vadd.f32 %v4919_v17, %v4918_v55  ;;  %v2936_v51 = vmul.f32 %v15558_v5, %v11808_v1 }
 0x333   : > { %15555 = vst [vmem:[#allocation124_spill] sm:$0xff] %v11823_v33  ;;  %v2028_v54 = vadd.f32 %v11350_v36, %v11429_v57  ;;  %v7159_v20 = vsel %vm7120_vm5, %v11606_v60, %v7158_v52  ;;  %v3382_v0 = vrot.slane %v3381_v2, 2  ;;  %v4927_v40 = vadd.f32 %v4926_v24, %v4925_v43  ;;  %v15562_v43 = vld [vmem:[#allocation44_spill] sm:$0xff]  ;;  %v11863_v52 = vpop.f32.mrf.mxu1  ;;  %v15591_v33 = vld [vmem:[#allocation51_spill] sm:$0xff] }
 0x334   : > { %15557 = vst [vmem:[#allocation202_spill] sm:$0xff] %v11835_v29  ;;  %7239 = vrot.lane.b32.xlu0 %v11470_v32, %s9051_s26  ;;  %v4472_v14 = vmul.f32 %v15559_v18, %v11808_v1  ;;  %v11847_v38 = vpop.permute.xlu2 %5462  ;;  %v15560_v32 = vrot.slane %v11608_v42, 1  ;;  %v11852_v55 = vadd.f32 %v3387_v8, %v3386_v62  ;;  %v1393_v21 = vmax.f32 %v1176_v23, 0.0  ;;  %v15566_v23 = vld [vmem:[#allocation129_spill] sm:$0xff]  ;;  %v8882_v18 = vld [vmem:[%s9181_s12 + $0x3b0] sm:$0xff] }
 0x335   : > { %v4934_v63 = vadd.f32 %v4933_v34, %v4932_v9  ;;  %v4872_v57 = vrot.slane %v11658_v11, 1  ;;  %v11855_v44 = vadd.f32 %v3377_v48, %v3376_v4  ;;  %v4915_v60 = vadd.f32 %v4914_v25, %v4913_v3  ;;  %v8881_v4 = vld [vmem:[%s9181_s12 + $0x130] sm:$0xff]  ;;  %v11871_v3 = vpop.f32.mrf.mxu2  ;;  %8415 = vmatmul.msk.f32.gmra.mxu2 %vm524_vm0, %v8882_v18 }
 0x336   : > { %v4866_v17 = vadd.f32 %v15560_v32, %v11608_v42  ;;  %v2935_v24 = vmul.f32 %v15562_v43, %v11736_v61  ;;  %v11861_v16 = vadd.f32 %v11828_v27, %v11234_v28  ;;  %v4921_v42 = vrot.slane %v4920_v6, 1  ;;  %v11868_v9 = vpop.permute.xlu0 %4409  ;;  %v15565_v34 = vld [vmem:[#allocation212_spill] sm:$0xff] }
 0x337   : > { %15561 = vst [vmem:[#allocation210_spill] sm:$0xff] %v11855_v44  ;;  %v3400_v62 = vsel %vm524_vm0, %v2936_v51, 0.0  ;;  %v11866_v8 = vmax.f32 %v2028_v54, 0.0  ;;  %v11876_v48 = vsel %vm7114_vm2, %v15566_v23, %v15565_v34  ;;  %v11878_v28 = vadd.f32 %v3382_v0, %v3381_v2  ;;  %v8883_v34 = vld [vmem:[%s9181_s12 + $0x140] sm:$0xff] }
 0x338   : > { %15564 = vst [vmem:[#allocation130_spill] sm:$0xff] %v11868_v9  ;;  %v4937_v25 = vsel %vm4544_vm6, %v4472_v14, 0.0  ;;  %v4928_v5 = vrot.slane %v4927_v40, 1  ;;  %v15568_v51 = vrot.slane %v11669_v13, 2  ;;  %v3389_v32 = vrot.slane %v11852_v55, 2 }
 0x339   : > { %15563 = vst [vmem:[#allocation182_spill] sm:$0xff] %v11866_v8  ;;  %5594 = vperm.xlu1 %8694, %v8881_v4   ;;  %v4935_v2 = vrot.slane %v4934_v63, 1  ;;  %v4873_v0 = vadd.f32 %v4872_v57, %v11658_v11  ;;  %v7160_v14 = vsel %vm7122_vm7, %v4866_v17, %v7159_v20  ;;  %v3393_v43 = vsel %vm524_vm0, %v2935_v24, 0.0  ;;  %v15571_v20 = vld [vmem:[#allocation128_spill] sm:$0xff] }
 0x33a   : > { %15567 = vst [vmem:[#allocation31_spill] sm:$0xff] %v11878_v28  ;;  %7237 = vrot.lane.b32.xlu2 %v11562_v7, %s9051_s26  ;;  %v4878_v54 = vadd.f32 %v15568_v51, %v11669_v13  ;;  %8508 = vmatmul.msk.f32.gmra.mxu3 %vm1454_vm1, %v1393_v21  ;;  %v3401_v7 = vrot.slane %v3400_v62, 4  ;;  %v2031_v4 = vadd.f32 %v11350_v36, %v11481_v12  ;;  %v1394_v13 = vmax.f32 %v11861_v16, 0.0  ;;  %v11897_v23 = vpop.permute.xlu1 %4413  ;;  %v15570_v21 = vld [vmem:[#allocation48_spill] sm:$0xff] }
 0x33b   : > { %15569 = vst [vmem:[#allocation190_spill] sm:$0xff] %v11897_v23  ;;  %v4938_v51 = vrot.slane %v4937_v25, 4  ;;  %v2937_v18 = vmul.f32 %v15570_v21, %v11866_v8  ;;  %v4922_v9 = vadd.f32 %v4921_v42, %v4920_v6  ;;  %v7163_v11 = vsel %vm7114_vm2, %v11806_v45, %v11774_v39 }
 0x33c   : > { %5602 = vperm.xlu0 %8693, %v8883_v34   ;;  %v4473_v17 = vmul.f32 %v15571_v20, %v11866_v8  ;;  %v4929_v57 = vadd.f32 %v4928_v5, %v4927_v40  ;;  %v7164_v12 = vsel %vm7116_vm3, %v11820_v15, %v7163_v11  ;;  %v4879_v24 = vrot.slane %v4878_v54, 1  ;;  %v11915_v40 = vpop.permute.xlu2 %5474  ;;  %v8893_v8 = vld [vmem:[%s9181_s12 + $0x170] sm:$0xff] }
 0x33d   : > { %v2034_v16 = vadd.f32 %v11350_v36, %v11520_v47  ;;  %v2037_v34 = vadd.f32 %v11350_v36, %v11568_v37  ;;  %v4936_v6 = vadd.f32 %v4935_v2, %v4934_v63  ;;  %v7165_v42 = vsel %vm7118_vm4, %v4908_v31, %v7164_v12  ;;  %v8884_v63 = vld [vmem:[%s9181_s12 + $0x138] sm:$0xff]  ;;  %v11926_v2 = vpop.f32.mrf.mxu1 }
 0x33e   : > { %v3394_v21 = vrot.slane %v3393_v43, 4  ;;  %v3402_v39 = vadd.f32 %v3401_v7, %v3400_v62  ;;  %v11913_v45 = vmax.f32 %v2031_v4, 0.0  ;;  %v7166_v5 = vsel %vm7120_vm5, %v4915_v60, %v7165_v42 }
 0x33f   : > { %v4939_v15 = vadd.f32 %v4938_v51, %v4937_v25  ;;  %v3407_v11 = vsel %vm524_vm0, %v2937_v18, 0.0  ;;  %v2040_v47 = vadd.f32 %v11350_v36, %v11631_v53  ;;  %v7167_v37 = vsel %vm7122_vm7, %v4922_v9, %v7166_v5  ;;  %v11931_v25 = vpop.f32.mrf.mxu2  ;;  %v8885_v53 = vld [vmem:[%s9181_s12 + $0x3b8] sm:$0xff] }
 0x340   : > { %15572 = vst [vmem:[#allocation45_spill] sm:$0xff] %v11913_v45  ;;  %v4944_v31 = vsel %vm4544_vm6, %v4473_v17, 0.0  ;;  %v2043_v62 = vadd.f32 %v11350_v36, %v11706_v30  ;;  %v7168_v60 = vsel %vm7124_vm8, %v4929_v57, %v7167_v37  ;;  %v4880_v7 = vadd.f32 %v4879_v24, %v4878_v54  ;;  %8416 = vmatmul.msk.f32.gmra.mxu2 %vm524_vm0, %v8885_v53  ;;  %v11941_v36 = vpop.permute.xlu0 %5446  ;;  %v15575_v54 = vld [vmem:[#allocation133_spill] sm:$0xff]  ;;  %v15576_v17 = vld [vmem:[#allocation214_spill] sm:$0xff]  ;;  %v15577_v24 = vld [vmem:[#allocation47_spill] sm:$0xff] }
 0x341   : > { %5598 = vperm.xlu1 %8694, %v8884_v63   ;;  %v11935_v9 = vmax.f32 %v2034_v16, 0.0  ;;  %v1182_v4 = vadd.f32 %v11828_v27, %v11294_v10  ;;  %v11939_v51 = vmax.f32 %v2037_v34, 0.0  ;;  %v7169_v30 = vsel %vm7126_vm9, %v4936_v6, %v7168_v60  ;;  %v15583_v53 = vld [vmem:[#allocation213_spill] sm:$0xff] }
 0x342   : > { %7241 = vrot.lane.b32.xlu2 %v11753_v50, %s9051_s26  ;;  %8509 = vmatmul.msk.f32.gmra.mxu3 %vm1454_vm1, %v1394_v13  ;;  %v3403_v50 = vrot.slane %v3402_v39, 2  ;;  %v3408_v18 = vrot.slane %v3407_v11, 4  ;;  %v4474_v20 = vmul.f32 %v15575_v54, %v11913_v45  ;;  %v7512_v57 = vsel %vm7116_vm3, %v15576_v17, %v11876_v48  ;;  %v15582_v48 = vld [vmem:[#allocation122_spill] sm:$0xff]  ;;  %v15584_v54 = vld [vmem:[#allocation136_spill] sm:$0xff] }
 0x343   : > { %15573 = vst [vmem:[#allocation239_spill] sm:$0xff] %v11935_v9  ;;  %v4940_v10 = vrot.slane %v4939_v15, 2  ;;  %v4945_v12 = vrot.slane %v4944_v31, 4  ;;  %v2938_v16 = vmul.f32 %v15577_v24, %v11913_v45  ;;  %v11953_v34 = vmax.f32 %v2040_v47, 0.0  ;;  %v11962_v5 = vpop.permute.xlu1 %5450 }
 0x344   : > { %15574 = vst [vmem:[#allocation34_spill] sm:$0xff] %v11939_v51  ;;  %7245 = vrot.lane.b32.xlu0 %v7169_v30, %s9051_s26  ;;  %v11956_v13 = vadd.f32 %v3389_v32, %v11852_v55  ;;  %v11958_v6 = vadd.f32 %v3394_v21, %v3393_v43  ;;  %v11960_v42 = vmax.f32 %v2043_v62, 0.0  ;;  %v7161_v37 = vsel %vm7124_vm8, %v4873_v0, %v7160_v14  ;;  %v11974_v21 = vld [vmem:[%s14805_s4] ss:$0 sm:$0xff]  ;;  %v11987_v17 = vpop.permute.xlu2 %5486 }
 0x345   : > { %15578 = vst [vmem:[#allocation11_spill] sm:$0xff] %v11953_v34  ;;  %v4475_v63 = vmul.f32 %v15582_v48, %v11935_v9  ;;  %v1395_v60 = vmax.f32 %v1182_v4, 0.0  ;;  %v4476_v30 = vmul.f32 %v15583_v53, %v11939_v51  ;;  %v7162_v47 = vsel %vm7126_vm9, %v4880_v7, %v7161_v37  ;;  %v15589_v48 = vld [vmem:[#allocation19_spill] sm:$0xff] }
 0x346   : > { %15579 = vst [vmem:[#allocation44_spill] sm:$0xff] %v11956_v13  ;;  %v3404_v55 = vadd.f32 %v3403_v50, %v3402_v39  ;;  %v3409_v32 = vadd.f32 %v3408_v18, %v3407_v11  ;;  %v4951_v43 = vsel %vm4544_vm6, %v4474_v20, 0.0  ;;  %v2046_v0 = vadd.f32 %v11974_v21, %v11757_v35  ;;  %v15585_v11 = vld [vmem:[#allocation37_spill] sm:$0xff]  ;;  %v8887_v35 = vld [vmem:[%s9181_s12 + $0x148] sm:$0xff]  ;;  %v15594_v13 = vld [vmem:[#allocation216_spill] sm:$0xff] }
 0x347   : > { %15580 = vst [vmem:[#allocation212_spill] sm:$0xff] %v11958_v6  ;;  %v4941_v14 = vadd.f32 %v4940_v10, %v4939_v15  ;;  %v4946_v62 = vadd.f32 %v4945_v12, %v4944_v31  ;;  %v3414_v4 = vsel %vm524_vm0, %v2938_v16, 0.0  ;;  %v4477_v7 = vmul.f32 %v15584_v54, %v11953_v34  ;;  %v15586_v18 = vld [vmem:[#allocation209_spill] sm:$0xff]  ;;  %v11990_v15 = vpop.f32.mrf.mxu2  ;;  %v15588_v10 = vld [vmem:[#allocation219_spill] sm:$0xff] }
 0x348   : > { %15581 = vst [vmem:[#allocation129_spill] sm:$0xff] %v11960_v42  ;;  %v2939_v50 = vmul.f32 %v15585_v11, %v11935_v9  ;;  %v4478_v20 = vmul.f32 %v15586_v18, %v11960_v42  ;;  %v8888_v31 = vld [vmem:[%s9181_s12 + $0x3c0] sm:$0xff]  ;;  %v7513_v12 = vsel %vm7118_vm4, %v15588_v10, %v7512_v57  ;;  %v4952_v24 = vrot.slane %v4951_v43, 4  ;;  %v12008_v39 = vpop.permute.xlu0 %5466 }
 0x349   : > { %7243 = vrot.lane.b32.xlu1 %v7162_v47, %s9051_s26  ;;  %15587 = vst [vmem:[#allocation48_spill] sm:$0xff] %v11990_v15  ;;  %8417 = vmatmul.msk.f32.gmra.mxu2 %vm524_vm0, %v8888_v31  ;;  %v4958_v16 = vsel %vm4544_vm6, %v4475_v63, 0.0  ;;  %v4965_v37 = vsel %vm4544_vm6, %v4476_v30, 0.0  ;;  %v1185_v53 = vadd.f32 %v11828_v27, %v15589_v48  ;;  %v3410_v54 = vrot.slane %v3409_v32, 2  ;;  %v8889_v31 = vld [vmem:[%s9181_s12 + $0x158] sm:$0xff] }
 0x34a   : > { %5606 = vperm.xlu2 %8692, %v8887_v35   ;;  %8510 = vmatmul.msk.f32.gmra.mxu3 %vm1454_vm1, %v1395_v60  ;;  %v3415_v11 = vrot.slane %v3414_v4, 4  ;;  %v12002_v18 = vmax.f32 %v2046_v0, 0.0  ;;  %v12004_v35 = vpop.f32.mrf.mxu1  ;;  %v3405_v57 = vrot.slane %v3404_v55, 1  ;;  %v4942_v10 = vrot.slane %v4941_v14, 1 }
 0x34b   : > { %v4947_v63 = vrot.slane %v4946_v62, 2  ;;  %v4972_v30 = vsel %vm4544_vm6, %v4477_v7, 0.0  ;;  %v3421_v48 = vsel %vm524_vm0, %v2939_v50, 0.0  ;;  %v4959_v60 = vrot.slane %v4958_v16, 4  ;;  %v12019_v6 = vpop.permute.xlu1 %5458 }
 0x34c   : > { %15590 = vst [vmem:[#allocation128_spill] sm:$0xff] %v12002_v18  ;;  %5614 = vperm.xlu0 %8693, %v8889_v31   ;;  %v4966_v47 = vrot.slane %v4965_v37, 4  ;;  %v4979_v23 = vsel %vm4544_vm6, %v4478_v20, 0.0  ;;  %v4953_v0 = vadd.f32 %v4952_v24, %v4951_v43  ;;  %v2940_v58 = vmul.f32 %v15591_v33, %v11939_v51  ;;  %v15592_v31 = vld [vmem:[#allocation224_spill] sm:$0xff]  ;;  %v15595_v24 = vld [vmem:[#allocation221_spill] sm:$0xff] }
 0x34d   : > { %v1396_v44 = vmax.f32 %v1185_v53, 0.0  ;;  %v15593_v29 = vrot.slane %v15592_v31, 1  ;;  %v3411_v46 = vadd.f32 %v3410_v54, %v3409_v32  ;;  %v3416_v7 = vadd.f32 %v3415_v11, %v3414_v4  ;;  %v8890_v43 = vld [vmem:[%s9181_s12 + $0x150] sm:$0xff]  ;;  %v15597_v4 = vld [vmem:[#allocation21_spill] sm:$0xff] }
 0x34e   : > { %v4973_v28 = vrot.slane %v4972_v30, 4  ;;  %v4479_v50 = vmul.f32 %v15594_v13, %v12002_v18  ;;  %v4948_v9 = vadd.f32 %v4947_v63, %v4946_v62  ;;  %v3422_v59 = vrot.slane %v3421_v48, 4 }
 0x34f   : > { %v3217_v41 = vadd.f32 %v15593_v29, %v15592_v31  ;;  %v4980_v20 = vrot.slane %v4979_v23, 4  ;;  %v7514_v33 = vsel %vm7120_vm5, %v15595_v24, %v7513_v12  ;;  %v12024_v53 = vadd.f32 %v3405_v57, %v3404_v55 }
 0x350   : > { %v4960_v29 = vadd.f32 %v4959_v60, %v4958_v16  ;;  %v4967_v32 = vadd.f32 %v4966_v47, %v4965_v37  ;;  %v1188_v54 = vadd.f32 %v11828_v27, %v15597_v4  ;;  %v12028_v11 = vadd.f32 %v4942_v10, %v4941_v14  ;;  %v12036_v16 = vpop.permute.xlu2 %5498  ;;  %v8891_v37 = vld [vmem:[%s9181_s12 + $0x160] sm:$0xff]  ;;  %v12042_v4 = vpop.f32.mrf.mxu2 }
 0x351   : > { %5610 = vperm.xlu1 %8694, %v8890_v43   ;;  %15596 = vst [vmem:[#allocation133_spill] sm:$0xff] %v12024_v53  ;;  %v4954_v13 = vrot.slane %v4953_v0, 2  ;;  %v3428_v62 = vsel %vm524_vm0, %v2940_v58, 0.0  ;;  %v12033_v63 = vsel %vm7122_vm7, %v3217_v41, %v7514_v33  ;;  %v3412_v31 = vrot.slane %v3411_v46, 1  ;;  %v15599_v10 = vld [vmem:[#allocation226_spill] sm:$0xff] }
 0x352   : > { %8511 = vmatmul.msk.f32.gmra.mxu3 %vm1454_vm1, %v1396_v44  ;;  %v3417_v43 = vrot.slane %v3416_v7, 2  ;;  %v4974_v55 = vadd.f32 %v4973_v28, %v4972_v30  ;;  %v4986_v12 = vsel %vm4544_vm6, %v4479_v50, 0.0  ;;  %15598 = vst [vmem:[#allocation214_spill] sm:$0xff] %v12036_v16  ;;  %v4949_v14 = vrot.slane %v4948_v9, 1  ;;  %v12040_v33 = vpop.f32.mrf.mxu1  ;;  %v8892_v28 = vld [vmem:[%s9181_s12 + $0x3c8] sm:$0xff] }
 0x353   : > { %v3423_v47 = vadd.f32 %v3422_v59, %v3421_v48  ;;  %v4981_v57 = vadd.f32 %v4980_v20, %v4979_v23  ;;  %v3223_v58 = vrot.slane %v15599_v10, 1  ;;  %v4961_v60 = vrot.slane %v4960_v29, 2  ;;  %15600 = vst [vmem:[#allocation47_spill] sm:$0xff] %v12042_v4  ;;  %8418 = vmatmul.msk.f32.gmra.mxu2 %vm524_vm0, %v8892_v28  ;;  %v15601_v50 = vld [vmem:[#allocation50_spill] sm:$0xff]  ;;  %v12048_v23 = vpop.permute.xlu0 %5478 }
 0x354   : > { %5618 = vperm.xlu0 %8693, %v8891_v37   ;;  %v3429_v44 = vrot.slane %v3428_v62, 4  ;;  %v4968_v24 = vrot.slane %v4967_v32, 2  ;;  %v1397_v41 = vmax.f32 %v1188_v54, 0.0  ;;  %v4955_v30 = vadd.f32 %v4954_v13, %v4953_v0  ;;  %15602 = vst [vmem:[#allocation122_spill] sm:$0xff] %v12048_v23  ;;  %v15603_v48 = vld [vmem:[#allocation162_spill] sm:$0xff] }
 0x355   : > { %v2941_v37 = vmul.f32 %v15601_v50, %v11953_v34  ;;  %v4987_v59 = vrot.slane %v4986_v12, 4  ;;  %v15604_v20 = vrot.slane %v15603_v48, 2  ;;  %v12053_v54 = vadd.f32 %v3412_v31, %v3411_v46  ;;  %v15606_v46 = vld [vmem:[#allocation217_spill] sm:$0xff]  ;;  %v12065_v31 = vpop.permute.xlu1 %5470 }
 0x356   : > { %v12055_v51 = vadd.f32 %v3417_v43, %v3416_v7  ;;  %v4975_v61 = vrot.slane %v4974_v55, 2  ;;  %v2049_v56 = vadd.f32 %v11974_v21, %v11799_v19  ;;  %v4950_v28 = vadd.f32 %v4949_v14, %v4948_v9  ;;  %15607 = vst [vmem:[#allocation136_spill] sm:$0xff] %v12065_v31 }
 0x357   : > { %v3229_v53 = vadd.f32 %v15604_v20, %v15603_v48  ;;  %15605 = vst [vmem:[#allocation213_spill] sm:$0xff] %v12053_v54  ;;  %v3424_v0 = vrot.slane %v3423_v47, 2  ;;  %v4982_v13 = vrot.slane %v4981_v57, 2  ;;  %v12061_v50 = vadd.f32 %v3223_v58, %v15599_v10  ;;  %v8894_v58 = vld [vmem:[%s9181_s12 + $0x178] sm:$0xff] }
 0x358   : > { %v4962_v34 = vadd.f32 %v4961_v60, %v4960_v29  ;;  %v3430_v1 = vadd.f32 %v3429_v44, %v3428_v62  ;;  %v4969_v48 = vadd.f32 %v4968_v24, %v4967_v32  ;;  %v1191_v7 = vadd.f32 %v11828_v27, %v15606_v46  ;;  %v15609_v29 = vld [vmem:[#allocation146_spill] sm:$0xff]  ;;  %v15610_v62 = vld [vmem:[#allocation125_spill] sm:$0xff] }
 0x359   : > { %5626 = vperm.xlu1 %8694, %v8893_v8   ;;  %v4956_v43 = vrot.slane %v4955_v30, 1  ;;  %v3435_v19 = vsel %vm524_vm0, %v2941_v37, 0.0  ;;  %v4988_v9 = vadd.f32 %v4987_v59, %v4986_v12  ;;  %v3230_v14 = vrot.slane %v3229_v53, 1  ;;  %v15611_v24 = vld [vmem:[#allocation9_spill] sm:$0xff] }
 0x35a   : > { %8512 = vmatmul.msk.f32.gmra.mxu3 %vm1454_vm1, %v1397_v41  ;;  %v4976_v20 = vadd.f32 %v4975_v61, %v4974_v55  ;;  %v12070_v10 = vmax.f32 %v2049_v56, 0.0  ;;  %v5953_v32 = vmul.f32 %v15610_v62, %v15609_v29  ;;  %v12075_v60 = vadd.f32 %v3424_v0, %v3423_v47  ;;  %v12081_v56 = vpop.permute.xlu2 %5510  ;;  %v15612_v55 = vld [vmem:[#allocation40_spill] sm:$0xff] }
 0x35b   : > { %v4983_v44 = vadd.f32 %v4982_v13, %v4981_v57  ;;  %v12079_v37 = vadd.f32 %v11828_v27, %v15611_v24  ;;  %v4963_v12 = vrot.slane %v4962_v34, 1  ;;  %v3431_v41 = vrot.slane %v3430_v1, 2  ;;  %v15613_v57 = vld [vmem:[#allocation53_spill] sm:$0xff]  ;;  %v12088_v24 = vpop.f32.mrf.mxu1 }
 0x35c   : > { %15608 = vst [vmem:[#allocation37_spill] sm:$0xff] %v12070_v10  ;;  %5630 = vperm.xlu0 %8693, %v8894_v58   ;;  %v4970_v59 = vrot.slane %v4969_v48, 1  ;;  %v3436_v46 = vrot.slane %v3435_v19, 4  ;;  %v4957_v61 = vadd.f32 %v4956_v43, %v4955_v30  ;;  %v2942_v29 = vmul.f32 %v15612_v55, %v11960_v42  ;;  %v15614_v30 = vld [vmem:[#allocation138_spill] sm:$0xff]  ;;  %v12094_v55 = vpop.permute.xlu0 %5490 }
 0x35d   : > { %v1398_v62 = vmax.f32 %v1191_v7, 0.0  ;;  %v4989_v47 = vrot.slane %v4988_v9, 2  ;;  %v4977_v0 = vrot.slane %v4976_v20, 1  ;;  %v2944_v13 = vmul.f32 %v15613_v57, %v12070_v10  ;;  %15615 = vst [vmem:[#allocation209_spill] sm:$0xff] %v12094_v55  ;;  %v8895_v7 = vld [vmem:[%s9181_s12 + $0x188] sm:$0xff] }
 0x35e   : > { %v6082_v58 = vsel %vm6081_vm10, %v5953_v32, 0.0  ;;  %v3231_v8 = vadd.f32 %v3230_v14, %v3229_v53  ;;  %v3426_v54 = vrot.slane %v12075_v60, 1  ;;  %v1399_v45 = vmax.f32 %v12079_v37, 0.0  ;;  %v15616_v53 = vld [vmem:[#allocation54_spill] sm:$0xff] }
 0x35f   : > { %v4480_v43 = vmul.f32 %v15614_v30, %v12070_v10  ;;  %v4984_v4 = vrot.slane %v4983_v44, 1  ;;  %v4964_v42 = vadd.f32 %v4963_v12, %v4962_v34  ;;  %v3432_v57 = vadd.f32 %v3431_v41, %v3430_v1  ;;  %v15617_v10 = vld [vmem:[#allocation151_spill] sm:$0xff]  ;;  %v12106_v34 = vpop.permute.xlu1 %5482 }
 0x360   : > { %v4971_v16 = vadd.f32 %v4970_v59, %v4969_v48  ;;  %v3437_v32 = vadd.f32 %v3436_v46, %v3435_v19  ;;  %v3442_v23 = vsel %vm524_vm0, %v2942_v29, 0.0  ;;  %v2943_v14 = vmul.f32 %v15616_v53, %v12002_v18  ;;  %v8896_v48 = vld [vmem:[%s9181_s12 + $0x198] sm:$0xff] }
 0x361   : > { %5638 = vperm.xlu1 %8694, %v8895_v7   ;;  %v6083_v15 = vrot.slane %v6082_v58, 4  ;;  %v4990_v37 = vadd.f32 %v4989_v47, %v4988_v9  ;;  %v3456_v30 = vsel %vm524_vm0, %v2944_v13, 0.0  ;;  %v5956_v55 = vmul.f32 %v11792_v22, %v15617_v10  ;;  %v15618_v13 = vld [vmem:[#allocation149_spill] sm:$0xff] }
 0x362   : > { %8513 = vmatmul.msk.f32.gmra.mxu3 %vm1454_vm1, %v1398_v62  ;;  %v4978_v31 = vadd.f32 %v4977_v0, %v4976_v20  ;;  %v7170_v1 = vsel %vm7114_vm2, %v4950_v28, %v12028_v11  ;;  %v4993_v19 = vsel %vm4544_vm6, %v4480_v43, 0.0  ;;  %v4985_v12 = vadd.f32 %v4984_v4, %v4983_v44  ;;  %v12116_v62 = vpop.f32.mrf.mxu2  ;;  %v8897_v4 = vld [vmem:[%s9181_s12 + $0x3d0] sm:$0xff]  ;;  %v12122_v0 = vpop.permute.xlu2 %5522 }
 0x363   : > { %v4991_v9 = vrot.slane %v4990_v37, 1  ;;  %v7171_v41 = vsel %vm7116_vm3, %v4957_v61, %v7170_v1  ;;  %v3438_v59 = vrot.slane %v3437_v32, 2  ;;  %v3443_v46 = vrot.slane %v3442_v23, 4  ;;  %8419 = vmatmul.msk.f32.gmra.mxu2 %vm524_vm0, %v8897_v4  ;;  %v15630_v4 = vld [vmem:[#allocation18_spill] sm:$0xff] }
 0x364   : > { %5646 = vperm.xlu0 %8693, %v8896_v48   ;;  %v2052_v22 = vadd.f32 %v11974_v21, %v11863_v52  ;;  %v7172_v20 = vsel %vm7118_vm4, %v4964_v42, %v7171_v41  ;;  %v3449_v11 = vsel %vm524_vm0, %v2943_v14, 0.0  ;;  %v6084_v28 = vadd.f32 %v6083_v15, %v6082_v58 }
 0x365   : > { %v4992_v10 = vadd.f32 %v4991_v9, %v4990_v37  ;;  %v7173_v29 = vsel %vm7120_vm5, %v4971_v16, %v7172_v20  ;;  %v3457_v44 = vrot.slane %v3456_v30, 4  ;;  %v4994_v61 = vrot.slane %v4993_v19, 4  ;;  %v8898_v16 = vld [vmem:[%s9181_s12 + $0x1a0] sm:$0xff]  ;;  %v12140_v9 = vpop.permute.xlu0 %5502 }
 0x366   : > { %v6103_v47 = vsel %vm6081_vm10, %v5956_v55, 0.0  ;;  %v7174_v52 = vsel %vm7122_vm7, %v4978_v31, %v7173_v29  ;;  %v3433_v42 = vrot.slane %v3432_v57, 1  ;;  %v1197_v15 = vadd.f32 %v11828_v27, %v15618_v13  ;;  %v2066_v31 = vpop.f32.mrf.mxu1  ;;  %v15626_v20 = vld [vmem:[#allocation25_spill] sm:$0xff] }
 0x367   : > { %v7175_v58 = vsel %vm7124_vm8, %v4985_v12, %v7174_v52  ;;  %v7516_v43 = vsel %vm7124_vm8, %v12061_v50, %v12033_v63  ;;  %v3444_v7 = vadd.f32 %v3443_v46, %v3442_v23  ;;  %v3450_v53 = vrot.slane %v3449_v11, 4 }
 0x368   : > { %v12131_v55 = vmax.f32 %v2052_v22, 0.0  ;;  %v7176_v14 = vsel %vm7126_vm9, %v4992_v10, %v7175_v58  ;;  %v15620_v37 = vrot.slane %v12055_v51, 1  ;;  %v6085_v48 = vrot.slane %v6084_v28, 2 }
 0x369   : > { %5650 = vperm.xlu1 %8694, %v8898_v16   ;;  %v6104_v12 = vrot.slane %v6103_v47, 4  ;;  %7247 = vrot.lane.b32.xlu2 %v7176_v14, %s9051_s26  ;;  %v12144_v63 = vsel %vm7126_vm9, %v3231_v8, %v7516_v43  ;;  %v12147_v23 = vadd.f32 %v3426_v54, %v12075_v60  ;;  %v12149_v50 = vadd.f32 %v3438_v59, %v3437_v32  ;;  %v12162_v54 = vpop.f32.mrf.mxu3  ;;  %v12168_v59 = vpop.permute.xlu1 %5494 }
 0x36a   : > { %15619 = vst [vmem:[#allocation219_spill] sm:$0xff] %v12131_v55  ;;  %v12137_v1 = vadd.f32 %v15620_v37, %v12055_v51  ;;  %8514 = vmatmul.msk.f32.gmra.mxu3 %vm1454_vm1, %v1399_v45  ;;  %v3458_v41 = vadd.f32 %v3457_v44, %v3456_v30  ;;  %v4995_v46 = vadd.f32 %v4994_v61, %v4993_v19  ;;  %v8899_v51 = vld [vmem:[%s9181_s12 + $0x1b0] sm:$0xff]  ;;  %v3445_v60 = vrot.slane %v3444_v7, 2 }
 0x36b   : > { %15622 = vst [vmem:[#allocation51_spill] sm:$0xff] %v12144_v63  ;;  %v12152_v22 = vadd.f32 %v3433_v42, %v3432_v57  ;;  %v12156_v10 = vadd.f32 %v11828_v27, %v15626_v20  ;;  %v2055_v45 = vadd.f32 %v11974_v21, %v11926_v2  ;;  %v2058_v8 = vadd.f32 %v11974_v21, %v12004_v35  ;;  %v15629_v19 = vld [vmem:[#allocation43_spill] sm:$0xff] }
 0x36c   : > { %15621 = vst [vmem:[#allocation19_spill] sm:$0xff] %v12137_v1  ;;  %5658 = vperm.xlu0 %8693, %v8899_v51   ;;  %v12164_v32 = vadd.f32 %v3450_v53, %v3449_v11  ;;  %v1400_v30 = vmax.f32 %v1197_v15, 0.0  ;;  %v2945_v57 = vmul.f32 %v15629_v19, %v12131_v55  ;;  %v6086_v29 = vadd.f32 %v6085_v48, %v6084_v28 }
 0x36d   : > { %15623 = vst [vmem:[#allocation224_spill] sm:$0xff] %v12147_v23  ;;  %v4481_v44 = vmul.f32 %v15630_v4, %v12131_v55  ;;  %v6105_v61 = vadd.f32 %v6104_v12, %v6103_v47  ;;  %v2061_v2 = vadd.f32 %v11974_v21, %v12040_v33  ;;  %v3459_v52 = vrot.slane %v3458_v41, 2  ;;  %v15638_v4 = vld [vmem:[#allocation153_spill] sm:$0xff] }
 0x36e   : > { %15624 = vst [vmem:[#allocation216_spill] sm:$0xff] %v12149_v50  ;;  %v4996_v11 = vrot.slane %v4995_v46, 2  ;;  %v2064_v42 = vadd.f32 %v11974_v21, %v12088_v24  ;;  %v1401_v13 = vmax.f32 %v12156_v10, 0.0  ;;  %v12178_v15 = vmax.f32 %v2055_v45, 0.0  ;;  %v12191_v24 = vpop.permute.xlu2 %5534  ;;  %v8901_v10 = vld [vmem:[%s9181_s12 + $0x1c0] sm:$0xff] }
 0x36f   : > { %15625 = vst [vmem:[#allocation221_spill] sm:$0xff] %v12152_v22  ;;  %v12182_v28 = vadd.f32 %v11828_v27, %v11777_v26  ;;  %v12184_v47 = vmax.f32 %v2058_v8, 0.0  ;;  %v12186_v58 = vadd.f32 %v3445_v60, %v3444_v7  ;;  %v3463_v16 = vsel %vm524_vm0, %v2945_v57, 0.0  ;;  %v8900_v26 = vld [vmem:[%s9181_s12 + $0x168] sm:$0xff]  ;;  %v15655_v55 = vld [vmem:[#allocation165_spill] sm:$0xff] }
 0x370   : > { %15627 = vst [vmem:[#allocation21_spill] sm:$0xff] %v12162_v54  ;;  %v2067_v43 = vadd.f32 %v11974_v21, %v2066_v31  ;;  %v6087_v53 = vrot.slane %v6086_v29, 1  ;;  %v5000_v14 = vsel %vm4544_vm6, %v4481_v44, 0.0  ;;  %v6106_v37 = vrot.slane %v6105_v61, 2  ;;  %v2069_v31 = vpop.f32.mrf.mxu1  ;;  %v15636_v8 = vld [vmem:[#allocation218_spill] sm:$0xff] }
 0x371   : > { %15628 = vst [vmem:[#allocation226_spill] sm:$0xff] %v12164_v32  ;;  %v12194_v48 = vmax.f32 %v2061_v2, 0.0  ;;  %5622 = vperm.xlu2 %8692, %v8900_v26   ;;  %v3460_v7 = vadd.f32 %v3459_v52, %v3458_v41  ;;  %v4997_v12 = vadd.f32 %v4996_v11, %v4995_v46  ;;  %v12200_v51 = vadd.f32 %v11828_v27, %v11812_v49  ;;  %v15637_v57 = vld [vmem:[#allocation150_spill] sm:$0xff]  ;;  %v5515_v41 = vpop.permute.xlu0 %5514  ;;  %v15640_v2 = vld [vmem:[#allocation180_spill] sm:$0xff]  ;;  %v12221_v35 = vpop.f32.mrf.mxu3 }
 0x372   : > { %15631 = vst [vmem:[#allocation50_spill] sm:$0xff] %v12178_v15  ;;  %8515 = vmatmul.msk.f32.gmra.mxu3 %vm1454_vm1, %v1400_v30  ;;  %v12202_v20 = vmax.f32 %v2064_v42, 0.0  ;;  %v3464_v45 = vrot.slane %v3463_v16, 4  ;;  %v4482_v60 = vmul.f32 %v15636_v8, %v12178_v15  ;;  %v4483_v30 = vmul.f32 %v15637_v57, %v12184_v47  ;;  %v15641_v26 = vld [vmem:[#allocation134_spill] sm:$0xff]  ;;  %v5507_v19 = vpop.permute.xlu1 %5506 }
 0x373   : > { %15632 = vst [vmem:[#allocation162_spill] sm:$0xff] %v12184_v47  ;;  %v5001_v46 = vrot.slane %v5000_v14, 4  ;;  %v5958_v49 = vmul.f32 %v11847_v38, %v15638_v4  ;;  %v12212_v44 = vmax.f32 %v2067_v43, 0.0  ;;  %v5970_v52 = vmul.f32 %v12081_v56, %v15640_v2  ;;  %v15643_v43 = vld [vmem:[#allocation222_spill] sm:$0xff] }
 0x374   : > { %15633 = vst [vmem:[#allocation217_spill] sm:$0xff] %v12186_v58  ;;  %5666 = vperm.xlu0 %8693, %v8901_v10   ;;  %v12216_v11 = vadd.f32 %v6087_v53, %v6086_v29  ;;  %v6107_v42 = vadd.f32 %v6106_v37, %v6105_v61  ;;  %v4484_v10 = vmul.f32 %v15641_v26, %v12194_v48  ;;  %v3461_v57 = vrot.slane %v3460_v7, 1  ;;  %v15644_v53 = vld [vmem:[#allocation181_spill] sm:$0xff] }
 0x375   : > { %15634 = vst [vmem:[#allocation146_spill] sm:$0xff] %v12194_v48  ;;  %v2070_v8 = vadd.f32 %v11974_v21, %v2069_v31  ;;  %v4998_v33 = vrot.slane %v4997_v12, 1  ;;  %v4485_v4 = vmul.f32 %v15643_v43, %v12202_v20  ;;  %v3465_v56 = vadd.f32 %v3464_v45, %v3463_v16  ;;  %v15645_v31 = vld [vmem:[#allocation10_spill] sm:$0xff] }
 0x376   : > { %15635 = vst [vmem:[#allocation125_spill] sm:$0xff] %v12202_v20  ;;  %v5007_v29 = vsel %vm4544_vm6, %v4482_v60, 0.0  ;;  %v5014_v61 = vsel %vm4544_vm6, %v4483_v30, 0.0  ;;  %v5971_v37 = vmul.f32 %v5515_v41, %v15644_v53  ;;  %v5002_v2 = vadd.f32 %v5001_v46, %v5000_v14  ;;  %v8902_v16 = vld [vmem:[%s9181_s12 + $0x180] sm:$0xff] }
 0x377   : > { %15639 = vst [vmem:[#allocation9_spill] sm:$0xff] %v12212_v44  ;;  %v6117_v21 = vsel %vm6081_vm10, %v5958_v49, 0.0  ;;  %v4486_v26 = vmul.f32 %v15645_v31, %v12212_v44  ;;  %v6201_v38 = vsel %vm6081_vm10, %v5970_v52, 0.0  ;;  %v6108_v22 = vrot.slane %v6107_v42, 1  ;;  %v15647_v45 = vld [vmem:[#allocation246_spill] sm:$0xff]  ;;  %v12246_v52 = vpop.permute.xlu2 %5546 }
 0x378   : > { %15642 = vst [vmem:[#allocation40_spill] sm:$0xff] %v12221_v35  ;;  %v5021_v43 = vsel %vm4544_vm6, %v4484_v10, 0.0  ;;  %v12234_v23 = vmax.f32 %v2070_v8, 0.0  ;;  %v15648_v14 = vrot.slane %v15647_v45, 1  ;;  %v12243_v30 = vadd.f32 %v3461_v57, %v3460_v7  ;;  %v8903_v10 = vld [vmem:[%s9181_s12 + $0x1d8] sm:$0xff] }
 0x379   : > { %5634 = vperm.xlu2 %8692, %v8902_v16   ;;  %v5008_v41 = vrot.slane %v5007_v29, 4  ;;  %v5015_v46 = vrot.slane %v5014_v61, 4  ;;  %v5028_v49 = vsel %vm4544_vm6, %v4485_v4, 0.0  ;;  %v3466_v8 = vrot.slane %v3465_v56, 2  ;;  %v15651_v4 = vld [vmem:[#allocation57_spill] sm:$0xff]  ;;  %v12261_v58 = vpop.permute.xlu0 %5526  ;;  %v12267_v18 = vpop.f32.mrf.mxu3 }
 0x37a   : > { %15646 = vst [vmem:[#allocation53_spill] sm:$0xff] %v12234_v23  ;;  %8516 = vmatmul.msk.f32.gmra.mxu3 %vm1454_vm1, %v1401_v13  ;;  %v12241_v60 = vadd.f32 %v15648_v14, %v15647_v45  ;;  %v6118_v53 = vrot.slane %v6117_v21, 4  ;;  %v6202_v31 = vrot.slane %v6201_v38, 4  ;;  %v6208_v13 = vsel %vm6081_vm10, %v5971_v37, 0.0 }
 0x37b   : > { %15650 = vst [vmem:[#allocation54_spill] sm:$0xff] %v12243_v30  ;;  %v5003_v16 = vrot.slane %v5002_v2, 2  ;;  %v5022_v1 = vrot.slane %v5021_v43, 4  ;;  %v12252_v45 = vadd.f32 %v11828_v27, %v11871_v3  ;;  %v5035_v7 = vsel %vm4544_vm6, %v4486_v26, 0.0 }
 0x37c   : > { %15649 = vst [vmem:[#allocation138_spill] sm:$0xff] %v12241_v60  ;;  %5678 = vperm.xlu0 %8693, %v8903_v10   ;;  %v12255_v57 = vadd.f32 %v4998_v33, %v4997_v12  ;;  %v2946_v14 = vmul.f32 %v15651_v4, %v12178_v15  ;;  %v5029_v30 = vrot.slane %v5028_v49, 4  ;;  %v15652_v10 = vld [vmem:[#allocation137_spill] sm:$0xff]  ;;  %v12263_v37 = vadd.f32 %v6108_v22, %v6107_v42  ;;  %v12272_v42 = vpop.permute.xlu1 %5518 }
 0x37d   : > { %v4487_v50 = vmul.f32 %v15652_v10, %v12234_v23  ;;  %v5009_v32 = vadd.f32 %v5008_v41, %v5007_v29  ;;  %v5016_v60 = vadd.f32 %v5015_v46, %v5014_v61  ;;  %v6209_v3 = vrot.slane %v6208_v13, 4  ;;  %15654 = vst [vmem:[#allocation149_spill] sm:$0xff] %v12267_v18  ;;  %v15656_v61 = vld [vmem:[#allocation143_spill] sm:$0xff] }
 0x37e   : > { %v12265_v63 = vadd.f32 %v3466_v8, %v3465_v56  ;;  %v6119_v26 = vadd.f32 %v6118_v53, %v6117_v21  ;;  %v5036_v33 = vrot.slane %v5035_v7, 4  ;;  %v6203_v12 = vadd.f32 %v6202_v31, %v6201_v38  ;;  %v8904_v41 = vld [vmem:[%s9181_s12 + $0x190] sm:$0xff] }
 0x37f   : > { %v5004_v4 = vadd.f32 %v5003_v16, %v5002_v2  ;;  %v5961_v10 = vmul.f32 %v11915_v40, %v15655_v55  ;;  %v5023_v15 = vadd.f32 %v5022_v1, %v5021_v43  ;;  %v3470_v29 = vsel %vm524_vm0, %v2946_v14, 0.0  ;;  %v15658_v43 = vld [vmem:[#allocation178_spill] sm:$0xff]  ;;  %v8905_v8 = vld [vmem:[%s9181_s12 + $0x1f0] sm:$0xff] }
 0x380   : > { %15653 = vst [vmem:[#allocation151_spill] sm:$0xff] %v12265_v63  ;;  %v5954_v56 = vmul.f32 %v11941_v36, %v15656_v61  ;;  %v5030_v21 = vadd.f32 %v5029_v30, %v5028_v49  ;;  %v5042_v38 = vsel %vm4544_vm6, %v4487_v50, 0.0  ;;  %v15657_v2 = vmax.f32 %v12182_v28, 0.0  ;;  %v12286_v28 = vpop.permute.xlu2 %5558 }
 0x381   : > { %5642 = vperm.xlu2 %8692, %v8904_v41   ;;  %v5010_v40 = vrot.slane %v5009_v32, 2  ;;  %v5017_v55 = vrot.slane %v5016_v60, 2  ;;  %v6210_v1 = vadd.f32 %v6209_v3, %v6208_v13  ;;  %v5969_v46 = vmul.f32 %v5507_v19, %v15658_v43  ;;  %v12289_v3 = vpop.f32.mrf.mxu2  ;;  %v12294_v18 = vpop.permute.xlu0 %5538 }
 0x382   : > { %8517 = vmatmul.msk.f32.gmra.mxu3 %vm1454_vm1, %v15657_v2  ;;  %v6120_v31 = vrot.slane %v6119_v26, 2  ;;  %v5037_v36 = vadd.f32 %v5036_v33, %v5035_v7  ;;  %v6204_v30 = vrot.slane %v6203_v12, 2  ;;  %v5005_v49 = vrot.slane %v5004_v4, 1 }
 0x383   : > { %v5024_v50 = vrot.slane %v5023_v15, 2  ;;  %v5043_v16 = vrot.slane %v5042_v38, 4  ;;  %v6194_v14 = vsel %vm6081_vm10, %v5969_v46, 0.0  ;;  %v3471_v61 = vrot.slane %v3470_v29, 4 }
 0x384   : > { %5690 = vperm.xlu0 %8693, %v8905_v8   ;;  %v6089_v41 = vsel %vm6081_vm10, %v5954_v56, 0.0  ;;  %v5031_v13 = vrot.slane %v5030_v21, 2  ;;  %v6195_v19 = vrot.slane %v6194_v14, 4  ;;  %v5011_v2 = vadd.f32 %v5010_v40, %v5009_v32 }
 0x385   : > { %v5018_v43 = vadd.f32 %v5017_v55, %v5016_v60  ;;  %v6138_v7 = vsel %vm6081_vm10, %v5961_v10, 0.0  ;;  %v6211_v33 = vrot.slane %v6210_v1, 2  ;;  %v12292_v8 = vadd.f32 %v6120_v31, %v6119_v26  ;;  %v8906_v55 = vld [vmem:[%s9181_s12 + $0x1a8] sm:$0xff]  ;;  %v12299_v10 = vpop.f32.mrf.mxu3 }
 0x386   : > { %v5038_v53 = vrot.slane %v5037_v36, 2  ;;  %v6205_v22 = vadd.f32 %v6204_v30, %v6203_v12  ;;  %v6196_v46 = vadd.f32 %v6195_v19, %v6194_v14  ;;  %v5006_v35 = vadd.f32 %v5005_v49, %v5004_v4  ;;  %15659 = vst [vmem:[#allocation25_spill] sm:$0xff] %v12299_v10  ;;  %v15661_v4 = vld [vmem:[#allocation144_spill] sm:$0xff] }
 0x387   : > { %v6090_v54 = vrot.slane %v6089_v41, 4  ;;  %v5025_v56 = vadd.f32 %v5024_v50, %v5023_v15  ;;  %v5044_v23 = vadd.f32 %v5043_v16, %v5042_v38  ;;  %v12296_v63 = vadd.f32 %v3471_v61, %v3470_v29  ;;  %v12306_v38 = vpop.permute.xlu1 %5530  ;;  %v8907_v29 = vld [vmem:[%s9181_s12 + $0x200] sm:$0xff]  ;;  %v15662_v19 = vld [vmem:[#allocation56_spill] sm:$0xff] }
 0x388   : > { %v6139_v32 = vrot.slane %v6138_v7, 4  ;;  %v5032_v60 = vadd.f32 %v5031_v13, %v5030_v21  ;;  %v6197_v40 = vrot.slane %v6196_v46, 2  ;;  %v15660_v26 = vmax.f32 %v12200_v51, 0.0 }
 0x389   : > { %5654 = vperm.xlu2 %8692, %v8906_v55   ;;  %v5012_v12 = vrot.slane %v5011_v2, 1  ;;  %v5019_v31 = vrot.slane %v5018_v43, 1  ;;  %v5955_v30 = vmul.f32 %v11962_v5, %v15661_v4  ;;  %v6212_v15 = vadd.f32 %v6211_v33, %v6210_v1 }
 0x38a   : > { %8518 = vmatmul.msk.f32.gmra.mxu3 %vm1454_vm1, %v15660_v26  ;;  %v5039_v49 = vadd.f32 %v5038_v53, %v5037_v36  ;;  %v6206_v50 = vrot.slane %v6205_v22, 1  ;;  %v6198_v16 = vadd.f32 %v6197_v40, %v6196_v46  ;;  %v6091_v14 = vadd.f32 %v6090_v54, %v6089_v41  ;;  %v12319_v54 = vpop.permute.xlu2 %5570  ;;  %v15663_v41 = vld [vmem:[#allocation152_spill] sm:$0xff]  ;;  %v12323_v40 = vpop.f32.mrf.mxu2 }
 0x38b   : > { %v5026_v61 = vrot.slane %v5025_v56, 1  ;;  %v12312_v51 = vadd.f32 %v11828_v27, %v11931_v25  ;;  %v5045_v13 = vrot.slane %v5044_v23, 2  ;;  %v2947_v5 = vmul.f32 %v15662_v19, %v12184_v47  ;;  %v15664_v19 = vld [vmem:[#allocation171_spill] sm:$0xff] }
 0x38c   : > { %5698 = vperm.xlu0 %8693, %v8907_v29   ;;  %v12316_v1 = vadd.f32 %v6139_v32, %v6138_v7  ;;  %v5033_v33 = vrot.slane %v5032_v60, 1  ;;  %v6199_v55 = vrot.slane %v6198_v16, 1  ;;  %v5013_v26 = vadd.f32 %v5012_v12, %v5011_v2 }
 0x38d   : > { %v5020_v4 = vadd.f32 %v5019_v31, %v5018_v43  ;;  %v6096_v53 = vsel %vm6081_vm10, %v5955_v30, 0.0  ;;  %v6213_v36 = vrot.slane %v6212_v15, 1  ;;  %v5957_v27 = vmul.f32 %v12019_v6, %v15663_v41  ;;  %v8908_v6 = vld [vmem:[%s9181_s12 + $0x1b8] sm:$0xff] }
 0x38e   : > { %v6207_v25 = vadd.f32 %v6206_v50, %v6205_v22  ;;  %v6200_v46 = vadd.f32 %v6199_v55, %v6198_v16  ;;  %v5040_v29 = vrot.slane %v5039_v49, 1  ;;  %v6092_v7 = vrot.slane %v6091_v14, 2  ;;  %v12331_v22 = vpop.permute.xlu0 %5550 }
 0x38f   : > { %v5027_v32 = vadd.f32 %v5026_v61, %v5025_v56  ;;  %v5964_v2 = vmul.f32 %v11987_v17, %v15664_v19  ;;  %v5046_v43 = vadd.f32 %v5045_v13, %v5044_v23  ;;  %v6097_v12 = vrot.slane %v6096_v53, 4  ;;  %v8909_v23 = vld [vmem:[%s9181_s12 + $0x218] sm:$0xff]  ;;  %v15666_v13 = vld [vmem:[#allocation158_spill] sm:$0xff]  ;;  %v12346_v41 = vpop.permute.xlu1 %5542 }
 0x390   : > { %v7845_v31 = vsel %vm7114_vm2, %v6207_v25, %v6200_v46  ;;  %v5034_v30 = vadd.f32 %v5033_v33, %v5032_v60  ;;  %v7177_v21 = vsel %vm7114_vm2, %v5006_v35, %v12255_v57  ;;  %v15665_v50 = vmax.f32 %v12252_v45, 0.0  ;;  %v15667_v33 = vld [vmem:[#allocation186_spill] sm:$0xff]  ;;  %v12344_v45 = vpop.f32.mrf.mxu3 }
 0x391   : > { %5662 = vperm.xlu2 %8692, %v8908_v6   ;;  %v6214_v56 = vadd.f32 %v6213_v36, %v6212_v15  ;;  %v5041_v16 = vadd.f32 %v5040_v29, %v5039_v49  ;;  %v5047_v61 = vrot.slane %v5046_v43, 1  ;;  %v7178_v17 = vsel %vm7116_vm3, %v5013_v26, %v7177_v21  ;;  %15668 = vst [vmem:[#allocation43_spill] sm:$0xff] %v12344_v45  ;;  %v15669_v15 = vld [vmem:[#allocation163_spill] sm:$0xff]  ;;  %v15670_v49 = vld [vmem:[#allocation136_spill] sm:$0xff] }
 0x392   : > { %8519 = vmatmul.msk.f32.gmra.mxu3 %vm1454_vm1, %v15665_v50  ;;  %v5959_v60 = vmul.f32 %v12008_v39, %v15666_v13  ;;  %v6110_v35 = vsel %vm6081_vm10, %v5957_v27, 0.0  ;;  %v7179_v57 = vsel %vm7118_vm4, %v5020_v4, %v7178_v17  ;;  %v5972_v55 = vmul.f32 %v12272_v42, %v15667_v33  ;;  %v15671_v50 = vld [vmem:[#allocation108_spill] sm:$0xff] }
 0x393   : > { %v5960_v36 = vmul.f32 %v15670_v49, %v15669_v15  ;;  %v5048_v21 = vadd.f32 %v5047_v61, %v5046_v43  ;;  %v7180_v26 = vsel %vm7120_vm5, %v5027_v32, %v7179_v57  ;;  %v12352_v25 = vsel %vm7116_vm3, %v6214_v56, %v7845_v31  ;;  %v15672_v56 = vld [vmem:[#allocation207_spill] sm:$0xff] }
 0x394   : > { %5710 = vperm.xlu0 %8693, %v8909_v23   ;;  %v3477_v39 = vsel %vm524_vm0, %v2947_v5, 0.0  ;;  %v1405_v4 = vmax.f32 %v12312_v51, 0.0  ;;  %v7181_v27 = vsel %vm7122_vm7, %v5034_v30, %v7180_v26  ;;  %v6215_v42 = vsel %vm6081_vm10, %v5972_v55, 0.0  ;;  %v12383_v23 = vpop.f32.mrf.mxu2  ;;  %v8911_v13 = vld [vmem:[%s9181_s12 + $0x1d0] sm:$0xff] }
 0x395   : > { %v6098_v46 = vadd.f32 %v6097_v12, %v6096_v53  ;;  %v6159_v29 = vsel %vm6081_vm10, %v5964_v2, 0.0  ;;  %v7182_v19 = vsel %vm7124_vm8, %v5041_v16, %v7181_v27  ;;  %v6216_v6 = vrot.slane %v6215_v42, 4  ;;  %v12368_v12 = vpop.permute.xlu2 %5582  ;;  %v8912_v55 = vld [vmem:[%s9181_s12 + $0x230] sm:$0xff] }
 0x396   : > { %v6124_v43 = vsel %vm6081_vm10, %v5959_v60, 0.0  ;;  %v6111_v32 = vrot.slane %v6110_v35, 4  ;;  %v7183_v31 = vsel %vm7126_vm9, %v5048_v21, %v7182_v19  ;;  %v5977_v5 = vmul.f32 %v12294_v18, %v15671_v50  ;;  %15673 = vst [vmem:[#allocation18_spill] sm:$0xff] %v12368_v12  ;;  %v12390_v26 = vpop.permute.xlu0 %5562 }
 0x397   : > { %v6093_v51 = vadd.f32 %v6092_v7, %v6091_v14  ;;  %v6131_v30 = vsel %vm6081_vm10, %v5960_v36, 0.0  ;;  %v5979_v53 = vmul.f32 %v12246_v52, %v15672_v56  ;;  %7249 = vrot.lane.b32.xlu1 %v7183_v31, %s9051_s26  ;;  %v6217_v2 = vadd.f32 %v6216_v6, %v6215_v42  ;;  %v12379_v14 = vld [vmem:[%s14803_s2] ss:$0 sm:$0xff]  ;;  %v15675_v52 = vld [vmem:[#allocation48_spill] sm:$0xff]  ;;  %15676 = vst [vmem:[#allocation218_spill] sm:$0xff] %v12390_v26  ;;  %v15677_v42 = vld [vmem:[#allocation46_spill] sm:$0xff] }
 0x398   : > { %v3473_v16 = vrot.slane %v12296_v63, 2  ;;  %v15674_v61 = vrot.slane %v12292_v8, 1  ;;  %v6160_v18 = vrot.slane %v6159_v29, 4  ;;  %v1215_v7 = vadd.f32 %v12379_v14, %v15675_v52  ;;  %v15678_v56 = vld [vmem:[#allocation166_spill] sm:$0xff] }
 0x399   : > { %5674 = vperm.xlu2 %8692, %v8911_v13   ;;  %v6141_v60 = vrot.slane %v12316_v1, 2  ;;  %v6099_v57 = vrot.slane %v6098_v46, 2  ;;  %v6218_v33 = vrot.slane %v6217_v2, 2  ;;  %v3478_v15 = vrot.slane %v3477_v39, 4 }
 0x39a   : > { %v12374_v17 = vadd.f32 %v15674_v61, %v12292_v8  ;;  %8520 = vmatmul.msk.f32.gmra.mxu3 %vm1454_vm1, %v1405_v4  ;;  %v6125_v8 = vrot.slane %v6124_v43, 4  ;;  %v6112_v49 = vadd.f32 %v6111_v32, %v6110_v35  ;;  %v6132_v36 = vrot.slane %v6131_v30, 4  ;;  %v15679_v61 = vld [vmem:[#allocation122_spill] sm:$0xff]  ;;  %v12400_v32 = vpop.f32.mrf.mxu3 }
 0x39b   : > { %v6250_v21 = vsel %vm6081_vm10, %v5977_v5, 0.0  ;;  %v6094_v27 = vrot.slane %v6093_v51, 1  ;;  %v2948_v19 = vmul.f32 %v15677_v42, %v12194_v48  ;;  %v6264_v4 = vsel %vm6081_vm10, %v5979_v53, 0.0  ;;  %v12402_v5 = vpop.permute.xlu1 %5554 }
 0x39c   : > { %5722 = vperm.xlu0 %8693, %v8912_v55   ;;  %v6219_v6 = vadd.f32 %v6218_v33, %v6217_v2  ;;  %v12396_v31 = vadd.f32 %v3473_v16, %v12296_v63  ;;  %v6161_v50 = vadd.f32 %v6160_v18, %v6159_v29  ;;  %v5962_v52 = vmul.f32 %v15679_v61, %v15678_v56  ;;  %v12407_v29 = vpop.f32.mrf.mxu1  ;;  %v15681_v56 = vld [vmem:[#allocation214_spill] sm:$0xff] }
 0x39d   : > { %v1406_v35 = vmax.f32 %v1215_v7, 0.0  ;;  %v6100_v13 = vadd.f32 %v6099_v57, %v6098_v46  ;;  %v6126_v55 = vadd.f32 %v6125_v8, %v6124_v43  ;;  %v6251_v42 = vrot.slane %v6250_v21, 4  ;;  %v8913_v43 = vld [vmem:[%s9181_s12 + $0x1c8] sm:$0xff]  ;;  %v15680_v8 = vld [vmem:[#allocation184_spill] sm:$0xff] }
 0x39e   : > { %v6220_v47 = vrot.slane %v6219_v6, 1  ;;  %v12405_v53 = vadd.f32 %v6141_v60, %v12316_v1  ;;  %v6113_v63 = vrot.slane %v6112_v49, 2  ;;  %v6133_v2 = vadd.f32 %v6132_v36, %v6131_v30  ;;  %v15682_v30 = vld [vmem:[#allocation47_spill] sm:$0xff] }
 0x39f   : > { %v6265_v16 = vrot.slane %v6264_v4, 4  ;;  %v12409_v18 = vadd.f32 %v3478_v15, %v3477_v39  ;;  %v6095_v7 = vadd.f32 %v6094_v27, %v6093_v51  ;;  %v12412_v33 = vsel %vm524_vm0, %v2948_v19, 0.0  ;;  %5670 = vperm.xlu1 %8694, %v8913_v43   ;;  %v8914_v61 = vld [vmem:[%s9181_s12 + $0x1e8] sm:$0xff]  ;;  %v12426_v27 = vpop.permute.xlu2 %5590  ;;  %v8915_v19 = vld [vmem:[%s9181_s12 + $0x240] sm:$0xff] }
 0x3a0   : > { %v6221_v46 = vadd.f32 %v6220_v47, %v6219_v6  ;;  %v6162_v57 = vrot.slane %v6161_v50, 2  ;;  %v5967_v1 = vmul.f32 %v15681_v56, %v15680_v8  ;;  %v6145_v60 = vsel %vm6081_vm10, %v5962_v52, 0.0  ;;  %15683 = vst [vmem:[#allocation150_spill] sm:$0xff] %v12426_v27  ;;  %v12430_v56 = vpop.f32.mrf.mxu2  ;;  %v15685_v6 = vld [vmem:[#allocation15_spill] sm:$0xff] }
 0x3a1   : > { %v1218_v36 = vadd.f32 %v12379_v14, %v15682_v30  ;;  %5686 = vperm.xlu2 %8692, %v8914_v61   ;;  %v6101_v39 = vrot.slane %v6100_v13, 1  ;;  %v6127_v51 = vrot.slane %v6126_v55, 2  ;;  %v6252_v15 = vadd.f32 %v6251_v42, %v6250_v21  ;;  %v15684_v61 = vld [vmem:[#allocation170_spill] sm:$0xff] }
 0x3a2   : > { %8521 = vmatmul.msk.f32.gmra.mxu3 %vm1454_vm1, %v1406_v35  ;;  %v12424_v47 = vsel %vm7118_vm4, %v6221_v46, %v12352_v25  ;;  %v6114_v52 = vadd.f32 %v6113_v63, %v6112_v49  ;;  %v6134_v43 = vrot.slane %v6133_v2, 2  ;;  %v6266_v8 = vadd.f32 %v6265_v16, %v6264_v4  ;;  %v12441_v4 = vpop.permute.xlu0 %5574 }
 0x3a3   : > { %v7831_v30 = vsel %vm7114_vm2, %v6095_v7, %v12216_v11  ;;  %v6146_v46 = vrot.slane %v6145_v60, 4  ;;  %v6180_v21 = vsel %vm6081_vm10, %v5967_v1, 0.0  ;;  %v1407_v42 = vmax.f32 %v1218_v36, 0.0  ;;  %v12446_v36 = vpop.f32.mrf.mxu3 }
 0x3a4   : > { %5730 = vperm.xlu0 %8693, %v8915_v19   ;;  %v5963_v19 = vmul.f32 %v12106_v34, %v15684_v61  ;;  %v5978_v49 = vmul.f32 %v12346_v41, %v15685_v6  ;;  %v6102_v63 = vadd.f32 %v6101_v39, %v6100_v13  ;;  %v12443_v16 = vadd.f32 %v6162_v57, %v6161_v50  ;;  %v12448_v34 = vpop.permute.xlu1 %5566  ;;  %v15687_v41 = vld [vmem:[#allocation145_spill] sm:$0xff]  ;;  %v12460_v10 = vpop.f32.mrf.mxu1 }
 0x3a5   : > { %v6128_v35 = vadd.f32 %v6127_v51, %v6126_v55  ;;  %v6253_v11 = vrot.slane %v6252_v15, 2  ;;  %v6115_v7 = vrot.slane %v6114_v52, 1  ;;  %v6135_v25 = vadd.f32 %v6134_v43, %v6133_v2  ;;  %15686 = vst [vmem:[#allocation153_spill] sm:$0xff] %v12448_v34  ;;  %v8916_v50 = vld [vmem:[%s9181_s12 + $0x1e0] sm:$0xff]  ;;  %v15690_v51 = vld [vmem:[#allocation188_spill] sm:$0xff] }
 0x3a6   : > { %v6267_v48 = vrot.slane %v6266_v8, 2  ;;  %v6257_v1 = vsel %vm6081_vm10, %v5978_v49, 0.0  ;;  %v6181_v61 = vrot.slane %v6180_v21, 4  ;;  %v6147_v45 = vadd.f32 %v6146_v46, %v6145_v60  ;;  %v15688_v55 = vld [vmem:[#allocation173_spill] sm:$0xff] }
 0x3a7   : > { %v5985_v6 = vmul.f32 %v12319_v54, %v15687_v41  ;;  %5682 = vperm.xlu1 %8694, %v8916_v50   ;;  %v6258_v13 = vrot.slane %v6257_v1, 4  ;;  %v15689_v57 = vld [vmem:[#allocation209_spill] sm:$0xff]  ;;  %v6152_v39 = vsel %vm6081_vm10, %v5963_v19, 0.0  ;;  %v5968_v43 = vmul.f32 %v12140_v9, %v15690_v51  ;;  %v12469_v34 = vpop.permute.xlu2 %7237 }
 0x3a8   : > { %v5965_v2 = vmul.f32 %v15689_v57, %v15688_v55  ;;  %v1221_v49 = vadd.f32 %v12379_v14, %v12116_v62  ;;  %v8917_v60 = vld [vmem:[%s9181_s12 + $0x1f8] sm:$0xff]  ;;  %v7832_v54 = vsel %vm7116_vm3, %v6102_v63, %v7831_v30  ;;  %v6254_v50 = vadd.f32 %v6253_v11, %v6252_v15  ;;  %v12473_v63 = vpop.f32.mrf.mxu2 }
 0x3a9   : > { %5694 = vperm.xlu2 %8692, %v8917_v60   ;;  %v15691_v46 = vld [vmem:[#allocation177_spill] sm:$0xff]  ;;  %v6259_v55 = vadd.f32 %v6258_v13, %v6257_v1  ;;  %v6129_v57 = vrot.slane %v6128_v35, 1  ;;  %v6116_v9 = vadd.f32 %v6115_v7, %v6114_v52  ;;  %v6136_v51 = vrot.slane %v6135_v25, 1 }
 0x3aa   : > { %8522 = vmatmul.msk.f32.gmra.mxu3 %vm1454_vm1, %v1407_v42  ;;  %v5966_v41 = vmul.f32 %v12168_v59, %v15691_v46  ;;  %v8918_v19 = vld [vmem:[%s9181_s12 + $0x258] sm:$0xff]  ;;  %v6268_v27 = vadd.f32 %v6267_v48, %v6266_v8  ;;  %v6182_v62 = vadd.f32 %v6181_v61, %v6180_v21  ;;  %v6153_v12 = vrot.slane %v6152_v39, 4 }
 0x3ab   : > { %v6306_v26 = vsel %vm6081_vm10, %v5985_v6, 0.0  ;;  %v6260_v60 = vrot.slane %v6259_v55, 2  ;;  %v6148_v42 = vrot.slane %v6147_v45, 2  ;;  %v6166_v30 = vsel %vm6081_vm10, %v5965_v2, 0.0  ;;  %v12479_v6 = vpop.permute.xlu0 %5586 }
 0x3ac   : > { %5742 = vperm.xlu0 %8693, %v8918_v19   ;;  %v6187_v59 = vsel %vm6081_vm10, %v5968_v43, 0.0  ;;  %v1408_v15 = vmax.f32 %v1221_v49, 0.0  ;;  %v6173_v11 = vsel %vm6081_vm10, %v5966_v41, 0.0  ;;  %v6255_v52 = vrot.slane %v6254_v50, 1  ;;  %v12481_v13 = vpop.permute.xlu1 %5578  ;;  %v8919_v19 = vld [vmem:[%s9181_s12 + $0x210] sm:$0xff] }
 0x3ad   : > { %v6261_v7 = vadd.f32 %v6260_v60, %v6259_v55  ;;  %v7833_v48 = vsel %vm7118_vm4, %v12263_v37, %v7832_v54  ;;  %v6269_v8 = vrot.slane %v6268_v27, 1  ;;  %v6307_v21 = vrot.slane %v6306_v26, 4 }
 0x3ae   : > { %v6137_v1 = vadd.f32 %v6136_v51, %v6135_v25  ;;  %v7834_v61 = vsel %vm7120_vm5, %v6116_v9, %v7833_v48  ;;  %v6130_v2 = vadd.f32 %v6129_v57, %v6128_v35  ;;  %v6167_v43 = vrot.slane %v6166_v30, 4  ;;  %v12487_v25 = vpop.f32.mrf.mxu3  ;;  %v12493_v48 = vpop.f32.mrf.mxu1 }
 0x3af   : > { %v6154_v49 = vadd.f32 %v6153_v12, %v6152_v39  ;;  %v6262_v46 = vrot.slane %v6261_v7, 1  ;;  %v6183_v41 = vrot.slane %v6182_v62, 2  ;;  %v6188_v55 = vrot.slane %v6187_v59, 4  ;;  %v8920_v39 = vld [vmem:[%s9181_s12 + $0x270] sm:$0xff] }
 0x3b0   : > { %v1224_v37 = vadd.f32 %v12379_v14, %v12289_v3  ;;  %v7835_v54 = vsel %vm7122_vm7, %v12374_v17, %v7834_v61  ;;  %v6174_v9 = vrot.slane %v6173_v11, 4  ;;  %v6256_v35 = vadd.f32 %v6255_v52, %v6254_v50  ;;  %v6985_v61 = vld [vmem:[%s14807_s6 + $0x18] sm:$0xff]  ;;  %v6984_v50 = vld [vmem:[%s14807_s6 + $0x10] sm:$0xff] }
 0x3b1   : > { %5706 = vperm.xlu2 %8692, %v8919_v19   ;;  %v6263_v57 = vadd.f32 %v6262_v46, %v6261_v7  ;;  %v7836_v12 = vsel %vm7124_vm8, %v6130_v2, %v7835_v54  ;;  %v6149_v51 = vadd.f32 %v6148_v42, %v6147_v45  ;;  %v6270_v60 = vadd.f32 %v6269_v8, %v6268_v27  ;;  %v15692_v7 = vld [vmem:[#allocation189_spill] sm:$0xff]  ;;  %v15695_v46 = vld [vmem:[#allocation227_spill] sm:$0xff]  ;;  %v12532_v19 = vpop.f32.mrf.mxu2 }
 0x3b2   : > { %8523 = vmatmul.msk.f32.gmra.mxu3 %vm1454_vm1, %v1408_v15  ;;  %v6308_v3 = vadd.f32 %v6307_v21, %v6306_v26  ;;  %v7837_v17 = vsel %vm7126_vm9, %v6137_v1, %v7836_v12  ;;  %v6168_v15 = vadd.f32 %v6167_v43, %v6166_v30  ;;  %v6155_v52 = vrot.slane %v6154_v49, 2  ;;  %7309 = vmatpush.msrb.mxu2 %v6985_v61  ;;  %v12520_v43 = vld [vmem:[%s14805_s4] ss:$0 sm:$0xff] }
 0x3b3   : > { %v5973_v2 = vmul.f32 %v12122_v0, %v15692_v7  ;;  %v7852_v45 = vsel %vm7114_vm2, %v6263_v57, %v6256_v35  ;;  %7943 = vrot.lane.b32.xlu1 %v7837_v17, %s9052_s13  ;;  %v15693_v26 = vrot.slane %v12412_v33, 4  ;;  %v6189_v42 = vadd.f32 %v6188_v55, %v6187_v59  ;;  %v6983_v0 = vld [vmem:[%s14807_s6 + $0x8] sm:$0xff]  ;;  %15694 = vst [vmem:[#allocation180_spill] sm:$0xff] %v12520_v43  ;;  %v12526_v55 = vpop.permute.xlu2 %7241  ;;  %v7236_v61 = vpop.permute.xlu0 %7235 }
 0x3b4   : > { %5754 = vperm.xlu0 %8693, %v8920_v39   ;;  %v1409_v8 = vmax.f32 %v1224_v37, 0.0  ;;  %v12512_v21 = vsel %vm7116_vm3, %v6270_v60, %v7852_v45  ;;  %v6184_v30 = vadd.f32 %v6183_v41, %v6182_v62  ;;  %v6175_v1 = vadd.f32 %v6174_v9, %v6173_v11  ;;  %7310 = vmatpush.msrb.mxu2 %v6984_v50  ;;  %v8922_v50 = vld [vmem:[%s9181_s12 + $0x228] sm:$0xff]  ;;  %v8923_v45 = vld [vmem:[%s9181_s12 + $0x280] sm:$0xff] }
 0x3b5   : > { %v12509_v27 = vadd.f32 %v15693_v26, %v12412_v33  ;;  %v2076_v33 = vadd.f32 %v12520_v43, %v12460_v10  ;;  %v5986_v59 = vmul.f32 %v12441_v4, %v15695_v46  ;;  %v15696_v37 = vrot.slane %v12405_v53, 1  ;;  %v6982_v10 = vld [vmem:[%s14807_s6] sm:$0xff] }
 0x3b6   : > { %v6164_v62 = vrot.slane %v12443_v16, 1  ;;  %v6150_v11 = vrot.slane %v6149_v51, 1  ;;  %v6309_v41 = vrot.slane %v6308_v3, 2  ;;  %v6169_v9 = vrot.slane %v6168_v15, 2  ;;  %7311 = vmatpush.msrb.mxu2 %v6983_v0  ;;  %v12549_v46 = vpop.f32.mrf.mxu3 }
 0x3b7   : > { %v6144_v54 = vadd.f32 %v15696_v37, %v12405_v53  ;;  %v6156_v4 = vadd.f32 %v6155_v52, %v6154_v49  ;;  %v6222_v35 = vsel %vm6081_vm10, %v5973_v2, 0.0  ;;  %v6313_v57 = vsel %vm6081_vm10, %v5986_v59, 0.0  ;;  %v7234_v53 = vpop.permute.xlu1 %7233  ;;  %v15698_v59 = vld [vmem:[#allocation60_spill] sm:$0xff] }
 0x3b8   : > { %v6190_v12 = vrot.slane %v6189_v42, 2  ;;  %v2073_v39 = vadd.f32 %v12520_v43, %v12407_v29  ;;  %v1227_v60 = vadd.f32 %v12379_v14, %v12323_v40  ;;  %v6314_v17 = vrot.slane %v6313_v57, 4  ;;  %7312 = vmatpush.msrb.mxu2 %v6982_v10  ;;  %v8924_v10 = vld [vmem:[%s9181_s12 + $0x208] sm:$0xff] }
 0x3b9   : > { %5718 = vperm.xlu2 %8692, %v8922_v50   ;;  %v6185_v52 = vrot.slane %v6184_v30, 1  ;;  %v6176_v7 = vrot.slane %v6175_v1, 2  ;;  %v12546_v2 = vmax.f32 %v2076_v33, 0.0  ;;  %v6151_v29 = vadd.f32 %v6150_v11, %v6149_v51  ;;  %8553 = vmatmul.msk.f32.vlgmr.msrb.gmra.mxu2 %vm524_vm0, %v7234_v53  ;;  %v2081_v11 = vpop.f32.mrf.mxu1 }
 0x3ba   : > { %8524 = vmatmul.msk.f32.gmra.mxu3 %vm1454_vm1, %v1409_v8  ;;  %v6223_v26 = vrot.slane %v6222_v35, 4  ;;  %v6310_v0 = vadd.f32 %v6309_v41, %v6308_v3  ;;  %v6315_v40 = vadd.f32 %v6314_v17, %v6313_v57  ;;  %v12553_v8 = vadd.f32 %v6164_v62, %v12443_v16  ;;  %v15700_v16 = vld [vmem:[#allocation225_spill] sm:$0xff] }
 0x3bb   : > { %15697 = vst [vmem:[#allocation134_spill] sm:$0xff] %v12546_v2  ;;  %v12557_v37 = vmul.f32 %v15698_v59, %v12202_v20  ;;  %v6170_v33 = vadd.f32 %v6169_v9, %v6168_v15  ;;  %v6157_v50 = vrot.slane %v6156_v4, 1  ;;  %5702 = vperm.xlu1 %8694, %v8924_v10   ;;  %v12560_v51 = vmax.f32 %v2073_v39, 0.0  ;;  %v15701_v59 = vld [vmem:[#allocation164_spill] sm:$0xff]  ;;  %v15702_v10 = vld [vmem:[#allocation155_spill] sm:$0xff] }
 0x3bc   : > { %5762 = vperm.xlu0 %8693, %v8923_v45   ;;  %v6191_v45 = vadd.f32 %v6190_v12, %v6189_v42  ;;  %v1410_v3 = vmax.f32 %v1227_v60, 0.0  ;;  %v6316_v41 = vrot.slane %v6315_v40, 2  ;;  %v12562_v57 = vadd.f32 %v6185_v52, %v6184_v30  ;;  %v5607_v52 = vpop.permute.xlu2 %5606 }
 0x3bd   : > { %15699 = vst [vmem:[#allocation222_spill] sm:$0xff] %v12560_v51  ;;  %v6177_v53 = vadd.f32 %v6176_v7, %v6175_v1  ;;  %v4489_v62 = vmul.f32 %v15700_v16, %v12546_v2  ;;  %v2079_v17 = vadd.f32 %v12520_v43, %v12493_v48  ;;  %v7838_v15 = vsel %vm7114_vm2, %v6151_v29, %v6144_v54  ;;  %v8925_v29 = vld [vmem:[%s9181_s12 + $0x238] sm:$0xff] }
 0x3be   : > { %v12569_v9 = vadd.f32 %v6223_v26, %v6222_v35  ;;  %v6311_v42 = vrot.slane %v6310_v0, 1  ;;  %v6317_v12 = vadd.f32 %v6316_v41, %v6315_v40  ;;  %v6171_v39 = vrot.slane %v6170_v33, 1  ;;  %v12578_v35 = vpop.f32.mrf.mxu2 }
 0x3bf   : > { %v6158_v60 = vadd.f32 %v6157_v50, %v6156_v4  ;;  %v5976_v30 = vmul.f32 %v12191_v24, %v15701_v59  ;;  %v2082_v1 = vadd.f32 %v12520_v43, %v2081_v11  ;;  %v6192_v7 = vrot.slane %v6191_v45, 1  ;;  %v8926_v50 = vld [vmem:[%s9181_s12 + $0x298] sm:$0xff]  ;;  %v15703_v59 = vld [vmem:[#allocation231_spill] sm:$0xff] }
 0x3c0   : > { %v4488_v16 = vmul.f32 %v15702_v10, %v12560_v51  ;;  %v1230_v48 = vadd.f32 %v12379_v14, %v12383_v23  ;;  %v6318_v54 = vrot.slane %v6317_v12, 1  ;;  %v6178_v4 = vrot.slane %v6177_v53, 1 }
 0x3c1   : > { %5726 = vperm.xlu2 %8692, %v8925_v29   ;;  %v5056_v24 = vsel %vm4544_vm6, %v4489_v62, 0.0  ;;  %v12583_v26 = vmax.f32 %v2079_v17, 0.0  ;;  %v2085_v40 = vadd.f32 %v12520_v43, %v12400_v32  ;;  %v6312_v11 = vadd.f32 %v6311_v42, %v6310_v0  ;;  %8554 = vmatmul.msk.f32.gmra.mxu2 %vm524_vm0, %v7236_v61  ;;  %v8927_v0 = vld [vmem:[%s9181_s12 + $0x220] sm:$0xff]  ;;  %v12610_v61 = vpop.f32.mrf.mxu3 }
 0x3c2   : > { %8525 = vmatmul.msk.f32.gmra.mxu3 %vm1454_vm1, %v1410_v3  ;;  %v6319_v23 = vadd.f32 %v6318_v54, %v6317_v12  ;;  %v2088_v41 = vadd.f32 %v12520_v43, %v12446_v36  ;;  %v5987_v10 = vmul.f32 %v12481_v13, %v15703_v59  ;;  %v12592_v3 = vpop.permute.xlu0 %7239  ;;  %v6172_v62 = vadd.f32 %v6171_v39, %v6170_v33 }
 0x3c3   : > { %v12596_v17 = vsel %vm6081_vm10, %v5976_v30, 0.0  ;;  %v12598_v29 = vmax.f32 %v2082_v1, 0.0  ;;  %v2091_v32 = vadd.f32 %v12520_v43, %v12487_v25  ;;  %5714 = vperm.xlu1 %8694, %v8927_v0   ;;  %v7839_v36 = vsel %vm7116_vm3, %v6158_v60, %v7838_v15  ;;  %15705 = vst [vmem:[#allocation10_spill] sm:$0xff] %v12610_v61  ;;  %v12615_v1 = vpop.permute.xlu1 %5594  ;;  %v15707_v15 = vld [vmem:[#allocation139_spill] sm:$0xff] }
 0x3c4   : > { %5774 = vperm.xlu0 %8693, %v8926_v50   ;;  %v12605_v42 = vsel %vm4544_vm6, %v4488_v16, 0.0  ;;  %v1411_v13 = vmax.f32 %v1230_v48, 0.0  ;;  %v12608_v12 = vsel %vm7114_vm2, %v6319_v23, %v6312_v11  ;;  %v6193_v33 = vadd.f32 %v6192_v7, %v6191_v45  ;;  %v15709_v50 = vld [vmem:[#allocation228_spill] sm:$0xff] }
 0x3c5   : > { %15704 = vst [vmem:[#allocation181_spill] sm:$0xff] %v12598_v29  ;;  %v5057_v39 = vrot.slane %v5056_v24, 4  ;;  %v12612_v30 = vmax.f32 %v2085_v40, 0.0  ;;  %v6320_v25 = vsel %vm6081_vm10, %v5987_v10, 0.0  ;;  %v6179_v54 = vadd.f32 %v6178_v4, %v6177_v53  ;;  %v8928_v10 = vld [vmem:[%s9181_s12 + $0x250] sm:$0xff] }
 0x3c6   : > { %v4490_v60 = vmul.f32 %v15707_v15, %v12583_v26  ;;  %v12619_v16 = vmax.f32 %v2088_v41, 0.0  ;;  %v6321_v48 = vrot.slane %v6320_v25, 4  ;;  %v4491_v11 = vmul.f32 %v15709_v50, %v12598_v29  ;;  %v15711_v41 = vld [vmem:[#allocation29_spill] sm:$0xff]  ;;  %v15713_v15 = vld [vmem:[#allocation204_spill] sm:$0xff] }
 0x3c7   : > { %15706 = vst [vmem:[#allocation246_spill] sm:$0xff] %v12612_v30  ;;  %v1233_v45 = vadd.f32 %v12379_v14, %v12430_v56  ;;  %v12625_v7 = vmax.f32 %v2091_v32, 0.0  ;;  %v2094_v40 = vadd.f32 %v12520_v43, %v12549_v46  ;;  %v5050_v53 = vrot.slane %v12605_v42, 4  ;;  %v15712_v56 = vld [vmem:[#allocation194_spill] sm:$0xff]  ;;  %v15714_v50 = vld [vmem:[#allocation229_spill] sm:$0xff] }
 0x3c8   : > { %15708 = vst [vmem:[#allocation57_spill] sm:$0xff] %v12619_v16  ;;  %v6322_v4 = vadd.f32 %v6321_v48, %v6320_v25  ;;  %v7840_v23 = vsel %vm7118_vm4, %v12553_v8, %v7839_v36  ;;  %v5994_v59 = vmul.f32 %v5607_v52, %v15711_v41  ;;  %v12635_v0 = vadd.f32 %v5057_v39, %v5056_v24  ;;  %v12643_v48 = vpop.permute.xlu2 %7247  ;;  %v8929_v8 = vld [vmem:[%s9181_s12 + $0x2b0] sm:$0xff]  ;;  %v12649_v39 = vpop.f32.mrf.mxu2 }
 0x3c9   : > { %15710 = vst [vmem:[#allocation137_spill] sm:$0xff] %v12625_v7  ;;  %5738 = vperm.xlu2 %8692, %v8928_v10   ;;  %v5974_v32 = vmul.f32 %v12261_v58, %v15712_v56  ;;  %v5975_v46 = vmul.f32 %v12306_v38, %v15713_v15  ;;  %v4492_v25 = vmul.f32 %v15714_v50, %v12612_v30  ;;  %v5063_v52 = vsel %vm4544_vm6, %v4490_v60, 0.0  ;;  %v15715_v36 = vld [vmem:[#allocation220_spill] sm:$0xff]  ;;  %v15716_v41 = vld [vmem:[#allocation167_spill] sm:$0xff] }
 0x3ca   : > { %8526 = vmatmul.msk.f32.gmra.mxu3 %vm1454_vm1, %v1411_v13  ;;  %v4493_v13 = vmul.f32 %v15715_v36, %v12619_v16  ;;  %v6323_v24 = vrot.slane %v6322_v4, 2  ;;  %v6369_v58 = vsel %vm6081_vm10, %v5994_v59, 0.0  ;;  %8555 = vmatmul.msk.f32.gmra.mxu2 %vm524_vm0, %v12469_v34  ;;  %v5070_v38 = vsel %vm4544_vm6, %v4491_v11, 0.0  ;;  %v5603_v49 = vpop.permute.xlu0 %5602 }
 0x3cb   : > { %v4494_v10 = vmul.f32 %v15716_v41, %v12625_v7  ;;  %v12657_v56 = vmax.f32 %v2094_v40, 0.0  ;;  %v7841_v60 = vsel %vm7120_vm5, %v6172_v62, %v7840_v23  ;;  %v1412_v15 = vmax.f32 %v1233_v45, 0.0  ;;  %v12667_v45 = vpop.f32.mrf.mxu3 }
 0x3cc   : > { %5786 = vperm.xlu0 %8693, %v8929_v8   ;;  %v6324_v50 = vadd.f32 %v6323_v24, %v6322_v4  ;;  %v7842_v8 = vsel %vm7122_vm7, %v6179_v54, %v7841_v60  ;;  %v6370_v36 = vrot.slane %v6369_v58, 4  ;;  %v5064_v20 = vrot.slane %v5063_v52, 4  ;;  %15718 = vst [vmem:[#allocation143_spill] sm:$0xff] %v12667_v45  ;;  %v15719_v4 = vld [vmem:[#allocation179_spill] sm:$0xff] }
 0x3cd   : > { %15717 = vst [vmem:[#allocation165_spill] sm:$0xff] %v12657_v56  ;;  %v6236_v59 = vsel %vm6081_vm10, %v5975_v46, 0.0  ;;  %v5077_v34 = vsel %vm4544_vm6, %v4492_v25, 0.0  ;;  %v7843_v11 = vsel %vm7124_vm8, %v12562_v57, %v7842_v8  ;;  %v5071_v16 = vrot.slane %v5070_v38, 4  ;;  %v15720_v25 = vld [vmem:[#allocation30_spill] sm:$0xff]  ;;  %v12674_v57 = vpop.permute.xlu1 %5598 }
 0x3ce   : > { %v5084_v40 = vsel %vm4544_vm6, %v4493_v13, 0.0  ;;  %v6325_v41 = vrot.slane %v6324_v50, 1  ;;  %v7844_v62 = vsel %vm7126_vm9, %v6193_v33, %v7843_v11  ;;  %v5091_v54 = vsel %vm4544_vm6, %v4494_v10, 0.0 }
 0x3cf   : > { %v4495_v23 = vmul.f32 %v15719_v4, %v12657_v56  ;;  %7945 = vrot.lane.b32.xlu1 %v7844_v62, %s9052_s13  ;;  %v6371_v46 = vadd.f32 %v6370_v36, %v6369_v58  ;;  %v5993_v24 = vmul.f32 %v5603_v49, %v15720_v25  ;;  %v6229_v13 = vsel %vm6081_vm10, %v5974_v32, 0.0  ;;  %v8930_v62 = vld [vmem:[%s9181_s12 + $0x2c0] sm:$0xff] }
 0x3d0   : > { %v5078_v60 = vrot.slane %v5077_v34, 4  ;;  %v1236_v33 = vadd.f32 %v12379_v14, %v12473_v63  ;;  %v6326_v8 = vadd.f32 %v6325_v41, %v6324_v50  ;;  %v5065_v10 = vadd.f32 %v5064_v20, %v5063_v52  ;;  %v12690_v50 = vpop.permute.xlu2 %5622 }
 0x3d1   : > { %v5085_v11 = vrot.slane %v5084_v40, 4  ;;  %v6372_v7 = vrot.slane %v6371_v46, 2  ;;  %v6362_v4 = vsel %vm6081_vm10, %v5993_v24, 0.0  ;;  %v6237_v58 = vrot.slane %v6236_v59, 4  ;;  %15722 = vst [vmem:[#allocation144_spill] sm:$0xff] %v12690_v50 }
 0x3d2   : > { %8527 = vmatmul.msk.f32.gmra.mxu3 %vm1454_vm1, %v1412_v15  ;;  %v5092_v49 = vrot.slane %v5091_v54, 4  ;;  %v12684_v36 = vsel %vm7116_vm3, %v6326_v8, %v12608_v12  ;;  %v6363_v32 = vrot.slane %v6362_v4, 4  ;;  %8556 = vmatmul.msk.f32.gmra.mxu2 %vm524_vm0, %v12592_v3  ;;  %v5051_v63 = vadd.f32 %v5050_v53, %v12605_v42 }
 0x3d3   : > { %15721 = vst [vmem:[#allocation178_spill] sm:$0xff] %v12684_v36  ;;  %v6230_v15 = vrot.slane %v6229_v13, 4  ;;  %v5072_v20 = vadd.f32 %v5071_v16, %v5070_v38  ;;  %v5098_v52 = vsel %vm4544_vm6, %v4495_v23, 0.0  ;;  %v5079_v41 = vadd.f32 %v5078_v60, %v5077_v34  ;;  %v12700_v36 = vpop.f32.mrf.mxu3 }
 0x3d4   : > { %5794 = vperm.xlu0 %8693, %v8930_v62   ;;  %v1413_v25 = vmax.f32 %v1236_v33, 0.0  ;;  %v6373_v24 = vadd.f32 %v6372_v7, %v6371_v46  ;;  %v12692_v62 = vpop.f32.mrf.mxu2  ;;  %v6364_v12 = vadd.f32 %v6363_v32, %v6362_v4  ;;  %v6244_v8 = vrot.slane %v12596_v17, 4  ;;  %v8931_v7 = vld [vmem:[%s9181_s12 + $0x248] sm:$0xff]  ;;  %15723 = vst [vmem:[#allocation56_spill] sm:$0xff] %v12700_v36 }
 0x3d5   : > { %v5059_v56 = vrot.slane %v12635_v0, 2  ;;  %v5066_v3 = vrot.slane %v5065_v10, 2  ;;  %v5086_v30 = vadd.f32 %v5085_v11, %v5084_v40  ;;  %v6238_v42 = vadd.f32 %v6237_v58, %v6236_v59  ;;  %v8932_v58 = vld [vmem:[%s9181_s12 + $0x2d8] sm:$0xff] }
 0x3d6   : > { %v5093_v53 = vadd.f32 %v5092_v49, %v5091_v54  ;;  %v5099_v16 = vrot.slane %v5098_v52, 4  ;;  %v6365_v38 = vrot.slane %v6364_v12, 2  ;;  %v6225_v23 = vrot.slane %v12569_v9, 2 }
 0x3d7   : > { %v5052_v50 = vrot.slane %v5051_v63, 2  ;;  %v6231_v34 = vadd.f32 %v6230_v15, %v6229_v13  ;;  %v5073_v60 = vrot.slane %v5072_v20, 2  ;;  %5734 = vperm.xlu1 %8694, %v8931_v7   ;;  %v5080_v46 = vrot.slane %v5079_v41, 2  ;;  %v7244_v13 = vpop.permute.xlu1 %7243 }
 0x3d8   : > { %v1239_v33 = vadd.f32 %v12379_v14, %v12532_v19  ;;  %v6374_v4 = vrot.slane %v6373_v24, 1  ;;  %v6366_v32 = vadd.f32 %v6365_v38, %v6364_v12  ;;  %v6245_v59 = vadd.f32 %v6244_v8, %v12596_v17  ;;  %v12709_v43 = vpop.permute.xlu2 %5634 }
 0x3d9   : > { %v5060_v40 = vadd.f32 %v5059_v56, %v12635_v0  ;;  %v5067_v54 = vadd.f32 %v5066_v3, %v5065_v10  ;;  %v5087_v11 = vrot.slane %v5086_v30, 2  ;;  %v6239_v49 = vrot.slane %v6238_v42, 2 }
 0x3da   : > { %8528 = vmatmul.msk.f32.gmra.mxu3 %vm1454_vm1, %v1413_v25  ;;  %v5094_v15 = vrot.slane %v5093_v53, 2  ;;  %v5100_v7 = vadd.f32 %v5099_v16, %v5098_v52  ;;  %v6367_v61 = vrot.slane %v6366_v32, 1  ;;  %8557 = vmatmul.msk.f32.gmra.mxu2 %vm524_vm0, %v12526_v55  ;;  %v6226_v19 = vadd.f32 %v6225_v23, %v12569_v9 }
 0x3db   : > { %v5053_v12 = vadd.f32 %v5052_v50, %v5051_v63  ;;  %v6232_v25 = vrot.slane %v6231_v34, 2  ;;  %v5074_v38 = vadd.f32 %v5073_v60, %v5072_v20  ;;  %v5081_v17 = vadd.f32 %v5080_v46, %v5079_v41 }
 0x3dc   : > { %5806 = vperm.xlu0 %8693, %v8932_v58   ;;  %v1414_v8 = vmax.f32 %v1239_v33, 0.0  ;;  %v6375_v0 = vadd.f32 %v6374_v4, %v6373_v24  ;;  %v6368_v56 = vadd.f32 %v6367_v61, %v6366_v32  ;;  %v6246_v10 = vrot.slane %v6245_v59, 2  ;;  %v12714_v9 = vpop.f32.mrf.mxu2  ;;  %v7246_v24 = vpop.permute.xlu0 %7245  ;;  %v8934_v32 = vld [vmem:[%s9181_s12 + $0x2f0] sm:$0xff] }
 0x3dd   : > { %v5061_v3 = vrot.slane %v5060_v40, 1  ;;  %v5068_v58 = vrot.slane %v5067_v54, 1  ;;  %v5088_v36 = vadd.f32 %v5087_v11, %v5086_v30  ;;  %v6240_v52 = vadd.f32 %v6239_v49, %v6238_v42  ;;  %v8933_v30 = vld [vmem:[%s9181_s12 + $0x260] sm:$0xff] }
 0x3de   : > { %v5095_v16 = vadd.f32 %v5094_v15, %v5093_v53  ;;  %v5101_v45 = vrot.slane %v5100_v7, 2  ;;  %v12712_v55 = vsel %vm7114_vm2, %v6375_v0, %v6368_v56  ;;  %v15724_v63 = vrot.slane %v12409_v18, 2 }
 0x3df   : > { %v5054_v61 = vrot.slane %v5053_v12, 1  ;;  %v6233_v50 = vadd.f32 %v6232_v25, %v6231_v34  ;;  %v5075_v41 = vrot.slane %v5074_v38, 1  ;;  %5746 = vperm.xlu1 %8694, %v8933_v30   ;;  %v15725_v42 = vrot.slane %v12509_v27, 2  ;;  %v12733_v25 = vpop.f32.mrf.mxu3 }
 0x3e0   : > { %v12719_v20 = vadd.f32 %v15724_v63, %v12409_v18  ;;  %v3491_v23 = vsel %vm524_vm0, %v12557_v37, 0.0  ;;  %v5082_v60 = vrot.slane %v5081_v17, 1  ;;  %v1242_v18 = vadd.f32 %v12379_v14, %v12578_v35  ;;  %v12736_v63 = vpop.permute.xlu1 %5610 }
 0x3e1   : > { %v12725_v53 = vadd.f32 %v15725_v42, %v12509_v27  ;;  %v6227_v46 = vrot.slane %v6226_v19, 1  ;;  %v6247_v34 = vadd.f32 %v6246_v10, %v6245_v59  ;;  %v5062_v33 = vadd.f32 %v5061_v3, %v5060_v40  ;;  %v15726_v59 = vld [vmem:[#allocation59_spill] sm:$0xff] }
 0x3e2   : > { %8529 = vmatmul.msk.f32.gmra.mxu3 %vm1454_vm1, %v1414_v8  ;;  %v5089_v4 = vrot.slane %v5088_v36, 1  ;;  %v5069_v11 = vadd.f32 %v5068_v58, %v5067_v54  ;;  %v6241_v49 = vrot.slane %v6240_v52, 1  ;;  %v5096_v15 = vrot.slane %v5095_v16, 1  ;;  %8558 = vmatmul.msk.f32.gmra.mxu2 %vm524_vm0, %v7244_v13 }
 0x3e3   : > { %v5102_v27 = vadd.f32 %v5101_v45, %v5100_v7  ;;  %v3492_v37 = vrot.slane %v3491_v23, 4  ;;  %v5055_v0 = vadd.f32 %v5054_v61, %v5053_v12  ;;  %v6234_v56 = vrot.slane %v6233_v50, 1  ;;  %v15727_v7 = vld [vmem:[#allocation63_spill] sm:$0xff] }
 0x3e4   : > { %5818 = vperm.xlu0 %8693, %v8934_v32   ;;  %v5076_v35 = vadd.f32 %v5075_v41, %v5074_v38  ;;  %v2950_v40 = vmul.f32 %v15726_v59, %v12212_v44  ;;  %v5083_v8 = vadd.f32 %v5082_v60, %v5081_v17  ;;  %v1415_v10 = vmax.f32 %v1242_v18, 0.0  ;;  %v12745_v17 = vpop.permute.xlu2 %5642  ;;  %v15728_v60 = vld [vmem:[#allocation126_spill] sm:$0xff]  ;;  %v12751_v18 = vpop.f32.mrf.mxu2 }
 0x3e5   : > { %v5103_v3 = vrot.slane %v5102_v27, 1  ;;  %v6228_v54 = vadd.f32 %v6227_v46, %v6226_v19  ;;  %v6248_v58 = vrot.slane %v6247_v34, 1  ;;  %v5090_v30 = vadd.f32 %v5089_v4, %v5088_v36  ;;  %v12761_v4 = vpop.permute.xlu0 %5614  ;;  %v15755_v44 = vld [vmem:[#allocation150_spill] sm:$0xff] }
 0x3e6   : > { %v7184_v45 = vsel %vm7114_vm2, %v5062_v33, %v5055_v0  ;;  %v2952_v13 = vmul.f32 %v15727_v7, %v12560_v51  ;;  %v6242_v42 = vadd.f32 %v6241_v49, %v6240_v52  ;;  %v5097_v12 = vadd.f32 %v5096_v15, %v5095_v16  ;;  %v15730_v15 = vld [vmem:[#allocation135_spill] sm:$0xff]  ;;  %v15793_v51 = vld [vmem:[#allocation178_spill] sm:$0xff] }
 0x3e7   : > { %v7185_v38 = vsel %vm7116_vm3, %v5069_v11, %v7184_v45  ;;  %v3493_v61 = vadd.f32 %v3492_v37, %v3491_v23  ;;  %v6235_v41 = vadd.f32 %v6234_v56, %v6233_v50  ;;  %v5104_v32 = vadd.f32 %v5103_v3, %v5102_v27  ;;  %v15729_v23 = vld [vmem:[#allocation132_spill] sm:$0xff]  ;;  %v15731_v3 = vld [vmem:[#allocation154_spill] sm:$0xff]  ;;  %v15733_v45 = vld [vmem:[#allocation151_spill] sm:$0xff] }
 0x3e8   : > { %v7186_v59 = vsel %vm7118_vm4, %v5076_v35, %v7185_v38  ;;  %v5980_v19 = vmul.f32 %v12331_v22, %v15728_v60  ;;  %v1245_v36 = vadd.f32 %v12379_v14, %v12649_v39  ;;  %v7848_v16 = vsel %vm7120_vm5, %v6228_v54, %v12424_v47  ;;  %v15732_v54 = vld [vmem:[#allocation153_spill] sm:$0xff]  ;;  %v15737_v38 = vld [vmem:[#allocation218_spill] sm:$0xff] }
 0x3e9   : > { %v7187_v52 = vsel %vm7120_vm5, %v5083_v8, %v7186_v59  ;;  %v6249_v50 = vadd.f32 %v6248_v58, %v6247_v34  ;;  %v5981_v46 = vmul.f32 %v12402_v5, %v15729_v23  ;;  %v7849_v22 = vsel %vm7122_vm7, %v6235_v41, %v7848_v16  ;;  %v15739_v60 = vld [vmem:[#allocation53_spill] sm:$0xff] }
 0x3ea   : > { %8530 = vmatmul.msk.f32.gmra.mxu3 %vm1454_vm1, %v1415_v10  ;;  %v7188_v33 = vsel %vm7122_vm7, %v5090_v30, %v7187_v52  ;;  %v3498_v39 = vsel %vm524_vm0, %v2950_v40, 0.0  ;;  %v3512_v11 = vsel %vm524_vm0, %v2952_v13, 0.0  ;;  %v7850_v47 = vsel %vm7124_vm8, %v6242_v42, %v7849_v22  ;;  %8559 = vmatmul.msk.f32.gmra.mxu2 %vm524_vm0, %v7246_v24  ;;  %v12777_v24 = vpop.f32.mrf.mxu3  ;;  %v12782_v30 = vpop.permute.xlu1 %5626  ;;  %v15741_v52 = vld [vmem:[#allocation62_spill] sm:$0xff] }
 0x3eb   : > { %v7189_v49 = vsel %vm7124_vm8, %v5097_v12, %v7188_v33  ;;  %v3475_v34 = vrot.slane %v12396_v31, 1  ;;  %v5982_v5 = vmul.f32 %v12286_v28, %v15730_v15  ;;  %v7851_v37 = vsel %vm7126_vm9, %v6249_v50, %v7850_v47  ;;  %v15736_v12 = vld [vmem:[#allocation140_spill] sm:$0xff] }
 0x3ec   : > { %v7190_v27 = vsel %vm7126_vm9, %v5104_v32, %v7189_v49  ;;  %v3482_v0 = vrot.slane %v12719_v20, 1  ;;  %v3494_v56 = vrot.slane %v3493_v61, 2  ;;  %v6271_v35 = vsel %vm6081_vm10, %v5980_v19, 0.0  ;;  %7947 = vrot.lane.b32.xlu1 %v7851_v37, %s9052_s13  ;;  %v15740_v19 = vld [vmem:[#allocation49_spill] sm:$0xff] }
 0x3ed   : > { %v1416_v40 = vmax.f32 %v1245_v36, 0.0  ;;  %7251 = vrot.lane.b32.xlu2 %v7190_v27, %s9051_s26  ;;  %v3499_v8 = vrot.slane %v3498_v39, 4  ;;  %v3513_v10 = vrot.slane %v3512_v11, 4  ;;  %v6278_v28 = vsel %vm6081_vm10, %v5981_v46, 0.0 }
 0x3ee   : > { %v5984_v58 = vmul.f32 %v15732_v54, %v15731_v3  ;;  %v15734_v7 = vrot.slane %v15733_v45, 1  ;;  %v3489_v42 = vrot.slane %v12725_v53, 1  ;;  %v5983_v41 = vmul.f32 %v15737_v38, %v15736_v12 }
 0x3ef   : > { %v2951_v36 = vmul.f32 %v15740_v19, %v15739_v60  ;;  %v2953_v16 = vmul.f32 %v15741_v52, %v12546_v2  ;;  %v6285_v50 = vsel %vm6081_vm10, %v5982_v5, 0.0  ;;  %v6272_v23 = vrot.slane %v6271_v35, 4  ;;  %v12810_v5 = vpop.permute.xlu2 %5654 }
 0x3f0   : > { %v12787_v13 = vadd.f32 %v15734_v7, %v15733_v45  ;;  %v12799_v46 = vadd.f32 %v3475_v34, %v12396_v31  ;;  %v12802_v33 = vadd.f32 %v3482_v0, %v12719_v20  ;;  %v6279_v22 = vrot.slane %v6278_v28, 4  ;;  %v15746_v34 = vld [vmem:[#allocation23_spill] sm:$0xff]  ;;  %v15747_v0 = vld [vmem:[#allocation18_spill] sm:$0xff] }
 0x3f1   : > { %v1248_v49 = vadd.f32 %v12379_v14, %v12692_v62  ;;  %v12807_v47 = vadd.f32 %v3494_v56, %v3493_v61  ;;  %v3500_v15 = vadd.f32 %v3499_v8, %v3498_v39  ;;  %v3514_v27 = vadd.f32 %v3513_v10, %v3512_v11  ;;  %v15748_v11 = vld [vmem:[#allocation52_spill] sm:$0xff]  ;;  %v12826_v8 = vpop.permute.xlu0 %5618  ;;  %v8935_v45 = vld [vmem:[%s9181_s12 + $0x268] sm:$0xff] }
 0x3f2   : > { %15735 = vst [vmem:[#allocation152_spill] sm:$0xff] %v12787_v13  ;;  %8531 = vmatmul.msk.f32.gmra.mxu3 %vm1454_vm1, %v1416_v40  ;;  %v6299_v37 = vsel %vm6081_vm10, %v5984_v58, 0.0  ;;  %v12813_v31 = vadd.f32 %v3489_v42, %v12725_v53  ;;  %v6286_v20 = vrot.slane %v6285_v50, 4  ;;  %v5988_v3 = vmul.f32 %v15747_v0, %v15746_v34  ;;  %v12818_v40 = vpop.f32.mrf.mxu2  ;;  %8560 = vmatmul.msk.f32.gmra.mxu2 %vm524_vm0, %v12643_v48  ;;  %v8936_v7 = vld [vmem:[%s9181_s12 + $0x288] sm:$0xff]  ;;  %v12838_v0 = vpop.permute.xlu1 %5638 }
 0x3f3   : > { %15742 = vst [vmem:[#allocation171_spill] sm:$0xff] %v12799_v46  ;;  %v6292_v62 = vsel %vm6081_vm10, %v5983_v41, 0.0  ;;  %v3505_v61 = vsel %vm524_vm0, %v2951_v36, 0.0  ;;  %v3519_v39 = vsel %vm524_vm0, %v2953_v16, 0.0  ;;  %v2954_v53 = vmul.f32 %v15748_v11, %v12583_v26  ;;  %v15749_v42 = vld [vmem:[#allocation119_spill] sm:$0xff]  ;;  %v12835_v16 = vpop.f32.mrf.mxu3 }
 0x3f4   : > { %15743 = vst [vmem:[#allocation158_spill] sm:$0xff] %v12802_v33  ;;  %v6273_v56 = vadd.f32 %v6272_v23, %v6271_v35  ;;  %v6280_v10 = vadd.f32 %v6279_v22, %v6278_v28  ;;  %v6300_v54 = vrot.slane %v6299_v37, 4  ;;  %v1417_v58 = vmax.f32 %v1248_v49, 0.0  ;;  %5766 = vperm.xlu1 %8694, %v8936_v7  }
 0x3f5   : > { %15744 = vst [vmem:[#allocation186_spill] sm:$0xff] %v12807_v47  ;;  %5750 = vperm.xlu2 %8692, %v8935_v45   ;;  %v5995_v48 = vmul.f32 %v12736_v63, %v15749_v42  ;;  %v3501_v38 = vrot.slane %v3500_v15, 2  ;;  %v3515_v41 = vrot.slane %v3514_v27, 2  ;;  %v6293_v19 = vrot.slane %v6292_v62, 4  ;;  %v15750_v63 = vld [vmem:[#allocation21_spill] sm:$0xff] }
 0x3f6   : > { %15745 = vst [vmem:[#allocation163_spill] sm:$0xff] %v12813_v31  ;;  %v3520_v36 = vrot.slane %v3519_v39, 4  ;;  %v6287_v52 = vadd.f32 %v6286_v20, %v6285_v50  ;;  %v6327_v35 = vsel %vm6081_vm10, %v5988_v3, 0.0  ;;  %v3506_v23 = vrot.slane %v3505_v61, 4 }
 0x3f7   : > { %v6376_v28 = vsel %vm6081_vm10, %v5995_v48, 0.0  ;;  %v3526_v22 = vsel %vm524_vm0, %v2954_v53, 0.0  ;;  %v6274_v49 = vrot.slane %v6273_v56, 2  ;;  %v12842_v11 = vadd.f32 %v12379_v14, %v15750_v63 }
 0x3f8   : > { %v6377_v34 = vrot.slane %v6376_v28, 4  ;;  %v6281_v45 = vrot.slane %v6280_v10, 2  ;;  %v6301_v7 = vadd.f32 %v6300_v54, %v6299_v37  ;;  %v1251_v50 = vadd.f32 %v12379_v14, %v12714_v9  ;;  %v15754_v54 = vld [vmem:[#allocation27_spill] sm:$0xff] }
 0x3f9   : > { %15751 = vst [vmem:[#allocation136_spill] sm:$0xff] %v12842_v11  ;;  %v12847_v20 = vadd.f32 %v3501_v38, %v3500_v15  ;;  %v6328_v3 = vrot.slane %v6327_v35, 4  ;;  %v6294_v42 = vadd.f32 %v6293_v19, %v6292_v62  ;;  %v12849_v48 = vadd.f32 %v3515_v41, %v3514_v27  ;;  %v8937_v41 = vld [vmem:[%s9181_s12 + $0x278] sm:$0xff] }
 0x3fa   : > { %8532 = vmatmul.msk.f32.gmra.mxu3 %vm1454_vm1, %v1417_v58  ;;  %v6378_v53 = vadd.f32 %v6377_v34, %v6376_v28  ;;  %v3521_v12 = vadd.f32 %v3520_v36, %v3519_v39  ;;  %v3527_v59 = vrot.slane %v3526_v22, 4  ;;  %v6288_v63 = vrot.slane %v6287_v52, 2  ;;  %v12855_v58 = vpop.permute.xlu2 %5662  ;;  %v12858_v27 = vpop.f32.mrf.mxu2  ;;  %v8938_v39 = vld [vmem:[%s9181_s12 + $0x2a0] sm:$0xff] }
 0x3fb   : > { %15752 = vst [vmem:[#allocation108_spill] sm:$0xff] %v12847_v20  ;;  %v12851_v60 = vadd.f32 %v3506_v23, %v3505_v61  ;;  %v6275_v37 = vadd.f32 %v6274_v49, %v6273_v56  ;;  %v5990_v14 = vmul.f32 %v15755_v44, %v15754_v54  ;;  %v6282_v62 = vadd.f32 %v6281_v45, %v6280_v10  ;;  %v12865_v61 = vld [vmem:[%s14803_s2] ss:$0 sm:$0xff]  ;;  %v15757_v44 = vld [vmem:[#allocation40_spill] sm:$0xff]  ;;  %v12871_v23 = vpop.permute.xlu0 %5630 }
 0x3fc   : > { %v6379_v9 = vrot.slane %v6378_v53, 2  ;;  %15756 = vst [vmem:[#allocation48_spill] sm:$0xff] %v12855_v58  ;;  %v6302_v38 = vrot.slane %v6301_v7, 2  ;;  %v1418_v19 = vmax.f32 %v1251_v50, 0.0  ;;  %5778 = vperm.xlu1 %8694, %v8938_v39   ;;  %v12869_v56 = vadd.f32 %v12865_v61, %v15757_v44  ;;  %v15758_v39 = vld [vmem:[#allocation142_spill] sm:$0xff]  ;;  %v15783_v20 = vld [vmem:[#allocation185_spill] sm:$0xff] }
 0x3fd   : > { %15753 = vst [vmem:[#allocation207_spill] sm:$0xff] %v12851_v60  ;;  %5758 = vperm.xlu2 %8692, %v8937_v41   ;;  %v6329_v36 = vadd.f32 %v6328_v3, %v6327_v35  ;;  %v6295_v28 = vrot.slane %v6294_v42, 2  ;;  %v3522_v34 = vrot.slane %v3521_v12, 2  ;;  %v3528_v45 = vadd.f32 %v3527_v59, %v3526_v22  ;;  %v15759_v3 = vld [vmem:[#allocation112_spill] sm:$0xff] }
 0x3fe   : > { %v6380_v10 = vadd.f32 %v6379_v9, %v6378_v53  ;;  %v6289_v50 = vadd.f32 %v6288_v63, %v6287_v52  ;;  %v6276_v54 = vrot.slane %v6275_v37, 1  ;;  %v6341_v41 = vsel %vm6081_vm10, %v5990_v14, 0.0  ;;  %v12881_v9 = vpop.f32.mrf.mxu3  ;;  %v15760_v22 = vld [vmem:[#allocation160_spill] sm:$0xff]  ;;  %v12886_v14 = vpop.permute.xlu1 %5650 }
 0x3ff   : > { %v6001_v15 = vmul.f32 %v12709_v43, %v15758_v39  ;;  %v6283_v33 = vrot.slane %v6282_v62, 1  ;;  %v6303_v44 = vadd.f32 %v6302_v38, %v6301_v7  ;;  %v1254_v35 = vadd.f32 %v12865_v61, %v12751_v18  ;;  %15761 = vst [vmem:[#allocation46_spill] sm:$0xff] %v12886_v14  ;;  %v15762_v38 = vld [vmem:[#allocation149_spill] sm:$0xff] }
 0x400   : > { %v6381_v31 = vrot.slane %v6380_v10, 1  ;;  %v6003_v53 = vmul.f32 %v12745_v17, %v15759_v3  ;;  %v6330_v59 = vrot.slane %v6329_v36, 2  ;;  %v6296_v52 = vadd.f32 %v6295_v28, %v6294_v42 }
 0x401   : > { %v5989_v63 = vmul.f32 %v12479_v6, %v15760_v22  ;;  %v12888_v7 = vadd.f32 %v3522_v34, %v3521_v12  ;;  %v12892_v18 = vadd.f32 %v12865_v61, %v15762_v38  ;;  %v3529_v17 = vrot.slane %v3528_v45, 2 }
 0x402   : > { %8533 = vmatmul.msk.f32.gmra.mxu3 %vm1454_vm1, %v1418_v19  ;;  %v6382_v43 = vadd.f32 %v6381_v31, %v6380_v10  ;;  %v6290_v39 = vrot.slane %v6289_v50, 1  ;;  %v6277_v3 = vadd.f32 %v6276_v54, %v6275_v37  ;;  %v6342_v49 = vrot.slane %v6341_v41, 4  ;;  %v8940_v10 = vld [vmem:[%s9181_s12 + $0x290] sm:$0xff]  ;;  %v12904_v54 = vpop.permute.xlu2 %5674 }
 0x403   : > { %v6418_v19 = vsel %vm6081_vm10, %v6001_v15, 0.0  ;;  %v6284_v6 = vadd.f32 %v6283_v33, %v6282_v62  ;;  %v6304_v31 = vrot.slane %v6303_v44, 1  ;;  %v1419_v28 = vmax.f32 %v1254_v35, 0.0  ;;  %v15765_v62 = vld [vmem:[#allocation242_spill] sm:$0xff] }
 0x404   : > { %v12897_v42 = vsel %vm7116_vm3, %v6382_v43, %v12712_v55  ;;  %v6432_v12 = vsel %vm6081_vm10, %v6003_v53, 0.0  ;;  %v6331_v34 = vadd.f32 %v6330_v59, %v6329_v36  ;;  %v6297_v22 = vrot.slane %v6296_v52, 1  ;;  %v15764_v55 = vld [vmem:[#allocation236_spill] sm:$0xff]  ;;  %v12911_v43 = vpop.f32.mrf.mxu2  ;;  %v15766_v59 = vld [vmem:[#allocation66_spill] sm:$0xff] }
 0x405   : > { %15763 = vst [vmem:[#allocation166_spill] sm:$0xff] %v12897_v42  ;;  %5770 = vperm.xlu2 %8692, %v8940_v10   ;;  %v6334_v38 = vsel %vm6081_vm10, %v5989_v63, 0.0  ;;  %v7854_v37 = vsel %vm7118_vm4, %v6277_v3, %v12512_v21  ;;  %v5991_v33 = vmul.f32 %v12615_v1, %v15764_v55  ;;  %v5992_v35 = vmul.f32 %v12674_v57, %v15765_v62  ;;  %v12915_v21 = vpop.permute.xlu0 %5646  ;;  %v15769_v62 = vld [vmem:[#allocation180_spill] sm:$0xff] }
 0x406   : > { %v6419_v53 = vrot.slane %v6418_v19, 4  ;;  %v6291_v36 = vadd.f32 %v6290_v39, %v6289_v50  ;;  %v2955_v63 = vmul.f32 %v15766_v59, %v12598_v29  ;;  %v6343_v10 = vadd.f32 %v6342_v49, %v6341_v41  ;;  %15767 = vst [vmem:[#allocation122_spill] sm:$0xff] %v12915_v21  ;;  %v15768_v39 = vld [vmem:[#allocation143_spill] sm:$0xff] }
 0x407   : > { %v6433_v46 = vrot.slane %v6432_v12, 4  ;;  %v6305_v3 = vadd.f32 %v6304_v31, %v6303_v44  ;;  %v6335_v13 = vrot.slane %v6334_v38, 4  ;;  %v1257_v15 = vadd.f32 %v12865_v61, %v12818_v40  ;;  %v12928_v40 = vpop.f32.mrf.mxu3 }
 0x408   : > { %v7855_v1 = vsel %vm7120_vm5, %v6284_v6, %v7854_v37  ;;  %v12921_v57 = vadd.f32 %v3529_v17, %v3528_v45  ;;  %v6332_v55 = vrot.slane %v6331_v34, 1  ;;  %v6298_v50 = vadd.f32 %v6297_v22, %v6296_v52  ;;  %v15770_v37 = vld [vmem:[#allocation10_spill] sm:$0xff] }
 0x409   : > { %v2100_v49 = vadd.f32 %v15769_v62, %v15768_v39  ;;  %v6348_v41 = vsel %vm6081_vm10, %v5991_v33, 0.0  ;;  %v6355_v44 = vsel %vm6081_vm10, %v5992_v35, 0.0  ;;  %v6420_v31 = vadd.f32 %v6419_v53, %v6418_v19  ;;  %v8941_v19 = vld [vmem:[%s9181_s12 + $0x2a8] sm:$0xff] }
 0x40a   : > { %8534 = vmatmul.msk.f32.gmra.mxu3 %vm1454_vm1, %v1419_v28  ;;  %v7856_v59 = vsel %vm7122_vm7, %v6291_v36, %v7855_v1  ;;  %v12931_v6 = vsel %vm524_vm0, %v2955_v63, 0.0  ;;  %v6344_v45 = vrot.slane %v6343_v10, 2  ;;  %v6434_v17 = vadd.f32 %v6433_v46, %v6432_v12  ;;  %v7250_v28 = vpop.permute.xlu1 %7249  ;;  %v15771_v46 = vld [vmem:[#allocation20_spill] sm:$0xff] }
 0x40b   : > { %v7857_v52 = vsel %vm7124_vm8, %v6298_v50, %v7856_v59  ;;  %v6336_v22 = vadd.f32 %v6335_v13, %v6334_v38  ;;  %v2097_v39 = vadd.f32 %v15769_v62, %v15770_v37  ;;  %v1420_v33 = vmax.f32 %v1257_v15, 0.0  ;;  %8561 = vmatmul.msk.f32.gmra.mxu2 %vm524_vm0, %v7250_v28  ;;  %v15772_v38 = vld [vmem:[#allocation56_spill] sm:$0xff]  ;;  %v12955_v28 = vpop.permute.xlu2 %5686 }
 0x40c   : > { %v7858_v35 = vsel %vm7126_vm9, %v6305_v3, %v7857_v52  ;;  %v6349_v53 = vrot.slane %v6348_v41, 4  ;;  %v12939_v36 = vmax.f32 %v2100_v49, 0.0  ;;  %v6356_v63 = vrot.slane %v6355_v44, 4  ;;  %15773 = vst [vmem:[#allocation184_spill] sm:$0xff] %v12955_v28 }
 0x40d   : > { %5782 = vperm.xlu2 %8692, %v8941_v19   ;;  %7949 = vrot.lane.b32.xlu1 %v7858_v35, %s9052_s13  ;;  %v6002_v12 = vmul.f32 %v12838_v0, %v15771_v46  ;;  %v12944_v13 = vadd.f32 %v6332_v55, %v6331_v34  ;;  %v2103_v15 = vadd.f32 %v15769_v62, %v15772_v38  ;;  %v6421_v1 = vrot.slane %v6420_v31, 2  ;;  %v12961_v35 = vpop.f32.mrf.mxu2  ;;  %v12968_v46 = vpop.permute.xlu0 %5658 }
 0x40e   : > { %v2106_v3 = vadd.f32 %v15769_v62, %v12733_v25  ;;  %v12950_v50 = vadd.f32 %v6344_v45, %v6343_v10  ;;  %v6435_v59 = vrot.slane %v6434_v17, 2  ;;  %v2109_v49 = vadd.f32 %v15769_v62, %v12777_v24  ;;  %v15774_v24 = vld [vmem:[#allocation13_spill] sm:$0xff]  ;;  %15775 = vst [vmem:[#allocation214_spill] sm:$0xff] %v12968_v46 }
 0x40f   : > { %v6425_v52 = vsel %vm6081_vm10, %v6002_v12, 0.0  ;;  %v6337_v0 = vrot.slane %v6336_v22, 2  ;;  %v1260_v34 = vadd.f32 %v12865_v61, %v12858_v27  ;;  %v2112_v55 = vadd.f32 %v15769_v62, %v12835_v16 }
 0x410   : > { %v6426_v37 = vrot.slane %v6425_v52, 4  ;;  %v12964_v25 = vmax.f32 %v2097_v39, 0.0  ;;  %v6350_v10 = vadd.f32 %v6349_v53, %v6348_v41  ;;  %v4497_v45 = vmul.f32 %v15774_v24, %v12939_v36  ;;  %v8942_v24 = vld [vmem:[%s9181_s12 + $0x2b8] sm:$0xff] }
 0x411   : > { %v6357_v19 = vadd.f32 %v6356_v63, %v6355_v44  ;;  %v12970_v12 = vmax.f32 %v2103_v15, 0.0  ;;  %v6422_v27 = vadd.f32 %v6421_v1, %v6420_v31  ;;  %v12972_v38 = vmax.f32 %v2106_v3, 0.0  ;;  %v12984_v31 = vpop.f32.mrf.mxu3  ;;  %v15780_v1 = vld [vmem:[#allocation156_spill] sm:$0xff] }
 0x412   : > { %8535 = vmatmul.msk.f32.gmra.mxu3 %vm1454_vm1, %v1420_v33  ;;  %v6427_v16 = vadd.f32 %v6426_v37, %v6425_v52  ;;  %v6346_v47 = vrot.slane %v12950_v50, 1  ;;  %v6436_v33 = vadd.f32 %v6435_v59, %v6434_v17  ;;  %v12975_v39 = vmax.f32 %v2109_v49, 0.0  ;;  %15779 = vst [vmem:[#allocation145_spill] sm:$0xff] %v12984_v31  ;;  %v8943_v49 = vld [vmem:[%s9181_s12 + $0x2c8] sm:$0xff] }
 0x413   : > { %15776 = vst [vmem:[#allocation47_spill] sm:$0xff] %v12972_v38  ;;  %v2115_v41 = vadd.f32 %v15769_v62, %v12881_v9  ;;  %v12979_v53 = vadd.f32 %v6337_v0, %v6336_v22  ;;  %v1421_v44 = vmax.f32 %v1260_v34, 0.0  ;;  %v12981_v63 = vmax.f32 %v2112_v55, 0.0  ;;  %v15781_v9 = vld [vmem:[#allocation187_spill] sm:$0xff] }
 0x414   : > { %15777 = vst [vmem:[#allocation170_spill] sm:$0xff] %v12975_v39  ;;  %v6428_v15 = vrot.slane %v6427_v16, 2  ;;  %v4496_v3 = vmul.f32 %v15780_v1, %v12964_v25  ;;  %v6351_v52 = vrot.slane %v6350_v10, 2  ;;  %v5112_v17 = vsel %vm4544_vm6, %v4497_v45, 0.0  ;;  %v15782_v34 = vld [vmem:[#allocation159_spill] sm:$0xff] }
 0x415   : > { %15778 = vst [vmem:[#allocation15_spill] sm:$0xff] %v12981_v63  ;;  %5790 = vperm.xlu2 %8692, %v8942_v24   ;;  %v6358_v59 = vrot.slane %v6357_v19, 2  ;;  %5798 = vperm.xlu1 %8694, %v8943_v49   ;;  %v4498_v22 = vmul.f32 %v15781_v9, %v12970_v12  ;;  %v6423_v0 = vrot.slane %v6422_v27, 1  ;;  %v4499_v55 = vmul.f32 %v15782_v34, %v12972_v38  ;;  %v15785_v49 = vld [vmem:[#allocation26_spill] sm:$0xff]  ;;  %v13011_v46 = vpop.f32.mrf.mxu2 }
 0x416   : > { %v6429_v37 = vadd.f32 %v6428_v15, %v6427_v16  ;;  %v6437_v24 = vrot.slane %v6436_v33, 1  ;;  %v4500_v32 = vmul.f32 %v15783_v20, %v12975_v39  ;;  %v1263_v1 = vadd.f32 %v12865_v61, %v12911_v43  ;;  %v13007_v43 = vpop.permute.xlu2 %5694 }
 0x417   : > { %v12998_v42 = vmax.f32 %v2115_v41, 0.0  ;;  %v6339_v45 = vrot.slane %v12979_v53, 1  ;;  %v4501_v29 = vmul.f32 %v15785_v49, %v12981_v63  ;;  %v2118_v28 = vadd.f32 %v15769_v62, %v12928_v40  ;;  %15786 = vst [vmem:[#allocation209_spill] sm:$0xff] %v13007_v43 }
 0x418   : > { %v6430_v9 = vrot.slane %v6429_v37, 1  ;;  %v5105_v16 = vsel %vm4544_vm6, %v4496_v3, 0.0  ;;  %v6352_v15 = vadd.f32 %v6351_v52, %v6350_v10  ;;  %v5113_v20 = vrot.slane %v5112_v17, 4  ;;  %v15787_v10 = vld [vmem:[#allocation230_spill] sm:$0xff] }
 0x419   : > { %15784 = vst [vmem:[#allocation173_spill] sm:$0xff] %v12998_v42  ;;  %v6359_v34 = vadd.f32 %v6358_v59, %v6357_v19  ;;  %v5119_v41 = vsel %vm4544_vm6, %v4498_v22, 0.0  ;;  %v6424_v11 = vadd.f32 %v6423_v0, %v6422_v27  ;;  %v5126_v14 = vsel %vm4544_vm6, %v4499_v55, 0.0  ;;  %v5667_v19 = vpop.permute.xlu0 %5666  ;;  %v15788_v59 = vld [vmem:[#allocation45_spill] sm:$0xff]  ;;  %v8944_v0 = vld [vmem:[%s9181_s12 + $0x2d0] sm:$0xff] }
 0x41a   : > { %8536 = vmatmul.msk.f32.gmra.mxu3 %vm1454_vm1, %v1421_v44  ;;  %v6431_v49 = vadd.f32 %v6430_v9, %v6429_v37  ;;  %v6438_v2 = vadd.f32 %v6437_v24, %v6436_v33  ;;  %v5133_v62 = vsel %vm4544_vm6, %v4500_v32, 0.0  ;;  %v1422_v40 = vmax.f32 %v1263_v1, 0.0  ;;  %v5671_v33 = vpop.permute.xlu1 %5670  ;;  %v8945_v1 = vld [vmem:[%s9181_s12 + $0x2e0] sm:$0xff] }
 0x41b   : > { %v4502_v44 = vmul.f32 %v15787_v10, %v12998_v42  ;;  %v5140_v3 = vsel %vm4544_vm6, %v4501_v29, 0.0  ;;  %v6011_v27 = vmul.f32 %v12904_v54, %v15788_v59  ;;  %v13020_v22 = vmax.f32 %v2118_v28, 0.0  ;;  %v13029_v54 = vpop.f32.mrf.mxu3 }
 0x41c   : > { %v7873_v52 = vsel %vm7114_vm2, %v6431_v49, %v6424_v11  ;;  %v5106_v55 = vrot.slane %v5105_v16, 4  ;;  %v6353_v37 = vrot.slane %v6352_v15, 1  ;;  %v5120_v32 = vrot.slane %v5119_v41, 4  ;;  %v15791_v49 = vld [vmem:[#allocation169_spill] sm:$0xff] }
 0x41d   : > { %15789 = vst [vmem:[#allocation188_spill] sm:$0xff] %v13020_v22  ;;  %5802 = vperm.xlu2 %8692, %v8944_v0   ;;  %v13024_v24 = vsel %vm7116_vm3, %v6438_v2, %v7873_v52  ;;  %5810 = vperm.xlu1 %8694, %v8945_v1   ;;  %v6347_v29 = vadd.f32 %v6346_v47, %v12950_v50  ;;  %v5127_v11 = vrot.slane %v5126_v14, 4  ;;  %v6360_v28 = vrot.slane %v6359_v34, 1  ;;  %v15792_v52 = vld [vmem:[#allocation237_spill] sm:$0xff] }
 0x41e   : > { %15790 = vst [vmem:[#allocation177_spill] sm:$0xff] %v13024_v24  ;;  %v5114_v9 = vadd.f32 %v5113_v20, %v5112_v17  ;;  %v6009_v10 = vmul.f32 %v5667_v19, %v15791_v49  ;;  %v5134_v59 = vrot.slane %v5133_v62, 4  ;;  %v5141_v0 = vrot.slane %v5140_v3, 4 }
 0x41f   : > { %v5147_v43 = vsel %vm4544_vm6, %v4502_v44, 0.0  ;;  %v1266_v42 = vadd.f32 %v12865_v61, %v12961_v35  ;;  %v6488_v2 = vsel %vm6081_vm10, %v6011_v27, 0.0  ;;  %v4503_v1 = vmul.f32 %v15792_v52, %v13020_v22  ;;  %v13044_v22 = vpop.permute.xlu2 %5706 }
 0x420   : > { %v6474_v47 = vsel %vm6081_vm10, %v6009_v10, 0.0  ;;  %v6340_v50 = vadd.f32 %v6339_v45, %v12979_v53  ;;  %v5107_v17 = vadd.f32 %v5106_v55, %v5105_v16  ;;  %v6354_v20 = vadd.f32 %v6353_v37, %v6352_v15  ;;  %v1271_v15 = vpop.f32.mrf.mxu2 }
 0x421   : > { %v5121_v19 = vadd.f32 %v5120_v32, %v5119_v41  ;;  %v5128_v49 = vadd.f32 %v5127_v11, %v5126_v14  ;;  %v5148_v44 = vrot.slane %v5147_v43, 4  ;;  %v6475_v24 = vrot.slane %v6474_v47, 4  ;;  %v8946_v14 = vld [vmem:[%s9181_s12 + $0x2e8] sm:$0xff] }
 0x422   : > { %8537 = vmatmul.msk.f32.gmra.mxu3 %vm1454_vm1, %v1422_v40  ;;  %v7861_v35 = vsel %vm7118_vm4, %v12944_v13, %v15793_v51  ;;  %v6361_v27 = vadd.f32 %v6360_v28, %v6359_v34  ;;  %v5135_v21 = vadd.f32 %v5134_v59, %v5133_v62  ;;  %v6489_v52 = vrot.slane %v6488_v2, 4  ;;  %v13051_v11 = vpop.permute.xlu1 %5682 }
 0x423   : > { %v7862_v10 = vsel %vm7120_vm5, %v6340_v50, %v7861_v35  ;;  %v5115_v40 = vrot.slane %v5114_v9, 2  ;;  %v5142_v53 = vadd.f32 %v5141_v0, %v5140_v3  ;;  %v1423_v45 = vmax.f32 %v1266_v42, 0.0  ;;  %15794 = vst [vmem:[#allocation189_spill] sm:$0xff] %v13051_v11  ;;  %v13054_v0 = vpop.permute.xlu0 %5678 }
 0x424   : > { %v5154_v16 = vsel %vm4544_vm6, %v4503_v1, 0.0  ;;  %v3534_v41 = vrot.slane %v12931_v6, 4  ;;  %v5108_v55 = vrot.slane %v5107_v17, 2  ;;  %v5122_v37 = vrot.slane %v5121_v19, 2  ;;  %15795 = vst [vmem:[#allocation227_spill] sm:$0xff] %v13054_v0 }
 0x425   : > { %5814 = vperm.xlu2 %8692, %v8946_v14   ;;  %v7863_v51 = vsel %vm7122_vm7, %v6347_v29, %v7862_v10  ;;  %v5129_v13 = vrot.slane %v5128_v49, 2  ;;  %v5149_v34 = vadd.f32 %v5148_v44, %v5147_v43  ;;  %v6476_v62 = vadd.f32 %v6475_v24, %v6474_v47  ;;  %v15796_v43 = vld [vmem:[#allocation182_spill] sm:$0xff]  ;;  %v13060_v29 = vpop.f32.mrf.mxu3 }
 0x426   : > { %v7864_v32 = vsel %vm7124_vm8, %v6354_v20, %v7863_v51  ;;  %v5136_v3 = vrot.slane %v5135_v21, 2  ;;  %v6490_v42 = vadd.f32 %v6489_v52, %v6488_v2  ;;  %v5155_v28 = vrot.slane %v5154_v16, 4  ;;  %15797 = vst [vmem:[#allocation60_spill] sm:$0xff] %v13060_v29  ;;  %v15798_v47 = vld [vmem:[#allocation246_spill] sm:$0xff]  ;;  %v15799_v20 = vld [vmem:[#allocation65_spill] sm:$0xff] }
 0x427   : > { %v7865_v59 = vsel %vm7126_vm9, %v6361_v27, %v7864_v32  ;;  %v5116_v1 = vadd.f32 %v5115_v40, %v5114_v9  ;;  %v5143_v50 = vrot.slane %v5142_v53, 2  ;;  %v1269_v35 = vadd.f32 %v12865_v61, %v13011_v46 }
 0x428   : > { %7951 = vrot.lane.b32.xlu1 %v7865_v59, %s9052_s13  ;;  %v6010_v24 = vmul.f32 %v5671_v33, %v15796_v43  ;;  %v2956_v44 = vmul.f32 %v15799_v20, %v15798_v47  ;;  %v5109_v27 = vadd.f32 %v5108_v55, %v5107_v17  ;;  %v5123_v52 = vadd.f32 %v5122_v37, %v5121_v19  ;;  %v15800_v20 = vld [vmem:[#allocation57_spill] sm:$0xff]  ;;  %v15801_v17 = vld [vmem:[#allocation55_spill] sm:$0xff]  ;;  %v13073_v37 = vpop.permute.xlu2 %5718 }
 0x429   : > { %v5130_v9 = vadd.f32 %v5129_v13, %v5128_v49  ;;  %v5150_v10 = vrot.slane %v5149_v34, 2  ;;  %v6477_v40 = vrot.slane %v6476_v62, 2  ;;  %v13068_v14 = vadd.f32 %v3534_v41, %v12931_v6  ;;  %15802 = vst [vmem:[#allocation225_spill] sm:$0xff] %v13073_v37 }
 0x42a   : > { %8538 = vmatmul.msk.f32.gmra.mxu3 %vm1454_vm1, %v1423_v45  ;;  %v6481_v46 = vsel %vm6081_vm10, %v6010_v24, 0.0  ;;  %v5137_v33 = vadd.f32 %v5136_v3, %v5135_v21  ;;  %v6491_v51 = vrot.slane %v6490_v42, 2  ;;  %v5156_v32 = vadd.f32 %v5155_v28, %v5154_v16  ;;  %v1274_v21 = vpop.f32.mrf.mxu2 }
 0x42b   : > { %v5117_v59 = vrot.slane %v5116_v1, 1  ;;  %v5144_v45 = vadd.f32 %v5143_v50, %v5142_v53  ;;  %v1424_v43 = vmax.f32 %v1269_v35, 0.0  ;;  %v6482_v2 = vrot.slane %v6481_v46, 4 }
 0x42c   : > { %v3540_v11 = vsel %vm524_vm0, %v2956_v44, 0.0  ;;  %v2957_v19 = vmul.f32 %v15801_v17, %v15800_v20  ;;  %v5110_v49 = vrot.slane %v5109_v27, 1  ;;  %v5124_v55 = vrot.slane %v5123_v52, 1  ;;  %v13077_v17 = vpop.permute.xlu1 %7943 }
 0x42d   : > { %v5131_v13 = vrot.slane %v5130_v9, 1  ;;  %v5151_v24 = vadd.f32 %v5150_v10, %v5149_v34  ;;  %v6478_v6 = vadd.f32 %v6477_v40, %v6476_v62  ;;  %v6483_v41 = vadd.f32 %v6482_v2, %v6481_v46  ;;  %15803 = vst [vmem:[#allocation164_spill] sm:$0xff] %v13077_v17  ;;  %v13081_v10 = vpop.permute.xlu0 %5690 }
 0x42e   : > { %v3536_v16 = vrot.slane %v13068_v14, 2  ;;  %v5138_v3 = vrot.slane %v5137_v33, 1  ;;  %v6492_v53 = vadd.f32 %v6491_v51, %v6490_v42  ;;  %v5157_v28 = vrot.slane %v5156_v32, 2  ;;  %15804 = vst [vmem:[#allocation155_spill] sm:$0xff] %v13081_v10 }
 0x42f   : > { %v5118_v50 = vadd.f32 %v5117_v59, %v5116_v1  ;;  %v5145_v35 = vrot.slane %v5144_v45, 1  ;;  %v1272_v44 = vadd.f32 %v12865_v61, %v1271_v15  ;;  %v6484_v47 = vrot.slane %v6483_v41, 2  ;;  %v13083_v1 = vpop.f32.mrf.mxu3  ;;  %v15805_v59 = vld [vmem:[#allocation137_spill] sm:$0xff] }
 0x430   : > { %v3541_v37 = vrot.slane %v3540_v11, 4  ;;  %v3547_v34 = vsel %vm524_vm0, %v2957_v19, 0.0  ;;  %v5111_v62 = vadd.f32 %v5110_v49, %v5109_v27  ;;  %v5125_v2 = vadd.f32 %v5124_v55, %v5123_v52  ;;  %v15806_v15 = vld [vmem:[#allocation69_spill] sm:$0xff]  ;;  %v13090_v10 = vpop.permute.xlu2 %5726 }
 0x431   : > { %v5132_v40 = vadd.f32 %v5131_v13, %v5130_v9  ;;  %v6479_v46 = vrot.slane %v6478_v6, 1  ;;  %v6485_v42 = vadd.f32 %v6484_v47, %v6483_v41  ;;  %v5152_v51 = vrot.slane %v5151_v24, 1  ;;  %15807 = vst [vmem:[#allocation231_spill] sm:$0xff] %v13090_v10 }
 0x432   : > { %8539 = vmatmul.msk.f32.gmra.mxu3 %vm1454_vm1, %v1424_v43  ;;  %v2958_v20 = vmul.f32 %v15806_v15, %v15805_v59  ;;  %v5139_v0 = vadd.f32 %v5138_v3, %v5137_v33  ;;  %v6493_v17 = vrot.slane %v6492_v53, 1  ;;  %v5158_v58 = vadd.f32 %v5157_v28, %v5156_v32  ;;  %v15808_v28 = vld [vmem:[#allocation25_spill] sm:$0xff] }
 0x433   : > { %v1425_v43 = vmax.f32 %v1272_v44, 0.0  ;;  %v6486_v29 = vrot.slane %v6485_v42, 1  ;;  %v5146_v31 = vadd.f32 %v5145_v35, %v5144_v45  ;;  %v7191_v27 = vsel %vm7114_vm2, %v5118_v50, %v5111_v62  ;;  %v15810_v44 = vld [vmem:[#allocation58_spill] sm:$0xff] }
 0x434   : > { %v3542_v52 = vadd.f32 %v3541_v37, %v3540_v11  ;;  %v5153_v19 = vadd.f32 %v5152_v51, %v5151_v24  ;;  %v5159_v49 = vrot.slane %v5158_v58, 1  ;;  %v7192_v9 = vsel %vm7116_vm3, %v5125_v2, %v7191_v27  ;;  %v13110_v62 = vpop.permute.xlu1 %5702  ;;  %v15817_v27 = vld [vmem:[#allocation68_spill] sm:$0xff] }
 0x435   : > { %v3548_v47 = vrot.slane %v3547_v34, 4  ;;  %v6480_v55 = vadd.f32 %v6479_v46, %v6478_v6  ;;  %v6487_v13 = vadd.f32 %v6486_v29, %v6485_v42  ;;  %v7193_v41 = vsel %vm7118_vm4, %v5132_v40, %v7192_v9  ;;  %v1277_v6 = vpop.f32.mrf.mxu2  ;;  %v15813_v40 = vld [vmem:[#allocation43_spill] sm:$0xff]  ;;  %v5699_v46 = vpop.permute.xlu0 %5698 }
 0x436   : > { %v3554_v33 = vsel %vm524_vm0, %v2958_v20, 0.0  ;;  %v6494_v32 = vadd.f32 %v6493_v17, %v6492_v53  ;;  %v5160_v3 = vadd.f32 %v5159_v49, %v5158_v58  ;;  %v7194_v45 = vsel %vm7120_vm5, %v5139_v0, %v7193_v41 }
 0x437   : > { %v13096_v11 = vadd.f32 %v12865_v61, %v15808_v28  ;;  %v7880_v37 = vsel %vm7114_vm2, %v6487_v13, %v6480_v55  ;;  %v1275_v24 = vadd.f32 %v12865_v61, %v1274_v21  ;;  %v7195_v29 = vsel %vm7122_vm7, %v5146_v31, %v7194_v45  ;;  %v13132_v49 = vpop.f32.mrf.mxu3  ;;  %v15820_v45 = vld [vmem:[#allocation37_spill] sm:$0xff]  ;;  %v15833_v55 = vld [vmem:[#allocation120_spill] sm:$0xff] }
 0x438   : > { %v3537_v50 = vadd.f32 %v3536_v16, %v13068_v14  ;;  %v3543_v20 = vrot.slane %v3542_v52, 2  ;;  %v13104_v58 = vsel %vm7116_vm3, %v6494_v32, %v7880_v37  ;;  %v7196_v0 = vsel %vm7124_vm8, %v5153_v19, %v7195_v29 }
 0x439   : > { %15809 = vst [vmem:[#allocation139_spill] sm:$0xff] %v13104_v58  ;;  %v3549_v53 = vadd.f32 %v3548_v47, %v3547_v34  ;;  %v3555_v35 = vrot.slane %v3554_v33, 4  ;;  %v2960_v17 = vmul.f32 %v15810_v44, %v12964_v25  ;;  %v7197_v21 = vsel %vm7126_vm9, %v5160_v3, %v7196_v0  ;;  %v15822_v0 = vld [vmem:[#allocation211_spill] sm:$0xff]  ;;  %v15823_v44 = vld [vmem:[#allocation144_spill] sm:$0xff] }
 0x43a   : > { %8540 = vmatmul.msk.f32.gmra.mxu3 %vm1454_vm1, %v1425_v43  ;;  %v15811_v14 = vrot.slane %v12849_v48, 1  ;;  %v13121_v34 = vadd.f32 %v12865_v61, %v15813_v40  ;;  %7253 = vrot.lane.b32.xlu1 %v7197_v21, %s9051_s26  ;;  %v15814_v42 = vrot.slane %v12888_v7, 1  ;;  %v15816_v43 = vld [vmem:[#allocation165_spill] sm:$0xff]  ;;  %v1426_v19 = vmax.f32 %v1275_v24, 0.0  ;;  %v15821_v24 = vld [vmem:[#allocation72_spill] sm:$0xff] }
 0x43b   : > { %v15818_v9 = vrot.slane %v12921_v57, 1  ;;  %v3538_v13 = vrot.slane %v3537_v50, 1  ;;  %v3544_v41 = vadd.f32 %v3543_v20, %v3542_v52  ;;  %v3550_v32 = vrot.slane %v3549_v53, 2  ;;  %v15825_v52 = vld [vmem:[#allocation71_spill] sm:$0xff] }
 0x43c   : > { %v13116_v16 = vadd.f32 %v15811_v14, %v12849_v48  ;;  %v13127_v51 = vadd.f32 %v15814_v42, %v12888_v7  ;;  %v2959_v48 = vmul.f32 %v15817_v27, %v15816_v43  ;;  %v3556_v7 = vadd.f32 %v3555_v35, %v3554_v33  ;;  %v15826_v20 = vld [vmem:[#allocation175_spill] sm:$0xff] }
 0x43d   : > { %v13137_v47 = vadd.f32 %v15818_v9, %v12921_v57  ;;  %v3568_v3 = vsel %vm524_vm0, %v2960_v17, 0.0  ;;  %v6017_v28 = vmul.f32 %v5699_v46, %v15820_v45  ;;  %v2961_v29 = vmul.f32 %v15821_v24, %v12939_v36  ;;  %v15824_v57 = vld [vmem:[#allocation50_spill] sm:$0xff]  ;;  %v13155_v46 = vpop.permute.xlu2 %5738  ;;  %v13183_v15 = vpop.permute.xlu0 %5710 }
 0x43e   : > { %15812 = vst [vmem:[#allocation228_spill] sm:$0xff] %v13116_v16  ;;  %v5998_v21 = vmul.f32 %v15823_v44, %v15822_v0  ;;  %v6019_v14 = vmul.f32 %v13044_v22, %v15824_v57  ;;  %v3561_v40 = vsel %vm524_vm0, %v2959_v48, 0.0  ;;  %v2962_v33 = vmul.f32 %v15825_v52, %v12970_v12  ;;  %v15828_v22 = vld [vmem:[#allocation61_spill] sm:$0xff]  ;;  %v15829_v48 = vld [vmem:[#allocation12_spill] sm:$0xff]  ;;  %v1280_v44 = vpop.f32.mrf.mxu2 }
 0x43f   : > { %15815 = vst [vmem:[#allocation29_spill] sm:$0xff] %v13127_v51  ;;  %v5996_v35 = vmul.f32 %v12761_v4, %v15826_v20  ;;  %v1278_v17 = vadd.f32 %v12865_v61, %v1277_v6  ;;  %v13158_v42 = vadd.f32 %v3538_v13, %v3537_v50  ;;  %v3569_v27 = vrot.slane %v3568_v3, 4  ;;  %v8947_v13 = vld [vmem:[%s9181_s12 + $0x308] sm:$0xff] }
 0x440   : > { %15819 = vst [vmem:[#allocation194_spill] sm:$0xff] %v13137_v47  ;;  %v2963_v9 = vmul.f32 %v15828_v22, %v12972_v38  ;;  %v5997_v45 = vmul.f32 %v12826_v8, %v15829_v48  ;;  %v3545_v24 = vrot.slane %v3544_v41, 1  ;;  %v13164_v0 = vadd.f32 %v3550_v32, %v3549_v53  ;;  %v15831_v53 = vld [vmem:[#allocation75_spill] sm:$0xff]  ;;  %v13175_v48 = vpop.permute.xlu1 %5714 }
 0x441   : > { %15827 = vst [vmem:[#allocation204_spill] sm:$0xff] %v13158_v42  ;;  %v3557_v4 = vrot.slane %v3556_v7, 2  ;;  %v6530_v6 = vsel %vm6081_vm10, %v6017_v28, 0.0  ;;  %v3562_v57 = vrot.slane %v3561_v40, 4  ;;  %v3575_v52 = vsel %vm524_vm0, %v2961_v29, 0.0  ;;  %v13177_v28 = vpop.f32.mrf.mxu3  ;;  %v8948_v42 = vld [vmem:[%s9181_s12 + $0x320] sm:$0xff] }
 0x442   : > { %8541 = vmatmul.msk.f32.gmra.mxu3 %vm1454_vm1, %v1426_v19  ;;  %15830 = vst [vmem:[#allocation229_spill] sm:$0xff] %v13164_v0  ;;  %v6397_v50 = vsel %vm6081_vm10, %v5998_v21, 0.0  ;;  %v6544_v19 = vsel %vm6081_vm10, %v6019_v14, 0.0  ;;  %5830 = vperm.xlu1 %8694, %v8947_v13   ;;  %v3582_v20 = vsel %vm524_vm0, %v2962_v33, 0.0  ;;  %v6383_v8 = vsel %vm6081_vm10, %v5996_v35, 0.0 }
 0x443   : > { %v2964_v32 = vmul.f32 %v15831_v53, %v12975_v39  ;;  %v1427_v22 = vmax.f32 %v1278_v17, 0.0  ;;  %15832 = vst [vmem:[#allocation220_spill] sm:$0xff] %v13175_v48  ;;  %v3570_v31 = vadd.f32 %v3569_v27, %v3568_v3  ;;  %v3589_v29 = vsel %vm524_vm0, %v2963_v9, 0.0 }
 0x444   : > { %v6390_v21 = vsel %vm6081_vm10, %v5997_v45, 0.0  ;;  %v6531_v14 = vrot.slane %v6530_v6, 4  ;;  %v3576_v37 = vrot.slane %v3575_v52, 4  ;;  %v6398_v13 = vrot.slane %v6397_v50, 4  ;;  %15834 = vst [vmem:[#allocation167_spill] sm:$0xff] %v13183_v15 }
 0x445   : > { %v6006_v33 = vmul.f32 %v12810_v5, %v15833_v55  ;;  %v6545_v35 = vrot.slane %v6544_v19, 4  ;;  %v13185_v53 = vadd.f32 %v3545_v24, %v3544_v41  ;;  %v3583_v2 = vrot.slane %v3582_v20, 4 }
 0x446   : > { %v6384_v38 = vrot.slane %v6383_v8, 4  ;;  %v3590_v3 = vrot.slane %v3589_v29, 4  ;;  %v6391_v27 = vrot.slane %v6390_v21, 4  ;;  %v3596_v9 = vsel %vm524_vm0, %v2964_v32, 0.0 }
 0x447   : > { %15835 = vst [vmem:[#allocation179_spill] sm:$0xff] %v13185_v53  ;;  %v1281_v45 = vadd.f32 %v12865_v61, %v1280_v44  ;;  %v7252_v39 = vpop.permute.xlu2 %7251  ;;  %v13191_v5 = vadd.f32 %v3557_v4, %v3556_v7  ;;  %v13193_v55 = vadd.f32 %v3562_v57, %v3561_v40  ;;  %v3571_v41 = vrot.slane %v3570_v31, 2  ;;  %v15838_v53 = vld [vmem:[#allocation199_spill] sm:$0xff] }
 0x448   : > { %v6532_v24 = vadd.f32 %v6531_v14, %v6530_v6  ;;  %8562 = vmatmul.msk.f32.gmra.mxu2 %vm524_vm0, %v7252_v39  ;;  %v3577_v17 = vadd.f32 %v3576_v37, %v3575_v52  ;;  %v6399_v10 = vadd.f32 %v6398_v13, %v6397_v50  ;;  %v6453_v15 = vsel %vm6081_vm10, %v6006_v33, 0.0  ;;  %v15839_v7 = vld [vmem:[#allocation219_spill] sm:$0xff]  ;;  %v1283_v39 = vpop.f32.mrf.mxu2  ;;  %v13204_v13 = vpop.permute.xlu1 %7945 }
 0x449   : > { %15836 = vst [vmem:[#allocation30_spill] sm:$0xff] %v13191_v5  ;;  %v6546_v48 = vadd.f32 %v6545_v35, %v6544_v19  ;;  %v3584_v32 = vadd.f32 %v3583_v2, %v3582_v20  ;;  %v3597_v58 = vrot.slane %v3596_v9, 4  ;;  %v6000_v44 = vmul.f32 %v12871_v23, %v15838_v53  ;;  %v13210_v53 = vpop.permute.xlu0 %5722  ;;  %v15877_v5 = vld [vmem:[#allocation214_spill] sm:$0xff] }
 0x44a   : > { %8542 = vmatmul.msk.f32.gmra.mxu3 %vm1454_vm1, %v1427_v22  ;;  %15837 = vst [vmem:[#allocation59_spill] sm:$0xff] %v13193_v55  ;;  %5842 = vperm.xlu1 %8694, %v8948_v42   ;;  %v6018_v40 = vmul.f32 %v13110_v62, %v15839_v7  ;;  %v6385_v4 = vadd.f32 %v6384_v38, %v6383_v8  ;;  %v1428_v22 = vmax.f32 %v1281_v45, 0.0  ;;  %v6454_v50 = vrot.slane %v6453_v15, 4  ;;  %v13206_v42 = vpop.f32.mrf.mxu3 }
 0x44b   : > { %v3591_v57 = vadd.f32 %v3590_v3, %v3589_v29  ;;  %v6392_v6 = vadd.f32 %v6391_v27, %v6390_v21  ;;  %v3572_v52 = vadd.f32 %v3571_v41, %v3570_v31  ;;  %v6533_v19 = vrot.slane %v6532_v24, 2  ;;  %15840 = vst [vmem:[#allocation63_spill] sm:$0xff] %v13204_v13  ;;  %v15842_v27 = vld [vmem:[#allocation32_spill] sm:$0xff] }
 0x44c   : > { %v3578_v2 = vrot.slane %v3577_v17, 2  ;;  %v6400_v20 = vrot.slane %v6399_v10, 2  ;;  %v6547_v14 = vrot.slane %v6546_v48, 2  ;;  %v6537_v23 = vsel %vm6081_vm10, %v6018_v40, 0.0  ;;  %15841 = vst [vmem:[#allocation126_spill] sm:$0xff] %v13210_v53 }
 0x44d   : > { %v3585_v62 = vrot.slane %v3584_v32, 2  ;;  %v3598_v38 = vadd.f32 %v3597_v58, %v3596_v9  ;;  %v6411_v8 = vsel %vm6081_vm10, %v6000_v44, 0.0  ;;  %v6538_v29 = vrot.slane %v6537_v23, 4 }
 0x44e   : > { %v6386_v21 = vrot.slane %v6385_v4, 2  ;;  %v3592_v33 = vrot.slane %v3591_v57, 2  ;;  %v6393_v35 = vrot.slane %v6392_v6, 2  ;;  %v1284_v31 = vadd.f32 %v12865_v61, %v1283_v39 }
 0x44f   : > { %v6455_v3 = vadd.f32 %v6454_v50, %v6453_v15  ;;  %v5999_v45 = vmul.f32 %v12782_v30, %v15842_v27  ;;  %v6534_v41 = vadd.f32 %v6533_v19, %v6532_v24  ;;  %v6539_v7 = vadd.f32 %v6538_v29, %v6537_v23  ;;  %v15844_v23 = vld [vmem:[#allocation74_spill] sm:$0xff] }
 0x450   : > { %v3573_v40 = vrot.slane %v3572_v52, 1  ;;  %v6401_v58 = vadd.f32 %v6400_v20, %v6399_v10  ;;  %v6412_v9 = vrot.slane %v6411_v8, 4  ;;  %v6548_v44 = vadd.f32 %v6547_v14, %v6546_v48  ;;  %v1286_v20 = vpop.f32.mrf.mxu2  ;;  %v13222_v29 = vpop.permute.xlu1 %5734 }
 0x451   : > { %v3579_v37 = vadd.f32 %v3578_v2, %v3577_v17  ;;  %v3586_v13 = vadd.f32 %v3585_v62, %v3584_v32  ;;  %v3599_v47 = vrot.slane %v3598_v38, 2  ;;  %v6540_v51 = vrot.slane %v6539_v7, 2 }
 0x452   : > { %8543 = vmatmul.msk.f32.gmra.mxu3 %vm1454_vm1, %v1428_v22  ;;  %v6387_v16 = vadd.f32 %v6386_v21, %v6385_v4  ;;  %v3593_v39 = vadd.f32 %v3592_v33, %v3591_v57  ;;  %v6394_v0 = vadd.f32 %v6393_v35, %v6392_v6  ;;  %v1429_v53 = vmax.f32 %v1284_v31, 0.0  ;;  %v13218_v14 = vpop.f32.mrf.mxu3  ;;  %v5731_v31 = vpop.permute.xlu0 %5730 }
 0x453   : > { %v6456_v55 = vrot.slane %v6455_v3, 2  ;;  %v6404_v15 = vsel %vm6081_vm10, %v5999_v45, 0.0  ;;  %v6535_v22 = vrot.slane %v6534_v41, 1  ;;  %v6541_v50 = vadd.f32 %v6540_v51, %v6539_v7 }
 0x454   : > { %v13216_v30 = vadd.f32 %v3573_v40, %v3572_v52  ;;  %v6402_v24 = vrot.slane %v6401_v58, 1  ;;  %v6413_v19 = vadd.f32 %v6412_v9, %v6411_v8  ;;  %v6549_v10 = vrot.slane %v6548_v44, 1 }
 0x455   : > { %v3580_v48 = vrot.slane %v3579_v37, 1  ;;  %v3587_v17 = vrot.slane %v3586_v13, 1  ;;  %v3600_v32 = vadd.f32 %v3599_v47, %v3598_v38  ;;  %v6542_v2 = vrot.slane %v6541_v50, 1 }
 0x456   : > { %15843 = vst [vmem:[#allocation132_spill] sm:$0xff] %v13216_v30  ;;  %v6388_v4 = vrot.slane %v6387_v16, 1  ;;  %v3594_v57 = vrot.slane %v3593_v39, 1  ;;  %v6405_v6 = vrot.slane %v6404_v15, 4  ;;  %v2965_v62 = vmul.f32 %v15844_v23, %v12981_v63  ;;  %v15876_v30 = vld [vmem:[#allocation121_spill] sm:$0xff] }
 0x457   : > { %v6395_v51 = vrot.slane %v6394_v0, 1  ;;  %v6457_v52 = vadd.f32 %v6456_v55, %v6455_v3  ;;  %v6536_v8 = vadd.f32 %v6535_v22, %v6534_v41  ;;  %v6543_v21 = vadd.f32 %v6542_v2, %v6541_v50 }
 0x458   : > { %v6414_v33 = vrot.slane %v6413_v19, 2  ;;  %v6550_v35 = vadd.f32 %v6549_v10, %v6548_v44  ;;  %v6027_v47 = vmul.f32 %v13155_v46, %v12583_v26  ;;  %v1287_v38 = vadd.f32 %v12865_v61, %v1286_v20  ;;  %v13248_v44 = vld [vmem:[%s14805_s4] ss:$0 sm:$0xff] }
 0x459   : > { %v13228_v27 = vadd.f32 %v3580_v48, %v3579_v37  ;;  %v13230_v45 = vadd.f32 %v6402_v24, %v6401_v58  ;;  %v3601_v7 = vrot.slane %v3600_v32, 1  ;;  %v7887_v40 = vsel %vm7114_vm2, %v6543_v21, %v6536_v8  ;;  %v15854_v24 = vld [vmem:[#allocation60_spill] sm:$0xff]  ;;  %v15855_v48 = vld [vmem:[#allocation38_spill] sm:$0xff] }
 0x45a   : > { %8544 = vmatmul.msk.f32.gmra.mxu3 %vm1454_vm1, %v1429_v53  ;;  %v13233_v53 = vadd.f32 %v3587_v17, %v3586_v13  ;;  %v6406_v55 = vadd.f32 %v6405_v6, %v6404_v15  ;;  %v3603_v3 = vsel %vm524_vm0, %v2965_v62, 0.0  ;;  %v13237_v41 = vsel %vm7116_vm3, %v6550_v35, %v7887_v40  ;;  %v13259_v10 = vpop.f32.mrf.mxu3  ;;  %v15856_v17 = vld [vmem:[#allocation48_spill] sm:$0xff]  ;;  %v1289_v6 = vpop.f32.mrf.mxu2 }
 0x45b   : > { %15845 = vst [vmem:[#allocation135_spill] sm:$0xff] %v13228_v27  ;;  %v13239_v9 = vadd.f32 %v6388_v4, %v6387_v16  ;;  %v13241_v26 = vadd.f32 %v3594_v57, %v3593_v39  ;;  %v13243_v46 = vadd.f32 %v6395_v51, %v6394_v0  ;;  %v6458_v37 = vrot.slane %v6457_v52, 1  ;;  %v15853_v39 = vld [vmem:[#allocation145_spill] sm:$0xff]  ;;  %v15859_v51 = vld [vmem:[#allocation222_spill] sm:$0xff] }
 0x45c   : > { %15846 = vst [vmem:[#allocation154_spill] sm:$0xff] %v13230_v45  ;;  %v6415_v58 = vadd.f32 %v6414_v33, %v6413_v19  ;;  %v2124_v13 = vadd.f32 %v13248_v44, %v13029_v54  ;;  %v6600_v15 = vsel %vm6081_vm10, %v6027_v47, 0.0  ;;  %v1430_v22 = vmax.f32 %v1287_v38, 0.0  ;;  %v15857_v4 = vld [vmem:[#allocation157_spill] sm:$0xff]  ;;  %v15858_v54 = vld [vmem:[#allocation122_spill] sm:$0xff] }
 0x45d   : > { %15847 = vst [vmem:[#allocation153_spill] sm:$0xff] %v13233_v53  ;;  %v13253_v50 = vadd.f32 %v3601_v7, %v3600_v32  ;;  %v3604_v16 = vrot.slane %v3603_v3, 4  ;;  %v2121_v0 = vadd.f32 %v13248_v44, %v15853_v39  ;;  %v2127_v19 = vadd.f32 %v13248_v44, %v15854_v24 }
 0x45e   : > { %15848 = vst [vmem:[#allocation151_spill] sm:$0xff] %v13237_v41  ;;  %v6407_v20 = vrot.slane %v6406_v55, 2  ;;  %v6008_v2 = vmul.f32 %v15856_v17, %v15855_v48  ;;  %v6004_v57 = vmul.f32 %v15858_v54, %v15857_v4  ;;  %v2130_v32 = vadd.f32 %v13248_v44, %v13083_v1  ;;  %v13278_v1 = vpop.permute.xlu1 %5746  ;;  %v15862_v48 = vld [vmem:[#allocation176_spill] sm:$0xff]  ;;  %v15863_v17 = vld [vmem:[#allocation134_spill] sm:$0xff] }
 0x45f   : > { %15849 = vst [vmem:[#allocation140_spill] sm:$0xff] %v13239_v9  ;;  %v2133_v23 = vadd.f32 %v13248_v44, %v13132_v49  ;;  %v6601_v62 = vrot.slane %v6600_v15, 4  ;;  %v6025_v8 = vmul.f32 %v5731_v31, %v15859_v51  ;;  %v1290_v21 = vadd.f32 %v12865_v61, %v1289_v6 }
 0x460   : > { %15850 = vst [vmem:[#allocation218_spill] sm:$0xff] %v13241_v26  ;;  %v13272_v33 = vadd.f32 %v6458_v37, %v6457_v52  ;;  %v6416_v35 = vrot.slane %v6415_v58, 1  ;;  %v13274_v47 = vmax.f32 %v2124_v13, 0.0  ;;  %v2136_v38 = vadd.f32 %v13248_v44, %v13177_v28 }
 0x461   : > { %15851 = vst [vmem:[#allocation49_spill] sm:$0xff] %v13243_v46  ;;  %v13280_v7 = vmax.f32 %v2121_v0, 0.0  ;;  %v13282_v40 = vmax.f32 %v2127_v19, 0.0  ;;  %v6586_v49 = vsel %vm6081_vm10, %v6025_v8, 0.0  ;;  %v2139_v31 = vadd.f32 %v13248_v44, %v13206_v42  ;;  %v13298_v19 = vpop.permute.xlu2 %5750 }
 0x462   : > { %15852 = vst [vmem:[#allocation62_spill] sm:$0xff] %v13253_v50  ;;  %8545 = vmatmul.msk.f32.gmra.mxu3 %vm1454_vm1, %v1430_v22  ;;  %v13287_v61 = vadd.f32 %v3604_v16, %v3603_v3  ;;  %v13289_v52 = vmax.f32 %v2130_v32, 0.0  ;;  %v6587_v37 = vrot.slane %v6586_v49, 4  ;;  %v1431_v13 = vmax.f32 %v1290_v21, 0.0  ;;  %v13291_v22 = vpop.permute.xlu0 %5742  ;;  %v13318_v21 = vpop.f32.mrf.mxu3 }
 0x463   : > { %15860 = vst [vmem:[#allocation23_spill] sm:$0xff] %v13272_v33  ;;  %v13293_v28 = vadd.f32 %v6407_v20, %v6406_v55  ;;  %v6467_v39 = vsel %vm6081_vm10, %v6008_v2, 0.0  ;;  %v13296_v0 = vmax.f32 %v2133_v23, 0.0  ;;  %v6602_v24 = vadd.f32 %v6601_v62, %v6600_v15  ;;  %v15864_v55 = vld [vmem:[#allocation16_spill] sm:$0xff]  ;;  %v15865_v2 = vld [vmem:[#allocation241_spill] sm:$0xff] }
 0x464   : > { %15861 = vst [vmem:[#allocation18_spill] sm:$0xff] %v13278_v1  ;;  %v4505_v42 = vmul.f32 %v15862_v48, %v13274_v47  ;;  %v13302_v3 = vmax.f32 %v2136_v38, 0.0  ;;  %v6588_v16 = vadd.f32 %v6587_v37, %v6586_v49  ;;  %v6026_v4 = vmul.f32 %v13222_v29, %v15863_v17  ;;  %v15867_v62 = vld [vmem:[#allocation244_spill] sm:$0xff] }
 0x465   : > { %v6439_v54 = vsel %vm6081_vm10, %v6004_v57, 0.0  ;;  %v4504_v20 = vmul.f32 %v15864_v55, %v13280_v7  ;;  %v4506_v32 = vmul.f32 %v15865_v2, %v13282_v40  ;;  %v13311_v15 = vmax.f32 %v2139_v31, 0.0  ;;  %v15868_v57 = vld [vmem:[#allocation174_spill] sm:$0xff] }
 0x466   : > { %v13313_v6 = vadd.f32 %v6416_v35, %v6415_v58  ;;  %v4507_v51 = vmul.f32 %v15867_v62, %v13289_v52  ;;  %v6589_v8 = vrot.slane %v6588_v16, 2  ;;  %v6468_v29 = vrot.slane %v6467_v39, 4  ;;  %v15869_v35 = vld [vmem:[#allocation247_spill] sm:$0xff]  ;;  %v15870_v62 = vld [vmem:[#allocation248_spill] sm:$0xff]  ;;  %v13336_v63 = vpop.permute.xlu1 %7947 }
 0x467   : > { %v4508_v38 = vmul.f32 %v15868_v57, %v13296_v0  ;;  %v6603_v49 = vrot.slane %v6602_v24, 2  ;;  %v6593_v31 = vsel %vm6081_vm10, %v6026_v4, 0.0  ;;  %v5168_v58 = vsel %vm4544_vm6, %v4505_v42, 0.0  ;;  %15872 = vst [vmem:[#allocation21_spill] sm:$0xff] %v13336_v63 }
 0x468   : > { %15866 = vst [vmem:[#allocation52_spill] sm:$0xff] %v13313_v6  ;;  %v4509_v37 = vmul.f32 %v15869_v35, %v13302_v3  ;;  %v6594_v48 = vrot.slane %v6593_v31, 4  ;;  %v2142_v17 = vadd.f32 %v13248_v44, %v13218_v14  ;;  %v6440_v55 = vrot.slane %v6439_v54, 4 }
 0x469   : > { %v5161_v2 = vsel %vm4544_vm6, %v4504_v20, 0.0  ;;  %v4510_v57 = vmul.f32 %v15870_v62, %v13311_v15  ;;  %v5182_v23 = vsel %vm4544_vm6, %v4507_v51, 0.0  ;;  %v6590_v4 = vadd.f32 %v6589_v8, %v6588_v16 }
 0x46a   : > { %8546 = vmatmul.msk.f32.gmra.mxu3 %vm1454_vm1, %v1431_v13  ;;  %v5175_v13 = vsel %vm4544_vm6, %v4506_v32, 0.0  ;;  %v6595_v41 = vadd.f32 %v6594_v48, %v6593_v31  ;;  %v13334_v42 = vmax.f32 %v2142_v17, 0.0  ;;  %v6409_v35 = vrot.slane %v13293_v28, 1  ;;  %v13343_v53 = vpop.permute.xlu0 %5754  ;;  %v13346_v48 = vpop.permute.xlu2 %5758 }
 0x46b   : > { %v5169_v33 = vrot.slane %v5168_v58, 4  ;;  %v5189_v14 = vsel %vm4544_vm6, %v4508_v38, 0.0  ;;  %v6604_v50 = vadd.f32 %v6603_v49, %v6602_v24  ;;  %v13340_v20 = vadd.f32 %v6468_v29, %v6467_v39  ;;  %15873 = vst [vmem:[#allocation27_spill] sm:$0xff] %v13343_v53  ;;  %v15875_v24 = vld [vmem:[#allocation6_spill] sm:$0xff]  ;;  %v1292_v29 = vpop.f32.mrf.mxu2 }
 0x46c   : > { %15871 = vst [vmem:[#allocation119_spill] sm:$0xff] %v13334_v42  ;;  %v5176_v32 = vrot.slane %v5175_v13, 4  ;;  %v5196_v26 = vsel %vm4544_vm6, %v4509_v37, 0.0  ;;  %v6596_v62 = vrot.slane %v6595_v41, 2  ;;  %v6441_v16 = vadd.f32 %v6440_v55, %v6439_v54  ;;  %v8950_v54 = vld [vmem:[%s14803_s2] ss:$0 sm:$0xff] }
 0x46d   : > { %v5162_v51 = vrot.slane %v5161_v2, 4  ;;  %v5183_v8 = vrot.slane %v5182_v23, 4  ;;  %v5203_v31 = vsel %vm4544_vm6, %v4510_v57, 0.0  ;;  %15874 = vst [vmem:[#allocation150_spill] sm:$0xff] %v13346_v48  ;;  %v5190_v17 = vrot.slane %v5189_v14, 4 }
 0x46e   : > { %v6591_v63 = vrot.slane %v6590_v4, 1  ;;  %v6597_v27 = vadd.f32 %v6596_v62, %v6595_v41  ;;  %v4511_v39 = vmul.f32 %v15875_v24, %v13334_v42  ;;  %v5170_v38 = vadd.f32 %v5169_v33, %v5168_v58  ;;  %v15878_v41 = vld [vmem:[#allocation173_spill] sm:$0xff]  ;;  %v15879_v62 = vld [vmem:[#allocation64_spill] sm:$0xff]  ;;  %v13360_v43 = vpop.permute.xlu1 %5766 }
 0x46f   : > { %v6605_v49 = vrot.slane %v6604_v50, 1  ;;  %v5197_v37 = vrot.slane %v5196_v26, 4  ;;  %v1293_v55 = vadd.f32 %v8950_v54, %v1292_v29  ;;  %v6007_v57 = vmul.f32 %v15877_v5, %v15876_v30 }
 0x470   : > { %v5177_v60 = vadd.f32 %v5176_v32, %v5175_v13  ;;  %v5204_v6 = vrot.slane %v5203_v31, 4  ;;  %v6598_v45 = vrot.slane %v6597_v27, 1  ;;  %v6442_v46 = vrot.slane %v6441_v16, 2 }
 0x471   : > { %v2966_v9 = vmul.f32 %v15879_v62, %v15878_v41  ;;  %v5163_v24 = vadd.f32 %v5162_v51, %v5161_v2  ;;  %v5184_v42 = vadd.f32 %v5183_v8, %v5182_v23  ;;  %v5191_v33 = vadd.f32 %v5190_v17, %v5189_v14  ;;  %v15883_v14 = vld [vmem:[#allocation39_spill] sm:$0xff]  ;;  %v15884_v51 = vld [vmem:[#allocation46_spill] sm:$0xff] }
 0x472   : > { %v6592_v58 = vadd.f32 %v6591_v63, %v6590_v4  ;;  %v6599_v1 = vadd.f32 %v6598_v45, %v6597_v27  ;;  %v5210_v53 = vsel %vm4544_vm6, %v4511_v39, 0.0  ;;  %v5171_v59 = vrot.slane %v5170_v38, 2  ;;  %v5771_v17 = vpop.permute.xlu2 %5770  ;;  %v13377_v39 = vpop.f32.mrf.mxu3 }
 0x473   : > { %v6606_v48 = vadd.f32 %v6605_v49, %v6604_v50  ;;  %v5198_v29 = vadd.f32 %v5197_v37, %v5196_v26  ;;  %v1432_v54 = vmax.f32 %v1293_v55, 0.0  ;;  %v6460_v5 = vsel %vm6081_vm10, %v6007_v57, 0.0 }
 0x474   : > { %v5178_v30 = vrot.slane %v5177_v60, 2  ;;  %v5205_v13 = vadd.f32 %v5204_v6, %v5203_v31  ;;  %v7894_v32 = vsel %vm7114_vm2, %v6599_v1, %v6592_v58  ;;  %v5164_v62 = vrot.slane %v5163_v24, 2  ;;  %v5763_v1 = vpop.permute.xlu0 %5762 }
 0x475   : > { %v5185_v2 = vrot.slane %v5184_v42, 2  ;;  %v13363_v23 = vsel %vm7116_vm3, %v6606_v48, %v7894_v32  ;;  %v5211_v63 = vrot.slane %v5210_v53, 4  ;;  %v13366_v27 = vadd.f32 %v6409_v35, %v13293_v28  ;;  %8547 = vmatmul.msk.f32.gmra.mxu3 %vm1454_vm1, %v1432_v54 }
 0x476   : > { %15880 = vst [vmem:[#allocation40_spill] sm:$0xff] %v13363_v23  ;;  %v15881_v45 = vrot.slane %v13287_v61, 2  ;;  %v6470_v50 = vrot.slane %v13340_v20, 2  ;;  %v5192_v6 = vrot.slane %v5191_v33, 2  ;;  %v3610_v4 = vsel %vm524_vm0, %v2966_v9, 0.0 }
 0x477   : > { %v6005_v8 = vmul.f32 %v15884_v51, %v15883_v14  ;;  %v5172_v31 = vadd.f32 %v5171_v59, %v5170_v38  ;;  %v5199_v48 = vrot.slane %v5198_v29, 2  ;;  %v6443_v28 = vadd.f32 %v6442_v46, %v6441_v16  ;;  %v15888_v51 = vld [vmem:[#allocation136_spill] sm:$0xff] }
 0x478   : > { %v13371_v26 = vadd.f32 %v15881_v45, %v13287_v61  ;;  %v6461_v35 = vrot.slane %v6460_v5, 4  ;;  %v5179_v61 = vadd.f32 %v5178_v30, %v5177_v60  ;;  %v5206_v49 = vrot.slane %v5205_v13, 2 }
 0x479   : > { %v5165_v37 = vadd.f32 %v5164_v62, %v5163_v24  ;;  %v5186_v55 = vadd.f32 %v5185_v2, %v5184_v42  ;;  %v5212_v57 = vadd.f32 %v5211_v63, %v5210_v53  ;;  %v6033_v58 = vmul.f32 %v5763_v1, %v12964_v25 }
 0x47a   : > { %15882 = vst [vmem:[#allocation142_spill] sm:$0xff] %v13371_v26  ;;  %v3611_v32 = vrot.slane %v3610_v4, 4  ;;  %v5193_v45 = vadd.f32 %v5192_v6, %v5191_v33  ;;  %v6035_v59 = vmul.f32 %v5771_v17, %v12970_v12  ;;  %v13384_v38 = vadd.f32 %v6470_v50, %v13340_v20  ;;  %v13389_v20 = vpop.permute.xlu1 %5778 }
 0x47b   : > { %v6446_v54 = vsel %vm6081_vm10, %v6005_v8, 0.0  ;;  %v5173_v46 = vrot.slane %v5172_v31, 1  ;;  %v5200_v16 = vadd.f32 %v5199_v48, %v5198_v29  ;;  %v6444_v60 = vrot.slane %v6443_v28, 1  ;;  %15886 = vst [vmem:[#allocation160_spill] sm:$0xff] %v13389_v20  ;;  %v15887_v29 = vld [vmem:[#allocation77_spill] sm:$0xff] }
 0x47c   : > { %15885 = vst [vmem:[#allocation112_spill] sm:$0xff] %v13384_v38  ;;  %v6462_v30 = vadd.f32 %v6461_v35, %v6460_v5  ;;  %v5180_v24 = vrot.slane %v5179_v61, 1  ;;  %v5207_v42 = vadd.f32 %v5206_v49, %v5205_v13  ;;  %v5166_v53 = vrot.slane %v5165_v37, 1  ;;  %v13394_v13 = vpop.f32.mrf.mxu3 }
 0x47d   : > { %v5187_v62 = vrot.slane %v5186_v55, 1  ;;  %v5213_v25 = vrot.slane %v5212_v57, 2  ;;  %v6642_v2 = vsel %vm6081_vm10, %v6033_v58, 0.0  ;;  %v3612_v63 = vadd.f32 %v3611_v32, %v3610_v4 }
 0x47e   : > { %v6447_v33 = vrot.slane %v6446_v54, 4  ;;  %v5194_v6 = vrot.slane %v5193_v45, 1  ;;  %v6656_v12 = vsel %vm6081_vm10, %v6035_v59, 0.0  ;;  %v2968_v1 = vmul.f32 %v15887_v29, %v13280_v7 }
 0x47f   : > { %v5174_v5 = vadd.f32 %v5173_v46, %v5172_v31  ;;  %v5201_v14 = vrot.slane %v5200_v16, 1  ;;  %v15889_v8 = vmax.f32 %v15888_v51, 0.0  ;;  %v6463_v4 = vrot.slane %v6462_v30, 2 }
 0x480   : > { %v5181_v48 = vadd.f32 %v5180_v24, %v5179_v61  ;;  %v6643_v17 = vrot.slane %v6642_v2, 4  ;;  %v5208_v35 = vrot.slane %v5207_v42, 1  ;;  %v5167_v49 = vadd.f32 %v5166_v53, %v5165_v37 }
 0x481   : > { %8548 = vmatmul.msk.f32.gmra.mxu3 %vm1454_vm1, %v15889_v8  ;;  %v5188_v58 = vadd.f32 %v5187_v62, %v5186_v55  ;;  %v6657_v32 = vrot.slane %v6656_v12, 4  ;;  %v5214_v59 = vadd.f32 %v5213_v25, %v5212_v57  ;;  %v13399_v50 = vadd.f32 %v6444_v60, %v6443_v28  ;;  %v15891_v8 = vld [vmem:[#allocation67_spill] sm:$0xff]  ;;  %v13406_v55 = vpop.permute.xlu0 %5774  ;;  %v15893_v25 = vld [vmem:[#allocation188_spill] sm:$0xff] }
 0x482   : > { %v3613_v9 = vrot.slane %v3612_v63, 2  ;;  %v6448_v29 = vadd.f32 %v6447_v33, %v6446_v54  ;;  %v5195_v31 = vadd.f32 %v5194_v6, %v5193_v45  ;;  %v3624_v46 = vsel %vm524_vm0, %v2968_v1, 0.0  ;;  %15892 = vst [vmem:[#allocation236_spill] sm:$0xff] %v13406_v55  ;;  %v15894_v33 = vld [vmem:[#allocation78_spill] sm:$0xff]  ;;  %v15896_v6 = vld [vmem:[#allocation184_spill] sm:$0xff] }
 0x483   : > { %15890 = vst [vmem:[#allocation149_spill] sm:$0xff] %v13399_v50  ;;  %v5202_v41 = vadd.f32 %v5201_v14, %v5200_v16  ;;  %v5215_v20 = vrot.slane %v5214_v59, 1  ;;  %v7198_v51 = vsel %vm7114_vm2, %v5174_v5, %v5167_v49  ;;  %v2969_v61 = vmul.f32 %v15891_v8, %v13274_v47  ;;  %v15897_v5 = vld [vmem:[#allocation239_spill] sm:$0xff] }
 0x484   : > { %v6644_v24 = vadd.f32 %v6643_v17, %v6642_v2  ;;  %v5209_v38 = vadd.f32 %v5208_v35, %v5207_v42  ;;  %v7199_v37 = vsel %vm7116_vm3, %v5181_v48, %v7198_v51  ;;  %v6464_v28 = vadd.f32 %v6463_v4, %v6462_v30  ;;  %v15895_v42 = vld [vmem:[#allocation11_spill] sm:$0xff]  ;;  %v15899_v4 = vld [vmem:[#allocation81_spill] sm:$0xff] }
 0x485   : > { %v6658_v57 = vadd.f32 %v6657_v32, %v6656_v12  ;;  %v5216_v60 = vadd.f32 %v5215_v20, %v5214_v59  ;;  %v7200_v45 = vsel %vm7118_vm4, %v5188_v58, %v7199_v37  ;;  %v6449_v54 = vrot.slane %v6448_v29, 2  ;;  %v15898_v14 = vld [vmem:[#allocation227_spill] sm:$0xff]  ;;  %v15902_v58 = vld [vmem:[#allocation128_spill] sm:$0xff]  ;;  %v15903_v32 = vld [vmem:[#allocation209_spill] sm:$0xff] }
 0x486   : > { %v3625_v53 = vrot.slane %v3624_v46, 4  ;;  %v7201_v16 = vsel %vm7120_vm5, %v5195_v31, %v7200_v45  ;;  %v6034_v62 = vmul.f32 %v13360_v43, %v12939_v36  ;;  %v2967_v2 = vmul.f32 %v15894_v33, %v15893_v25  ;;  %v13423_v36 = vpop.permute.xlu1 %7949  ;;  %v13425_v43 = vpop.f32.mrf.mxu3 }
 0x487   : > { %v6014_v1 = vmul.f32 %v15896_v6, %v15895_v42  ;;  %v6012_v30 = vmul.f32 %v15898_v14, %v15897_v5  ;;  %v7202_v12 = vsel %vm7122_vm7, %v5202_v41, %v7201_v16  ;;  %v3631_v20 = vsel %vm524_vm0, %v2969_v61, 0.0  ;;  %15900 = vst [vmem:[#allocation242_spill] sm:$0xff] %v13423_v36  ;;  %v15912_v36 = vld [vmem:[#allocation129_spill] sm:$0xff] }
 0x488   : > { %v2970_v48 = vmul.f32 %v15899_v4, %v13282_v40  ;;  %v6645_v17 = vrot.slane %v6644_v24, 2  ;;  %v7203_v35 = vsel %vm7124_vm8, %v5209_v38, %v7202_v12  ;;  %v15901_v49 = vmax.f32 %v12869_v56, 0.0 }
 0x489   : > { %v6016_v59 = vmul.f32 %v15903_v32, %v15902_v58  ;;  %v6659_v41 = vrot.slane %v6658_v57, 2  ;;  %v7204_v31 = vsel %vm7126_vm9, %v5216_v60, %v7203_v35  ;;  %v6649_v51 = vsel %vm6081_vm10, %v6034_v62, 0.0  ;;  %v13446_v12 = vpop.permute.xlu0 %5786 }
 0x48a   : > { %8549 = vmatmul.msk.f32.gmra.mxu3 %vm1454_vm1, %v15901_v49  ;;  %v13434_v8 = vadd.f32 %v3613_v9, %v3612_v63  ;;  %v6465_v61 = vrot.slane %v6464_v28, 1  ;;  %v3626_v38 = vadd.f32 %v3625_v53, %v3624_v46  ;;  %7255 = vrot.lane.b32.xlu0 %v7204_v31, %s9051_s26  ;;  %v6650_v37 = vrot.slane %v6649_v51, 4  ;;  %v15905_v63 = vld [vmem:[#allocation80_spill] sm:$0xff]  ;;  %v15906_v53 = vld [vmem:[#allocation70_spill] sm:$0xff]  ;;  %15907 = vst [vmem:[#allocation143_spill] sm:$0xff] %v13446_v12 }
 0x48b   : > { %v6450_v45 = vadd.f32 %v6449_v54, %v6448_v29  ;;  %v3617_v56 = vsel %vm524_vm0, %v2967_v2, 0.0  ;;  %v6495_v16 = vsel %vm6081_vm10, %v6012_v30, 0.0  ;;  %v3632_v33 = vrot.slane %v3631_v20, 4  ;;  %v15914_v12 = vld [vmem:[#allocation84_spill] sm:$0xff] }
 0x48c   : > { %15904 = vst [vmem:[#allocation66_spill] sm:$0xff] %v13434_v8  ;;  %v6509_v42 = vsel %vm6081_vm10, %v6014_v1, 0.0  ;;  %v3638_v6 = vsel %vm524_vm0, %v2970_v48, 0.0  ;;  %v6646_v60 = vadd.f32 %v6645_v17, %v6644_v24  ;;  %v6651_v5 = vadd.f32 %v6650_v37, %v6649_v51 }
 0x48d   : > { %v6523_v9 = vsel %vm6081_vm10, %v6016_v59, 0.0  ;;  %v2971_v46 = vmul.f32 %v15905_v63, %v13289_v52  ;;  %v2972_v62 = vmul.f32 %v15906_v53, %v13296_v0  ;;  %v6660_v29 = vadd.f32 %v6659_v41, %v6658_v57  ;;  %v15909_v59 = vld [vmem:[#allocation34_spill] sm:$0xff]  ;;  %v15910_v57 = vld [vmem:[#allocation189_spill] sm:$0xff] }
 0x48e   : > { %v3618_v54 = vrot.slane %v3617_v56, 4  ;;  %v3627_v2 = vrot.slane %v3626_v38, 2  ;;  %v6496_v14 = vrot.slane %v6495_v16, 4  ;;  %v6652_v30 = vrot.slane %v6651_v5, 2  ;;  %v13450_v32 = vpop.permute.xlu1 %5798 }
 0x48f   : > { %v13448_v1 = vadd.f32 %v6465_v61, %v6464_v28  ;;  %v6451_v4 = vrot.slane %v6450_v45, 1  ;;  %v3633_v24 = vadd.f32 %v3632_v33, %v3631_v20  ;;  %v3639_v48 = vrot.slane %v3638_v6, 4  ;;  %v8951_v33 = vld [vmem:[%s9181_s12 + $0x300] sm:$0xff] }
 0x490   : > { %v6510_v17 = vrot.slane %v6509_v42, 4  ;;  %v6524_v35 = vrot.slane %v6523_v9, 4  ;;  %v6647_v49 = vrot.slane %v6646_v60, 1  ;;  %v6653_v58 = vadd.f32 %v6652_v30, %v6651_v5  ;;  %v15913_v5 = vld [vmem:[#allocation155_spill] sm:$0xff] }
 0x491   : > { %15908 = vst [vmem:[#allocation180_spill] sm:$0xff] %v13448_v1  ;;  %v6013_v41 = vmul.f32 %v15910_v57, %v15909_v59  ;;  %v3645_v31 = vsel %vm524_vm0, %v2971_v46, 0.0  ;;  %v3652_v51 = vsel %vm524_vm0, %v2972_v62, 0.0  ;;  %v6661_v37 = vrot.slane %v6660_v29, 1 }
 0x492   : > { %v13456_v28 = vadd.f32 %v3618_v54, %v3617_v56  ;;  %v3628_v61 = vadd.f32 %v3627_v2, %v3626_v38  ;;  %v6497_v63 = vadd.f32 %v6496_v14, %v6495_v16  ;;  %v6654_v20 = vrot.slane %v6653_v58, 1  ;;  %5826 = vperm.xlu0 %8693, %v8951_v33  }
 0x493   : > { %v3634_v53 = vrot.slane %v3633_v24, 2  ;;  %v6015_v30 = vmul.f32 %v15913_v5, %v15912_v36  ;;  %v3640_v25 = vadd.f32 %v3639_v48, %v3638_v6  ;;  %v2973_v59 = vmul.f32 %v15914_v12, %v13302_v3  ;;  %v13471_v6 = vpop.f32.mrf.mxu3 }
 0x494   : > { %15911 = vst [vmem:[#allocation10_spill] sm:$0xff] %v13456_v28  ;;  %v3646_v57 = vrot.slane %v3645_v31, 4  ;;  %v3653_v46 = vrot.slane %v3652_v51, 4  ;;  %v6648_v55 = vadd.f32 %v6647_v49, %v6646_v60  ;;  %v6655_v62 = vadd.f32 %v6654_v20, %v6653_v58  ;;  %v15920_v58 = vld [vmem:[#allocation57_spill] sm:$0xff] }
 0x495   : > { %v13463_v1 = vadd.f32 %v6510_v17, %v6509_v42  ;;  %v13465_v56 = vadd.f32 %v6524_v35, %v6523_v9  ;;  %v6502_v38 = vsel %vm6081_vm10, %v6013_v41, 0.0  ;;  %v6662_v16 = vadd.f32 %v6661_v37, %v6660_v29 }
 0x496   : > { %v13468_v54 = vadd.f32 %v6451_v4, %v6450_v45  ;;  %v3629_v2 = vrot.slane %v3628_v61, 1  ;;  %v6498_v14 = vrot.slane %v6497_v63, 2  ;;  %v7901_v36 = vsel %vm7114_vm2, %v6655_v62, %v6648_v55  ;;  %v5795_v55 = vpop.permute.xlu0 %5794  ;;  %v13481_v35 = vpop.permute.xlu1 %5810 }
 0x497   : > { %15915 = vst [vmem:[#allocation20_spill] sm:$0xff] %v13463_v1  ;;  %v15918_v12 = vmax.f32 %v12892_v18, 0.0  ;;  %v3635_v60 = vadd.f32 %v3634_v53, %v3633_v24  ;;  %v6516_v42 = vsel %vm6081_vm10, %v6015_v30, 0.0  ;;  %v3659_v9 = vsel %vm524_vm0, %v2973_v59, 0.0 }
 0x498   : > { %15916 = vst [vmem:[#allocation56_spill] sm:$0xff] %v13465_v56  ;;  %v13479_v29 = vsel %vm7116_vm3, %v6662_v16, %v7901_v36  ;;  %v6503_v45 = vrot.slane %v6502_v38, 4  ;;  %v3641_v4 = vrot.slane %v3640_v25, 2  ;;  %v3647_v48 = vadd.f32 %v3646_v57, %v3645_v31 }
 0x499   : > { %15917 = vst [vmem:[#allocation13_spill] sm:$0xff] %v13468_v54  ;;  %8550 = vmatmul.msk.f32.gmra.mxu3 %vm1454_vm1, %v15918_v12  ;;  %v3654_v17 = vadd.f32 %v3653_v46, %v3652_v51  ;;  %v6030_v41 = vmul.f32 %v13298_v19, %v15920_v58  ;;  %v13488_v37 = vadd.f32 %v6498_v14, %v6497_v63  ;;  %v6517_v20 = vrot.slane %v6516_v42, 4  ;;  %v8952_v51 = vld [vmem:[%s9181_s12 + $0x318] sm:$0xff] }
 0x49a   : > { %15919 = vst [vmem:[#allocation156_spill] sm:$0xff] %v13479_v29  ;;  %v3660_v33 = vrot.slane %v3659_v9, 4  ;;  %v2148_v31 = vadd.f32 %v13248_v44, %v13318_v21  ;;  %5838 = vperm.xlu0 %8693, %v8952_v51   ;;  %v13493_v53 = vadd.f32 %v3629_v2, %v3628_v61  ;;  %v3636_v5 = vrot.slane %v3635_v60, 1  ;;  %v15928_v58 = vld [vmem:[#allocation181_spill] sm:$0xff]  ;;  %v15930_v51 = vld [vmem:[#allocation131_spill] sm:$0xff] }
 0x49b   : > { %15921 = vst [vmem:[#allocation187_spill] sm:$0xff] %v13488_v37  ;;  %v2151_v30 = vadd.f32 %v13248_v44, %v13377_v39  ;;  %v6041_v59 = vmul.f32 %v5795_v55, %v13280_v7  ;;  %v6504_v57 = vadd.f32 %v6503_v45, %v6502_v38  ;;  %v3642_v46 = vadd.f32 %v3641_v4, %v3640_v25  ;;  %v13510_v25 = vpop.f32.mrf.mxu3 }
 0x49c   : > { %15922 = vst [vmem:[#allocation159_spill] sm:$0xff] %v13493_v53  ;;  %v3648_v19 = vrot.slane %v3647_v48, 2  ;;  %v3655_v63 = vrot.slane %v3654_v17, 2  ;;  %v6621_v62 = vsel %vm6081_vm10, %v6030_v41, 0.0  ;;  %v2145_v16 = vadd.f32 %v13248_v44, %v13259_v10 }
 0x49d   : > { %v2154_v21 = vadd.f32 %v13248_v44, %v13394_v13  ;;  %v6698_v61 = vsel %vm6081_vm10, %v6041_v59, 0.0  ;;  %v13504_v2 = vadd.f32 %v6517_v20, %v6516_v42  ;;  %v3661_v14 = vadd.f32 %v3660_v33, %v3659_v9  ;;  %v15926_v13 = vld [vmem:[#allocation83_spill] sm:$0xff] }
 0x49e   : > { %v13506_v39 = vmax.f32 %v2148_v31, 0.0  ;;  %v2157_v7 = vadd.f32 %v13248_v44, %v13425_v43  ;;  %v15924_v38 = vmax.f32 %v13096_v11, 0.0  ;;  %v13515_v10 = vadd.f32 %v3636_v5, %v3635_v60  ;;  %v13527_v60 = vpop.permute.xlu1 %7951 }
 0x49f   : > { %15923 = vst [vmem:[#allocation185_spill] sm:$0xff] %v13504_v2  ;;  %v2974_v36 = vmul.f32 %v15926_v13, %v13311_v15  ;;  %v13519_v12 = vmax.f32 %v2151_v30, 0.0  ;;  %v6699_v42 = vrot.slane %v6698_v61, 4  ;;  %v6505_v9 = vrot.slane %v6504_v57, 2 }
 0x4a0   : > { %15925 = vst [vmem:[#allocation26_spill] sm:$0xff] %v13515_v10  ;;  %v3649_v45 = vadd.f32 %v3648_v19, %v3647_v48  ;;  %v3656_v4 = vadd.f32 %v3655_v63, %v3654_v17  ;;  %v6622_v55 = vrot.slane %v6621_v62, 4  ;;  %v3643_v43 = vrot.slane %v3642_v46, 1  ;;  %v8953_v48 = vld [vmem:[%s9181_s12 + $0x330] sm:$0xff] }
 0x4a1   : > { %8551 = vmatmul.msk.f32.gmra.mxu3 %vm1454_vm1, %v15924_v38  ;;  %15927 = vst [vmem:[#allocation230_spill] sm:$0xff] %v13519_v12  ;;  %v6028_v41 = vmul.f32 %v13291_v22, %v15928_v58  ;;  %v13523_v11 = vmax.f32 %v2145_v16, 0.0  ;;  %v13525_v20 = vmax.f32 %v2154_v21, 0.0  ;;  %v3662_v31 = vrot.slane %v3661_v14, 2  ;;  %v15931_v22 = vld [vmem:[#allocation168_spill] sm:$0xff] }
 0x4a2   : > { %15929 = vst [vmem:[#allocation45_spill] sm:$0xff] %v13527_v60  ;;  %v4513_v5 = vmul.f32 %v15930_v51, %v13506_v39  ;;  %v13532_v30 = vmax.f32 %v2157_v7, 0.0  ;;  %5850 = vperm.xlu0 %8693, %v8953_v48   ;;  %v3666_v17 = vsel %vm524_vm0, %v2974_v36, 0.0  ;;  %v4514_v59 = vmul.f32 %v15931_v22, %v13519_v12  ;;  %v15934_v51 = vld [vmem:[#allocation223_spill] sm:$0xff]  ;;  %v15935_v36 = vld [vmem:[#allocation17_spill] sm:$0xff] }
 0x4a3   : > { %v6700_v19 = vadd.f32 %v6699_v42, %v6698_v61  ;;  %v6042_v63 = vmul.f32 %v13450_v32, %v13274_v47  ;;  %v13540_v16 = vadd.f32 %v6505_v9, %v6504_v57  ;;  %v3650_v21 = vrot.slane %v3649_v45, 1  ;;  %v13552_v32 = vpop.permute.xlu2 %5782  ;;  %v15938_v57 = vld [vmem:[#allocation200_spill] sm:$0xff] }
 0x4a4   : > { %v3657_v38 = vrot.slane %v3656_v4, 1  ;;  %v6623_v13 = vadd.f32 %v6622_v55, %v6621_v62  ;;  %v13542_v58 = vadd.f32 %v3643_v43, %v3642_v46  ;;  %v6607_v7 = vsel %vm6081_vm10, %v6028_v41, 0.0  ;;  %15937 = vst [vmem:[#allocation182_spill] sm:$0xff] %v13552_v32  ;;  %v2165_v46 = vpop.f32.mrf.mxu3 }
 0x4a5   : > { %15932 = vst [vmem:[#allocation169_spill] sm:$0xff] %v13540_v16  ;;  %v4512_v48 = vmul.f32 %v15934_v51, %v13523_v11  ;;  %v4515_v24 = vmul.f32 %v15935_v36, %v13525_v20  ;;  %v13549_v22 = vadd.f32 %v3662_v31, %v3661_v14  ;;  %v3667_v61 = vrot.slane %v3666_v17, 4 }
 0x4a6   : > { %15933 = vst [vmem:[#allocation237_spill] sm:$0xff] %v13542_v58  ;;  %v5224_v47 = vsel %vm4544_vm6, %v4513_v5, 0.0  ;;  %v4516_v62 = vmul.f32 %v15938_v57, %v13532_v30  ;;  %v15939_v42 = vmax.f32 %v13121_v34, 0.0  ;;  %v5231_v9 = vsel %vm4544_vm6, %v4514_v59, 0.0 }
 0x4a7   : > { %15936 = vst [vmem:[#allocation178_spill] sm:$0xff] %v13549_v22  ;;  %v6701_v55 = vrot.slane %v6700_v19, 2  ;;  %v6705_v43 = vsel %vm6081_vm10, %v6042_v63, 0.0  ;;  %v2160_v14 = vadd.f32 %v13248_v44, %v13471_v6  ;;  %v13563_v41 = vadd.f32 %v3650_v21, %v3649_v45  ;;  %v15942_v21 = vld [vmem:[#allocation245_spill] sm:$0xff] }
 0x4a8   : > { %v13565_v31 = vadd.f32 %v3657_v38, %v3656_v4  ;;  %v6624_v5 = vrot.slane %v6623_v13, 2  ;;  %v6608_v51 = vrot.slane %v6607_v7, 4  ;;  %v5217_v36 = vsel %vm4544_vm6, %v4512_v48, 0.0 }
 0x4a9   : > { %8552 = vmatmul.msk.f32.gmra.mxu3 %vm1454_vm1, %v15939_v42  ;;  %15940 = vst [vmem:[#allocation65_spill] sm:$0xff] %v13563_v41  ;;  %v5238_v34 = vsel %vm4544_vm6, %v4515_v24, 0.0  ;;  %v6706_v57 = vrot.slane %v6705_v43, 4  ;;  %v13569_v42 = vmax.f32 %v2160_v14, 0.0  ;;  %v13571_v59 = vadd.f32 %v3667_v61, %v3666_v17 }
 0x4aa   : > { %15941 = vst [vmem:[#allocation55_spill] sm:$0xff] %v13565_v31  ;;  %v5225_v33 = vrot.slane %v5224_v47, 4  ;;  %v5232_v63 = vrot.slane %v5231_v9, 4  ;;  %v5245_v49 = vsel %vm4544_vm6, %v4516_v62, 0.0  ;;  %v6702_v45 = vadd.f32 %v6701_v55, %v6700_v19 }
 0x4ab   : > { %v6707_v4 = vadd.f32 %v6706_v57, %v6705_v43  ;;  %v4517_v38 = vmul.f32 %v15942_v21, %v13569_v42  ;;  %v13577_v48 = vadd.f32 %v6624_v5, %v6623_v13  ;;  %v5218_v24 = vrot.slane %v5217_v36, 4 }
 0x4ac   : > { %v7254_v18 = vpop.permute.xlu1 %7253  ;;  %v5239_v60 = vrot.slane %v5238_v34, 4  ;;  %v2163_v17 = vadd.f32 %v13248_v44, %v13510_v25  ;;  %v6609_v61 = vadd.f32 %v6608_v51, %v6607_v7  ;;  %v5246_v14 = vrot.slane %v5245_v49, 4  ;;  %v13584_v21 = vpop.f32.mrf.mxu3  ;;  %v15943_v7 = vld [vmem:[#allocation165_spill] sm:$0xff]  ;;  %v15944_v51 = vld [vmem:[#allocation150_spill] sm:$0xff] }
 0x4ad   : > { %8563 = vmatmul.msk.f32.gmra.mxu2 %vm524_vm0, %v7254_v18  ;;  %v6708_v62 = vrot.slane %v6707_v4, 2  ;;  %v5252_v6 = vsel %vm4544_vm6, %v4517_v38, 0.0  ;;  %v5226_v55 = vadd.f32 %v5225_v33, %v5224_v47  ;;  %v5233_v43 = vadd.f32 %v5232_v63, %v5231_v9  ;;  %v13592_v38 = vpop.permute.xlu2 %5790  ;;  %v15946_v63 = vld [vmem:[#allocation197_spill] sm:$0xff] }
 0x4ae   : > { %v5253_v57 = vrot.slane %v5252_v6, 4  ;;  %v6703_v13 = vrot.slane %v6702_v45, 1  ;;  %v13586_v29 = vmax.f32 %v2163_v17, 0.0  ;;  %v2166_v25 = vadd.f32 %v13248_v44, %v2165_v46  ;;  %15945 = vst [vmem:[#allocation69_spill] sm:$0xff] %v13592_v38  ;;  %v15948_v17 = vld [vmem:[#allocation27_spill] sm:$0xff]  ;;  %v15953_v38 = vld [vmem:[#allocation73_spill] sm:$0xff] }
 0x4af   : > { %v6709_v5 = vadd.f32 %v6708_v62, %v6707_v4  ;;  %v6032_v32 = vmul.f32 %v15944_v51, %v15943_v7  ;;  %v5219_v37 = vadd.f32 %v5218_v24, %v5217_v36  ;;  %v5240_v19 = vadd.f32 %v5239_v60, %v5238_v34  ;;  %v15947_v4 = vld [vmem:[#allocation137_spill] sm:$0xff]  ;;  %v15950_v34 = vld [vmem:[#allocation246_spill] sm:$0xff] }
 0x4b0   : > { %v6610_v33 = vrot.slane %v6609_v61, 2  ;;  %v5247_v47 = vadd.f32 %v5246_v14, %v5245_v49  ;;  %v4518_v56 = vmul.f32 %v15946_v63, %v13586_v29  ;;  %v6031_v62 = vmul.f32 %v15948_v17, %v15947_v4  ;;  %v15951_v49 = vld [vmem:[#allocation18_spill] sm:$0xff]  ;;  %v15952_v63 = vld [vmem:[#allocation119_spill] sm:$0xff] }
 0x4b1   : > { %v6710_v9 = vrot.slane %v6709_v5, 1  ;;  %v5227_v16 = vrot.slane %v5226_v55, 2  ;;  %v5234_v46 = vrot.slane %v5233_v43, 2  ;;  %v5254_v2 = vadd.f32 %v5253_v57, %v5252_v6 }
 0x4b2   : > { %v6704_v18 = vadd.f32 %v6703_v13, %v6702_v45  ;;  %v5259_v7 = vsel %vm4544_vm6, %v4518_v56, 0.0  ;;  %v13599_v36 = vmax.f32 %v2166_v25, 0.0  ;;  %v6635_v60 = vsel %vm6081_vm10, %v6032_v32, 0.0 }
 0x4b3   : > { %v6711_v1 = vadd.f32 %v6710_v9, %v6709_v5  ;;  %v6029_v24 = vmul.f32 %v15951_v49, %v15950_v34  ;;  %v5220_v14 = vrot.slane %v5219_v37, 2  ;;  %v5241_v51 = vrot.slane %v5240_v19, 2  ;;  %v15954_v34 = vld [vmem:[#allocation195_spill] sm:$0xff] }
 0x4b4   : > { %15949 = vst [vmem:[#allocation25_spill] sm:$0xff] %v13599_v36  ;;  %v2975_v54 = vmul.f32 %v15953_v38, %v15952_v63  ;;  %v5248_v4 = vrot.slane %v5247_v47, 2  ;;  %v5260_v6 = vrot.slane %v5259_v7, 4  ;;  %v13609_v45 = vadd.f32 %v6610_v33, %v6609_v61  ;;  %v13612_v32 = vpop.f32.mrf.mxu3 }
 0x4b5   : > { %v13607_v17 = vsel %vm7114_vm2, %v6711_v1, %v6704_v18  ;;  %v6628_v56 = vsel %vm6081_vm10, %v6031_v62, 0.0  ;;  %v5228_v57 = vadd.f32 %v5227_v16, %v5226_v55  ;;  %v5255_v13 = vrot.slane %v5254_v2, 2  ;;  %v15955_v1 = vld [vmem:[#allocation87_spill] sm:$0xff]  ;;  %v15956_v55 = vld [vmem:[#allocation86_spill] sm:$0xff] }
 0x4b6   : > { %v6636_v5 = vrot.slane %v6635_v60, 4  ;;  %v5235_v25 = vadd.f32 %v5234_v46, %v5233_v43  ;;  %v5261_v9 = vadd.f32 %v5260_v6, %v5259_v7  ;;  %v4519_v49 = vmul.f32 %v15954_v34, %v13599_v36  ;;  %v5803_v46 = vpop.permute.xlu2 %5802 }
 0x4b7   : > { %v6614_v38 = vsel %vm6081_vm10, %v6029_v24, 0.0  ;;  %v2976_v18 = vmul.f32 %v15955_v1, %v13523_v11  ;;  %v5221_v50 = vadd.f32 %v5220_v14, %v5219_v37  ;;  %v5242_v61 = vadd.f32 %v5241_v51, %v5240_v19 }
 0x4b8   : > { %v6629_v33 = vrot.slane %v6628_v56, 4  ;;  %v5249_v23 = vadd.f32 %v5248_v4, %v5247_v47  ;;  %v5262_v62 = vrot.slane %v5261_v9, 2  ;;  %v5266_v16 = vsel %vm4544_vm6, %v4519_v49, 0.0  ;;  %v15957_v4 = vld [vmem:[#allocation76_spill] sm:$0xff] }
 0x4b9   : > { %v2977_v31 = vmul.f32 %v15956_v55, %v13506_v39  ;;  %v5229_v43 = vrot.slane %v5228_v57, 1  ;;  %v5256_v7 = vadd.f32 %v5255_v13, %v5254_v2  ;;  %v5267_v6 = vrot.slane %v5266_v16, 4 }
 0x4ba   : > { %v6637_v34 = vadd.f32 %v6636_v5, %v6635_v60  ;;  %v6615_v41 = vrot.slane %v6614_v38, 4  ;;  %v5236_v24 = vrot.slane %v5235_v25, 1  ;;  %v5263_v58 = vadd.f32 %v5262_v62, %v5261_v9 }
 0x4bb   : > { %v3680_v1 = vsel %vm524_vm0, %v2976_v18, 0.0  ;;  %v5222_v37 = vrot.slane %v5221_v50, 1  ;;  %v5243_v19 = vrot.slane %v5242_v61, 1  ;;  %v5268_v14 = vadd.f32 %v5267_v6, %v5266_v16 }
 0x4bc   : > { %v3673_v47 = vsel %vm524_vm0, %v2975_v54, 0.0  ;;  %v6630_v51 = vadd.f32 %v6629_v33, %v6628_v56  ;;  %v2978_v49 = vmul.f32 %v15957_v4, %v13519_v12  ;;  %v5250_v55 = vrot.slane %v5249_v23, 1  ;;  %v13627_v5 = vpop.f32.mrf.mxu3  ;;  %v15958_v4 = vld [vmem:[#allocation90_spill] sm:$0xff] }
 0x4bd   : > { %v3687_v10 = vsel %vm524_vm0, %v2977_v31, 0.0  ;;  %v5230_v2 = vadd.f32 %v5229_v43, %v5228_v57  ;;  %v5257_v13 = vrot.slane %v5256_v7, 1  ;;  %v5269_v60 = vrot.slane %v5268_v14, 2 }
 0x4be   : > { %v6638_v9 = vrot.slane %v6637_v34, 2  ;;  %v3681_v62 = vrot.slane %v3680_v1, 4  ;;  %v5237_v18 = vadd.f32 %v5236_v24, %v5235_v25  ;;  %v5264_v53 = vrot.slane %v5263_v58, 1 }
 0x4bf   : > { %v6616_v22 = vadd.f32 %v6615_v41, %v6614_v38  ;;  %v5223_v16 = vadd.f32 %v5222_v37, %v5221_v50  ;;  %v5244_v6 = vadd.f32 %v5243_v19, %v5242_v61  ;;  %v5270_v54 = vadd.f32 %v5269_v60, %v5268_v14  ;;  %v5815_v61 = vpop.permute.xlu2 %5814  ;;  %v5807_v37 = vpop.permute.xlu0 %5806 }
 0x4c0   : > { %v3688_v56 = vrot.slane %v3687_v10, 4  ;;  %v3694_v33 = vsel %vm524_vm0, %v2978_v49, 0.0  ;;  %v2979_v26 = vmul.f32 %v15958_v4, %v13525_v20  ;;  %v5251_v31 = vadd.f32 %v5250_v55, %v5249_v23 }
 0x4c1   : > { %v6043_v57 = vmul.f32 %v5803_v46, %v13282_v40  ;;  %v5258_v43 = vadd.f32 %v5257_v13, %v5256_v7  ;;  %v5271_v28 = vrot.slane %v5270_v54, 1  ;;  %v7205_v8 = vsel %vm7114_vm2, %v5230_v2, %v5223_v16 }
 0x4c2   : > { %v3674_v12 = vrot.slane %v3673_v47, 4  ;;  %v3682_v25 = vadd.f32 %v3681_v62, %v3680_v1  ;;  %v5265_v24 = vadd.f32 %v5264_v53, %v5263_v58  ;;  %v7206_v50 = vsel %vm7116_vm3, %v5237_v18, %v7205_v8 }
 0x4c3   : > { %v6631_v41 = vrot.slane %v6630_v51, 2  ;;  %v3695_v38 = vrot.slane %v3694_v33, 4  ;;  %v5272_v19 = vadd.f32 %v5271_v28, %v5270_v54  ;;  %v7207_v14 = vsel %vm7118_vm4, %v5244_v6, %v7206_v50 }
 0x4c4   : > { %v6639_v49 = vadd.f32 %v6638_v9, %v6637_v34  ;;  %v3689_v23 = vadd.f32 %v3688_v56, %v3687_v10  ;;  %v3701_v40 = vsel %vm524_vm0, %v2979_v26, 0.0  ;;  %v7208_v46 = vsel %vm7120_vm5, %v5251_v31, %v7207_v14  ;;  %v2177_v58 = vpop.f32.mrf.mxu3  ;;  %v6981_v26 = vld [vmem:[%s14806_s5 + $0x18] sm:$0xff]  ;;  %v15963_v31 = vld [vmem:[#allocation166_spill] sm:$0xff] }
 0x4c5   : > { %v6612_v7 = vrot.slane %v13609_v45, 1  ;;  %v6617_v55 = vrot.slane %v6616_v22, 2  ;;  %v6712_v53 = vsel %vm6081_vm10, %v6043_v57, 0.0  ;;  %v7209_v8 = vsel %vm7122_vm7, %v5258_v43, %v7208_v46  ;;  %7646 = vmatpush.msra.mxu3 %v6981_v26  ;;  %v15964_v57 = vld [vmem:[#allocation140_spill] sm:$0xff]  ;;  %v15967_v46 = vld [vmem:[#allocation49_spill] sm:$0xff] }
 0x4c6   : > { %v3683_v1 = vrot.slane %v3682_v25, 2  ;;  %v6046_v2 = vmul.f32 %v5815_v61, %v13302_v3  ;;  %v6044_v28 = vmul.f32 %v5807_v37, %v13289_v52  ;;  %v7210_v34 = vsel %vm7124_vm8, %v5265_v24, %v7209_v8 }
 0x4c7   : > { %v13647_v10 = vadd.f32 %v3674_v12, %v3673_v47  ;;  %v3696_v13 = vadd.f32 %v3695_v38, %v3694_v33  ;;  %v3702_v60 = vrot.slane %v3701_v40, 4  ;;  %v7211_v9 = vsel %vm7126_vm9, %v5272_v19, %v7210_v34  ;;  %v8955_v34 = vld [vmem:[%s9181_s12 + $0x2f8] sm:$0xff] }
 0x4c8   : > { %v6640_v62 = vrot.slane %v6639_v49, 1  ;;  %v6632_v18 = vadd.f32 %v6631_v41, %v6630_v51  ;;  %v3690_v16 = vrot.slane %v3689_v23, 2  ;;  %v6713_v6 = vrot.slane %v6712_v53, 4  ;;  %7257 = vrot.lane.b32.xlu2 %v7211_v9, %s9051_s26 }
 0x4c9   : > { %v15959_v52 = vrot.slane %v13571_v59, 2  ;;  %v15960_v12 = vrot.slane %v13577_v48, 1  ;;  %v13662_v54 = vadd.f32 %v6612_v7, %v13609_v45  ;;  %v6618_v56 = vadd.f32 %v6617_v55, %v6616_v22 }
 0x4ca   : > { %v3684_v33 = vadd.f32 %v3683_v1, %v3682_v25  ;;  %v6733_v51 = vsel %vm6081_vm10, %v6046_v2, 0.0  ;;  %v6719_v4 = vsel %vm6081_vm10, %v6044_v28, 0.0  ;;  %v7868_v43 = vsel %vm7118_vm4, %v15964_v57, %v15963_v31 }
 0x4cb   : > { %v13654_v3 = vadd.f32 %v15959_v52, %v13571_v59  ;;  %v13659_v47 = vadd.f32 %v15960_v12, %v13577_v48  ;;  %15962 = vst [vmem:[#allocation43_spill] sm:$0xff] %v13662_v54  ;;  %v3697_v24 = vrot.slane %v3696_v13, 2  ;;  %v3703_v50 = vadd.f32 %v3702_v60, %v3701_v40  ;;  %v15965_v48 = vld [vmem:[#allocation89_spill] sm:$0xff]  ;;  %v15968_v60 = vld [vmem:[#allocation154_spill] sm:$0xff]  ;;  %v6980_v12 = vld [vmem:[%s14806_s5 + $0x10] sm:$0xff] }
 0x4cc   : > { %v2980_v41 = vmul.f32 %v15965_v48, %v13532_v30  ;;  %v13672_v38 = vadd.f32 %v6640_v62, %v6639_v49  ;;  %v6633_v45 = vrot.slane %v6632_v18, 1  ;;  %v3691_v22 = vadd.f32 %v3690_v16, %v3689_v23  ;;  %v2180_v14 = vpop.f32.mrf.mxu3  ;;  %v13681_v49 = vld [vmem:[%s14805_s4] ss:$0 sm:$0xff]  ;;  %v5819_v16 = vpop.permute.xlu0 %5818  ;;  %7647 = vmatpush.msra.mxu3 %v6980_v12 }
 0x4cd   : > { %15961 = vst [vmem:[#allocation58_spill] sm:$0xff] %v13659_v47  ;;  %v6714_v25 = vadd.f32 %v6713_v6, %v6712_v53  ;;  %v6734_v61 = vrot.slane %v6733_v51, 4  ;;  %v6720_v37 = vrot.slane %v6719_v4, 4  ;;  %v2172_v19 = vadd.f32 %v13248_v44, %v13612_v32  ;;  %v15995_v47 = vld [vmem:[#allocation8_spill] sm:$0xff] }
 0x4ce   : > { %15966 = vst [vmem:[#allocation68_spill] sm:$0xff] %v13672_v38  ;;  %v7869_v7 = vsel %vm7120_vm5, %v15967_v46, %v7868_v43  ;;  %v6619_v55 = vrot.slane %v6618_v56, 1  ;;  %v3685_v40 = vrot.slane %v3684_v33, 1  ;;  %v2169_v23 = vadd.f32 %v13681_v49, %v13584_v21  ;;  %v15990_v38 = vld [vmem:[#allocation22_spill] sm:$0xff] }
 0x4cf   : > { %v2175_v53 = vadd.f32 %v13681_v49, %v13627_v5  ;;  %v3698_v8 = vadd.f32 %v3697_v24, %v3696_v13  ;;  %v3704_v1 = vrot.slane %v3703_v50, 2  ;;  %v3708_v44 = vsel %vm524_vm0, %v2980_v41, 0.0 }
 0x4d0   : > { %v2178_v32 = vadd.f32 %v13681_v49, %v2177_v58  ;;  %v3692_v2 = vrot.slane %v3691_v22, 1  ;;  %v6715_v28 = vrot.slane %v6714_v25, 2  ;;  %5822 = vperm.xlu2 %8692, %v8955_v34   ;;  %v2181_v26 = vadd.f32 %v13681_v49, %v2180_v14 }
 0x4d1   : > { %v7870_v9 = vsel %vm7122_vm7, %v15968_v60, %v7869_v7  ;;  %v6735_v62 = vadd.f32 %v6734_v61, %v6733_v51  ;;  %v6721_v21 = vadd.f32 %v6720_v37, %v6719_v4  ;;  %v13693_v6 = vmax.f32 %v2172_v19, 0.0  ;;  %v6979_v51 = vld [vmem:[%s14806_s5 + $0x8] sm:$0xff]  ;;  %v15972_v4 = vld [vmem:[#allocation52_spill] sm:$0xff]  ;;  %v6978_v19 = vld [vmem:[%s14806_s5] sm:$0xff] }
 0x4d2   : > { %v7871_v5 = vsel %vm7124_vm8, %v13366_v27, %v7870_v9  ;;  %v3709_v13 = vrot.slane %v3708_v44, 4  ;;  %v13697_v52 = vmax.f32 %v2169_v23, 0.0  ;;  %v13699_v58 = vmax.f32 %v2175_v53, 0.0  ;;  %7648 = vmatpush.msra.mxu3 %v6979_v51  ;;  %v15979_v23 = vld [vmem:[#allocation183_spill] sm:$0xff]  ;;  %v15983_v60 = vld [vmem:[#allocation36_spill] sm:$0xff] }
 0x4d3   : > { %15969 = vst [vmem:[#allocation37_spill] sm:$0xff] %v13693_v6  ;;  %v13709_v31 = vsel %vm7126_vm9, %v15972_v4, %v7871_v5  ;;  %v13711_v57 = vadd.f32 %v6633_v45, %v6632_v18  ;;  %v3699_v27 = vrot.slane %v3698_v8, 1  ;;  %v3705_v43 = vadd.f32 %v3704_v1, %v3703_v50  ;;  %v15977_v50 = vld [vmem:[#allocation198_spill] sm:$0xff] }
 0x4d4   : > { %15970 = vst [vmem:[#allocation72_spill] sm:$0xff] %v13697_v52  ;;  %v13713_v24 = vmax.f32 %v2178_v32, 0.0  ;;  %v13715_v48 = vadd.f32 %v6619_v55, %v6618_v56  ;;  %v6716_v41 = vadd.f32 %v6715_v28, %v6714_v25  ;;  %v6047_v61 = vmul.f32 %v5819_v16, %v13311_v15  ;;  %v2183_v56 = vpop.f32.mrf.mxu3  ;;  %v15978_v15 = vld [vmem:[#allocation249_spill] sm:$0xff]  ;;  %7649 = vmatpush.msra.mxu3 %v6978_v19  ;;  %v15982_v28 = vld [vmem:[#allocation79_spill] sm:$0xff] }
 0x4d5   : > { %15971 = vst [vmem:[#allocation211_spill] sm:$0xff] %v13699_v58  ;;  %v13718_v37 = vmax.f32 %v2181_v26, 0.0  ;;  %v13723_v14 = vadd.f32 %v3685_v40, %v3684_v33  ;;  %v13725_v18 = vadd.f32 %v3692_v2, %v3691_v22  ;;  %v6736_v45 = vrot.slane %v6735_v62, 2  ;;  %v15981_v22 = vld [vmem:[#allocation215_spill] sm:$0xff] }
 0x4d6   : > { %15973 = vst [vmem:[#allocation144_spill] sm:$0xff] %v13711_v57  ;;  %v4521_v46 = vmul.f32 %v15977_v50, %v13693_v6  ;;  %v3710_v25 = vadd.f32 %v3709_v13, %v3708_v44  ;;  %v6722_v7 = vrot.slane %v6721_v21, 2  ;;  %v4520_v55 = vmul.f32 %v15978_v15, %v13697_v52  ;;  %v8956_v26 = vld [vmem:[%s9181_s12 + $0x310] sm:$0xff] }
 0x4d7   : > { %15974 = vst [vmem:[#allocation50_spill] sm:$0xff] %v13713_v24  ;;  %v4522_v53 = vmul.f32 %v15979_v23, %v13699_v58  ;;  %v13733_v1 = vadd.f32 %v3699_v27, %v3698_v8  ;;  %v3706_v33 = vrot.slane %v3705_v43, 1  ;;  %v4523_v40 = vmul.f32 %v15981_v22, %v13713_v24  ;;  %v15984_v8 = vld [vmem:[#allocation208_spill] sm:$0xff] }
 0x4d8   : > { %15975 = vst [vmem:[#allocation71_spill] sm:$0xff] %v13715_v48  ;;  %v2184_v32 = vadd.f32 %v13681_v49, %v2183_v56  ;;  %v6717_v2 = vrot.slane %v6716_v41, 1  ;;  %v2981_v44 = vmul.f32 %v15982_v28, %v13569_v42  ;;  %v6740_v34 = vsel %vm6081_vm10, %v6047_v61, 0.0  ;;  %5834 = vperm.xlu2 %8692, %v8956_v26   ;;  %8569 = vmatmul.msk.f32.vlgmr.msra.gmra.mxu3 %vm524_vm0, %v15984_v8  ;;  %v8957_v8 = vld [vmem:[%s9181_s12 + $0x328] sm:$0xff]  ;;  %v8959_v48 = vld [vmem:[%s9181_s12 + $0x350] sm:$0xff] }
 0x4d9   : > { %15976 = vst [vmem:[#allocation175_spill] sm:$0xff] %v13718_v37  ;;  %v4524_v9 = vmul.f32 %v15983_v60, %v13718_v37  ;;  %v6737_v16 = vadd.f32 %v6736_v45, %v6735_v62  ;;  %v6045_v5 = vmul.f32 %v13481_v35, %v13296_v0  ;;  %v5280_v13 = vsel %vm4544_vm6, %v4521_v46, 0.0  ;;  %v15987_v62 = vld [vmem:[#allocation148_spill] sm:$0xff]  ;;  %v5831_v35 = vpop.permute.xlu1 %5830 }
 0x4da   : > { %15980 = vst [vmem:[#allocation61_spill] sm:$0xff] %v13733_v1  ;;  %v13749_v12 = vmax.f32 %v2184_v32, 0.0  ;;  %v3711_v51 = vrot.slane %v3710_v25, 2  ;;  %v6723_v4 = vadd.f32 %v6722_v7, %v6721_v21  ;;  %v5273_v27 = vsel %vm4544_vm6, %v4520_v55, 0.0 }
 0x4db   : > { %v5287_v61 = vsel %vm4544_vm6, %v4522_v53, 0.0  ;;  %v13753_v19 = vadd.f32 %v3706_v33, %v3705_v43  ;;  %v6741_v50 = vrot.slane %v6740_v34, 4  ;;  %v5294_v56 = vsel %vm4544_vm6, %v4523_v40, 0.0 }
 0x4dc   : > { %15985 = vst [vmem:[#allocation12_spill] sm:$0xff] %v13749_v12  ;;  %v4525_v45 = vmul.f32 %v15987_v62, %v13749_v12  ;;  %v13758_v15 = vadd.f32 %v6717_v2, %v6716_v41  ;;  %v3715_v0 = vsel %vm524_vm0, %v2981_v44, 0.0  ;;  %v5281_v46 = vrot.slane %v5280_v13, 4  ;;  %v2186_v53 = vpop.f32.mrf.mxu3  ;;  %v15988_v62 = vld [vmem:[#allocation93_spill] sm:$0xff] }
 0x4dd   : > { %15986 = vst [vmem:[#allocation75_spill] sm:$0xff] %v13753_v19  ;;  %v5301_v21 = vsel %vm4544_vm6, %v4524_v9, 0.0  ;;  %v6726_v7 = vsel %vm6081_vm10, %v6045_v5, 0.0  ;;  %v5274_v55 = vrot.slane %v5273_v27, 4  ;;  %v5288_v43 = vrot.slane %v5287_v61, 4 }
 0x4de   : > { %v5308_v23 = vsel %vm4544_vm6, %v4525_v45, 0.0  ;;  %v13764_v33 = vadd.f32 %v3711_v51, %v3710_v25  ;;  %v6738_v22 = vrot.slane %v6737_v16, 1  ;;  %v6724_v40 = vrot.slane %v6723_v4, 1 }
 0x4df   : > { %v5295_v41 = vrot.slane %v5294_v56, 4  ;;  %v6742_v32 = vadd.f32 %v6741_v50, %v6740_v34  ;;  %v6050_v2 = vmul.f32 %v5831_v35, %v13506_v39  ;;  %v5302_v28 = vrot.slane %v5301_v21, 4 }
 0x4e0   : > { %v2187_v44 = vadd.f32 %v13681_v49, %v2186_v53  ;;  %v3716_v26 = vrot.slane %v3715_v0, 4  ;;  %v6727_v60 = vrot.slane %v6726_v7, 4  ;;  %v5282_v9 = vadd.f32 %v5281_v46, %v5280_v13  ;;  %5846 = vperm.xlu2 %8692, %v8957_v8   ;;  %8570 = vmatmul.msk.f32.gmra.mxu3 %vm524_vm0, %v15990_v38  ;;  %v15991_v8 = vld [vmem:[#allocation33_spill] sm:$0xff] }
 0x4e1   : > { %v5309_v5 = vrot.slane %v5308_v23, 4  ;;  %v2982_v45 = vmul.f32 %v15988_v62, %v13586_v29  ;;  %v5275_v25 = vadd.f32 %v5274_v55, %v5273_v27  ;;  %v5289_v51 = vadd.f32 %v5288_v43, %v5287_v61 }
 0x4e2   : > { %v13771_v59 = vmax.f32 %v2187_v44, 0.0  ;;  %v13776_v34 = vadd.f32 %v6738_v22, %v6737_v16  ;;  %v13778_v50 = vadd.f32 %v6724_v40, %v6723_v4  ;;  %v5296_v13 = vadd.f32 %v5295_v41, %v5294_v56  ;;  %v15992_v40 = vld [vmem:[#allocation82_spill] sm:$0xff] }
 0x4e3   : > { %v6743_v35 = vrot.slane %v6742_v32, 2  ;;  %v6761_v46 = vsel %vm6081_vm10, %v6050_v2, 0.0  ;;  %v5303_v53 = vadd.f32 %v5302_v28, %v5301_v21  ;;  %v13783_v61 = vadd.f32 %v3716_v26, %v3715_v0  ;;  %v15993_v0 = vld [vmem:[#allocation92_spill] sm:$0xff] }
 0x4e4   : > { %15989 = vst [vmem:[#allocation120_spill] sm:$0xff] %v13771_v59  ;;  %v4526_v27 = vmul.f32 %v15991_v8, %v13771_v59  ;;  %v6728_v55 = vadd.f32 %v6727_v60, %v6726_v7  ;;  %v5283_v43 = vrot.slane %v5282_v9, 2  ;;  %v5310_v44 = vadd.f32 %v5309_v5, %v5308_v23  ;;  %v2189_v56 = vpop.f32.mrf.mxu3  ;;  %v8958_v8 = vld [vmem:[%s9181_s12 + $0x338] sm:$0xff] }
 0x4e5   : > { %v3722_v38 = vsel %vm524_vm0, %v2982_v45, 0.0  ;;  %v5276_v16 = vrot.slane %v5275_v25, 2  ;;  %v5290_v22 = vrot.slane %v5289_v51, 2  ;;  %v2984_v41 = vmul.f32 %v15992_v40, %v13697_v52 }
 0x4e6   : > { %v5315_v4 = vsel %vm4544_vm6, %v4526_v27, 0.0  ;;  %v6762_v21 = vrot.slane %v6761_v46, 4  ;;  %v5297_v2 = vrot.slane %v5296_v13, 2  ;;  %v13789_v62 = vadd.f32 %v6743_v35, %v6742_v32 }
 0x4e7   : > { %v5316_v28 = vrot.slane %v5315_v4, 4  ;;  %v2983_v7 = vmul.f32 %v15993_v0, %v13599_v36  ;;  %v5304_v23 = vrot.slane %v5303_v53, 2  ;;  %v2190_v26 = vadd.f32 %v13681_v49, %v2189_v56  ;;  %v16000_v36 = vld [vmem:[#allocation95_spill] sm:$0xff] }
 0x4e8   : > { %v6729_v60 = vrot.slane %v6728_v55, 2  ;;  %v5284_v5 = vadd.f32 %v5283_v43, %v5282_v9  ;;  %v5311_v45 = vrot.slane %v5310_v44, 2  ;;  %5854 = vperm.xlu2 %8692, %v8958_v8   ;;  %v3723_v39 = vrot.slane %v3722_v38, 4  ;;  %8571 = vmatmul.msk.f32.gmra.mxu3 %vm524_vm0, %v15995_v47  ;;  %v15996_v8 = vld [vmem:[#allocation234_spill] sm:$0xff] }
 0x4e9   : > { %v5317_v27 = vadd.f32 %v5316_v28, %v5315_v4  ;;  %v5277_v57 = vadd.f32 %v5276_v16, %v5275_v25  ;;  %v5291_v40 = vadd.f32 %v5290_v22, %v5289_v51  ;;  %v13795_v52 = vmax.f32 %v2190_v26, 0.0  ;;  %v15997_v28 = vld [vmem:[#allocation127_spill] sm:$0xff] }
 0x4ea   : > { %v3736_v35 = vsel %vm524_vm0, %v2984_v41, 0.0  ;;  %v13801_v0 = vadd.f32 %v6762_v21, %v6761_v46  ;;  %v5298_v56 = vadd.f32 %v5297_v2, %v5296_v13  ;;  %v5305_v9 = vadd.f32 %v5304_v23, %v5303_v53  ;;  %v5843_v13 = vpop.permute.xlu1 %5842 }
 0x4eb   : > { %15994 = vst [vmem:[#allocation199_spill] sm:$0xff] %v13795_v52  ;;  %v5318_v43 = vrot.slane %v5317_v27, 2  ;;  %v4527_v4 = vmul.f32 %v15996_v8, %v13795_v52  ;;  %v15998_v25 = vrot.slane %v15997_v28, 2  ;;  %v13808_v16 = vadd.f32 %v6729_v60, %v6728_v55  ;;  %v15999_v8 = vld [vmem:[#allocation96_spill] sm:$0xff] }
 0x4ec   : > { %v13811_v47 = vsel %vm524_vm0, %v2983_v7, 0.0  ;;  %v5285_v22 = vrot.slane %v5284_v5, 1  ;;  %v5312_v26 = vadd.f32 %v5311_v45, %v5310_v44  ;;  %v13813_v41 = vadd.f32 %v3723_v39, %v3722_v38  ;;  %v2192_v2 = vpop.f32.mrf.mxu3 }
 0x4ed   : > { %v3285_v51 = vadd.f32 %v15998_v25, %v15997_v28  ;;  %v5278_v46 = vrot.slane %v5277_v57, 1  ;;  %v5292_v53 = vrot.slane %v5291_v40, 1  ;;  %v5322_v21 = vsel %vm4544_vm6, %v4527_v4, 0.0 }
 0x4ee   : > { %v3737_v23 = vrot.slane %v3736_v35, 4  ;;  %v2985_v28 = vmul.f32 %v15999_v8, %v13693_v6  ;;  %v5299_v55 = vrot.slane %v5298_v56, 1  ;;  %v5323_v60 = vrot.slane %v5322_v21, 4  ;;  %v16001_v8 = vld [vmem:[#allocation51_spill] sm:$0xff]  ;;  %v16002_v6 = vld [vmem:[#allocation250_spill] sm:$0xff] }
 0x4ef   : > { %v5306_v25 = vrot.slane %v5305_v9, 1  ;;  %v5319_v32 = vadd.f32 %v5318_v43, %v5317_v27  ;;  %v3286_v44 = vrot.slane %v3285_v51, 1  ;;  %v5286_v39 = vadd.f32 %v5285_v22, %v5284_v5  ;;  %v16004_v5 = vld [vmem:[#allocation85_spill] sm:$0xff] }
 0x4f0   : > { %v6053_v38 = vmul.f32 %v5843_v13, %v13532_v30  ;;  %v5313_v45 = vrot.slane %v5312_v26, 1  ;;  %5866 = vperm.xlu2 %8692, %v8959_v48   ;;  %v5324_v54 = vadd.f32 %v5323_v60, %v5322_v21  ;;  %v5279_v4 = vadd.f32 %v5278_v46, %v5277_v57  ;;  %8572 = vmatmul.msk.f32.gmra.mxu3 %vm524_vm0, %v16001_v8  ;;  %v16005_v13 = vld [vmem:[#allocation233_spill] sm:$0xff]  ;;  %v16006_v48 = vld [vmem:[#allocation238_spill] sm:$0xff] }
 0x4f1   : > { %v2986_v19 = vmul.f32 %v16000_v36, %v13699_v58  ;;  %v5293_v1 = vadd.f32 %v5292_v53, %v5291_v40  ;;  %v16003_v7 = vrot.slane %v16002_v6, 1  ;;  %v2987_v43 = vmul.f32 %v16004_v5, %v13713_v24  ;;  %v16007_v40 = vld [vmem:[#allocation240_spill] sm:$0xff] }
 0x4f2   : > { %v5300_v30 = vadd.f32 %v5299_v55, %v5298_v56  ;;  %v5325_v22 = vrot.slane %v5324_v54, 2  ;;  %v7518_v57 = vsel %vm7114_vm2, %v16006_v48, %v16005_v13  ;;  %v5307_v46 = vadd.f32 %v5306_v25, %v5305_v9  ;;  %v16009_v9 = vld [vmem:[#allocation192_spill] sm:$0xff] }
 0x4f3   : > { %v3280_v27 = vadd.f32 %v16003_v7, %v16002_v6  ;;  %v5320_v21 = vrot.slane %v5319_v32, 1  ;;  %v3287_v36 = vadd.f32 %v3286_v44, %v3285_v51  ;;  %v7519_v53 = vsel %vm7116_vm3, %v16007_v40, %v7518_v57  ;;  %v16008_v6 = vld [vmem:[#allocation243_spill] sm:$0xff] }
 0x4f4   : > { %v5314_v60 = vadd.f32 %v5313_v45, %v5312_v26  ;;  %v5326_v8 = vadd.f32 %v5325_v22, %v5324_v54  ;;  %v7212_v58 = vsel %vm7114_vm2, %v5286_v39, %v5279_v4  ;;  %v7520_v7 = vsel %vm7118_vm4, %v16008_v6, %v7519_v53  ;;  %v2195_v55 = vpop.f32.mrf.mxu3  ;;  %v16010_v26 = vld [vmem:[#allocation138_spill] sm:$0xff] }
 0x4f5   : > { %v3743_v56 = vsel %vm524_vm0, %v2985_v28, 0.0  ;;  %v5321_v5 = vadd.f32 %v5320_v21, %v5319_v32  ;;  %v7213_v13 = vsel %vm7116_vm3, %v5293_v1, %v7212_v58  ;;  %v7521_v51 = vsel %vm7120_vm5, %v16009_v9, %v7520_v7  ;;  %v8960_v1 = vld [vmem:[%s9181_s12 + $0x368] sm:$0xff] }
 0x4f6   : > { %v6782_v25 = vsel %vm6081_vm10, %v6053_v38, 0.0  ;;  %v5327_v44 = vrot.slane %v5326_v8, 1  ;;  %v7214_v54 = vsel %vm7118_vm4, %v5300_v30, %v7213_v13  ;;  %v7522_v39 = vsel %vm7122_vm7, %v16010_v26, %v7521_v51 }
 0x4f7   : > { %v3738_v45 = vadd.f32 %v3737_v23, %v3736_v35  ;;  %v3750_v4 = vsel %vm524_vm0, %v2986_v19, 0.0  ;;  %v7215_v28 = vsel %vm7120_vm5, %v5307_v46, %v7214_v54  ;;  %v7523_v32 = vsel %vm7124_vm8, %v3280_v27, %v7522_v39  ;;  %v16012_v27 = vld [vmem:[#allocation99_spill] sm:$0xff] }
 0x4f8   : > { %v3757_v58 = vsel %vm524_vm0, %v2987_v43, 0.0  ;;  %5878 = vperm.xlu2 %8692, %v8960_v1   ;;  %v5328_v22 = vadd.f32 %v5327_v44, %v5326_v8  ;;  %v7216_v38 = vsel %vm7122_vm7, %v5314_v60, %v7215_v28  ;;  %v7524_v48 = vsel %vm7126_vm9, %v3287_v36, %v7523_v32  ;;  %v16015_v28 = vld [vmem:[#allocation98_spill] sm:$0xff] }
 0x4f9   : > { %v6745_v30 = vrot.slane %v13789_v62, 1  ;;  %v3744_v57 = vrot.slane %v3743_v56, 4  ;;  %v6783_v21 = vrot.slane %v6782_v25, 4  ;;  %v7217_v35 = vsel %vm7124_vm8, %v5321_v5, %v7216_v38  ;;  %8573 = vmatmul.msk.f32.gmra.mxu3 %vm524_vm0, %v7524_v48 }
 0x4fa   : > { %v16011_v19 = vrot.slane %v13764_v33, 1  ;;  %v2988_v43 = vmul.f32 %v16012_v27, %v13718_v37  ;;  %v2193_v46 = vadd.f32 %v13681_v49, %v2192_v2  ;;  %v7218_v36 = vsel %vm7126_vm9, %v5328_v22, %v7217_v35  ;;  %v16017_v35 = vld [vmem:[#allocation115_spill] sm:$0xff]  ;;  %v16020_v27 = vld [vmem:[#allocation205_spill] sm:$0xff]  ;;  %v16047_v37 = vld [vmem:[#allocation42_spill] sm:$0xff] }
 0x4fb   : > { %v16013_v40 = vrot.slane %v13783_v61, 2  ;;  %v3730_v60 = vrot.slane %v13811_v47, 4  ;;  %v3751_v8 = vrot.slane %v3750_v4, 4  ;;  %v3758_v6 = vrot.slane %v3757_v58, 4  ;;  %7259 = vrot.lane.b32.xlu1 %v7218_v36, %s9051_s26  ;;  %v16022_v36 = vld [vmem:[#allocation35_spill] sm:$0xff] }
 0x4fc   : > { %v13859_v23 = vadd.f32 %v16011_v19, %v13764_v33  ;;  %v7256_v7 = vpop.permute.xlu0 %7255  ;;  %v6731_v33 = vrot.slane %v13808_v16, 1  ;;  %v3725_v5 = vrot.slane %v13813_v41, 2  ;;  %v3739_v13 = vrot.slane %v3738_v45, 2  ;;  %v2198_v26 = vpop.f32.mrf.mxu3 }
 0x4fd   : > { %v13868_v53 = vadd.f32 %v16013_v40, %v13783_v61  ;;  %v16014_v2 = vrot.slane %v13801_v0, 2  ;;  %8564 = vmatmul.msk.f32.gmra.mxu2 %vm524_vm0, %v7256_v7  ;;  %v13883_v61 = vsel %vm7116_vm3, %v13758_v15, %v13607_v17  ;;  %v13886_v51 = vadd.f32 %v6745_v30, %v13789_v62  ;;  %v8961_v30 = vld [vmem:[%s9181_s12 + $0x378] sm:$0xff] }
 0x4fe   : > { %v3745_v44 = vadd.f32 %v3744_v57, %v3743_v56  ;;  %v6784_v54 = vadd.f32 %v6783_v21, %v6782_v25  ;;  %v3764_v39 = vsel %vm524_vm0, %v2988_v43, 0.0  ;;  %v13891_v32 = vmax.f32 %v2193_v46, 0.0 }
 0x4ff   : > { %v13877_v9 = vadd.f32 %v16014_v2, %v13801_v0  ;;  %v2989_v0 = vmul.f32 %v16015_v28, %v13749_v12  ;;  %v2196_v1 = vadd.f32 %v13681_v49, %v2195_v55  ;;  %v13896_v17 = vadd.f32 %v3730_v60, %v13811_v47  ;;  %v16027_v28 = vld [vmem:[#allocation141_spill] sm:$0xff] }
 0x500   : > { %16016 = vst [vmem:[#allocation219_spill] sm:$0xff] %v13891_v32  ;;  %v3752_v15 = vadd.f32 %v3751_v8, %v3750_v4  ;;  %v3759_v62 = vadd.f32 %v3758_v6, %v3757_v58  ;;  %v13899_v56 = vadd.f32 %v6731_v33, %v13808_v16  ;;  %v13902_v25 = vadd.f32 %v3725_v5, %v13813_v41  ;;  %v16018_v4 = vld [vmem:[#allocation191_spill] sm:$0xff]  ;;  %v16024_v8 = vld [vmem:[#allocation193_spill] sm:$0xff] }
 0x501   : > { %v3740_v38 = vadd.f32 %v3739_v13, %v3738_v45  ;;  %v6766_v48 = vrot.slane %v13877_v9, 1  ;;  %5886 = vperm.xlu2 %8692, %v8961_v30   ;;  %v3746_v57 = vrot.slane %v3745_v44, 2  ;;  %v6785_v55 = vrot.slane %v6784_v54, 2  ;;  %v16025_v6 = vld [vmem:[#allocation147_spill] sm:$0xff]  ;;  %v16026_v33 = vld [vmem:[#allocation101_spill] sm:$0xff] }
 0x502   : > { %v3765_v21 = vrot.slane %v3764_v39, 4  ;;  %v3335_v19 = vrot.slane %v16017_v35, 1  ;;  %v3771_v47 = vsel %vm524_vm0, %v2989_v0, 0.0  ;;  %v4528_v58 = vmul.f32 %v16018_v4, %v13891_v32 }
 0x503   : > { %v13910_v16 = vmax.f32 %v2196_v1, 0.0  ;;  %v16021_v41 = vrot.slane %v16020_v27, 2  ;;  %v3753_v43 = vrot.slane %v3752_v15, 2  ;;  %v3760_v46 = vrot.slane %v3759_v62, 2  ;;  %7953 = vrot.lane.b32.xlu1 %v13709_v31, %s9052_s13 }
 0x504   : > { %v16023_v40 = vrot.slane %v16022_v36, 1  ;;  %v7525_v7 = vsel %vm7114_vm2, %v16025_v6, %v16024_v8  ;;  %v2992_v5 = vmul.f32 %v16026_v33, %v13891_v32  ;;  %v3336_v13 = vadd.f32 %v3335_v19, %v16017_v35  ;;  %v13928_v4 = vpop.f32.mrf.mxu3  ;;  %v16030_v35 = vld [vmem:[#allocation232_spill] sm:$0xff] }
 0x505   : > { %16019 = vst [vmem:[#allocation32_spill] sm:$0xff] %v13910_v16  ;;  %v3341_v45 = vadd.f32 %v16021_v41, %v16020_v27  ;;  %v7526_v0 = vsel %vm7116_vm3, %v16027_v28, %v7525_v7  ;;  %v3747_v1 = vadd.f32 %v3746_v57, %v3745_v44  ;;  %v3766_v31 = vadd.f32 %v3765_v21, %v3764_v39  ;;  %v16028_v27 = vld [vmem:[#allocation203_spill] sm:$0xff]  ;;  %v16031_v44 = vld [vmem:[#allocation88_spill] sm:$0xff] }
 0x506   : > { %v3329_v60 = vadd.f32 %v16023_v40, %v16022_v36  ;;  %v3772_v30 = vrot.slane %v3771_v47, 4  ;;  %v7527_v41 = vsel %vm7118_vm4, %v16028_v27, %v7526_v0  ;;  %v5329_v36 = vsel %vm4544_vm6, %v4528_v58, 0.0  ;;  %v16029_v40 = vld [vmem:[#allocation111_spill] sm:$0xff]  ;;  %v16046_v32 = vld [vmem:[#allocation28_spill] sm:$0xff] }
 0x507   : > { %v3342_v2 = vrot.slane %v3341_v45, 1  ;;  %v4529_v8 = vmul.f32 %v16029_v40, %v13910_v16  ;;  %v7528_v19 = vsel %vm7120_vm5, %v16030_v35, %v7527_v41  ;;  %v6786_v33 = vadd.f32 %v6785_v55, %v6784_v54  ;;  %v8962_v0 = vld [vmem:[%s9181_s12 + $0x390] sm:$0xff] }
 0x508   : > { %v3754_v7 = vadd.f32 %v3753_v43, %v3752_v15  ;;  %v2990_v39 = vmul.f32 %v16031_v44, %v13771_v59  ;;  %v7529_v57 = vsel %vm7122_vm7, %v3329_v60, %v7528_v19  ;;  %v3761_v21 = vadd.f32 %v3760_v46, %v3759_v62 }
 0x509   : > { %v3343_v6 = vadd.f32 %v3342_v2, %v3341_v45  ;;  %v3792_v28 = vsel %vm524_vm0, %v2992_v5, 0.0  ;;  %5898 = vperm.xlu2 %8692, %v8962_v0   ;;  %v2199_v58 = vadd.f32 %v13681_v49, %v2198_v26  ;;  %v7530_v27 = vsel %vm7124_vm8, %v3336_v13, %v7529_v57  ;;  %v16032_v26 = vld [vmem:[#allocation91_spill] sm:$0xff]  ;;  %v16034_v57 = vld [vmem:[#allocation212_spill] sm:$0xff] }
 0x50a   : > { %v3767_v2 = vrot.slane %v3766_v31, 2  ;;  %v5330_v41 = vrot.slane %v5329_v36, 4  ;;  %v3741_v15 = vrot.slane %v3740_v38, 1  ;;  %v3748_v55 = vrot.slane %v3747_v1, 1 }
 0x50b   : > { %v7531_v54 = vsel %vm7126_vm9, %v3343_v6, %v7530_v27  ;;  %v3773_v43 = vadd.f32 %v3772_v30, %v3771_v47  ;;  %v5336_v60 = vsel %vm4544_vm6, %v4529_v8, 0.0  ;;  %v6787_v62 = vrot.slane %v6786_v33, 1 }
 0x50c   : > { %8574 = vmatmul.msk.f32.gmra.mxu3 %vm524_vm0, %v7531_v54  ;;  %v3778_v46 = vsel %vm524_vm0, %v2990_v39, 0.0  ;;  %v3793_v5 = vrot.slane %v3792_v28, 4  ;;  %v2993_v13 = vmul.f32 %v16032_v26, %v13910_v16  ;;  %v13952_v40 = vadd.f32 %v6766_v48, %v13877_v9  ;;  %v2204_v8 = vpop.f32.mrf.mxu3 }
 0x50d   : > { %v3755_v35 = vrot.slane %v3754_v7, 1  ;;  %v3762_v19 = vrot.slane %v3761_v21, 1  ;;  %v13954_v6 = vmax.f32 %v2199_v58, 0.0  ;;  %v3768_v44 = vadd.f32 %v3767_v2, %v3766_v31  ;;  %v16038_v58 = vld [vmem:[#allocation102_spill] sm:$0xff] }
 0x50e   : > { %v5331_v47 = vadd.f32 %v5330_v41, %v5329_v36  ;;  %v5337_v30 = vrot.slane %v5336_v60, 4  ;;  %v16035_v0 = vrot.slane %v16034_v57, 2  ;;  %v13959_v27 = vadd.f32 %v3741_v15, %v3740_v38  ;;  %v8963_v15 = vld [vmem:[%s9181_s12 + $0x3a8] sm:$0xff] }
 0x50f   : > { %16033 = vst [vmem:[#allocation74_spill] sm:$0xff] %v13954_v6  ;;  %v13961_v54 = vadd.f32 %v3748_v55, %v3747_v1  ;;  %v3774_v26 = vrot.slane %v3773_v43, 2  ;;  %v3779_v9 = vrot.slane %v3778_v46, 4  ;;  %v13963_v48 = vadd.f32 %v6787_v62, %v6786_v33  ;;  %v16042_v1 = vld [vmem:[#allocation44_spill] sm:$0xff]  ;;  %v5827_v62 = vpop.permute.xlu0 %5826 }
 0x510   : > { %v3397_v39 = vadd.f32 %v16035_v0, %v16034_v57  ;;  %v2991_v22 = vmul.f32 %v16038_v58, %v13795_v52  ;;  %v3794_v31 = vadd.f32 %v3793_v5, %v3792_v28  ;;  %v3799_v36 = vsel %vm524_vm0, %v2993_v13, 0.0  ;;  %v16041_v57 = vld [vmem:[#allocation105_spill] sm:$0xff]  ;;  %v16049_v52 = vld [vmem:[#allocation202_spill] sm:$0xff] }
 0x511   : > { %16036 = vst [vmem:[#allocation145_spill] sm:$0xff] %v13961_v54  ;;  %v13968_v2 = vadd.f32 %v3755_v35, %v3754_v7  ;;  %v13970_v41 = vadd.f32 %v3762_v19, %v3761_v21  ;;  %v2994_v38 = vmul.f32 %v16041_v57, %v13954_v6  ;;  %5910 = vperm.xlu2 %8692, %v8963_v15   ;;  %v3391_v55 = vrot.slane %v16042_v1, 1  ;;  %v16043_v7 = vld [vmem:[#allocation206_spill] sm:$0xff]  ;;  %v16044_v19 = vld [vmem:[#allocation31_spill] sm:$0xff] }
 0x512   : > { %16037 = vst [vmem:[#allocation60_spill] sm:$0xff] %v13963_v48  ;;  %v3769_v0 = vrot.slane %v3768_v44, 1  ;;  %v5332_v33 = vrot.slane %v5331_v47, 2  ;;  %v5338_v45 = vadd.f32 %v5337_v30, %v5336_v60  ;;  %v3398_v16 = vrot.slane %v3397_v39, 1  ;;  %v16048_v30 = vld [vmem:[#allocation41_spill] sm:$0xff]  ;;  %v16090_v54 = vld [vmem:[#allocation179_spill] sm:$0xff] }
 0x513   : > { %16039 = vst [vmem:[#allocation38_spill] sm:$0xff] %v13968_v2  ;;  %v13976_v58 = vadd.f32 %v3774_v26, %v3773_v43  ;;  %v3780_v28 = vadd.f32 %v3779_v9, %v3778_v46  ;;  %v3800_v5 = vrot.slane %v3799_v36, 4  ;;  %v4530_v21 = vmul.f32 %v16043_v7, %v13954_v6 }
 0x514   : > { %16040 = vst [vmem:[#allocation48_spill] sm:$0xff] %v13970_v41  ;;  %v3785_v13 = vsel %vm524_vm0, %v2991_v22, 0.0  ;;  %v3795_v35 = vrot.slane %v3794_v31, 2  ;;  %v16045_v57 = vrot.slane %v16044_v19, 1  ;;  %v7532_v59 = vsel %vm7114_vm2, %v16047_v37, %v16046_v32  ;;  %v2207_v7 = vpop.f32.mrf.mxu3  ;;  %v16050_v32 = vld [vmem:[#allocation210_spill] sm:$0xff] }
 0x515   : > { %v6049_v60 = vmul.f32 %v5827_v62, %v13523_v11  ;;  %v3806_v43 = vsel %vm524_vm0, %v2994_v38, 0.0  ;;  %v3392_v46 = vadd.f32 %v3391_v55, %v16042_v1  ;;  %v7533_v26 = vsel %vm7116_vm3, %v16048_v30, %v7532_v59 }
 0x516   : > { %v3385_v15 = vadd.f32 %v16045_v57, %v16044_v19  ;;  %v5333_v22 = vadd.f32 %v5332_v33, %v5331_v47  ;;  %v5339_v9 = vrot.slane %v5338_v45, 2  ;;  %v3399_v6 = vadd.f32 %v3398_v16, %v3397_v39  ;;  %v8964_v39 = vld [vmem:[%s9181_s12 + $0x3b8] sm:$0xff] }
 0x517   : > { %v7534_v19 = vsel %vm7118_vm4, %v16049_v52, %v7533_v26  ;;  %v3801_v57 = vadd.f32 %v3800_v5, %v3799_v36  ;;  %v5343_v37 = vsel %vm4544_vm6, %v4530_v21, 0.0  ;;  %v2202_v11 = vadd.f32 %v13681_v49, %v13928_v4 }
 0x518   : > { %v7535_v38 = vsel %vm7120_vm5, %v16050_v32, %v7534_v19  ;;  %v3781_v1 = vrot.slane %v3780_v28, 2  ;;  %v3807_v55 = vrot.slane %v3806_v43, 4  ;;  %v2205_v59 = vadd.f32 %v13681_v49, %v2204_v8 }
 0x519   : > { %v7536_v47 = vsel %vm7122_vm7, %v3385_v15, %v7535_v38  ;;  %v3786_v33 = vrot.slane %v3785_v13, 4  ;;  %v6754_v16 = vsel %vm6081_vm10, %v6049_v60, 0.0  ;;  %5918 = vperm.xlu2 %8692, %v8964_v39   ;;  %v2208_v52 = vadd.f32 %v13681_v49, %v2207_v7  ;;  %v16054_v7 = vld [vmem:[#allocation226_spill] sm:$0xff]  ;;  %v16056_v38 = vld [vmem:[#allocation217_spill] sm:$0xff] }
 0x51a   : > { %v7537_v36 = vsel %vm7124_vm8, %v3392_v46, %v7536_v47  ;;  %v14005_v62 = vadd.f32 %v3795_v35, %v3794_v31  ;;  %v5340_v4 = vadd.f32 %v5339_v9, %v5338_v45  ;;  %v5344_v5 = vrot.slane %v5343_v37, 4  ;;  %v16057_v47 = vld [vmem:[#allocation14_spill] sm:$0xff]  ;;  %v16064_v45 = vld [vmem:[#allocation19_spill] sm:$0xff] }
 0x51b   : > { %v7538_v21 = vsel %vm7126_vm9, %v3399_v6, %v7537_v36  ;;  %v14008_v30 = vadd.f32 %v3769_v0, %v3768_v44  ;;  %v5334_v8 = vrot.slane %v5333_v22, 1  ;;  %v3802_v26 = vrot.slane %v3801_v57, 2  ;;  %v16065_v0 = vld [vmem:[#allocation24_spill] sm:$0xff] }
 0x51c   : > { %v14010_v15 = vmax.f32 %v2202_v11, 0.0  ;;  %8575 = vmatmul.msk.f32.gmra.mxu3 %vm524_vm0, %v7538_v21  ;;  %v6755_v60 = vrot.slane %v6754_v16, 4  ;;  %v3808_v19 = vadd.f32 %v3807_v55, %v3806_v43  ;;  %v14013_v32 = vmax.f32 %v2205_v59, 0.0  ;;  %v2210_v43 = vpop.f32.mrf.mxu3 }
 0x51d   : > { %16051 = vst [vmem:[#allocation157_spill] sm:$0xff] %v14008_v30  ;;  %v16055_v31 = vrot.slane %v16054_v7, 2  ;;  %v14019_v46 = vadd.f32 %v3781_v1, %v3780_v28  ;;  %v14021_v6 = vadd.f32 %v3786_v33, %v3785_v13  ;;  %v14023_v44 = vmax.f32 %v2208_v52, 0.0  ;;  %v16058_v52 = vld [vmem:[#allocation201_spill] sm:$0xff] }
 0x51e   : > { %16052 = vst [vmem:[#allocation122_spill] sm:$0xff] %v14010_v15  ;;  %v5341_v9 = vrot.slane %v5340_v4, 1  ;;  %v5345_v11 = vadd.f32 %v5344_v5, %v5343_v37  ;;  %v3447_v55 = vrot.slane %v16056_v38, 1  ;;  %v14027_v59 = vadd.f32 %v5334_v8, %v5333_v22  ;;  %v8965_v37 = vld [vmem:[%s9181_s12 + $0x3d0] sm:$0xff] }
 0x51f   : > { %16053 = vst [vmem:[#allocation222_spill] sm:$0xff] %v14013_v32  ;;  %v3453_v35 = vadd.f32 %v16055_v31, %v16054_v7  ;;  %v4531_v39 = vmul.f32 %v16057_v47, %v14010_v15  ;;  %v2211_v28 = vadd.f32 %v13681_v49, %v2210_v43  ;;  %v14032_v36 = vadd.f32 %v6755_v60, %v6754_v16  ;;  %v16059_v5 = vld [vmem:[#allocation235_spill] sm:$0xff]  ;;  %v16060_v7 = vld [vmem:[#allocation216_spill] sm:$0xff]  ;;  %v16062_v47 = vld [vmem:[#allocation133_spill] sm:$0xff] }
 0x520   : > { %v14034_v13 = vadd.f32 %v3802_v26, %v3801_v57  ;;  %v3809_v33 = vrot.slane %v3808_v19, 2  ;;  %v4532_v21 = vmul.f32 %v16058_v52, %v14013_v32  ;;  %v4533_v22 = vmul.f32 %v16059_v5, %v14023_v44  ;;  %v16063_v16 = vld [vmem:[#allocation213_spill] sm:$0xff] }
 0x521   : > { %v3454_v1 = vrot.slane %v3453_v35, 1  ;;  %5930 = vperm.xlu2 %8692, %v8965_v37   ;;  %v14041_v8 = vmax.f32 %v2211_v28, 0.0  ;;  %v16061_v31 = vrot.slane %v16060_v7, 1  ;;  %v7539_v57 = vsel %vm7114_vm2, %v16063_v16, %v16062_v47  ;;  %v16071_v47 = vld [vmem:[#allocation108_spill] sm:$0xff] }
 0x522   : > { %v14049_v26 = vadd.f32 %v5341_v9, %v5340_v4  ;;  %v5346_v60 = vrot.slane %v5345_v11, 2  ;;  %v3448_v52 = vadd.f32 %v3447_v55, %v16056_v38  ;;  %v7540_v37 = vsel %vm7116_vm3, %v16064_v45, %v7539_v57  ;;  %v7258_v28 = vpop.permute.xlu2 %7257  ;;  %v16067_v4 = vld [vmem:[#allocation104_spill] sm:$0xff]  ;;  %v16068_v45 = vld [vmem:[#allocation221_spill] sm:$0xff] }
 0x523   : > { %v3441_v43 = vadd.f32 %v16061_v31, %v16060_v7  ;;  %v5350_v5 = vsel %vm4544_vm6, %v4531_v39, 0.0  ;;  %v4534_v12 = vmul.f32 %v16065_v0, %v14041_v8  ;;  %v3455_v24 = vadd.f32 %v3454_v1, %v3453_v35  ;;  %v16066_v7 = vld [vmem:[#allocation224_spill] sm:$0xff]  ;;  %8565 = vmatmul.msk.f32.gmra.mxu2 %vm524_vm0, %v7258_v28  ;;  %v5839_v39 = vpop.permute.xlu0 %5838  ;;  %v16069_v1 = vld [vmem:[#allocation207_spill] sm:$0xff] }
 0x524   : > { %v7541_v31 = vsel %vm7118_vm4, %v16066_v7, %v7540_v37  ;;  %v2995_v9 = vmul.f32 %v16067_v4, %v14010_v15  ;;  %v5357_v38 = vsel %vm4544_vm6, %v4532_v21, 0.0  ;;  %v14066_v16 = vadd.f32 %v3809_v33, %v3808_v19  ;;  %v2213_v4 = vpop.f32.mrf.mxu3 }
 0x525   : > { %v7542_v55 = vsel %vm7120_vm5, %v16068_v45, %v7541_v31  ;;  %v5364_v35 = vsel %vm4544_vm6, %v4533_v22, 0.0  ;;  %v16070_v57 = vrot.slane %v16069_v1, 2  ;;  %v5351_v7 = vrot.slane %v5350_v5, 4 }
 0x526   : > { %v7543_v0 = vsel %vm7122_vm7, %v3441_v43, %v7542_v55  ;;  %v5371_v21 = vsel %vm4544_vm6, %v4534_v12, 0.0  ;;  %v3503_v31 = vrot.slane %v16071_v47, 1  ;;  %v5358_v45 = vrot.slane %v5357_v38, 4 }
 0x527   : > { %v3509_v37 = vadd.f32 %v16070_v57, %v16069_v1  ;;  %v7544_v28 = vsel %vm7124_vm8, %v3448_v52, %v7543_v0  ;;  %v2214_v33 = vadd.f32 %v13681_v49, %v2213_v4  ;;  %v6052_v43 = vmul.f32 %v5839_v39, %v13525_v20  ;;  %v16072_v1 = vld [vmem:[#allocation186_spill] sm:$0xff]  ;;  %v16076_v39 = vld [vmem:[#allocation171_spill] sm:$0xff] }
 0x528   : > { %v7545_v19 = vsel %vm7126_vm9, %v3455_v24, %v7544_v28  ;;  %v14079_v55 = vadd.f32 %v5346_v60, %v5345_v11  ;;  %v5365_v15 = vrot.slane %v5364_v35, 4  ;;  %v16073_v12 = vrot.slane %v16072_v1, 1  ;;  %v8966_v0 = vld [vmem:[%s9181_s12 + $0x3e8] sm:$0xff]  ;;  %v16075_v28 = vld [vmem:[#allocation152_spill] sm:$0xff] }
 0x529   : > { %v3510_v22 = vrot.slane %v3509_v37, 1  ;;  %8576 = vmatmul.msk.f32.gmra.mxu3 %vm524_vm0, %v7545_v19  ;;  %5942 = vperm.xlu2 %8692, %v8966_v0   ;;  %v5372_v57 = vrot.slane %v5371_v21, 4  ;;  %v14086_v48 = vmax.f32 %v2214_v33, 0.0  ;;  %v16074_v24 = vld [vmem:[#allocation54_spill] sm:$0xff]  ;;  %v7910_v20 = vsel %vm7118_vm4, %v13778_v50, %v13883_v61 }
 0x52a   : > { %v3497_v52 = vadd.f32 %v16073_v12, %v16072_v1  ;;  %v7546_v4 = vsel %vm7114_vm2, %v16075_v28, %v16074_v24  ;;  %v5352_v11 = vadd.f32 %v5351_v7, %v5350_v5  ;;  %v3504_v60 = vadd.f32 %v3503_v31, %v16071_v47  ;;  %v5823_v33 = vpop.permute.xlu2 %5822  ;;  %v16077_v0 = vld [vmem:[#allocation118_spill] sm:$0xff]  ;;  %v16079_v47 = vld [vmem:[#allocation163_spill] sm:$0xff] }
 0x52b   : > { %v7547_v19 = vsel %vm7116_vm3, %v16076_v39, %v7546_v4  ;;  %v7911_v1 = vsel %vm7120_vm5, %v13899_v56, %v7910_v20  ;;  %v5359_v12 = vadd.f32 %v5358_v45, %v5357_v38  ;;  %v4535_v30 = vmul.f32 %v16077_v0, %v14086_v48  ;;  %v16078_v24 = vld [vmem:[#allocation158_spill] sm:$0xff] }
 0x52c   : > { %v3511_v41 = vadd.f32 %v3510_v22, %v3509_v37  ;;  %v7548_v28 = vsel %vm7118_vm4, %v16078_v24, %v7547_v19  ;;  %v3813_v50 = vsel %vm524_vm0, %v2995_v9, 0.0  ;;  %v5366_v61 = vadd.f32 %v5365_v15, %v5364_v35  ;;  %v2216_v9 = vpop.f32.mrf.mxu3  ;;  %v16080_v39 = vld [vmem:[#allocation30_spill] sm:$0xff] }
 0x52d   : > { %v6048_v5 = vmul.f32 %v5823_v33, %v15952_v63  ;;  %v7549_v7 = vsel %vm7120_vm5, %v16079_v47, %v7548_v28  ;;  %v14108_v31 = vsel %vm6081_vm10, %v6052_v43, 0.0  ;;  %v5373_v56 = vadd.f32 %v5372_v57, %v5371_v21  ;;  %v16081_v21 = vld [vmem:[#allocation94_spill] sm:$0xff]  ;;  %v8967_v28 = vld [vmem:[%s9181_s12 + $0x3f8] sm:$0xff] }
 0x52e   : > { %v5378_v38 = vsel %vm4544_vm6, %v4535_v30, 0.0  ;;  %v7550_v45 = vsel %vm7122_vm7, %v3497_v52, %v7549_v7  ;;  %v5353_v37 = vrot.slane %v5352_v11, 2  ;;  %v5360_v63 = vrot.slane %v5359_v12, 2  ;;  %v16082_v52 = vld [vmem:[#allocation59_spill] sm:$0xff]  ;;  %v16086_v7 = vld [vmem:[#allocation228_spill] sm:$0xff] }
 0x52f   : > { %v6747_v22 = vsel %vm6081_vm10, %v6048_v5, 0.0  ;;  %v5379_v4 = vrot.slane %v5378_v38, 4  ;;  %v7551_v15 = vsel %vm7124_vm8, %v3504_v60, %v7550_v45  ;;  %v3559_v43 = vrot.slane %v16080_v39, 1  ;;  %v16084_v5 = vld [vmem:[#allocation229_spill] sm:$0xff] }
 0x530   : > { %v6748_v35 = vrot.slane %v6747_v22, 4  ;;  %v7552_v20 = vsel %vm7126_vm9, %v3511_v41, %v7551_v15  ;;  %v2996_v57 = vmul.f32 %v16081_v21, %v14013_v32  ;;  %v5367_v30 = vrot.slane %v5366_v61, 2  ;;  %v16087_v45 = vld [vmem:[#allocation29_spill] sm:$0xff] }
 0x531   : > { %v5380_v19 = vadd.f32 %v5379_v4, %v5378_v38  ;;  %8577 = vmatmul.msk.f32.gmra.mxu3 %vm524_vm0, %v7552_v20  ;;  %v16083_v33 = vrot.slane %v16082_v52, 2  ;;  %v5374_v60 = vrot.slane %v5373_v56, 2  ;;  %5950 = vperm.xlu2 %8692, %v8967_v28   ;;  %v16085_v41 = vrot.slane %v16084_v5, 1  ;;  %v16088_v20 = vld [vmem:[#allocation194_spill] sm:$0xff] }
 0x532   : > { %v6749_v24 = vadd.f32 %v6748_v35, %v6747_v22  ;;  %v7553_v15 = vsel %vm7114_vm2, %v16087_v45, %v16086_v7  ;;  %v5354_v21 = vadd.f32 %v5353_v37, %v5352_v11  ;;  %v3560_v38 = vadd.f32 %v3559_v43, %v16080_v39 }
 0x533   : > { %v3565_v0 = vadd.f32 %v16083_v33, %v16082_v52  ;;  %v3553_v47 = vadd.f32 %v16085_v41, %v16084_v5  ;;  %v7554_v32 = vsel %vm7116_vm3, %v16088_v20, %v7553_v15  ;;  %v5348_v22 = vrot.slane %v14079_v55, 1  ;;  %v16089_v33 = vld [vmem:[#allocation204_spill] sm:$0xff] }
 0x534   : > { %v5361_v35 = vadd.f32 %v5360_v63, %v5359_v12  ;;  %v6750_v52 = vrot.slane %v6749_v24, 2  ;;  %v7555_v28 = vsel %vm7118_vm4, %v16089_v33, %v7554_v32  ;;  %v5368_v2 = vadd.f32 %v5367_v30, %v5366_v61  ;;  %v14141_v20 = vpop.f32.mrf.mxu3 }
 0x535   : > { %v3566_v4 = vrot.slane %v3565_v0, 1  ;;  %v5381_v5 = vrot.slane %v5380_v19, 2  ;;  %v7556_v7 = vsel %vm7120_vm5, %v16090_v54, %v7555_v28  ;;  %v3820_v11 = vsel %vm524_vm0, %v2996_v57, 0.0 }
 0x536   : > { %v6751_v37 = vadd.f32 %v6750_v52, %v6749_v24  ;;  %v5375_v39 = vadd.f32 %v5374_v60, %v5373_v56  ;;  %v7557_v43 = vsel %vm7122_vm7, %v3553_v47, %v7556_v7  ;;  %v6776_v45 = vrot.slane %v14108_v31, 4  ;;  %v5835_v7 = vpop.permute.xlu2 %5834 }
 0x537   : > { %v3567_v41 = vadd.f32 %v3566_v4, %v3565_v0  ;;  %v3814_v15 = vrot.slane %v3813_v50, 4  ;;  %v5355_v12 = vrot.slane %v5354_v21, 1  ;;  %v7558_v63 = vsel %vm7124_vm8, %v3560_v38, %v7557_v43 }
 0x538   : > { %v5362_v32 = vrot.slane %v5361_v35, 1  ;;  %v6752_v61 = vrot.slane %v6751_v37, 1  ;;  %v7912_v30 = vsel %vm7122_vm7, %v13776_v34, %v7911_v1  ;;  %v3821_v57 = vrot.slane %v3820_v11, 4 }
 0x539   : > { %v7559_v54 = vsel %vm7126_vm9, %v3567_v41, %v7558_v63  ;;  %v5369_v0 = vrot.slane %v5368_v2, 1  ;;  %v2217_v56 = vadd.f32 %v13681_v49, %v2216_v9  ;;  %v5382_v24 = vadd.f32 %v5381_v5, %v5380_v19 }
 0x53a   : > { %8578 = vmatmul.msk.f32.gmra.mxu3 %vm524_vm0, %v7559_v54  ;;  %v16091_v60 = vrot.slane %v14032_v36, 2  ;;  %v5349_v38 = vadd.f32 %v5348_v22, %v14079_v55  ;;  %v6753_v4 = vadd.f32 %v6752_v61, %v6751_v37  ;;  %v5376_v52 = vrot.slane %v5375_v39, 1  ;;  %v5851_v61 = vpop.permute.xlu0 %5850  ;;  %v16095_v54 = vld [vmem:[#allocation110_spill] sm:$0xff] }
 0x53b   : > { %v3815_v33 = vadd.f32 %v3814_v15, %v3813_v50  ;;  %v5356_v28 = vadd.f32 %v5355_v12, %v5354_v21  ;;  %v7913_v34 = vsel %vm7124_vm8, %v13886_v51, %v7912_v30  ;;  %v5383_v1 = vrot.slane %v5382_v24, 1  ;;  %v16092_v21 = vld [vmem:[#allocation107_spill] sm:$0xff] }
 0x53c   : > { %v6758_v47 = vadd.f32 %v16091_v60, %v14032_v36  ;;  %v3804_v41 = vrot.slane %v14034_v13, 1  ;;  %v6777_v49 = vadd.f32 %v6776_v45, %v14108_v31  ;;  %v5363_v9 = vadd.f32 %v5362_v32, %v5361_v35  ;;  %v14176_v32 = vpop.f32.mrf.mxu3 }
 0x53d   : > { %v7914_v19 = vsel %vm7126_vm9, %v6753_v4, %v7913_v34  ;;  %v3822_v5 = vadd.f32 %v3821_v57, %v3820_v11  ;;  %v14157_v36 = vmax.f32 %v2217_v56, 0.0  ;;  %v5370_v55 = vadd.f32 %v5369_v0, %v5368_v2 }
 0x53e   : > { %7965 = vrot.lane.b32.xlu2 %v7914_v19, %s9052_s13  ;;  %v7219_v50 = vsel %vm7114_vm2, %v14049_v26, %v14027_v59  ;;  %v3811_v51 = vrot.slane %v14066_v16, 1  ;;  %v2997_v22 = vmul.f32 %v16092_v21, %v14023_v44  ;;  %v5377_v31 = vadd.f32 %v5376_v52, %v5375_v39  ;;  %v16094_v59 = vld [vmem:[#allocation230_spill] sm:$0xff] }
 0x53f   : > { %v7220_v35 = vsel %vm7116_vm3, %v5349_v38, %v7219_v50  ;;  %v6759_v37 = vrot.slane %v6758_v47, 1  ;;  %v3816_v11 = vrot.slane %v3815_v33, 2  ;;  %v5384_v43 = vadd.f32 %v5383_v1, %v5382_v24  ;;  %v16100_v21 = vld [vmem:[#allocation142_spill] sm:$0xff] }
 0x540   : > { %v7221_v45 = vsel %vm7118_vm4, %v5356_v28, %v7220_v35  ;;  %v3788_v15 = vrot.slane %v14021_v6, 2  ;;  %v16093_v2 = vrot.slane %v14005_v62, 1  ;;  %v6051_v26 = vmul.f32 %v5835_v7, %v16094_v59  ;;  %v16096_v28 = vld [vmem:[#allocation66_spill] sm:$0xff]  ;;  %v16105_v59 = vld [vmem:[#allocation153_spill] sm:$0xff] }
 0x541   : > { %v7222_v63 = vsel %vm7120_vm5, %v5363_v9, %v7221_v45  ;;  %v6778_v39 = vrot.slane %v6777_v49, 2  ;;  %v3823_v30 = vrot.slane %v3822_v5, 2  ;;  %v3000_v57 = vmul.f32 %v16095_v54, %v14157_v36 }
 0x542   : > { %v14172_v12 = vadd.f32 %v16093_v2, %v14005_v62  ;;  %v7223_v0 = vsel %vm7122_vm7, %v5370_v55, %v7222_v63  ;;  %v14182_v56 = vadd.f32 %v3804_v41, %v14034_v13  ;;  %v14185_v62 = vadd.f32 %v3811_v51, %v14066_v16  ;;  %v16097_v13 = vld [vmem:[#allocation7_spill] sm:$0xff]  ;;  %v16098_v16 = vld [vmem:[#allocation10_spill] sm:$0xff] }
 0x543   : > { %v3827_v24 = vsel %vm524_vm0, %v2997_v22, 0.0  ;;  %v7224_v60 = vsel %vm7124_vm8, %v5377_v31, %v7223_v0  ;;  %v6760_v38 = vadd.f32 %v6759_v37, %v6758_v47  ;;  %v3817_v4 = vadd.f32 %v3816_v11, %v3815_v33  ;;  %v16102_v37 = vld [vmem:[#allocation132_spill] sm:$0xff]  ;;  %v16103_v11 = vld [vmem:[#allocation135_spill] sm:$0xff] }
 0x544   : > { %v7225_v52 = vsel %vm7126_vm9, %v5384_v43, %v7224_v60  ;;  %v3615_v34 = vrot.slane %v16096_v28, 1  ;;  %v6055_v1 = vmul.f32 %v5851_v61, %v13586_v29  ;;  %v6768_v9 = vsel %vm6081_vm10, %v6051_v26, 0.0  ;;  %v14203_v29 = vld [vmem:[%s14805_s4] ss:$0 sm:$0xff]  ;;  %v16106_v61 = vld [vmem:[#allocation218_spill] sm:$0xff] }
 0x545   : > { %v4536_v41 = vmul.f32 %v16097_v13, %v14157_v36  ;;  %7261 = vrot.lane.b32.xlu0 %v7225_v52, %s9051_s26  ;;  %v16099_v19 = vrot.slane %v16098_v16, 2  ;;  %v6779_v55 = vadd.f32 %v6778_v39, %v6777_v49  ;;  %v3824_v47 = vadd.f32 %v3823_v30, %v3822_v5  ;;  %v16104_v5 = vld [vmem:[#allocation106_spill] sm:$0xff] }
 0x546   : > { %v3828_v33 = vrot.slane %v3827_v24, 4  ;;  %v3848_v50 = vsel %vm524_vm0, %v3000_v57, 0.0  ;;  %v2220_v51 = vadd.f32 %v14203_v29, %v14141_v20  ;;  %v16101_v22 = vrot.slane %v16100_v21, 1  ;;  %v16107_v60 = vld [vmem:[#allocation62_spill] sm:$0xff] }
 0x547   : > { %v3621_v7 = vadd.f32 %v16099_v19, %v16098_v16  ;;  %v7560_v49 = vsel %vm7114_vm2, %v16103_v11, %v16102_v37  ;;  %v2998_v43 = vmul.f32 %v16104_v5, %v14041_v8  ;;  %v6769_v45 = vrot.slane %v6768_v9, 4 }
 0x548   : > { %v3609_v31 = vadd.f32 %v16101_v22, %v16100_v21  ;;  %v3616_v2 = vadd.f32 %v3615_v34, %v16096_v28  ;;  %v7561_v26 = vsel %vm7116_vm3, %v16105_v59, %v7560_v49  ;;  %v3849_v63 = vrot.slane %v3848_v50, 4  ;;  %v8969_v49 = vld [vmem:[%s9181_s12 + $0x340] sm:$0xff] }
 0x549   : > { %v3622_v35 = vrot.slane %v3621_v7, 1  ;;  %v5385_v20 = vsel %vm4544_vm6, %v4536_v41, 0.0  ;;  %v7562_v30 = vsel %vm7118_vm4, %v16106_v61, %v7561_v26  ;;  %v6780_v54 = vrot.slane %v6779_v55, 1  ;;  %v2225_v41 = vpop.f32.mrf.mxu3  ;;  %v16111_v61 = vld [vmem:[#allocation178_spill] sm:$0xff] }
 0x54a   : > { %v14222_v57 = vsel %vm6081_vm10, %v6055_v1, 0.0  ;;  %v3818_v0 = vrot.slane %v3817_v4, 1  ;;  %v7563_v52 = vsel %vm7120_vm5, %v16107_v60, %v7562_v30  ;;  %v3825_v28 = vrot.slane %v3824_v47, 1  ;;  %v16108_v1 = vld [vmem:[#allocation97_spill] sm:$0xff] }
 0x54b   : > { %v3623_v39 = vadd.f32 %v3622_v35, %v3621_v7  ;;  %v3829_v34 = vadd.f32 %v3828_v33, %v3827_v24  ;;  %v14226_v13 = vmax.f32 %v2220_v51, 0.0  ;;  %v7564_v16 = vsel %vm7122_vm7, %v3609_v31, %v7563_v52 }
 0x54c   : > { %v3834_v19 = vsel %vm524_vm0, %v2998_v43, 0.0  ;;  %v6770_v7 = vadd.f32 %v6769_v45, %v6768_v9  ;;  %v5386_v21 = vrot.slane %v5385_v20, 4  ;;  %v7565_v22 = vsel %vm7124_vm8, %v3616_v2, %v7564_v16  ;;  %v5847_v45 = vpop.permute.xlu2 %5846  ;;  %v16110_v2 = vld [vmem:[#allocation109_spill] sm:$0xff]  ;;  %v16115_v16 = vld [vmem:[#allocation196_spill] sm:$0xff] }
 0x54d   : > { %v2999_v35 = vmul.f32 %v16108_v1, %v14086_v48  ;;  %v3850_v37 = vadd.f32 %v3849_v63, %v3848_v50  ;;  %v7566_v11 = vsel %vm7126_vm9, %v3623_v39, %v7565_v22  ;;  %5858 = vperm.xlu0 %8693, %v8969_v49   ;;  %v16109_v24 = vrot.slane %v13647_v10, 2 }
 0x54e   : > { %v14240_v51 = vsel %vm7114_vm2, %v13952_v40, %v6760_v38  ;;  %v6797_v9 = vrot.slane %v14222_v57, 4  ;;  %v14243_v31 = vadd.f32 %v3818_v0, %v3817_v4  ;;  %8579 = vmatmul.msk.f32.gmra.mxu3 %vm524_vm0, %v7566_v11  ;;  %v3671_v50 = vrot.slane %v13654_v3, 1  ;;  %v16117_v11 = vld [vmem:[#allocation65_spill] sm:$0xff] }
 0x54f   : > { %v3677_v33 = vadd.f32 %v16109_v24, %v13647_v10  ;;  %v14247_v5 = vadd.f32 %v6780_v54, %v6779_v55  ;;  %v3835_v43 = vrot.slane %v3834_v19, 4  ;;  %v3001_v59 = vmul.f32 %v16110_v2, %v14226_v13  ;;  %v16113_v55 = vld [vmem:[#allocation159_spill] sm:$0xff]  ;;  %v16114_v54 = vld [vmem:[#allocation26_spill] sm:$0xff] }
 0x550   : > { %v14251_v26 = vadd.f32 %v3825_v28, %v3824_v47  ;;  %v3830_v40 = vrot.slane %v3829_v34, 2  ;;  %v6771_v38 = vrot.slane %v6770_v7, 2  ;;  %v5387_v63 = vadd.f32 %v5386_v21, %v5385_v20  ;;  %v16116_v20 = vld [vmem:[#allocation237_spill] sm:$0xff] }
 0x551   : > { %v3678_v10 = vrot.slane %v3677_v33, 1  ;;  %v3841_v4 = vsel %vm524_vm0, %v2999_v35, 0.0  ;;  %v3851_v39 = vrot.slane %v3850_v37, 2  ;;  %v16112_v30 = vrot.slane %v16111_v61, 1 }
 0x552   : > { %v7567_v60 = vsel %vm7114_vm2, %v16114_v54, %v16113_v55  ;;  %v6054_v52 = vmul.f32 %v5847_v45, %v13569_v42  ;;  %v4537_v47 = vmul.f32 %v16115_v16, %v14226_v13  ;;  %v3672_v28 = vadd.f32 %v3671_v50, %v13654_v3  ;;  %v16118_v42 = vld [vmem:[#allocation55_spill] sm:$0xff]  ;;  %v8970_v50 = vld [vmem:[%s9181_s12 + $0x358] sm:$0xff] }
 0x553   : > { %v3665_v0 = vadd.f32 %v16112_v30, %v16111_v61  ;;  %v7568_v21 = vsel %vm7116_vm3, %v16116_v20, %v7567_v60  ;;  %v3836_v22 = vadd.f32 %v3835_v43, %v3834_v19  ;;  %v3855_v1 = vsel %vm524_vm0, %v3001_v59, 0.0 }
 0x554   : > { %v3679_v35 = vadd.f32 %v3678_v10, %v3677_v33  ;;  %v7569_v49 = vsel %vm7118_vm4, %v16117_v11, %v7568_v21  ;;  %v6772_v24 = vadd.f32 %v6771_v38, %v6770_v7  ;;  %v3842_v2 = vrot.slane %v3841_v4, 4  ;;  %v2228_v33 = vpop.f32.mrf.mxu3  ;;  %v16121_v11 = vld [vmem:[#allocation61_spill] sm:$0xff] }
 0x555   : > { %v5388_v61 = vrot.slane %v5387_v63, 2  ;;  %v7570_v45 = vsel %vm7120_vm5, %v16118_v42, %v7569_v49  ;;  %v14271_v30 = vadd.f32 %v3830_v40, %v3829_v34  ;;  %v3852_v55 = vadd.f32 %v3851_v39, %v3850_v37  ;;  %5870 = vperm.xlu0 %8693, %v8970_v50   ;;  %v8971_v50 = vld [vmem:[%s9181_s12 + $0x370] sm:$0xff] }
 0x556   : > { %v2223_v3 = vadd.f32 %v14203_v29, %v14176_v32  ;;  %v7571_v19 = vsel %vm7122_vm7, %v3665_v0, %v7570_v45  ;;  %v6789_v43 = vsel %vm6081_vm10, %v6054_v52, 0.0  ;;  %v3856_v59 = vrot.slane %v3855_v1, 4  ;;  %v16122_v45 = vld [vmem:[#allocation75_spill] sm:$0xff] }
 0x557   : > { %v5392_v7 = vsel %vm4544_vm6, %v4537_v47, 0.0  ;;  %v7572_v10 = vsel %vm7124_vm8, %v3672_v28, %v7571_v19  ;;  %v3837_v38 = vrot.slane %v3836_v22, 2  ;;  %v2226_v37 = vadd.f32 %v14203_v29, %v2225_v41 }
 0x558   : > { %v7573_v34 = vsel %vm7126_vm9, %v3679_v35, %v7572_v10  ;;  %v3727_v40 = vrot.slane %v13902_v25, 1  ;;  %v6773_v32 = vrot.slane %v6772_v24, 1  ;;  %v14283_v39 = vadd.f32 %v3842_v2, %v3841_v4 }
 0x559   : > { %v5389_v0 = vadd.f32 %v5388_v61, %v5387_v63  ;;  %8580 = vmatmul.msk.f32.gmra.mxu3 %vm524_vm0, %v7573_v34  ;;  %v16119_v54 = vrot.slane %v13896_v17, 2  ;;  %v6790_v52 = vrot.slane %v6789_v43, 4  ;;  %v3853_v16 = vrot.slane %v3852_v55, 1 }
 0x55a   : > { %v5393_v47 = vrot.slane %v5392_v7, 4  ;;  %v14289_v28 = vmax.f32 %v2223_v3, 0.0  ;;  %v3857_v20 = vadd.f32 %v3856_v59, %v3855_v1  ;;  %v16120_v41 = vrot.slane %v13868_v53, 1 }
 0x55b   : > { %v3733_v60 = vadd.f32 %v16119_v54, %v13896_v17  ;;  %v7574_v63 = vsel %vm7114_vm2, %v13725_v18, %v13723_v14  ;;  %v14297_v35 = vmax.f32 %v2226_v37, 0.0  ;;  %v3728_v17 = vadd.f32 %v3727_v40, %v13902_v25  ;;  %v16123_v14 = vld [vmem:[#allocation161_spill] sm:$0xff]  ;;  %v16125_v40 = vld [vmem:[#allocation123_spill] sm:$0xff] }
 0x55c   : > { %v3721_v21 = vadd.f32 %v16120_v41, %v13868_v53  ;;  %v7575_v49 = vsel %vm7116_vm3, %v16121_v11, %v7574_v63  ;;  %v2229_v2 = vadd.f32 %v14203_v29, %v2228_v33  ;;  %v6774_v1 = vadd.f32 %v6773_v32, %v6772_v24  ;;  %v16124_v33 = vld [vmem:[#allocation100_spill] sm:$0xff]  ;;  %v2231_v54 = vpop.f32.mrf.mxu3  ;;  %v16126_v63 = vld [vmem:[#allocation25_spill] sm:$0xff] }
 0x55d   : > { %v3734_v4 = vrot.slane %v3733_v60, 1  ;;  %v5390_v61 = vrot.slane %v5389_v0, 1  ;;  %v7576_v53 = vsel %vm7118_vm4, %v16122_v45, %v7575_v49  ;;  %v14305_v3 = vadd.f32 %v6790_v52, %v6789_v43  ;;  %5882 = vperm.xlu0 %8693, %v8971_v50  }
 0x55e   : > { %v5394_v19 = vadd.f32 %v5393_v47, %v5392_v7  ;;  %v4538_v18 = vmul.f32 %v16123_v14, %v14289_v28  ;;  %v7577_v25 = vsel %vm7120_vm5, %v13859_v23, %v7576_v53  ;;  %v3858_v59 = vrot.slane %v3857_v20, 2  ;;  %v5855_v7 = vpop.permute.xlu2 %5854  ;;  %v16130_v53 = vld [vmem:[#allocation145_spill] sm:$0xff] }
 0x55f   : > { %v3735_v42 = vadd.f32 %v3734_v4, %v3733_v60  ;;  %v3002_v24 = vmul.f32 %v16124_v33, %v14289_v28  ;;  %v7578_v10 = vsel %vm7122_vm7, %v3721_v21, %v7577_v25  ;;  %v14315_v34 = vmax.f32 %v2229_v2, 0.0  ;;  %v16131_v25 = vld [vmem:[#allocation113_spill] sm:$0xff] }
 0x560   : > { %v3832_v43 = vrot.slane %v14271_v30, 1  ;;  %v14318_v37 = vadd.f32 %v3837_v38, %v3836_v22  ;;  %v4539_v32 = vmul.f32 %v16125_v40, %v14297_v35  ;;  %v7579_v23 = vsel %vm7124_vm8, %v3728_v17, %v7578_v10  ;;  %v16133_v40 = vld [vmem:[#allocation48_spill] sm:$0xff] }
 0x561   : > { %v3844_v60 = vrot.slane %v14283_v39, 2  ;;  %v14324_v52 = vadd.f32 %v3853_v16, %v3852_v55  ;;  %v14326_v47 = vadd.f32 %v5390_v61, %v5389_v0  ;;  %v7580_v41 = vsel %vm7126_vm9, %v3735_v42, %v7579_v23  ;;  %v16127_v16 = vld [vmem:[#allocation124_spill] sm:$0xff] }
 0x562   : > { %v14331_v21 = vsel %vm7116_vm3, %v6774_v1, %v14240_v51  ;;  %v6792_v22 = vrot.slane %v14305_v3, 2  ;;  %v5395_v38 = vrot.slane %v5394_v19, 2  ;;  %v5399_v4 = vsel %vm4544_vm6, %v4538_v18, 0.0  ;;  %8581 = vmatmul.msk.f32.gmra.mxu3 %vm524_vm0, %v7580_v41  ;;  %v16128_v51 = vld [vmem:[#allocation114_spill] sm:$0xff] }
 0x563   : > { %v6056_v17 = vmul.f32 %v5855_v7, %v16126_v63  ;;  %v14337_v55 = vadd.f32 %v3858_v59, %v3857_v20  ;;  %v3862_v0 = vsel %vm524_vm0, %v3002_v24, 0.0  ;;  %v4540_v11 = vmul.f32 %v16127_v16, %v14315_v34  ;;  %v16132_v24 = vld [vmem:[#allocation38_spill] sm:$0xff] }
 0x564   : > { %v3003_v49 = vmul.f32 %v16128_v51, %v14297_v35  ;;  %v5406_v2 = vsel %vm4544_vm6, %v4539_v32, 0.0  ;;  %v3783_v1 = vrot.slane %v14019_v46, 1  ;;  %v3789_v61 = vadd.f32 %v3788_v15, %v14021_v6  ;;  %v8972_v15 = vld [vmem:[%s9181_s12 + $0x380] sm:$0xff] }
 0x565   : > { %v5400_v42 = vrot.slane %v5399_v4, 4  ;;  %v16129_v20 = vrot.slane %v13976_v58, 1  ;;  %v7581_v14 = vsel %vm7114_vm2, %v16130_v53, %v13959_v27  ;;  %v2232_v18 = vadd.f32 %v14203_v29, %v2231_v54  ;;  %5890 = vperm.xlu0 %8693, %v8972_v15   ;;  %v16134_v54 = vld [vmem:[#allocation157_spill] sm:$0xff] }
 0x566   : > { %v3004_v50 = vmul.f32 %v16131_v25, %v14315_v34  ;;  %v3784_v59 = vadd.f32 %v3783_v1, %v14019_v46  ;;  %v3790_v33 = vrot.slane %v3789_v61, 1  ;;  %v7582_v6 = vsel %vm7116_vm3, %v16132_v24, %v7581_v14 }
 0x567   : > { %v3777_v45 = vadd.f32 %v16129_v20, %v13976_v58  ;;  %v14362_v10 = vadd.f32 %v5395_v38, %v5394_v19  ;;  %v5407_v58 = vrot.slane %v5406_v2, 4  ;;  %v5413_v7 = vsel %vm4544_vm6, %v4540_v11, 0.0  ;;  %v2234_v20 = vpop.f32.mrf.mxu3 }
 0x568   : > { %v7583_v27 = vsel %vm7118_vm4, %v16133_v40, %v7582_v6  ;;  %v3869_v32 = vsel %vm524_vm0, %v3003_v49, 0.0  ;;  %v3791_v23 = vadd.f32 %v3790_v33, %v3789_v61  ;;  %v14370_v41 = vmax.f32 %v2232_v18, 0.0  ;;  %v16135_v49 = vld [vmem:[#allocation103_spill] sm:$0xff] }
 0x569   : > { %v7584_v46 = vsel %vm7120_vm5, %v16134_v54, %v7583_v27  ;;  %v14373_v63 = vsel %vm6081_vm10, %v6056_v17, 0.0  ;;  %v3863_v16 = vrot.slane %v3862_v0, 4  ;;  %v5401_v19 = vadd.f32 %v5400_v42, %v5399_v4  ;;  %v16136_v17 = vld [vmem:[#allocation172_spill] sm:$0xff] }
 0x56a   : > { %v7585_v38 = vsel %vm7122_vm7, %v3777_v45, %v7584_v46  ;;  %v3876_v11 = vsel %vm524_vm0, %v3004_v50, 0.0  ;;  %v5414_v51 = vrot.slane %v5413_v7, 4  ;;  %v3005_v61 = vmul.f32 %v16135_v49, %v14370_v41  ;;  %v8973_v27 = vld [vmem:[%s9181_s12 + $0x398] sm:$0xff] }
 0x56b   : > { %v7586_v1 = vsel %vm7124_vm8, %v3784_v59, %v7585_v38  ;;  %v3870_v53 = vrot.slane %v3869_v32, 4  ;;  %v5408_v14 = vadd.f32 %v5407_v58, %v5406_v2  ;;  %v4541_v25 = vmul.f32 %v16136_v17, %v14370_v41 }
 0x56c   : > { %v7587_v18 = vsel %vm7126_vm9, %v3791_v23, %v7586_v1  ;;  %v6804_v4 = vrot.slane %v14373_v63, 4  ;;  %v3860_v42 = vrot.slane %v14337_v55, 1  ;;  %v5397_v45 = vrot.slane %v14362_v10, 1 }
 0x56d   : > { %8582 = vmatmul.msk.f32.gmra.mxu3 %vm524_vm0, %v7587_v18  ;;  %v3883_v50 = vsel %vm524_vm0, %v3005_v61, 0.0  ;;  %v3864_v59 = vadd.f32 %v3863_v16, %v3862_v0  ;;  %v5402_v33 = vrot.slane %v5401_v19, 2  ;;  %v3877_v24 = vrot.slane %v3876_v11, 4  ;;  %5902 = vperm.xlu0 %8693, %v8973_v27   ;;  %v7260_v49 = vpop.permute.xlu1 %7259  ;;  %v8974_v27 = vld [vmem:[%s9181_s12 + $0x3b0] sm:$0xff] }
 0x56e   : > { %v5420_v2 = vsel %vm4544_vm6, %v4541_v25, 0.0  ;;  %v5415_v6 = vadd.f32 %v5414_v51, %v5413_v7  ;;  %v3839_v58 = vrot.slane %v14318_v37, 1  ;;  %v3845_v40 = vadd.f32 %v3844_v60, %v14283_v39  ;;  %8566 = vmatmul.msk.f32.gmra.mxu2 %vm524_vm0, %v7260_v49  ;;  %v16138_v25 = vld [vmem:[#allocation130_spill] sm:$0xff] }
 0x56f   : > { %v5421_v15 = vrot.slane %v5420_v2, 4  ;;  %v3871_v23 = vadd.f32 %v3870_v53, %v3869_v32  ;;  %v5409_v54 = vrot.slane %v5408_v14, 2  ;;  %v3884_v46 = vrot.slane %v3883_v50, 4 }
 0x570   : > { %v2235_v38 = vadd.f32 %v14203_v29, %v2234_v20  ;;  %v3833_v0 = vadd.f32 %v3832_v43, %v14271_v30  ;;  %v3846_v16 = vrot.slane %v3845_v40, 1  ;;  %v7588_v7 = vsel %vm7114_vm2, %v14182_v56, %v14172_v12  ;;  %v16137_v56 = vld [vmem:[#allocation117_spill] sm:$0xff] }
 0x571   : > { %v5422_v1 = vadd.f32 %v5421_v15, %v5420_v2  ;;  %v3878_v51 = vadd.f32 %v3877_v24, %v3876_v11  ;;  %v3840_v39 = vadd.f32 %v3839_v58, %v14318_v37  ;;  %v7589_v60 = vsel %vm7116_vm3, %v14185_v62, %v7588_v7  ;;  %v2237_v2 = vpop.f32.mrf.mxu3 }
 0x572   : > { %v14402_v32 = vmax.f32 %v2235_v38, 0.0  ;;  %v3865_v61 = vrot.slane %v3864_v59, 2  ;;  %v5416_v20 = vrot.slane %v5415_v6, 2  ;;  %v3847_v53 = vadd.f32 %v3846_v16, %v3845_v40 }
 0x573   : > { %v7590_v30 = vsel %vm7118_vm4, %v14243_v31, %v7589_v60  ;;  %v5403_v43 = vadd.f32 %v5402_v33, %v5401_v19  ;;  %v3885_v18 = vadd.f32 %v3884_v46, %v3883_v50  ;;  %v3872_v37 = vrot.slane %v3871_v23, 2 }
 0x574   : > { %v7591_v12 = vsel %vm7120_vm5, %v14251_v26, %v7590_v30  ;;  %v3006_v62 = vmul.f32 %v16137_v56, %v14402_v32  ;;  %v5423_v11 = vrot.slane %v5422_v1, 2  ;;  %v4542_v24 = vmul.f32 %v16138_v25, %v14402_v32 }
 0x575   : > { %v7592_v17 = vsel %vm7122_vm7, %v3833_v0, %v7591_v12  ;;  %v5410_v31 = vadd.f32 %v5409_v54, %v5408_v14  ;;  %v3879_v15 = vrot.slane %v3878_v51, 2  ;;  %v5417_v33 = vadd.f32 %v5416_v20, %v5415_v6  ;;  %5914 = vperm.xlu0 %8693, %v8974_v27  }
 0x576   : > { %v7593_v19 = vsel %vm7124_vm8, %v3840_v39, %v7592_v17  ;;  %v3890_v50 = vsel %vm524_vm0, %v3006_v62, 0.0  ;;  %v5427_v40 = vsel %vm4544_vm6, %v4542_v24, 0.0  ;;  %v3866_v46 = vadd.f32 %v3865_v61, %v3864_v59 }
 0x577   : > { %v7594_v26 = vsel %vm7126_vm9, %v3847_v53, %v7593_v19  ;;  %v3891_v58 = vrot.slane %v3890_v50, 4  ;;  %v3886_v38 = vrot.slane %v3885_v18, 2  ;;  %v5428_v0 = vrot.slane %v5427_v40, 4 }
 0x578   : > { %8583 = vmatmul.msk.f32.gmra.mxu3 %vm524_vm0, %v7594_v26  ;;  %v2238_v14 = vadd.f32 %v14203_v29, %v2237_v2  ;;  %v5404_v54 = vrot.slane %v5403_v43, 1  ;;  %v3873_v16 = vadd.f32 %v3872_v37, %v3871_v23  ;;  %v5424_v7 = vadd.f32 %v5423_v11, %v5422_v1  ;;  %v16139_v29 = vld [vmem:[#allocation116_spill] sm:$0xff]  ;;  %v16140_v23 = vld [vmem:[#allocation190_spill] sm:$0xff] }
 0x579   : > { %v3892_v39 = vadd.f32 %v3891_v58, %v3890_v50  ;;  %v3861_v6 = vadd.f32 %v3860_v42, %v14337_v55  ;;  %v5398_v60 = vadd.f32 %v5397_v45, %v14362_v10  ;;  %v5429_v49 = vadd.f32 %v5428_v0, %v5427_v40 }
 0x57a   : > { %v14423_v20 = vmax.f32 %v2238_v14, 0.0  ;;  %v5411_v53 = vrot.slane %v5410_v31, 1  ;;  %v3880_v30 = vadd.f32 %v3879_v15, %v3878_v51  ;;  %v5418_v59 = vrot.slane %v5417_v33, 1  ;;  %v8975_v15 = vld [vmem:[%s9181_s12 + $0x3c0] sm:$0xff] }
 0x57b   : > { %v3893_v61 = vrot.slane %v3892_v39, 2  ;;  %v3887_v12 = vadd.f32 %v3886_v38, %v3885_v18  ;;  %v5430_v56 = vrot.slane %v5429_v49, 2  ;;  %v3867_v37 = vrot.slane %v3866_v46, 1 }
 0x57c   : > { %v3007_v62 = vmul.f32 %v16139_v29, %v14423_v20  ;;  %v4543_v1 = vmul.f32 %v16140_v23, %v14423_v20  ;;  %v5405_v55 = vadd.f32 %v5404_v54, %v5403_v43  ;;  %v3874_v42 = vrot.slane %v3873_v16, 1 }
 0x57d   : > { %v5425_v10 = vrot.slane %v5424_v7, 1  ;;  %v3894_v45 = vadd.f32 %v3893_v61, %v3892_v39  ;;  %v5431_v11 = vadd.f32 %v5430_v56, %v5429_v49  ;;  %v5412_v25 = vadd.f32 %v5411_v53, %v5410_v31  ;;  %5922 = vperm.xlu0 %8693, %v8975_v15   ;;  %v16141_v61 = vld [vmem:[#allocation40_spill] sm:$0xff] }
 0x57e   : > { %v3897_v17 = vsel %vm524_vm0, %v3007_v62, 0.0  ;;  %v5434_v51 = vsel %vm4544_vm6, %v4543_v1, 0.0  ;;  %v3881_v18 = vrot.slane %v3880_v30, 1  ;;  %v14435_v19 = vadd.f32 %v6804_v4, %v14373_v63  ;;  %v16143_v62 = vld [vmem:[#allocation71_spill] sm:$0xff]  ;;  %v16144_v1 = vld [vmem:[#allocation177_spill] sm:$0xff] }
 0x57f   : > { %v3898_v24 = vrot.slane %v3897_v17, 4  ;;  %v5435_v2 = vrot.slane %v5434_v51, 4  ;;  %v5419_v43 = vadd.f32 %v5418_v59, %v5417_v33  ;;  %v3888_v50 = vrot.slane %v3887_v12, 1 }
 0x580   : > { %v5432_v26 = vrot.slane %v5431_v11, 1  ;;  %v5426_v27 = vadd.f32 %v5425_v10, %v5424_v7  ;;  %v7226_v38 = vsel %vm7114_vm2, %v5398_v60, %v14326_v47  ;;  %v3868_v31 = vadd.f32 %v3867_v37, %v3866_v46  ;;  %v16142_v7 = vld [vmem:[#allocation43_spill] sm:$0xff]  ;;  %v16145_v37 = vld [vmem:[#allocation149_spill] sm:$0xff] }
 0x581   : > { %v3899_v58 = vadd.f32 %v3898_v24, %v3897_v17  ;;  %v5436_v40 = vadd.f32 %v5435_v2, %v5434_v51  ;;  %v3875_v0 = vadd.f32 %v3874_v42, %v3873_v16  ;;  %v7227_v14 = vsel %vm7116_vm3, %v5405_v55, %v7226_v38  ;;  %v8976_v55 = vld [vmem:[%s9181_s12 + $0x3d8] sm:$0xff]  ;;  %v16146_v17 = vld [vmem:[#allocation58_spill] sm:$0xff] }
 0x582   : > { %v3895_v54 = vrot.slane %v3894_v45, 1  ;;  %v3882_v39 = vadd.f32 %v3881_v18, %v3880_v30  ;;  %v7228_v63 = vsel %vm7118_vm4, %v5412_v25, %v7227_v14  ;;  %v5433_v4 = vadd.f32 %v5432_v26, %v5431_v11  ;;  %v16147_v25 = vld [vmem:[#allocation13_spill] sm:$0xff] }
 0x583   : > { %v3900_v49 = vrot.slane %v3899_v58, 2  ;;  %v5437_v53 = vrot.slane %v5436_v40, 2  ;;  %v7229_v33 = vsel %vm7120_vm5, %v5419_v43, %v7228_v63  ;;  %v3889_v59 = vadd.f32 %v3888_v50, %v3887_v12  ;;  %v16148_v43 = vld [vmem:[#allocation144_spill] sm:$0xff] }
 0x584   : > { %v7896_v56 = vsel %vm7118_vm4, %v16142_v7, %v16141_v61  ;;  %v7230_v46 = vsel %vm7122_vm7, %v5426_v27, %v7229_v33  ;;  %v7595_v60 = vsel %vm7114_vm2, %v3861_v6, %v14324_v52  ;;  %v3896_v30 = vadd.f32 %v3895_v54, %v3894_v45  ;;  %v16151_v27 = vld [vmem:[#allocation60_spill] sm:$0xff]  ;;  %v16157_v61 = vld [vmem:[#allocation185_spill] sm:$0xff] }
 0x585   : > { %v5438_v47 = vadd.f32 %v5437_v53, %v5436_v40  ;;  %v3901_v16 = vadd.f32 %v3900_v49, %v3899_v58  ;;  %v7596_v29 = vsel %vm7116_vm3, %v3868_v31, %v7595_v60  ;;  %v7897_v23 = vsel %vm7120_vm5, %v16143_v62, %v7896_v56  ;;  %5934 = vperm.xlu0 %8693, %v8976_v55   ;;  %v16150_v58 = vld [vmem:[#allocation23_spill] sm:$0xff]  ;;  %v16152_v31 = vld [vmem:[#allocation112_spill] sm:$0xff] }
 0x586   : > { %v7875_v12 = vsel %vm7118_vm4, %v16145_v37, %v16144_v1  ;;  %v7597_v11 = vsel %vm7118_vm4, %v3875_v0, %v7596_v29  ;;  %v7917_v52 = vsel %vm7118_vm4, %v14247_v5, %v14331_v21  ;;  %v7231_v6 = vsel %vm7124_vm8, %v5433_v4, %v7230_v46  ;;  %v16149_v5 = vld [vmem:[#allocation68_spill] sm:$0xff] }
 0x587   : > { %v5439_v42 = vrot.slane %v5438_v47, 1  ;;  %v3902_v10 = vrot.slane %v3901_v16, 1  ;;  %v7598_v45 = vsel %vm7120_vm5, %v3882_v39, %v7597_v11  ;;  %v7898_v51 = vsel %vm7122_vm7, %v16146_v17, %v7897_v23  ;;  %v16154_v53 = vld [vmem:[#allocation20_spill] sm:$0xff] }
 0x588   : > { %v7876_v18 = vsel %vm7120_vm5, %v16147_v25, %v7875_v12  ;;  %v7599_v15 = vsel %vm7122_vm7, %v3889_v59, %v7598_v45  ;;  %v7899_v50 = vsel %vm7124_vm8, %v16148_v43, %v7898_v51  ;;  %v7918_v38 = vsel %vm7120_vm5, %v16151_v27, %v7917_v52  ;;  %v16156_v33 = vld [vmem:[#allocation180_spill] sm:$0xff]  ;;  %v8978_v51 = vld [vmem:[%s9181_s12 + $0x348] sm:$0xff] }
 0x589   : > { %v5440_v24 = vadd.f32 %v5439_v42, %v5438_v47  ;;  %v3903_v2 = vadd.f32 %v3902_v10, %v3901_v16  ;;  %v7600_v26 = vsel %vm7124_vm8, %v3896_v30, %v7599_v15  ;;  %v7900_v21 = vsel %vm7126_vm9, %v16149_v5, %v7899_v50  ;;  %v16160_v46 = vld [vmem:[#allocation56_spill] sm:$0xff]  ;;  %v16162_v30 = vld [vmem:[#allocation187_spill] sm:$0xff]  ;;  %v16164_v5 = vld [vmem:[#allocation146_spill] sm:$0xff] }
 0x58a   : > { %v7877_v40 = vsel %vm7122_vm7, %v16150_v58, %v7876_v18  ;;  %v16153_v0 = vrot.slane %v16152_v31, 1  ;;  %v6798_v54 = vadd.f32 %v6797_v9, %v14222_v57  ;;  %v16155_v63 = vrot.slane %v16154_v53, 2  ;;  %v16159_v57 = vld [vmem:[#allocation169_spill] sm:$0xff]  ;;  %v8977_v37 = vld [vmem:[%s9181_s12 + $0x3f0] sm:$0xff]  ;;  %v16166_v27 = vld [vmem:[#allocation162_spill] sm:$0xff] }
 0x58b   : > { %v7232_v39 = vsel %vm7126_vm9, %v5440_v24, %v7231_v6  ;;  %v7601_v49 = vsel %vm7126_vm9, %v3903_v2, %v7600_v26  ;;  %v7878_v59 = vsel %vm7124_vm8, %v16156_v33, %v7877_v40  ;;  %v16158_v7 = vrot.slane %v16157_v61, 2  ;;  %v16165_v58 = vld [vmem:[#allocation220_spill] sm:$0xff]  ;;  %v16171_v33 = vld [vmem:[#allocation126_spill] sm:$0xff] }
 0x58c   : > { %v6473_v14 = vadd.f32 %v16153_v0, %v16152_v31  ;;  %v6513_v4 = vadd.f32 %v16155_v63, %v16154_v53  ;;  %7263 = vrot.lane.b32.xlu1 %v7232_v39, %s9051_s26  ;;  %8584 = vmatmul.msk.f32.gmra.mxu3 %vm524_vm0, %v7601_v49  ;;  %v6507_v9 = vrot.slane %v16159_v57, 1  ;;  %v16161_v16 = vrot.slane %v16160_v46, 2  ;;  %v16167_v31 = vld [vmem:[#allocation167_spill] sm:$0xff]  ;;  %v16168_v49 = vld [vmem:[#allocation125_spill] sm:$0xff] }
 0x58d   : > { %v6520_v56 = vadd.f32 %v16158_v7, %v16157_v61  ;;  %v6500_v29 = vrot.slane %v16162_v30, 1  ;;  %v6793_v62 = vadd.f32 %v6792_v22, %v14305_v3  ;;  %v6806_v23 = vrot.slane %v14435_v19, 2  ;;  %5946 = vperm.xlu0 %8693, %v8977_v37   ;;  %v16163_v3 = vld [vmem:[#allocation139_spill] sm:$0xff]  ;;  %v16169_v53 = vld [vmem:[#allocation225_spill] sm:$0xff] }
 0x58e   : > { %v7879_v47 = vsel %vm7126_vm9, %v6473_v14, %v7878_v59  ;;  %v6527_v60 = vadd.f32 %v16161_v16, %v16160_v46  ;;  %v6799_v1 = vrot.slane %v6798_v54, 2  ;;  %v6514_v12 = vrot.slane %v6513_v4, 1 }
 0x58f   : > { %v6521_v55 = vrot.slane %v6520_v56, 1  ;;  %v6508_v42 = vadd.f32 %v6507_v9, %v16159_v57  ;;  %v6501_v11 = vadd.f32 %v6500_v29, %v16162_v30  ;;  %v6794_v52 = vrot.slane %v6793_v62, 1  ;;  %v16173_v57 = vld [vmem:[#allocation231_spill] sm:$0xff] }
 0x590   : > { %v6528_v10 = vrot.slane %v6527_v60, 1  ;;  %v6807_v6 = vadd.f32 %v6806_v23, %v14435_v19  ;;  %v6800_v45 = vadd.f32 %v6799_v1, %v6798_v54  ;;  %v6515_v17 = vadd.f32 %v6514_v12, %v6513_v4  ;;  %v8979_v4 = vld [vmem:[%s9181_s12 + $0x360] sm:$0xff]  ;;  %v16175_v23 = vld [vmem:[#allocation160_spill] sm:$0xff]  ;;  %v16176_v12 = vld [vmem:[#allocation47_spill] sm:$0xff] }
 0x591   : > { %v7882_v22 = vsel %vm7118_vm4, %v6501_v11, %v16163_v3  ;;  %v6522_v25 = vadd.f32 %v6521_v55, %v6520_v56  ;;  %v6795_v2 = vadd.f32 %v6794_v52, %v6793_v62  ;;  %v6021_v40 = vmul.f32 %v16165_v58, %v16164_v5  ;;  %v16172_v56 = vld [vmem:[#allocation53_spill] sm:$0xff]  ;;  %v16174_v62 = vld [vmem:[#allocation170_spill] sm:$0xff]  ;;  %v16177_v55 = vld [vmem:[#allocation236_spill] sm:$0xff] }
 0x592   : > { %v7883_v18 = vsel %vm7120_vm5, %v6508_v42, %v7882_v22  ;;  %v6529_v24 = vadd.f32 %v6528_v10, %v6527_v60  ;;  %v6808_v15 = vrot.slane %v6807_v6, 1  ;;  %v6801_v50 = vrot.slane %v6800_v45, 1  ;;  %v16180_v22 = vld [vmem:[#allocation173_spill] sm:$0xff] }
 0x593   : > { %v7884_v43 = vsel %vm7122_vm7, %v6515_v17, %v7883_v18  ;;  %v6020_v0 = vmul.f32 %v16167_v31, %v16166_v27  ;;  %v7919_v54 = vsel %vm7122_vm7, %v6795_v2, %v7918_v38  ;;  %v6022_v63 = vmul.f32 %v16169_v53, %v16168_v49 }
 0x594   : > { %5862 = vperm.xlu1 %8694, %v8978_v51   ;;  %v7885_v19 = vsel %vm7124_vm8, %v6522_v25, %v7884_v43  ;;  %v6809_v14 = vadd.f32 %v6808_v15, %v6807_v6  ;;  %v6802_v39 = vadd.f32 %v6801_v50, %v6800_v45  ;;  %v6558_v61 = vsel %vm6081_vm10, %v6021_v40, 0.0  ;;  %v16178_v6 = vld [vmem:[#allocation15_spill] sm:$0xff]  ;;  %v16179_v45 = vld [vmem:[#allocation182_spill] sm:$0xff]  ;;  %v16182_v15 = vld [vmem:[#allocation188_spill] sm:$0xff] }
 0x595   : > { %7961 = vrot.lane.b32.xlu0 %v7900_v21, %s9052_s13  ;;  %v14515_v26 = vsel %vm7126_vm9, %v6529_v24, %v7885_v19  ;;  %v16170_v21 = vld [vmem:[#allocation9_spill] sm:$0xff]  ;;  %v6024_v9 = vmul.f32 %v16173_v57, %v16172_v56  ;;  %v6551_v46 = vsel %vm6081_vm10, %v6020_v0, 0.0  ;;  %v6565_v16 = vsel %vm6081_vm10, %v6022_v63, 0.0  ;;  %v16181_v25 = vld [vmem:[#allocation143_spill] sm:$0xff] }
 0x596   : > { %v6023_v59 = vmul.f32 %v16171_v33, %v16170_v21  ;;  %v7920_v7 = vsel %vm7124_vm8, %v6802_v39, %v7919_v54  ;;  %v6559_v60 = vrot.slane %v6558_v61, 4  ;;  %v6552_v30 = vrot.slane %v6551_v46, 4  ;;  %v16183_v43 = vld [vmem:[#allocation69_spill] sm:$0xff]  ;;  %v8980_v33 = vld [vmem:[%s9181_s12 + $0x388] sm:$0xff] }
 0x597   : > { %v7921_v38 = vsel %vm7126_vm9, %v6809_v14, %v7920_v7  ;;  %v6037_v1 = vmul.f32 %v16175_v23, %v16174_v62  ;;  %v6579_v37 = vsel %vm6081_vm10, %v6024_v9, 0.0  ;;  %v6036_v42 = vmul.f32 %v16177_v55, %v16176_v12 }
 0x598   : > { %v6572_v29 = vsel %vm6081_vm10, %v6023_v59, 0.0  ;;  %v6566_v10 = vrot.slane %v6565_v16, 4  ;;  %v6560_v52 = vadd.f32 %v6559_v60, %v6558_v61  ;;  %v6038_v17 = vmul.f32 %v16179_v45, %v16178_v6 }
 0x599   : > { %v6573_v11 = vrot.slane %v6572_v29, 4  ;;  %v6580_v51 = vrot.slane %v6579_v37, 4  ;;  %v6553_v3 = vadd.f32 %v6552_v30, %v6551_v46  ;;  %v6039_v18 = vmul.f32 %v16181_v25, %v16180_v22  ;;  %v16184_v22 = vld [vmem:[#allocation151_spill] sm:$0xff] }
 0x59a   : > { %v6670_v24 = vsel %vm6081_vm10, %v6037_v1, 0.0  ;;  %v6663_v2 = vsel %vm6081_vm10, %v6036_v42, 0.0  ;;  %v6040_v50 = vmul.f32 %v16183_v43, %v16182_v15  ;;  %v6567_v19 = vadd.f32 %v6566_v10, %v6565_v16 }
 0x59b   : > { %v6574_v5 = vadd.f32 %v6573_v11, %v6572_v29  ;;  %v6561_v58 = vrot.slane %v6560_v52, 2  ;;  %v6677_v40 = vsel %vm6081_vm10, %v6038_v17, 0.0  ;;  %v6671_v27 = vrot.slane %v6670_v24, 4  ;;  %v8981_v11 = vld [vmem:[%s9181_s12 + $0x3a0] sm:$0xff] }
 0x59c   : > { %5874 = vperm.xlu1 %8694, %v8979_v4   ;;  %v6554_v31 = vrot.slane %v6553_v3, 2  ;;  %v6664_v0 = vrot.slane %v6663_v2, 4  ;;  %v6684_v14 = vsel %vm6081_vm10, %v6039_v18, 0.0  ;;  %v6691_v54 = vsel %vm6081_vm10, %v6040_v50, 0.0 }
 0x59d   : > { %7967 = vrot.lane.b32.xlu0 %v7921_v38, %s9052_s13  ;;  %v6568_v39 = vrot.slane %v6567_v19, 2  ;;  %v6678_v49 = vrot.slane %v6677_v40, 4  ;;  %v6575_v53 = vrot.slane %v6574_v5, 2  ;;  %v6562_v63 = vadd.f32 %v6561_v58, %v6560_v52 }
 0x59e   : > { %v6685_v4 = vrot.slane %v6684_v14, 4  ;;  %v6672_v21 = vadd.f32 %v6671_v27, %v6670_v24  ;;  %v6555_v61 = vadd.f32 %v6554_v31, %v6553_v3  ;;  %v6665_v7 = vadd.f32 %v6664_v0, %v6663_v2 }
 0x59f   : > { %v6692_v56 = vrot.slane %v6691_v54, 4  ;;  %v6569_v57 = vadd.f32 %v6568_v39, %v6567_v19  ;;  %v6679_v9 = vadd.f32 %v6678_v49, %v6677_v40  ;;  %v6576_v46 = vadd.f32 %v6575_v53, %v6574_v5  ;;  %v16185_v49 = vld [vmem:[#allocation156_spill] sm:$0xff] }
 0x5a0   : > { %v6563_v38 = vrot.slane %v6562_v63, 1  ;;  %v6686_v16 = vadd.f32 %v6685_v4, %v6684_v14  ;;  %v6673_v60 = vrot.slane %v6672_v21, 2  ;;  %v6556_v29 = vrot.slane %v6555_v61, 1 }
 0x5a1   : > { %v6666_v62 = vrot.slane %v6665_v7, 2  ;;  %v6693_v23 = vadd.f32 %v6692_v56, %v6691_v54  ;;  %v6570_v1 = vrot.slane %v6569_v57, 1  ;;  %v6577_v12 = vrot.slane %v6576_v46, 1  ;;  %v8983_v56 = vld [vmem:[%s9181_s12 + $0x3e0] sm:$0xff] }
 0x5a2   : > { %v6564_v55 = vadd.f32 %v6563_v38, %v6562_v63  ;;  %v6687_v42 = vrot.slane %v6686_v16, 2  ;;  %v6674_v10 = vadd.f32 %v6673_v60, %v6672_v21  ;;  %v6557_v6 = vadd.f32 %v6556_v29, %v6555_v61  ;;  %v7700_v38 = vld [vmem:[%s14808_s7 + $0x8] sm:$0xff] }
 0x5a3   : > { %v6667_v45 = vadd.f32 %v6666_v62, %v6665_v7  ;;  %v6694_v17 = vrot.slane %v6693_v23, 2  ;;  %v6578_v18 = vadd.f32 %v6577_v12, %v6576_v46  ;;  %v8982_v7 = vld [vmem:[%s9181_s12 + $0x3c8] sm:$0xff]  ;;  %v7701_v46 = vld [vmem:[%s14808_s7 + $0x10] sm:$0xff]  ;;  %s8234_s12 = sshll.u32 %s381_s18, 4  ;;  %s8235_s12 = int_to_ptr.vmem [resolvable:$true] %s8234_s12 }
 0x5a4   : > { %7955 = vrot.lane.b32.xlu1 %v7879_v47, %s9052_s13  ;;  %v6581_v47 = vadd.f32 %v6580_v51, %v6579_v37  ;;  %v6680_v37 = vrot.slane %v6679_v9, 2  ;;  %v6571_v51 = vadd.f32 %v6570_v1, %v6569_v57  ;;  %v7889_v25 = vsel %vm7118_vm4, %v6557_v6, %v16184_v22  ;;  %v5867_v57 = vpop.permute.xlu2 %5866  ;;  %v14588_v1 = vpop.f32.mrf.mxu2 }
 0x5a5   : > { %v6688_v24 = vadd.f32 %v6687_v42, %v6686_v16  ;;  %v6675_v2 = vrot.slane %v6674_v10, 1  ;;  %v7890_v15 = vsel %vm7120_vm5, %v6564_v55, %v7889_v25  ;;  %v6668_v50 = vrot.slane %v6667_v45, 1  ;;  %v16187_v55 = vld [vmem:[#allocation211_spill] sm:$0xff] }
 0x5a6   : > { %v6582_v59 = vrot.slane %v6581_v47, 2  ;;  %v6681_v3 = vadd.f32 %v6680_v37, %v6679_v9  ;;  %v6695_v19 = vadd.f32 %v6694_v17, %v6693_v23  ;;  %v7891_v58 = vsel %vm7122_vm7, %v6571_v51, %v7890_v15  ;;  %v7702_v9 = vld [vmem:[%s14808_s7 + $0x18] sm:$0xff]  ;;  %v14586_v23 = vpop.permute.xlu1 %7953 }
 0x5a7   : > { %v7892_v40 = vsel %vm7124_vm8, %v6578_v18, %v7891_v58  ;;  %v6689_v31 = vrot.slane %v6688_v24, 1  ;;  %v6676_v0 = vadd.f32 %v6675_v2, %v6674_v10  ;;  %v6669_v14 = vadd.f32 %v6668_v50, %v6667_v45  ;;  %8019 = vmatpush.msra.mxu2 %v7702_v9  ;;  %v16186_v37 = vld [vmem:[#allocation72_spill] sm:$0xff]  ;;  %v16188_v45 = vld [vmem:[#allocation50_spill] sm:$0xff]  ;;  %v16190_v18 = vld [vmem:[#allocation199_spill] sm:$0xff] }
 0x5a8   : > { %v6583_v30 = vadd.f32 %v6582_v59, %v6581_v47  ;;  %v6682_v27 = vrot.slane %v6681_v3, 1  ;;  %v6696_v54 = vrot.slane %v6695_v19, 1  ;;  %v6059_v42 = vmul.f32 %v5867_v57, %v16187_v55  ;;  %v16191_v2 = vld [vmem:[#allocation120_spill] sm:$0xff] }
 0x5a9   : > { %v7903_v53 = vsel %vm7118_vm4, %v6669_v14, %v16185_v49  ;;  %v6690_v63 = vadd.f32 %v6689_v31, %v6688_v24  ;;  %8020 = vmatpush.msra.mxu2 %v7701_v46 }
 0x5aa   : > { %v6584_v52 = vrot.slane %v6583_v30, 1  ;;  %v6683_v39 = vadd.f32 %v6682_v27, %v6681_v3  ;;  %v7904_v4 = vsel %vm7120_vm5, %v6676_v0, %v7903_v53  ;;  %v6697_v21 = vadd.f32 %v6696_v54, %v6695_v19  ;;  %v16189_v3 = vld [vmem:[#allocation12_spill] sm:$0xff]  ;;  %v16192_v0 = vld [vmem:[#allocation37_spill] sm:$0xff] }
 0x5ab   : > { %8021 = vmatpush.msra.mxu2 %v7700_v38  ;;  %v6824_v51 = vsel %vm6081_vm10, %v6059_v42, 0.0  ;;  %v16193_v54 = vld [vmem:[#allocation164_spill] sm:$0xff] }
 0x5ac   : > { %5894 = vperm.xlu1 %8694, %v8980_v33   ;;  %v6585_v43 = vadd.f32 %v6584_v52, %v6583_v30  ;;  %v7905_v33 = vsel %vm7122_vm7, %v6683_v39, %v7904_v4  ;;  %v5879_v60 = vpop.permute.xlu2 %5878  ;;  %v7699_v30 = vld [vmem:[%s14808_s7] sm:$0xff]  ;;  %v6825_v50 = vrot.slane %v6824_v51, 4 }
 0x5ad   : > { %v7906_v59 = vsel %vm7124_vm8, %v6690_v63, %v7905_v33  ;;  %8022 = vmatpush.msra.mxu2 %v7699_v30  ;;  %v6062_v22 = vmul.f32 %v5879_v60, %v16189_v3  ;;  %v16196_v3 = vld [vmem:[#allocation219_spill] sm:$0xff] }
 0x5ae   : > { %v7893_v47 = vsel %vm7126_vm9, %v6585_v43, %v7892_v40  ;;  %v7907_v61 = vsel %vm7126_vm9, %v6697_v21, %v7906_v59  ;;  %v14599_v43 = vpop.f32.mrf.mxu2  ;;  %v6826_v39 = vadd.f32 %v6825_v50, %v6824_v51 }
 0x5b4   : > { %5906 = vperm.xlu1 %8694, %v8981_v11   ;;  %v5887_v62 = vpop.permute.xlu2 %5886 }
 0x5b5   : > { %v6064_v24 = vmul.f32 %v5887_v62, %v16190_v18  ;;  %v16194_v62 = vld [vmem:[#allocation175_spill] sm:$0xff] }
 0x5b6   : > { %v14609_v38 = vpop.f32.mrf.mxu2 }
 0x5b7   : > { %v7262_v5 = vpop.permute.xlu0 %7261  ;;  %v6859_v40 = vsel %vm6081_vm10, %v6064_v24, 0.0 }
 0x5b8   : > { %8567 = vmatmul.msk.f32.gmra.mxu2 %vm524_vm0, %v7262_v5  ;;  %v6845_v5 = vsel %vm6081_vm10, %v6062_v22, 0.0  ;;  %v6860_v63 = vrot.slane %v6859_v40, 4 }
 0x5b9   : > { %v6846_v49 = vrot.slane %v6845_v5, 4 }
 0x5ba   : > { %v6861_v9 = vadd.f32 %v6860_v63, %v6859_v40  ;;  %v16198_v63 = vld [vmem:[#allocation21_spill] sm:$0xff] }
 0x5bc   : > { %7957 = vrot.lane.b32.xlu1 %v14515_v26, %s9052_s13  ;;  %v5899_v6 = vpop.permute.xlu2 %5898 }
 0x5bf   : > { %v5859_v26 = vpop.permute.xlu0 %5858 }
 0x5c0   : > { %v6057_v12 = vmul.f32 %v5859_v26, %v16186_v37  ;;  %v6847_v26 = vadd.f32 %v6846_v49, %v6845_v5 }
 0x5c2   : > { %v6810_v10 = vsel %vm6081_vm10, %v6057_v12, 0.0  ;;  %v16195_v12 = vld [vmem:[#allocation63_spill] sm:$0xff]  ;;  %v6848_v42 = vrot.slane %v6847_v26, 2 }
 0x5c3   : > { %v6811_v25 = vrot.slane %v6810_v10, 4 }
 0x5c4   : > { %5926 = vperm.xlu1 %8694, %v8982_v7   ;;  %v5911_v4 = vpop.permute.xlu2 %5910 }
 0x5c5   : > { %v6812_v58 = vadd.f32 %v6811_v25, %v6810_v10 }
 0x5c7   : > { %v5871_v16 = vpop.permute.xlu0 %5870  ;;  %v6813_v21 = vrot.slane %v6812_v58, 2 }
 0x5c8   : > { %v6060_v17 = vmul.f32 %v5871_v16, %v16188_v45 }
 0x5c9   : > { %v6814_v46 = vadd.f32 %v6813_v21, %v6812_v58  ;;  %v14623_v21 = vpop.f32.mrf.mxu2 }
 0x5ca   : > { %v6831_v19 = vsel %vm6081_vm10, %v6060_v17, 0.0 }
 0x5cb   : > { %v6815_v45 = vrot.slane %v6814_v46, 1 }
 0x5cc   : > { %5938 = vperm.xlu1 %8694, %v8983_v56   ;;  %v6827_v56 = vrot.slane %v6826_v39, 2 }
 0x5ce   : > { %v6828_v55 = vadd.f32 %v6827_v56, %v6826_v39 }
 0x5cf   : > { %v5883_v29 = vpop.permute.xlu0 %5882 }
 0x5d0   : > { %v6063_v15 = vmul.f32 %v5883_v29, %v16191_v2  ;;  %v5919_v2 = vpop.permute.xlu2 %5918  ;;  %v6829_v50 = vrot.slane %v6828_v55, 1 }
 0x5d2   : > { %v6852_v31 = vsel %vm6081_vm10, %v6063_v15, 0.0 }
 0x5d3   : > { %v6853_v59 = vrot.slane %v6852_v31, 4 }
 0x5d4   : > { %7959 = vrot.lane.b32.xlu1 %v7893_v47, %s9052_s13  ;;  %v6832_v47 = vrot.slane %v6831_v19, 4 }
 0x5d5   : > { %v6854_v16 = vadd.f32 %v6853_v59, %v6852_v31  ;;  %v6816_v31 = vadd.f32 %v6815_v45, %v6814_v46  ;;  %v6072_v46 = vmul.f32 %v5919_v2, %v14086_v48 }
 0x5d6   : > { %v6833_v7 = vadd.f32 %v6832_v47, %v6831_v19  ;;  %v6849_v19 = vadd.f32 %v6848_v42, %v6847_v26 }
 0x5d7   : > { %v5891_v11 = vpop.permute.xlu0 %5890  ;;  %v6855_v51 = vrot.slane %v6854_v16, 2  ;;  %v6915_v45 = vsel %vm6081_vm10, %v6072_v46, 0.0  ;;  %v16203_v46 = vld [vmem:[#allocation45_spill] sm:$0xff] }
 0x5d8   : > { %v6834_v29 = vrot.slane %v6833_v7, 2  ;;  %v6065_v22 = vmul.f32 %v5891_v11, %v16196_v3  ;;  %v6850_v59 = vrot.slane %v6849_v19, 1 }
 0x5da   : > { %v6835_v15 = vadd.f32 %v6834_v29, %v6833_v7  ;;  %v6851_v42 = vadd.f32 %v6850_v59, %v6849_v19 }
 0x5dc   : > { %7963 = vrot.lane.b32.xlu1 %v7907_v61, %s9052_s13  ;;  %v6836_v11 = vrot.slane %v6835_v15, 1 }
 0x5de   : > { %v6837_v29 = vadd.f32 %v6836_v11, %v6835_v15 }
 0x5df   : > { %v5903_v53 = vpop.permute.xlu0 %5902 }
 0x5e7   : > { %v5915_v25 = vpop.permute.xlu0 %5914 }
 0x5fe   : > { %v7264_v52 = vpop.permute.xlu1 %7263 }
 0x5ff   : > { %8568 = vmatmul.msk.f32.gmra.mxu2 %vm524_vm0, %v7264_v52  ;;  %v6862_v52 = vrot.slane %v6861_v9, 2 }
 0x601   : > { %v6863_v40 = vadd.f32 %v6862_v52, %v6861_v9  ;;  %v5931_v52 = vpop.permute.xlu2 %5930 }
 0x603   : > { %v6864_v56 = vrot.slane %v6863_v40, 1 }
 0x605   : > { %v6865_v48 = vadd.f32 %v6864_v56, %v6863_v40 }
 0x606   : > { %v5863_v27 = vpop.permute.xlu1 %5862 }
 0x607   : > { %v6058_v14 = vmul.f32 %v5863_v27, %v16192_v0  ;;  %8585 = vmatmul.msk.f32.vlgmr.msra.gmra.mxu2 %vm524_vm0, %v16193_v54  ;;  %v16197_v27 = vld [vmem:[#allocation74_spill] sm:$0xff]  ;;  %v6856_v0 = vadd.f32 %v6855_v51, %v6854_v16 }
 0x608   : > { %v6067_v47 = vmul.f32 %v5899_v6, %v16197_v27 }
 0x609   : > { %v6817_v33 = vsel %vm6081_vm10, %v6058_v14, 0.0  ;;  %v6866_v14 = vsel %vm6081_vm10, %v6065_v22, 0.0  ;;  %v6857_v16 = vrot.slane %v6856_v0, 1  ;;  %v5943_v56 = vpop.permute.xlu2 %5942 }
 0x60a   : > { %v6818_v61 = vrot.slane %v6817_v33, 4  ;;  %v6880_v26 = vsel %vm6081_vm10, %v6067_v47, 0.0  ;;  %v6867_v9 = vrot.slane %v6866_v14, 4  ;;  %v14644_v47 = vpop.f32.mrf.mxu2 }
 0x60c   : > { %v6819_v57 = vadd.f32 %v6818_v61, %v6817_v33  ;;  %v6830_v33 = vadd.f32 %v6829_v50, %v6828_v55  ;;  %v16199_v61 = vld [vmem:[#allocation122_spill] sm:$0xff] }
 0x60d   : > { %v6068_v7 = vmul.f32 %v5903_v53, %v16199_v61  ;;  %v5923_v53 = vpop.permute.xlu0 %5922 }
 0x60e   : > { %v6820_v60 = vrot.slane %v6819_v57, 2  ;;  %v5875_v30 = vpop.permute.xlu1 %5874 }
 0x60f   : > { %v6061_v37 = vmul.f32 %v5875_v30, %v16194_v62  ;;  %8586 = vmatmul.msk.f32.gmra.mxu2 %vm524_vm0, %v16195_v12  ;;  %v6071_v62 = vmul.f32 %v5915_v25, %v14041_v8  ;;  %v6887_v12 = vsel %vm6081_vm10, %v6068_v7, 0.0  ;;  %v16200_v25 = vld [vmem:[#allocation32_spill] sm:$0xff] }
 0x610   : > { %v6821_v10 = vadd.f32 %v6820_v60, %v6819_v57  ;;  %v6070_v57 = vmul.f32 %v5911_v4, %v14023_v44  ;;  %v6868_v44 = vadd.f32 %v6867_v9, %v6866_v14  ;;  %v6888_v8 = vrot.slane %v6887_v12, 4 }
 0x611   : > { %v6838_v17 = vsel %vm6081_vm10, %v6061_v37, 0.0  ;;  %v6881_v37 = vrot.slane %v6880_v26, 4  ;;  %v6908_v22 = vsel %vm6081_vm10, %v6071_v62, 0.0 }
 0x612   : > { %v6822_v18 = vrot.slane %v6821_v10, 1  ;;  %v6839_v24 = vrot.slane %v6838_v17, 4  ;;  %v6889_v14 = vadd.f32 %v6888_v8, %v6887_v12  ;;  %v6075_v8 = vmul.f32 %v5931_v52, %v14289_v28  ;;  %v5951_v52 = vpop.permute.xlu2 %5950 }
 0x613   : > { %v6882_v15 = vadd.f32 %v6881_v37, %v6880_v26 }
 0x614   : > { %v6823_v5 = vadd.f32 %v6822_v18, %v6821_v10  ;;  %v6840_v58 = vadd.f32 %v6839_v24, %v6838_v17  ;;  %v6901_v10 = vsel %vm6081_vm10, %v6070_v57, 0.0  ;;  %v6858_v17 = vadd.f32 %v6857_v16, %v6856_v0  ;;  %v16201_v24 = vld [vmem:[#allocation242_spill] sm:$0xff] }
 0x615   : > { %v6902_v50 = vrot.slane %v6901_v10, 4  ;;  %v5935_v61 = vpop.permute.xlu0 %5934  ;;  %v6890_v26 = vrot.slane %v6889_v14, 2  ;;  %v16202_v57 = vld [vmem:[#allocation222_spill] sm:$0xff]  ;;  %v6936_v28 = vsel %vm6081_vm10, %v6075_v8, 0.0 }
 0x616   : > { %v6841_v54 = vrot.slane %v6840_v58, 2  ;;  %v14618_v39 = vpop.permute.xlu1 %7955  ;;  %v7922_v49 = vsel %vm7114_vm2, %v6823_v5, %v6816_v31  ;;  %v6916_v5 = vrot.slane %v6915_v45, 4  ;;  %v6909_v31 = vrot.slane %v6908_v22, 4 }
 0x617   : > { %8587 = vmatmul.msk.f32.gmra.mxu2 %vm524_vm0, %v16198_v63  ;;  %v7923_v60 = vsel %vm7116_vm3, %v6830_v33, %v7922_v49  ;;  %v6903_v49 = vadd.f32 %v6902_v50, %v6901_v10  ;;  %v6076_v50 = vmul.f32 %v5935_v61, %v14297_v35  ;;  %v6080_v35 = vmul.f32 %v5951_v52, %v14423_v20 }
 0x618   : > { %v6842_v6 = vadd.f32 %v6841_v54, %v6840_v58  ;;  %v7924_v4 = vsel %vm7118_vm4, %v6837_v29, %v7923_v60  ;;  %v6869_v58 = vrot.slane %v6868_v44, 2  ;;  %v6883_v54 = vrot.slane %v6882_v15, 2 }
 0x619   : > { %v6917_v63 = vadd.f32 %v6916_v5, %v6915_v45  ;;  %v6910_v59 = vadd.f32 %v6909_v31, %v6908_v22  ;;  %v6078_v31 = vmul.f32 %v5943_v56, %v14370_v41 }
 0x61a   : > { %v6843_v30 = vrot.slane %v6842_v6, 1  ;;  %v6870_v33 = vadd.f32 %v6869_v58, %v6868_v44  ;;  %v6884_v16 = vadd.f32 %v6883_v54, %v6882_v15  ;;  %v6891_v44 = vadd.f32 %v6890_v26, %v6889_v14 }
 0x61b   : > { %v6918_v29 = vrot.slane %v6917_v63, 2  ;;  %v6911_v12 = vrot.slane %v6910_v59, 2  ;;  %v6957_v56 = vsel %vm6081_vm10, %v6078_v31, 0.0 }
 0x61c   : > { %v6844_v55 = vadd.f32 %v6843_v30, %v6842_v6  ;;  %v6904_v30 = vrot.slane %v6903_v49, 2  ;;  %v6871_v62 = vrot.slane %v6870_v33, 1  ;;  %v6892_v15 = vrot.slane %v6891_v44, 1 }
 0x61e   : > { %v5895_v51 = vpop.permute.xlu1 %5894  ;;  %v7925_v3 = vsel %vm7120_vm5, %v6844_v55, %v7924_v4  ;;  %v6073_v55 = vmul.f32 %v5923_v53, %v14157_v36  ;;  %v14652_v4 = vpop.f32.mrf.mxu2  ;;  %v6872_v22 = vadd.f32 %v6871_v62, %v6870_v33  ;;  %v6958_v62 = vrot.slane %v6957_v56, 4 }
 0x61f   : > { %v6066_v18 = vmul.f32 %v5895_v51, %v16200_v25  ;;  %8588 = vmatmul.msk.f32.gmra.mxu2 %vm524_vm0, %v16201_v24  ;;  %v7926_v2 = vsel %vm7122_vm7, %v6851_v42, %v7925_v3  ;;  %v6905_v51 = vadd.f32 %v6904_v30, %v6903_v49  ;;  %v6919_v3 = vadd.f32 %v6918_v29, %v6917_v63 }
 0x620   : > { %v7927_v19 = vsel %vm7124_vm8, %v6858_v17, %v7926_v2  ;;  %v6912_v25 = vadd.f32 %v6911_v12, %v6910_v59  ;;  %v6937_v49 = vrot.slane %v6936_v28, 4  ;;  %v6943_v63 = vsel %vm6081_vm10, %v6076_v50, 0.0 }
 0x621   : > { %v6873_v40 = vsel %vm6081_vm10, %v6066_v18, 0.0  ;;  %v7928_v27 = vsel %vm7126_vm9, %v6865_v48, %v7927_v19  ;;  %v6885_v48 = vrot.slane %v6884_v16, 1  ;;  %v6922_v18 = vsel %vm6081_vm10, %v6073_v55, 0.0  ;;  %v5947_v19 = vpop.permute.xlu0 %5946 }
 0x622   : > { %v6874_v0 = vrot.slane %v6873_v40, 4  ;;  %7969 = vrot.lane.b32.xlu1 %v7928_v27, %s9052_s13  ;;  %v6906_v58 = vrot.slane %v6905_v51, 1  ;;  %v6923_v27 = vrot.slane %v6922_v18, 4  ;;  %v6971_v30 = vsel %vm6081_vm10, %v6080_v35, 0.0 }
 0x623   : > { %v6886_v53 = vadd.f32 %v6885_v48, %v6884_v16 }
 0x624   : > { %v6875_v11 = vadd.f32 %v6874_v0, %v6873_v40  ;;  %v6920_v40 = vrot.slane %v6919_v3, 1  ;;  %v6913_v0 = vrot.slane %v6912_v25, 1  ;;  %v6907_v59 = vadd.f32 %v6906_v58, %v6905_v51 }
 0x625   : > { %v6924_v61 = vadd.f32 %v6923_v27, %v6922_v18 }
 0x626   : > { %v6876_v7 = vrot.slane %v6875_v11, 2  ;;  %v5907_v6 = vpop.permute.xlu1 %5906  ;;  %v6921_v41 = vadd.f32 %v6920_v40, %v6919_v3  ;;  %v6914_v26 = vadd.f32 %v6913_v0, %v6912_v25 }
 0x627   : > { %v6069_v9 = vmul.f32 %v5907_v6, %v16202_v57  ;;  %8589 = vmatmul.msk.f32.gmra.mxu2 %vm524_vm0, %v16203_v46  ;;  %v14667_v6 = vpop.f32.mrf.mxu2 }
 0x628   : > { %v6877_v60 = vadd.f32 %v6876_v7, %v6875_v11  ;;  %v6893_v11 = vadd.f32 %v6892_v15, %v6891_v44 }
 0x629   : > { %v6894_v37 = vsel %vm6081_vm10, %v6069_v9, 0.0 }
 0x62a   : > { %v6878_v42 = vrot.slane %v6877_v60, 1  ;;  %v6895_v10 = vrot.slane %v6894_v37, 4 }
 0x62c   : > { %v6879_v45 = vadd.f32 %v6878_v42, %v6877_v60  ;;  %v6896_v17 = vadd.f32 %v6895_v10, %v6894_v37  ;;  %v6938_v60 = vadd.f32 %v6937_v49, %v6936_v28  ;;  %v6925_v37 = vrot.slane %v6924_v61, 2 }
 0x62e   : > { %v6897_v24 = vrot.slane %v6896_v17, 2  ;;  %v7958_v2 = vpop.permute.xlu1 %7957  ;;  %v7929_v36 = vsel %vm7114_vm2, %v6879_v45, %v6872_v22  ;;  %v6959_v45 = vadd.f32 %v6958_v62, %v6957_v56 }
 0x62f   : > { %8590 = vmatmul.msk.f32.gmra.mxu2 %vm524_vm0, %v14586_v23  ;;  %v7930_v14 = vsel %vm7116_vm3, %v6886_v53, %v7929_v36  ;;  %v6079_v23 = vmul.f32 %v5947_v19, %v14402_v32  ;;  %v6944_v32 = vrot.slane %v6943_v63, 4 }
 0x630   : > { %v6898_v5 = vadd.f32 %v6897_v24, %v6896_v17  ;;  %v7931_v7 = vsel %vm7118_vm4, %v6893_v11, %v7930_v14  ;;  %v6926_v17 = vadd.f32 %v6925_v37, %v6924_v61  ;;  %v14683_v24 = vpop.f32.mrf.mxu2  ;;  %v6960_v53 = vrot.slane %v6959_v45, 2 }
 0x631   : > { %v6964_v46 = vsel %vm6081_vm10, %v6079_v23, 0.0  ;;  %v6945_v44 = vadd.f32 %v6944_v32, %v6943_v63 }
 0x632   : > { %v6899_v54 = vrot.slane %v6898_v5, 1  ;;  %v6965_v42 = vrot.slane %v6964_v46, 4  ;;  %v6927_v50 = vrot.slane %v6926_v17, 1  ;;  %v6961_v14 = vadd.f32 %v6960_v53, %v6959_v45  ;;  %v7651_v45 = vpop.f32.mrf.mxu3 }
 0x633   : > { %v6946_v25 = vrot.slane %v6945_v44, 2 }
 0x634   : > { %v6900_v33 = vadd.f32 %v6899_v54, %v6898_v5  ;;  %v6966_v51 = vadd.f32 %v6965_v42, %v6964_v46 }
 0x635   : > { %v6947_v52 = vadd.f32 %v6946_v25, %v6945_v44 }
 0x636   : > { %v5927_v57 = vpop.permute.xlu1 %5926  ;;  %v7932_v9 = vsel %vm7120_vm5, %v6900_v33, %v7931_v7  ;;  %v6967_v5 = vrot.slane %v6966_v51, 2 }
 0x637   : > { %v6074_v20 = vmul.f32 %v5927_v57, %v14226_v13  ;;  %8591 = vmatmul.msk.f32.gmra.mxu2 %vm524_vm0, %v14618_v39  ;;  %v7933_v16 = vsel %vm7122_vm7, %v6907_v59, %v7932_v9  ;;  %v6972_v13 = vrot.slane %v6971_v30, 4  ;;  %v6939_v39 = vrot.slane %v6938_v60, 2 }
 0x638   : > { %v7934_v29 = vsel %vm7124_vm8, %v6914_v26, %v7933_v16  ;;  %v6968_v54 = vadd.f32 %v6967_v5, %v6966_v51  ;;  %v6948_v49 = vrot.slane %v6947_v52, 1  ;;  %v6962_v59 = vrot.slane %v6961_v14, 1  ;;  %v14688_v61 = vpop.f32.mrf.mxu2  ;;  %v7962_v16 = vpop.permute.xlu0 %7961 }
 0x639   : > { %v6929_v12 = vsel %vm6081_vm10, %v6074_v20, 0.0  ;;  %v7935_v55 = vsel %vm7126_vm9, %v6921_v41, %v7934_v29  ;;  %v6973_v22 = vadd.f32 %v6972_v13, %v6971_v30  ;;  %v6940_v15 = vadd.f32 %v6939_v39, %v6938_v60 }
 0x63a   : > { %v6930_v10 = vrot.slane %v6929_v12, 4  ;;  %7971 = vrot.lane.b32.xlu2 %v7935_v55, %s9052_s13  ;;  %v6969_v7 = vrot.slane %v6968_v54, 1  ;;  %v6949_v57 = vadd.f32 %v6948_v49, %v6947_v52  ;;  %v6963_v32 = vadd.f32 %v6962_v59, %v6961_v14  ;;  %v7654_v51 = vpop.f32.mrf.mxu3 }
 0x63b   : > { %v6974_v28 = vrot.slane %v6973_v22, 2  ;;  %v6941_v27 = vrot.slane %v6940_v15, 1 }
 0x63c   : > { %v6931_v48 = vadd.f32 %v6930_v10, %v6929_v12  ;;  %v6970_v20 = vadd.f32 %v6969_v7, %v6968_v54  ;;  %v7966_v10 = vpop.permute.xlu2 %7965 }
 0x63d   : > { %v6975_v23 = vadd.f32 %v6974_v28, %v6973_v22  ;;  %v6942_v63 = vadd.f32 %v6941_v27, %v6940_v15  ;;  %v7652_v22 = vadd.f32 %v7651_v45, %v14588_v1  ;;  %v7655_v15 = vadd.f32 %v7654_v51, %v14599_v43 }
 0x63e   : > { %v6932_v3 = vrot.slane %v6931_v48, 2  ;;  %v5939_v8 = vpop.permute.xlu1 %5938 }
 0x63f   : > { %v6077_v18 = vmul.f32 %v5939_v8, %v14315_v34  ;;  %8592 = vmatmul.msk.f32.gmra.mxu2 %vm524_vm0, %v7958_v2  ;;  %v6928_v34 = vadd.f32 %v6927_v50, %v6926_v17  ;;  %v6976_v26 = vrot.slane %v6975_v23, 1 }
 0x640   : > { %v6933_v36 = vadd.f32 %v6932_v3, %v6931_v48  ;;  %v7341_v12 = vpop.f32.mrf.mxu2  ;;  %v7968_v44 = vpop.permute.xlu0 %7967 }
 0x641   : > { %v6950_v19 = vsel %vm6081_vm10, %v6077_v18, 0.0  ;;  %v6977_v30 = vadd.f32 %v6976_v26, %v6975_v23 }
 0x642   : > { %v6934_v58 = vrot.slane %v6933_v36, 1  ;;  %v6951_v40 = vrot.slane %v6950_v19, 4  ;;  %v7657_v8 = vpop.f32.mrf.mxu3 }
 0x643   : > { %v7658_v5 = vadd.f32 %v7657_v8, %v14609_v38 }
 0x644   : > { %v6935_v31 = vadd.f32 %v6934_v58, %v6933_v36  ;;  %v6952_v0 = vadd.f32 %v6951_v40, %v6950_v19 }
 0x646   : > { %v6953_v2 = vrot.slane %v6952_v0, 2  ;;  %v7960_v11 = vpop.permute.xlu1 %7959  ;;  %v7936_v35 = vsel %vm7114_vm2, %v6935_v31, %v6928_v34 }
 0x647   : > { %8593 = vmatmul.msk.f32.gmra.mxu2 %vm524_vm0, %v7960_v11  ;;  %v7937_v41 = vsel %vm7116_vm3, %v6942_v63, %v7936_v35 }
 0x648   : > { %v6954_v33 = vadd.f32 %v6953_v2, %v6952_v0  ;;  %v7938_v46 = vsel %vm7118_vm4, %v6949_v57, %v7937_v41  ;;  %v14699_v42 = vpop.f32.mrf.mxu2 }
 0x64a   : > { %v6955_v56 = vrot.slane %v6954_v33, 1  ;;  %v7660_v36 = vpop.f32.mrf.mxu3 }
 0x64b   : > { %v7661_v1 = vadd.f32 %v7660_v36, %v14623_v21 }
 0x64c   : > { %v6956_v9 = vadd.f32 %v6955_v56, %v6954_v33 }
 0x64e   : > { %v7939_v60 = vsel %vm7120_vm5, %v6956_v9, %v7938_v46  ;;  %v7964_v55 = vpop.permute.xlu1 %7963 }
 0x64f   : > { %8594 = vmatmul.msk.f32.gmra.mxu2 %vm524_vm0, %v7962_v16  ;;  %v7940_v29 = vsel %vm7122_vm7, %v6963_v32, %v7939_v60 }
 0x650   : > { %v7941_v62 = vsel %vm7124_vm8, %v6970_v20, %v7940_v29  ;;  %v14702_v13 = vpop.f32.mrf.mxu2 }
 0x651   : > { %v7942_v37 = vsel %vm7126_vm9, %v6977_v30, %v7941_v62 }
 0x652   : > { %7973 = vrot.lane.b32.xlu0 %v7942_v37, %s9052_s13  ;;  %v7663_v28 = vpop.f32.mrf.mxu3  ;;  %s8224_s13 = scalar_lea.sflag [#allocation4], %s380_s14 }
 0x653   : > { %v7664_v0 = vadd.f32 %v7663_v28, %v14644_v47 }
 0x657   : > { %8595 = vmatmul.msk.f32.gmra.mxu2 %vm524_vm0, %v7964_v55 }
 0x658   : > { %v14705_v39 = vpop.f32.mrf.mxu2 }
 0x65a   : > { %v7666_v31 = vpop.f32.mrf.mxu3 }
 0x65b   : > { %v7667_v38 = vadd.f32 %v7666_v31, %v14652_v4 }
 0x65f   : > { %8596 = vmatmul.msk.f32.gmra.mxu2 %vm524_vm0, %v7966_v10 }
 0x660   : > { %v14707_v48 = vpop.f32.mrf.mxu2 }
 0x662   : > { %v7669_v54 = vpop.f32.mrf.mxu3 }
 0x663   : > { %v7670_v23 = vadd.f32 %v7669_v54, %v14667_v6 }
 0x667   : > { %8597 = vmatmul.msk.f32.gmra.mxu2 %vm524_vm0, %v7968_v44 }
 0x668   : > { %v7356_v17 = vpop.f32.mrf.mxu2 }
 0x66a   : > { %v7672_v49 = vpop.f32.mrf.mxu3 }
 0x66b   : > { %v7673_v63 = vadd.f32 %v7672_v49, %v14683_v24 }
 0x672   : > { %v7675_v47 = vpop.f32.mrf.mxu3 }
 0x673   : > { %v7676_v41 = vadd.f32 %v7675_v47, %v14688_v61 }
 0x67a   : > { %v7678_v26 = vpop.f32.mrf.mxu3 }
 0x67b   : > { %v7679_v57 = vadd.f32 %v7678_v26, %v7341_v12  ;;  %v8699_v12 = vld [vmem:[%s14809_s8] ss:$0 sm:$0xff] }
 0x682   : > { %v7359_v3 = vpop.f32.mrf.mxu2  ;;  %v7681_v32 = vpop.f32.mrf.mxu3 }
 0x68a   : > { %v8024_v25 = vpop.f32.mrf.mxu2  ;;  %v7684_v20 = vpop.f32.mrf.mxu3 }
 0x68b   : > { %v14710_v18 = vadd.f32 %v8024_v25, %v7652_v22 }
 0x692   : > { %v8027_v53 = vpop.f32.mrf.mxu2  ;;  %v7687_v60 = vpop.f32.mrf.mxu3 }
 0x693   : > { %v14713_v50 = vadd.f32 %v8027_v53, %v7655_v15  ;;  %v7688_v53 = vadd.f32 %v7687_v60, %v14705_v39 }
 0x694   : > { %v7970_v19 = vpop.permute.xlu1 %7969  ;;  %v7972_v52 = vpop.permute.xlu2 %7971 }
 0x695   : > { %8598 = vmatmul.msk.f32.gmra.mxu2 %vm524_vm0, %v7970_v19 }
 0x69a   : > { %v8030_v58 = vpop.f32.mrf.mxu2  ;;  %v7690_v30 = vpop.f32.mrf.mxu3 }
 0x69b   : > { %v14717_v40 = vadd.f32 %v8030_v58, %v7658_v5  ;;  %v7691_v8 = vadd.f32 %v7690_v30, %v14707_v48  ;;  %v7685_v5 = vadd.f32 %v7684_v20, %v14702_v13  ;;  %v7682_v48 = vadd.f32 %v7681_v32, %v14699_v42 }
 0x69d   : > { %8599 = vmatmul.msk.f32.gmra.mxu2 %vm524_vm0, %v7972_v52 }
 0x6a2   : > { %v8033_v27 = vpop.f32.mrf.mxu2  ;;  %v7693_v62 = vpop.f32.mrf.mxu3 }
 0x6a3   : > { %v14721_v43 = vadd.f32 %v8033_v27, %v7661_v1  ;;  %v7694_v10 = vadd.f32 %v7693_v62, %v7356_v17 }
 0x6aa   : > { %v8036_v14 = vpop.f32.mrf.mxu2  ;;  %v7696_v55 = vpop.f32.mrf.mxu3 }
 0x6ab   : > { %v14724_v34 = vadd.f32 %v8036_v14, %v7664_v0  ;;  %v7697_v44 = vadd.f32 %v7696_v55, %v7359_v3 }
 0x6b2   : > { %v8039_v2 = vpop.f32.mrf.mxu2 }
 0x6b3   : > { %v14727_v11 = vadd.f32 %v8039_v2, %v7667_v38 }
 0x6ba   : > { %v8042_v35 = vpop.f32.mrf.mxu2 }
 0x6bb   : > { %v14730_v21 = vadd.f32 %v8042_v35, %v7670_v23  ;;  %v8125_v35 = vld [vmem:[#allocation2] sm:$0x1] }
 0x6bd   : > { %v8098_v23 = vadd.f32 %v8699_v12, %v14730_v21  ;;  %v8095_v21 = vadd.f32 %v8699_v12, %v14721_v43 }
 0x6bf   : > { %v8114_v47 = vmax.f32 %v8098_v23, 0.0 }
 0x6c2   : > { %v8045_v33 = vpop.f32.mrf.mxu2 }
 0x6c3   : > { %v8079_v59 = vadd.f32 %v8045_v33, %v7673_v63  ;;  %v9053_v63 = vmov 0   ;;  %v8097_v33 = vadd.f32 %v8699_v12, %v14727_v11  ;;  %v8093_v11 = vadd.f32 %v8699_v12, %v14713_v50 }
 0x6c4   : > { %v7974_v7 = vpop.permute.xlu0 %7973  ;;  %8695 = vset.pattern.permute.xlu1 %v9053_v63  ;;  %8696 = vset.pattern.permute.xlu0 %v9053_v63 }
 0x6c5   : > { %8600 = vmatmul.msk.f32.gmra.mxu2 %vm524_vm0, %v7974_v7  ;;  %v8099_v42 = vadd.f32 %v8699_v12, %v8079_v59  ;;  %8128 = vperm.xlu1 %8695, %v8125_v35   ;;  %v8096_v59 = vadd.f32 %v8699_v12, %v14724_v34  ;;  %v8113_v7 = vmax.f32 %v8097_v33, 0.0  ;;  %v8092_v34 = vadd.f32 %v8699_v12, %v14710_v18 }
 0x6c7   : > { %v8115_v49 = vmax.f32 %v8099_v42, 0.0  ;;  %v8108_v43 = vmax.f32 %v8092_v34, 0.0 }
 0x6ca   : > { %v8048_v4 = vpop.f32.mrf.mxu2 }
 0x6cb   : > { %v8080_v56 = vadd.f32 %v8048_v4, %v7676_v41  ;;  %v8112_v41 = vmax.f32 %v8096_v59, 0.0  ;;  %v8094_v4 = vadd.f32 %v8699_v12, %v14717_v40  ;;  %v8124_v40 = vld [vmem:[%s14810_s9] sm:$0x1] }
 0x6cd   : > { %v8100_v54 = vadd.f32 %v8699_v12, %v8080_v56  ;;  %v8111_v56 = vmax.f32 %v8095_v21, 0.0  ;;  %v8110_v26 = vmax.f32 %v8094_v4, 0.0 }
 0x6cf   : > { %v8116_v2 = vmax.f32 %v8100_v54, 0.0 }
 0x6d2   : > { %v8051_v9 = vpop.f32.mrf.mxu2 }
 0x6d3   : > { %v8081_v6 = vadd.f32 %v8051_v9, %v7679_v57  ;;  %v8109_v57 = vmax.f32 %v8093_v11, 0.0 }
 0x6d5   : > { %v8101_v14 = vadd.f32 %v8699_v12, %v8081_v6 }
 0x6d7   : > { %v8117_v38 = vmax.f32 %v8101_v14, 0.0 }
 0x6da   : > { %v8054_v46 = vpop.f32.mrf.mxu2 }
 0x6db   : > { %v8082_v1 = vadd.f32 %v8054_v46, %v7682_v48 }
 0x6dd   : > { %v8102_v39 = vadd.f32 %v8699_v12, %v8082_v1 }
 0x6df   : > { %v8118_v13 = vmax.f32 %v8102_v39, 0.0 }
 0x6e2   : > { %v8057_v16 = vpop.f32.mrf.mxu2 }
 0x6e3   : > { %v8083_v58 = vadd.f32 %v8057_v16, %v7685_v5 }
 0x6e5   : > { %v8103_v27 = vadd.f32 %v8699_v12, %v8083_v58 }
 0x6e7   : > { %v8119_v0 = vmax.f32 %v8103_v27, 0.0 }
 0x6ea   : > { %v8060_v24 = vpop.f32.mrf.mxu2 }
 0x6eb   : > { %v8084_v19 = vadd.f32 %v8060_v24, %v7688_v53 }
 0x6ed   : > { %v8104_v28 = vadd.f32 %v8699_v12, %v8084_v19 }
 0x6ef   : > { %v8120_v31 = vmax.f32 %v8104_v28, 0.0 }
 0x718   : > { %v8063_v29 = vpop.f32.mrf.mxu2 }
 0x719   : > { %v8085_v25 = vadd.f32 %v8063_v29, %v7691_v8 }
 0x71b   : > { %v8105_v17 = vadd.f32 %v8699_v12, %v8085_v25 }
 0x71d   : > { %v8121_v52 = vmax.f32 %v8105_v17, 0.0 }
 0x720   : > { %v8066_v37 = vpop.f32.mrf.mxu2 }
 0x721   : > { %v8086_v45 = vadd.f32 %v8066_v37, %v7694_v10 }
 0x723   : > { %v8106_v15 = vadd.f32 %v8699_v12, %v8086_v45 }
 0x725   : > { %v8122_v3 = vmax.f32 %v8106_v15, 0.0 }
 0x737   : > { %v8129_v50 = vpop.permute.xlu1 %8128 }
 0x738   : > { %v8131_v9 = vperm.slane %v8129_v50, 0 }
 0x748   : > { %v8069_v61 = vpop.f32.mrf.mxu2 }
 0x749   : > { %v8087_v51 = vadd.f32 %v8069_v61, %v7697_v44 }
 0x74b   : > { %v8107_v22 = vadd.f32 %v8699_v12, %v8087_v51 }
 0x74d   : > { %v8123_v36 = vmax.f32 %v8107_v22, 0.0 }
 0x74f   : > { %8601 = vmatpush.xpose.msk.msrb.mxu3 %vm524_vm0, %v8123_v36 }
 0x753   : > { %8602 = vmatpush.xpose.msk.msrb.mxu3 %vm524_vm0, %v8122_v3 }
 0x757   : > { %8603 = vmatpush.xpose.msk.msrb.mxu3 %vm524_vm0, %v8121_v52 }
 0x75b   : > { %8604 = vmatpush.xpose.msk.msrb.mxu3 %vm524_vm0, %v8120_v31 }
 0x75f   : > { %8605 = vmatpush.xpose.msk.msrb.mxu3 %vm524_vm0, %v8119_v0 }
 0x763   : > { %8606 = vmatpush.xpose.msk.msrb.mxu3 %vm524_vm0, %v8118_v13 }
 0x767   : > { %8607 = vmatpush.xpose.msk.msrb.mxu3 %vm524_vm0, %v8117_v38 }
 0x76b   : > { %8608 = vmatpush.xpose.msk.msrb.mxu3 %vm524_vm0, %v8116_v2 }
 0x76f   : > { %8609 = vmatpush.xpose.msk.msrb.mxu3 %vm524_vm0, %v8115_v49 }
 0x773   : > { %8610 = vmatpush.xpose.msk.msrb.mxu3 %vm524_vm0, %v8114_v47 }
 0x777   : > { %8611 = vmatpush.xpose.msk.msrb.mxu3 %vm524_vm0, %v8113_v7 }
 0x77b   : > { %8612 = vmatpush.xpose.msk.msrb.mxu3 %vm524_vm0, %v8112_v41 }
 0x77f   : > { %8613 = vmatpush.xpose.msk.msrb.mxu3 %vm524_vm0, %v8111_v56 }
 0x783   : > { %8614 = vmatpush.xpose.msk.msrb.mxu3 %vm524_vm0, %v8110_v26 }
 0x787   : > { %8615 = vmatpush.xpose.msk.msrb.mxu3 %vm524_vm0, %v8109_v57 }
 0x78b   : > { %8616 = vmatpush.xpose.msk.msrb.mxu3 %vm524_vm0, %v8108_v43 }
 0x78e   : > { %8617 = vmatmul.msk.f32.vlgmr.msrb.gmra.mxu3 %vm524_vm0, %v8124_v40 }
 0x811   : > { %v8200_v6 = vpop.f32.mrf.mxu3 }
 0x812   : > { %v8201_v32 = vadd.f32 %v8200_v6, %v8131_v9 }
 0x814   : > { %v8618_v46 = vmul.f32 -1.442695, %v8201_v32 }
 0x816   : > { %8700 = vpow2.f32 %v8618_v46 }
 0x81c   : > { %v8701_v18 = vpop.eup %8700 }
 0x81d   : > { %v8206_v20 = vadd.f32 1.0, %v8701_v18 }
 0x81f   : > { %8702 = vrcp.f32 %v8206_v20  ;;  %v8218_v30 = vand.u32 2147483648, %v8206_v20  ;;  %v8216_v62 = vand.u32 2147483647, %v8206_v20  ;;  %vm8212_vm12 = vweird.f32 %v8206_v20 }
 0x821   : > { %v8219_v55 = vor.u32 1.1754944e-38, %v8218_v30  ;;  %vm8217_vm14 = vcmp.eq.f32.partialorder %v8216_v62, 8.507059e+37 }
 0x825   : > { %v8703_v16 = vpop.eup %8702 }
 0x826   : > { %v8208_v60 = vmul.f32 %v8703_v16, %v8206_v20  ;;  %vm8213_vm11 = vweird.f32 %v8703_v16 }
 0x827   : > { %vm8214_vm13 = vmor %vm8212_vm12, %vm8213_vm11 }
 0x828   : > { %v8209_v24 = vsub.f32 1.0, %v8208_v60 }
 0x82a   : > { %v8210_v29 = vmul.f32 %v8703_v16, %v8209_v24 }
 0x82c   : > { %v8211_v37 = vadd.f32 %v8703_v16, %v8210_v29 }
 0x82e   : > { %v8215_v10 = vsel %vm8214_vm13, %v8703_v16, %v8211_v37 }
 0x82f   : > { %v8220_v44 = vsel %vm8217_vm14, %v8219_v55, %v8215_v10 }
 0x830   : > { %8222 = vst [vmem:[%s381_s18] sm:$0x1] %v8220_v44 }
 0x831   : > { %9011 = shalt.err (!%p9008_p3)
}
 0x832   : > { %8641 = dma.vmem_to_hbm [thread:$0]  (%p9155_p5), %s8235_s12, 16, %s8237_s23, %s8224_s13  }
 0x833 PF: > { %p8647_p4 = scmp.ge.s32.totalorder %s9046_s22, 2  ;;  %s8248_s14 = sand.u32 1, %s9034_s19  }
 0x834   : > { %s8249_s18 = scalar_lea.sflag [#allocation4], %s8248_s14 }
 0x835   : > { %p8644_p7 = pnand %p8647_p4, %p9159_p6 }
 0x837   : > { %p8645_p8 = pneg %p8644_p7 }
 0x839   : > { %9029 = dma.done.wait (%p8645_p8), %s8249_s18, 16  }
 0x83a   : > { %9031 = vsyncadd (%p8645_p8), %s8249_s18, 4294967280  ;;  %p23_p9 = scmp.ge.s32.totalorder %s9142_s24, 4   ;;  %s16204_s19 = smov %s9038_s20 }
 0x83b   : > { %s16205_s20 = smov %s9042_s21  ;;  %s16206_s21 = smov %s9153_s27 }
 0x83c   : > { %s16207_s22 = smov %s9142_s24  ;;  %25 = sbr.rel (!%p23_p9) target bundleno = 6 (0x6), region = 99 }
 0x841   :  { %8254 = vsyncpa [#allocation4], 1 }
 0x842   :  { %8256 = vsyncpa [#allocation4 + $0x1], 1 }

</bundles_post_ra>
